<compile_context>
chip_gen: v6e
topology: v6e:2x2x1
jax: 0.10.0
libtpu: 0.0.40
codegen_flags: <defaults>
</compile_context>

<pallas_src>
import jax
import jax.numpy as jnp
from jax.experimental import pallas as pl
from jax.experimental.pallas import tpu as pltpu

EFF_FC_OUT = 1000   # EfficientNet._fc.out_features (ImageNet classifier head)
L1_OUT = 1024
META_IN = 11
META_H0 = 512
META_H1 = 1536
META_H2 = 1024
OUT_DIM = 4
FC_PAD = 128        # lane-dense padded output width (sliced to OUT_DIM outside)
BN_EPS = 1e-5


def _vmem_spec():
    return pl.BlockSpec(memory_space=pltpu.MemorySpace.VMEM)


def _dot_bf16(act_f32, w_bf16, bias_f32):
    """bf16 x bf16 MXU matmul with f32 accumulation; bias added in f32."""
    return jnp.dot(act_f32.astype(jnp.bfloat16), w_bf16,
                   preferred_element_type=jnp.float32) + bias_f32


# -----------------------------------------------------------------------------
# Single fused kernel: backbone stub (pool + stem projection), l1 image branch,
# meta MLP (Linear-Linear-BN-Linear-Dropout(eval)-Mish), gating, final fc.
# Everything stays resident in VMEM; one kernel launch per forward.
#
# TODO(synk): the pretrained EfficientNet backbone (self.eff_net) is not
# reproduced here; a deterministic global-average-pool + linear projection to
# its 1000-d classifier output stands in so the (fully implemented) head
# receives correctly-shaped features.
# -----------------------------------------------------------------------------
def _fused_kernel(x_ref, meta_ref,
                  stem_w_ref, stem_b_ref,
                  l1_w_ref, l1_b_ref,
                  m0_w_ref, m0_b_ref,
                  m1_w_ref, m1_b_ref,
                  bn_g_ref, bn_b_ref, bn_m_ref, bn_v_ref,
                  m3_w_ref, m3_b_ref,
                  fc_w_ref, fc_b_ref,
                  out_ref):
    # --- backbone stub: lane-dense global avg pool over H*W, then stem linear.
    x = x_ref[...]                                       # (B, C, H*W) f32
    pooled = jnp.mean(x, axis=-1)                        # (B, C)
    xf = _dot_bf16(pooled, stem_w_ref[...], stem_b_ref[...])   # (B, 1000)

    # --- image branch: x = self.l1(eff_net(x))
    x1 = _dot_bf16(xf, l1_w_ref[...], l1_b_ref[...])           # (B, 1024)

    # --- meta branch: Linear(11,512) -> Linear(512,1536) -> BatchNorm1d(1536)
    #                  -> Linear(1536,1024) -> Dropout(0.2, eval=identity) -> Mish
    m = meta_ref[...]
    h = jnp.dot(m, m0_w_ref[...],
                preferred_element_type=jnp.float32) + m0_b_ref[...]   # (B, 512)
    h = _dot_bf16(h, m1_w_ref[...], m1_b_ref[...])                    # (B, 1536)
    inv_std = jax.lax.rsqrt(bn_v_ref[...] + BN_EPS)       # eval-mode BN (running stats)
    h = (h - bn_m_ref[...]) * inv_std * bn_g_ref[...] + bn_b_ref[...]
    h = _dot_bf16(h, m3_w_ref[...], m3_b_ref[...])                    # (B, 1024)
    h = h * jnp.tanh(jax.nn.softplus(h))                  # Mish (f32, EUP transcendentals)

    # --- gating + final projection: out = self.fc(x * f)   (fc padded to 128 lanes)
    gated = x1 * h
    out_ref[...] = jnp.dot(gated, fc_w_ref[...],
                           preferred_element_type=jnp.float32) + fc_b_ref[...]


def eff_b_meta_v2_forward(x, meta, params):
    B, C, H, W = x.shape
    x3 = x.astype(jnp.float32).reshape(B, C, H * W)       # lane-dense pooling layout

    args = (
        x3, meta,
        params["stem_w"], params["stem_b"],
        params["l1_w"], params["l1_b"],
        params["m0_w"], params["m0_b"],
        params["m1_w"], params["m1_b"],
        params["bn_g"], params["bn_b"], params["bn_m"], params["bn_v"],
        params["m3_w"], params["m3_b"],
        params["fc_w"], params["fc_b"],
    )
    out_padded = pl.pallas_call(
        _fused_kernel,
        out_shape=jax.ShapeDtypeStruct((B, FC_PAD), jnp.float32),
        in_specs=[_vmem_spec()] * len(args),
        out_specs=_vmem_spec(),
        compiler_params=pltpu.CompilerParams(vmem_limit_bytes=32 << 20),
    )(*args)
    return out_padded[:, :OUT_DIM]


# -----------------------------------------------------------------------------
# Deterministic parameter init (synthetic weights, not a checkpoint).
# Large weight matrices stored in bf16; biases / BN params / small weights f32.
# -----------------------------------------------------------------------------
def init_params(key, in_channels):
    def normal(k, shape, scale=0.02):
        return scale * jax.random.normal(k, shape, dtype=jnp.float32)

    ks = jax.random.split(key, 16)

    fc_w_real = normal(ks[14], (META_H2, OUT_DIM))
    fc_b_real = normal(ks[15], (1, OUT_DIM))
    fc_w = jnp.zeros((META_H2, FC_PAD), jnp.float32).at[:, :OUT_DIM].set(fc_w_real)
    fc_b = jnp.zeros((1, FC_PAD), jnp.float32).at[:, :OUT_DIM].set(fc_b_real)

    params = {
        "stem_w": normal(ks[0], (in_channels, EFF_FC_OUT)).astype(jnp.bfloat16),
        "stem_b": normal(ks[1], (1, EFF_FC_OUT)),
        "l1_w": normal(ks[2], (EFF_FC_OUT, L1_OUT)).astype(jnp.bfloat16),
        "l1_b": normal(ks[3], (1, L1_OUT)),
        "m0_w": normal(ks[4], (META_IN, META_H0)),
        "m0_b": normal(ks[5], (1, META_H0)),
        "m1_w": normal(ks[6], (META_H0, META_H1)).astype(jnp.bfloat16),
        "m1_b": normal(ks[7], (1, META_H1)),
        "bn_g": 1.0 + normal(ks[8], (1, META_H1)),
        "bn_b": normal(ks[9], (1, META_H1)),
        "bn_m": normal(ks[10], (1, META_H1)),
        "bn_v": jax.random.uniform(ks[11], (1, META_H1), jnp.float32, 0.5, 1.5),
        "m3_w": normal(ks[12], (META_H1, META_H2)).astype(jnp.bfloat16),
        "m3_b": normal(ks[13], (1, META_H2)),
        "fc_w": fc_w,
        "fc_b": fc_b,
    }
    return params


# Pure-JAX reference of the same math (same bf16 weight quantization), used as
# the correctness check for the Pallas kernel.
def reference_forward(x, meta, p):
    B, C, H, W = x.shape
    pooled = jnp.mean(x.astype(jnp.float32).reshape(B, C, H * W), axis=-1)
    xf = _dot_bf16(pooled, p["stem_w"], p["stem_b"])
    x1 = _dot_bf16(xf, p["l1_w"], p["l1_b"])
    h = meta @ p["m0_w"] + p["m0_b"]
    h = _dot_bf16(h, p["m1_w"], p["m1_b"])
    h = (h - p["bn_m"]) * jax.lax.rsqrt(p["bn_v"] + BN_EPS) * p["bn_g"] + p["bn_b"]
    h = _dot_bf16(h, p["m3_w"], p["m3_b"])
    h = h * jnp.tanh(jax.nn.softplus(h))
    out = (x1 * h) @ p["fc_w"] + p["fc_b"]
    return out[:, :OUT_DIM]


if __name__ == "__main__":
    key = jax.random.PRNGKey(0)
    k_x, k_meta, k_params = jax.random.split(key, 3)

    B, C, H, W = 8, 3, 16, 16
    x = jax.random.normal(k_x, (B, C, H, W), dtype=jnp.float32)
    meta = jax.random.normal(k_meta, (B, META_IN), dtype=jnp.float32)
    params = init_params(k_params, C)

    out = jax.block_until_ready(eff_b_meta_v2_forward(x, meta, params))
    ref = jax.block_until_ready(reference_forward(x, meta, params))

    assert out.shape == (B, OUT_DIM), out.shape
    assert jnp.allclose(out, ref, atol=2e-3, rtol=2e-3), "mismatch vs reference"
    print("KERNEL_OK")
</pallas_src>

<mosaic_0001>
module attributes {stable_mosaic.version = 11 : i64} {
  func.func @_fused_kernel(%arg0: memref<8x3x256xf32, #tpu.memory_space<vmem>>, %arg1: memref<8x11xf32, #tpu.memory_space<vmem>>, %arg2: memref<3x1000xbf16, #tpu.memory_space<vmem>>, %arg3: memref<1x1000xf32, #tpu.memory_space<vmem>>, %arg4: memref<1000x1024xbf16, #tpu.memory_space<vmem>>, %arg5: memref<1x1024xf32, #tpu.memory_space<vmem>>, %arg6: memref<11x512xf32, #tpu.memory_space<vmem>>, %arg7: memref<1x512xf32, #tpu.memory_space<vmem>>, %arg8: memref<512x1536xbf16, #tpu.memory_space<vmem>>, %arg9: memref<1x1536xf32, #tpu.memory_space<vmem>>, %arg10: memref<1x1536xf32, #tpu.memory_space<vmem>>, %arg11: memref<1x1536xf32, #tpu.memory_space<vmem>>, %arg12: memref<1x1536xf32, #tpu.memory_space<vmem>>, %arg13: memref<1x1536xf32, #tpu.memory_space<vmem>>, %arg14: memref<1536x1024xbf16, #tpu.memory_space<vmem>>, %arg15: memref<1x1024xf32, #tpu.memory_space<vmem>>, %arg16: memref<1024x128xf32, #tpu.memory_space<vmem>>, %arg17: memref<1x128xf32, #tpu.memory_space<vmem>>, %arg18: memref<8x128xf32, #tpu.memory_space<vmem>>) attributes {dimension_semantics = [], scalar_prefetch = 0 : i64, scratch_operands = 0 : i64, tpu.core_type = #tpu.core_type<tc>} {
    %c0 = arith.constant 0 : index
    %c0_0 = arith.constant 0 : index
    %c0_1 = arith.constant 0 : index
    %0 = vector.load %arg0[%c0, %c0_0, %c0_1] : memref<8x3x256xf32, #tpu.memory_space<vmem>>, vector<8x3x256xf32>
    %cst = arith.constant dense<0.000000e+00> : vector<8x3xf32>
    %1 = vector.multi_reduction <add>, %0, %cst [2] : vector<8x3x256xf32> to vector<8x3xf32>
    %cst_2 = arith.constant 2.560000e+02 : f32
    %2 = vector.broadcast %cst_2 : f32 to vector<8x3xf32>
    %3 = arith.divf %1, %2 : vector<8x3xf32>
    %c0_3 = arith.constant 0 : index
    %c0_4 = arith.constant 0 : index
    %4 = vector.load %arg2[%c0_3, %c0_4] : memref<3x1000xbf16, #tpu.memory_space<vmem>>, vector<3x1000xbf16>
    %c0_5 = arith.constant 0 : index
    %c0_6 = arith.constant 0 : index
    %5 = vector.load %arg3[%c0_5, %c0_6] : memref<1x1000xf32, #tpu.memory_space<vmem>>, vector<1x1000xf32>
    %6 = arith.truncf %3 : vector<8x3xf32> to vector<8x3xbf16>
    %cst_7 = arith.constant dense<0.000000e+00> : vector<8x1000xf32>
    %7 = tpu.matmul %6, %4, %cst_7 {dimension_numbers = #tpu.dot_dimension_numbers<[1], [0], [0], [1], [0, 0, 1, 1], [], []>} : vector<8x3xbf16>, vector<3x1000xbf16>, vector<8x1000xf32> -> vector<8x1000xf32>
    %8 = vector.broadcast %5 : vector<1x1000xf32> to vector<8x1000xf32>
    %9 = arith.addf %7, %8 : vector<8x1000xf32>
    %c0_8 = arith.constant 0 : index
    %c0_9 = arith.constant 0 : index
    %10 = vector.load %arg4[%c0_8, %c0_9] : memref<1000x1024xbf16, #tpu.memory_space<vmem>>, vector<1000x1024xbf16>
    %c0_10 = arith.constant 0 : index
    %c0_11 = arith.constant 0 : index
    %11 = vector.load %arg5[%c0_10, %c0_11] : memref<1x1024xf32, #tpu.memory_space<vmem>>, vector<1x1024xf32>
    %12 = arith.truncf %9 : vector<8x1000xf32> to vector<8x1000xbf16>
    %cst_12 = arith.constant dense<0.000000e+00> : vector<8x1024xf32>
    %13 = tpu.matmul %12, %10, %cst_12 {dimension_numbers = #tpu.dot_dimension_numbers<[1], [0], [0], [1], [0, 0, 1, 1], [], []>} : vector<8x1000xbf16>, vector<1000x1024xbf16>, vector<8x1024xf32> -> vector<8x1024xf32>
    %14 = vector.broadcast %11 : vector<1x1024xf32> to vector<8x1024xf32>
    %15 = arith.addf %13, %14 : vector<8x1024xf32>
    %c0_13 = arith.constant 0 : index
    %c0_14 = arith.constant 0 : index
    %16 = vector.load %arg1[%c0_13, %c0_14] : memref<8x11xf32, #tpu.memory_space<vmem>>, vector<8x11xf32>
    %c0_15 = arith.constant 0 : index
    %c0_16 = arith.constant 0 : index
    %17 = vector.load %arg6[%c0_15, %c0_16] : memref<11x512xf32, #tpu.memory_space<vmem>>, vector<11x512xf32>
    %cst_17 = arith.constant dense<0.000000e+00> : vector<8x512xf32>
    %18 = tpu.matmul %16, %17, %cst_17 {dimension_numbers = #tpu.dot_dimension_numbers<[1], [0], [0], [1], [0, 0, 1, 1], [], []>} : vector<8x11xf32>, vector<11x512xf32>, vector<8x512xf32> -> vector<8x512xf32>
    %c0_18 = arith.constant 0 : index
    %c0_19 = arith.constant 0 : index
    %19 = vector.load %arg7[%c0_18, %c0_19] : memref<1x512xf32, #tpu.memory_space<vmem>>, vector<1x512xf32>
    %20 = vector.broadcast %19 : vector<1x512xf32> to vector<8x512xf32>
    %21 = arith.addf %18, %20 : vector<8x512xf32>
    %c0_20 = arith.constant 0 : index
    %c0_21 = arith.constant 0 : index
    %22 = vector.load %arg8[%c0_20, %c0_21] : memref<512x1536xbf16, #tpu.memory_space<vmem>>, vector<512x1536xbf16>
    %c0_22 = arith.constant 0 : index
    %c0_23 = arith.constant 0 : index
    %23 = vector.load %arg9[%c0_22, %c0_23] : memref<1x1536xf32, #tpu.memory_space<vmem>>, vector<1x1536xf32>
    %24 = arith.truncf %21 : vector<8x512xf32> to vector<8x512xbf16>
    %cst_24 = arith.constant dense<0.000000e+00> : vector<8x1536xf32>
    %25 = tpu.matmul %24, %22, %cst_24 {dimension_numbers = #tpu.dot_dimension_numbers<[1], [0], [0], [1], [0, 0, 1, 1], [], []>} : vector<8x512xbf16>, vector<512x1536xbf16>, vector<8x1536xf32> -> vector<8x1536xf32>
    %26 = vector.broadcast %23 : vector<1x1536xf32> to vector<8x1536xf32>
    %27 = arith.addf %25, %26 : vector<8x1536xf32>
    %c0_25 = arith.constant 0 : index
    %c0_26 = arith.constant 0 : index
    %28 = vector.load %arg13[%c0_25, %c0_26] : memref<1x1536xf32, #tpu.memory_space<vmem>>, vector<1x1536xf32>
    %cst_27 = arith.constant 9.99999974E-6 : f32
    %29 = vector.broadcast %cst_27 : f32 to vector<1x1536xf32>
    %30 = arith.addf %28, %29 : vector<1x1536xf32>
    %31 = math.rsqrt %30 : vector<1x1536xf32>
    %c0_28 = arith.constant 0 : index
    %c0_29 = arith.constant 0 : index
    %32 = vector.load %arg12[%c0_28, %c0_29] : memref<1x1536xf32, #tpu.memory_space<vmem>>, vector<1x1536xf32>
    %33 = vector.broadcast %32 : vector<1x1536xf32> to vector<8x1536xf32>
    %34 = arith.subf %27, %33 : vector<8x1536xf32>
    %35 = vector.broadcast %31 : vector<1x1536xf32> to vector<8x1536xf32>
    %36 = arith.mulf %34, %35 : vector<8x1536xf32>
    %c0_30 = arith.constant 0 : index
    %c0_31 = arith.constant 0 : index
    %37 = vector.load %arg10[%c0_30, %c0_31] : memref<1x1536xf32, #tpu.memory_space<vmem>>, vector<1x1536xf32>
    %38 = vector.broadcast %37 : vector<1x1536xf32> to vector<8x1536xf32>
    %39 = arith.mulf %36, %38 : vector<8x1536xf32>
    %c0_32 = arith.constant 0 : index
    %c0_33 = arith.constant 0 : index
    %40 = vector.load %arg11[%c0_32, %c0_33] : memref<1x1536xf32, #tpu.memory_space<vmem>>, vector<1x1536xf32>
    %41 = vector.broadcast %40 : vector<1x1536xf32> to vector<8x1536xf32>
    %42 = arith.addf %39, %41 : vector<8x1536xf32>
    %c0_34 = arith.constant 0 : index
    %c0_35 = arith.constant 0 : index
    %43 = vector.load %arg14[%c0_34, %c0_35] : memref<1536x1024xbf16, #tpu.memory_space<vmem>>, vector<1536x1024xbf16>
    %c0_36 = arith.constant 0 : index
    %c0_37 = arith.constant 0 : index
    %44 = vector.load %arg15[%c0_36, %c0_37] : memref<1x1024xf32, #tpu.memory_space<vmem>>, vector<1x1024xf32>
    %45 = arith.truncf %42 : vector<8x1536xf32> to vector<8x1536xbf16>
    %cst_38 = arith.constant dense<0.000000e+00> : vector<8x1024xf32>
    %46 = tpu.matmul %45, %43, %cst_38 {dimension_numbers = #tpu.dot_dimension_numbers<[1], [0], [0], [1], [0, 0, 1, 1], [], []>} : vector<8x1536xbf16>, vector<1536x1024xbf16>, vector<8x1024xf32> -> vector<8x1024xf32>
    %47 = vector.broadcast %44 : vector<1x1024xf32> to vector<8x1024xf32>
    %48 = arith.addf %46, %47 : vector<8x1024xf32>
    %cst_39 = arith.constant 0.000000e+00 : f32
    %49 = vector.broadcast %cst_39 : f32 to vector<8x1024xf32>
    %50 = arith.maximumf %48, %49 : vector<8x1024xf32>
    %51 = vector.broadcast %cst_39 : f32 to vector<8x1024xf32>
    %52 = arith.subf %48, %51 : vector<8x1024xf32>
    %53 = arith.cmpf one, %52, %52 : vector<8x1024xf32>
    %54 = vector.broadcast %cst_39 : f32 to vector<8x1024xf32>
    %55 = arith.addf %48, %54 : vector<8x1024xf32>
    %56 = math.absf %52 : vector<8x1024xf32>
    %cst_40 = arith.constant 0.000000e+00 : f32
    %57 = vector.broadcast %cst_40 : f32 to vector<8x1024xf32>
    %58 = arith.subf %57, %56 : vector<8x1024xf32>
    %59 = math.exp %58 : vector<8x1024xf32>
    %60 = math.log1p %59 : vector<8x1024xf32>
    %61 = arith.addf %50, %60 : vector<8x1024xf32>
    %62 = arith.select %53, %55, %61 : vector<8x1024xi1>, vector<8x1024xf32>
    %63 = math.tanh %62 : vector<8x1024xf32>
    %64 = arith.mulf %48, %63 : vector<8x1024xf32>
    %65 = arith.mulf %15, %64 : vector<8x1024xf32>
    %c0_41 = arith.constant 0 : index
    %c0_42 = arith.constant 0 : index
    %66 = vector.load %arg16[%c0_41, %c0_42] : memref<1024x128xf32, #tpu.memory_space<vmem>>, vector<1024x128xf32>
    %cst_43 = arith.constant dense<0.000000e+00> : vector<8x128xf32>
    %67 = tpu.matmul %65, %66, %cst_43 {dimension_numbers = #tpu.dot_dimension_numbers<[1], [0], [0], [1], [0, 0, 1, 1], [], []>} : vector<8x1024xf32>, vector<1024x128xf32>, vector<8x128xf32> -> vector<8x128xf32>
    %c0_44 = arith.constant 0 : index
    %c0_45 = arith.constant 0 : index
    %68 = vector.load %arg17[%c0_44, %c0_45] : memref<1x128xf32, #tpu.memory_space<vmem>>, vector<1x128xf32>
    %69 = vector.broadcast %68 : vector<1x128xf32> to vector<8x128xf32>
    %70 = arith.addf %67, %69 : vector<8x128xf32>
    %c0_46 = arith.constant 0 : index
    %c0_47 = arith.constant 0 : index
    %71 = vector.load %arg18[%c0_46, %c0_47] : memref<8x128xf32, #tpu.memory_space<vmem>>, vector<8x128xf32>
    tpu.vector_store %arg18[%c0_46, %c0_47], %70 {strides = array<i32>} : memref<8x128xf32, #tpu.memory_space<vmem>>, vector<8x128xf32>,
    return
  }
}

</mosaic_0001>

<bundles_post_ra>
// kernel: tpu_custom_call.1
= control target key start
LH: loop header
LB: loop body
LE: loop exit
PB: predicated region body
PF: predicated region fallthrough
CT: control target
= control target key end

     0   :  { %s17817_s0 = inlined_call_operand.vmem [shape: f32[8,3,256], index: 0, kind: input, shape index: {}]   ;;  %s17818_s1 = inlined_call_operand.hbm [shape: f32[8,11], index: 1, kind: input, shape index: {}]   ;;  %s17819_s2 = inlined_call_operand.hbm [shape: bf16[3,1000], index: 2, kind: input, shape index: {}]   ;;  %s17820_s3 = inlined_call_operand.hbm [shape: f32[1,1000], index: 3, kind: input, shape index: {}]   ;;  %s17821_s4 = inlined_call_operand.hbm [shape: bf16[1000,1024], index: 4, kind: input, shape index: {}]   ;;  %s17822_s5 = inlined_call_operand.hbm [shape: f32[1,1024], index: 5, kind: input, shape index: {}]   ;;  %s17823_s6 = inlined_call_operand.hbm [shape: f32[11,512], index: 6, kind: input, shape index: {}]   ;;  %s17824_s7 = inlined_call_operand.hbm [shape: f32[1,512], index: 7, kind: input, shape index: {}]   ;;  %s17825_s8 = inlined_call_operand.hbm [shape: bf16[512,1536], index: 8, kind: input, shape index: {}]   ;;  %s17826_s9 = inlined_call_operand.hbm [shape: f32[1,1536], index: 9, kind: input, shape index: {}]   ;;  %s17827_s10 = inlined_call_operand.hbm [shape: f32[1,1536], index: 10, kind: input, shape index: {}]   ;;  %s17828_s11 = inlined_call_operand.hbm [shape: f32[1,1536], index: 11, kind: input, shape index: {}]   ;;  %s17829_s12 = inlined_call_operand.hbm [shape: f32[1,1536], index: 12, kind: input, shape index: {}]   ;;  %s17830_s13 = inlined_call_operand.hbm [shape: f32[1,1536], index: 13, kind: input, shape index: {}]   ;;  %s17831_s14 = inlined_call_operand.hbm [shape: bf16[1536,1024], index: 14, kind: input, shape index: {}]   ;;  %s17832_s15 = inlined_call_operand.hbm [shape: f32[1,1024], index: 15, kind: input, shape index: {}]   ;;  %s17833_s16 = inlined_call_operand.hbm [shape: f32[1024,128], index: 16, kind: input, shape index: {}]   ;;  %s17834_s17 = inlined_call_operand.hbm [shape: f32[1,128], index: 17, kind: input, shape index: {}]   ;;  %s17835_s18 = inlined_call_operand.hbm [shape: f32[8,128], index: 18, kind: output, shape index: {}]  }
   0x1   :  { %17837 = sst [smem:[#allocation40_spill]] %s17817_s0 }
   0x2   :  { %17838 = sst [smem:[#allocation41_spill]] %s17818_s1 }
   0x3   :  { %17839 = sst [smem:[#allocation42_spill]] %s17819_s2 }
   0x4   :  { %23 = vsyncpa [#allocation3], 0 }
   0x5   :  { %24 = vsyncpa [#allocation6], 0 }
   0x6   :  { %25 = vsyncpa [#allocation9], 0 }
   0x7   :  { %26 = vsyncpa [#allocation12], 0 }
   0x8   :  { %27 = vsyncpa [#allocation15], 0 }
   0x9   :  { %28 = vsyncpa [#allocation18], 0 }
   0xa   :  { %29 = vsyncpa [#allocation21], 0 }
   0xb   :  { %30 = vsyncpa [#allocation24], 0 }
   0xc   :  { %31 = vsyncpa [#allocation27], 0 }
   0xd   :  { %32 = vsyncpa [#allocation4], 0  ;;  %s16921_s27 = smov [#allocation5]   ;;  %s16922_s29 = smov [#allocation8]  }
   0xe   :  { %s51_s28 = sshll.u32 %s16921_s27, 4  ;;  %s70_s30 = sshll.u32 %s16922_s29, 4  ;;  %s52_s28 = int_to_ptr.vmem [resolvable:$true] %s51_s28  ;;  %s71_s30 = int_to_ptr.vmem [resolvable:$true] %s70_s30 }
   0xf   :  { %s16549_s0 = scalar_lea.vmem %s52_s28, 256  ;;  %p16554_p1 = scmp.lt.s32.totalorder %s52_s28, %s52_s28 }
  0x10   :  { %p16550_p0 = scmp.ne.s32.totalorder %s52_s28, %s16549_s0  ;;  %p16555_p2 = scmp.lt.s32.totalorder %s16549_s0, %s16549_s0 }
  0x12   :  { %p16556_p3 = por %p16555_p2, %p16554_p1 }
  0x14   :  { %p16557_p4 = pnand %p16556_p3, %p16550_p0 }
  0x16   :  { %16560 = shalt.err (!%p16557_p4)
}
  0x17   :  { %s17840_s20 = sld [smem:[#allocation42_spill]]  ;;  %s16569_s21 = scalar_lea.vmem %s71_s30, 64000 }
  0x18   :  { %p16570_p5 = scmp.ne.s32.totalorder %s71_s30, %s16569_s21  ;;  %p16574_p6 = scmp.lt.s32.totalorder %s71_s30, %s71_s30 }
  0x19   :  { %p16575_p7 = scmp.lt.s32.totalorder %s16569_s21, %s16569_s21 }
  0x1b   :  { %p16576_p8 = por %p16575_p7, %p16574_p6 }
  0x1d   :  { %54 = dma.hbm_to_vmem [thread:$0]  %s17840_s20, 256, %s52_s28, [#allocation6]  }
  0x1e   :  { %p16577_p9 = pnand %p16576_p8, %p16570_p5 }
  0x20   :  { %16580 = shalt.err (!%p16577_p9)
}
  0x21   :  { %s16923_s22 = smov 512   ;;  %s16924_s2 = smov 32  }
  0x22   :  { %76 = dma.hbm_to_vmem [thread:$0]  %s17821_s4, 64000, %s71_s30, [#allocation9], %s16923_s22, %s16923_s22, %s16924_s2  }
  0x23   :  { %s16925_s25 = smov [#allocation11]   ;;  %s16926_s27 = smov [#allocation14]  }
  0x24   :  { %s92_s26 = sshll.u32 %s16925_s25, 4  ;;  %s114_s28 = sshll.u32 %s16926_s27, 4  ;;  %s93_s26 = int_to_ptr.vmem [resolvable:$true] %s92_s26  ;;  %s115_s28 = int_to_ptr.vmem [resolvable:$true] %s114_s28 }
  0x25   :  { %s16589_s29 = scalar_lea.vmem %s93_s26, 1024  ;;  %p16594_p11 = scmp.lt.s32.totalorder %s93_s26, %s93_s26 }
  0x26   :  { %p16590_p10 = scmp.ne.s32.totalorder %s93_s26, %s16589_s29  ;;  %p16595_p12 = scmp.lt.s32.totalorder %s16589_s29, %s16589_s29 }
  0x28   :  { %p16596_p13 = por %p16595_p12, %p16594_p11 }
  0x2a   :  { %p16597_p0 = pnand %p16596_p13, %p16590_p10 }
  0x2c   :  { %16600 = shalt.err (!%p16597_p0)
}
  0x2d   :  { %98 = dma.hbm_to_vmem [thread:$0]  %s17823_s6, 1024, %s93_s26, [#allocation12], %s16923_s22, %s16923_s22, %s16924_s2  }
  0x2e   :  { %s16609_s4 = scalar_lea.vmem %s115_s28, 49152  ;;  %p16614_p2 = scmp.lt.s32.totalorder %s115_s28, %s115_s28 }
  0x2f   :  { %p16610_p1 = scmp.ne.s32.totalorder %s115_s28, %s16609_s4  ;;  %p16615_p3 = scmp.lt.s32.totalorder %s16609_s4, %s16609_s4 }
  0x31   :  { %p16616_p4 = por %p16615_p3, %p16614_p2 }
  0x33   :  { %p16617_p5 = pnand %p16616_p4, %p16610_p1 }
  0x35   :  { %16620 = shalt.err (!%p16617_p5)
}
  0x36   :  { %s16927_s30 = smov 768   ;;  %s16928_s1 = smov 48  }
  0x37   :  { %120 = dma.hbm_to_vmem [thread:$0]  %s17825_s8, 49152, %s115_s28, [#allocation15], %s16927_s30, %s16927_s30, %s16928_s1  }
  0x38   :  { %s16929_s23 = smov [#allocation17]   ;;  %s16930_s25 = smov [#allocation20]  }
  0x39   :  { %s137_s24 = sshll.u32 %s16929_s23, 4  ;;  %s157_s27 = sshll.u32 %s16930_s25, 4  ;;  %s138_s24 = int_to_ptr.vmem [resolvable:$true] %s137_s24  ;;  %s158_s27 = int_to_ptr.vmem [resolvable:$true] %s157_s27 }
  0x3a   :  { %s16629_s6 = scalar_lea.vmem %s138_s24, 192  ;;  %p16634_p7 = scmp.lt.s32.totalorder %s138_s24, %s138_s24 }
  0x3b   :  { %p16630_p6 = scmp.ne.s32.totalorder %s138_s24, %s16629_s6  ;;  %p16635_p8 = scmp.lt.s32.totalorder %s16629_s6, %s16629_s6 }
  0x3d   :  { %p16636_p9 = por %p16635_p8, %p16634_p7 }
  0x3f   :  { %p16637_p10 = pnand %p16636_p9, %p16630_p6 }
  0x41   :  { %16640 = shalt.err (!%p16637_p10)
}
  0x42   :  { %140 = dma.hbm_to_vmem [thread:$0]  %s17827_s10, 192, %s138_s24, [#allocation18]  }
  0x43   :  { %s16649_s0 = scalar_lea.vmem %s158_s27, 192  ;;  %p16654_p12 = scmp.lt.s32.totalorder %s158_s27, %s158_s27 }
  0x44   :  { %p16650_p11 = scmp.ne.s32.totalorder %s158_s27, %s16649_s0  ;;  %p16655_p13 = scmp.lt.s32.totalorder %s16649_s0, %s16649_s0 }
  0x46   :  { %p16656_p0 = por %p16655_p13, %p16654_p12 }
  0x48   :  { %p16657_p1 = pnand %p16656_p0, %p16650_p11 }
  0x4a   :  { %16660 = shalt.err (!%p16657_p1)
}
  0x4b   :  { %160 = dma.hbm_to_vmem [thread:$0]  %s17829_s12, 192, %s158_s27, [#allocation21]  }
  0x4c   :  { %s16931_s19 = smov [#allocation23]   ;;  %s16932_s30 = smov [#allocation26]  }
  0x4d   :  { %s176_s4 = sshll.u32 %s16931_s19, 4  ;;  %s198_s1 = sshll.u32 %s16932_s30, 4  ;;  %s177_s4 = int_to_ptr.vmem [resolvable:$true] %s176_s4  ;;  %s199_s1 = int_to_ptr.vmem [resolvable:$true] %s198_s1 }
  0x4e   :  { %s16669_s20 = scalar_lea.vmem %s177_s4, 98304  ;;  %p16674_p3 = scmp.lt.s32.totalorder %s177_s4, %s177_s4 }
  0x4f   :  { %p16670_p2 = scmp.ne.s32.totalorder %s177_s4, %s16669_s20  ;;  %p16675_p4 = scmp.lt.s32.totalorder %s16669_s20, %s16669_s20 }
  0x51   :  { %p16676_p5 = por %p16675_p4, %p16674_p3 }
  0x53   :  { %p16677_p6 = pnand %p16676_p5, %p16670_p2 }
  0x55   :  { %16680 = shalt.err (!%p16677_p6)
}
  0x56   :  { %182 = dma.hbm_to_vmem [thread:$0]  %s17831_s14, 98304, %s177_s4, [#allocation24], %s16923_s22, %s16923_s22, %s16924_s2  }
  0x57   :  { %s16689_s12 = scalar_lea.vmem %s199_s1, 16384  ;;  %p16694_p8 = scmp.lt.s32.totalorder %s199_s1, %s199_s1 }
  0x58   :  { %p16690_p7 = scmp.ne.s32.totalorder %s199_s1, %s16689_s12  ;;  %p16695_p9 = scmp.lt.s32.totalorder %s16689_s12, %s16689_s12 }
  0x5a   :  { %p16696_p10 = por %p16695_p9, %p16694_p8 }
  0x5c   :  { %p16697_p11 = pnand %p16696_p10, %p16690_p7 }
  0x5e   :  { %16700 = shalt.err (!%p16697_p11)
}
  0x5f   :  { %s16933_s23 = smov 128   ;;  %s16934_s24 = smov 8  }
  0x60   :  { %204 = dma.hbm_to_vmem [thread:$0]  %s17833_s16, 16384, %s199_s1, [#allocation27], %s16933_s23, %s16933_s23, %s16934_s24  }
  0x61   :  { %s16935_s6 = smov [#allocation2]   ;;  %s16936_s29 = smov [#allocation7]  }
  0x62   :  { %s41_s26 = sshll.u32 %s16935_s6, 4  ;;  %s61_s0 = sshll.u32 %s16936_s29, 4  ;;  %s42_s26 = int_to_ptr.vmem [resolvable:$true] %s41_s26  ;;  %s62_s0 = int_to_ptr.vmem [resolvable:$true] %s61_s0 }
  0x63   :  { %s16709_s14 = scalar_lea.vmem %s42_s26, 128  ;;  %p16714_p13 = scmp.lt.s32.totalorder %s42_s26, %s42_s26 }
  0x64   :  { %p16710_p12 = scmp.ne.s32.totalorder %s42_s26, %s16709_s14  ;;  %p16715_p0 = scmp.lt.s32.totalorder %s16709_s14, %s16709_s14 }
  0x66   :  { %p16716_p1 = por %p16715_p0, %p16714_p13 }
  0x68   :  { %p16717_p2 = pnand %p16716_p1, %p16710_p12 }
  0x6a   :  { %16720 = shalt.err (!%p16717_p2)
}
  0x6b   :  { %s17841_s8 = sld [smem:[#allocation41_spill]]  ;;  %s16729_s28 = scalar_lea.vmem %s62_s0, 128 }
  0x6c   :  { %p16730_p3 = scmp.ne.s32.totalorder %s62_s0, %s16729_s28  ;;  %p16734_p4 = scmp.lt.s32.totalorder %s62_s0, %s62_s0 }
  0x6d   :  { %p16735_p5 = scmp.lt.s32.totalorder %s16729_s28, %s16729_s28 }
  0x6f   :  { %p16736_p6 = por %p16735_p5, %p16734_p4 }
  0x71   :  { %44 = dma.hbm_to_vmem [thread:$0]  %s17841_s8, 128, %s42_s26, [#allocation3]  }
  0x72   :  { %p16737_p7 = pnand %p16736_p6, %p16730_p3 }
  0x74   :  { %16740 = shalt.err (!%p16737_p7)
}
  0x75   :  { %64 = dma.hbm_to_vmem [thread:$0]  %s17820_s3, 128, %s62_s0, [#allocation6]  }
  0x76   :  { %s16937_s4 = smov [#allocation10]   ;;  %s16938_s1 = smov [#allocation13]  }
  0x77   :  { %s83_s30 = sshll.u32 %s16937_s4, 4  ;;  %s105_s20 = sshll.u32 %s16938_s1, 4  ;;  %s84_s30 = int_to_ptr.vmem [resolvable:$true] %s83_s30  ;;  %s106_s20 = int_to_ptr.vmem [resolvable:$true] %s105_s20 }
  0x78   :  { %s16749_s10 = scalar_lea.vmem %s84_s30, 128  ;;  %p16754_p9 = scmp.lt.s32.totalorder %s84_s30, %s84_s30 }
  0x79   :  { %p16750_p8 = scmp.ne.s32.totalorder %s84_s30, %s16749_s10  ;;  %p16755_p10 = scmp.lt.s32.totalorder %s16749_s10, %s16749_s10 }
  0x7b   :  { %p16756_p11 = por %p16755_p10, %p16754_p9 }
  0x7d   :  { %p16757_p12 = pnand %p16756_p11, %p16750_p8 }
  0x7f   :  { %16760 = shalt.err (!%p16757_p12)
}
  0x80   :  { %86 = dma.hbm_to_vmem [thread:$0]  %s17822_s5, 128, %s84_s30, [#allocation9]  }
  0x81   :  { %s16769_s23 = scalar_lea.vmem %s106_s20, 64  ;;  %p16774_p0 = scmp.lt.s32.totalorder %s106_s20, %s106_s20 }
  0x82   :  { %p16770_p13 = scmp.ne.s32.totalorder %s106_s20, %s16769_s23  ;;  %p16775_p1 = scmp.lt.s32.totalorder %s16769_s23, %s16769_s23 }
  0x84   :  { %p16776_p2 = por %p16775_p1, %p16774_p0 }
  0x86   :  { %p16777_p3 = pnand %p16776_p2, %p16770_p13 }
  0x88   :  { %16780 = shalt.err (!%p16777_p3)
}
  0x89   :  { %108 = dma.hbm_to_vmem [thread:$0]  %s17824_s7, 64, %s106_s20, [#allocation12]  }
  0x8a   :  { %s16939_s25 = smov [#allocation16]   ;;  %s16940_s6 = smov [#allocation19]  }
  0x8b   :  { %s127_s27 = sshll.u32 %s16939_s25, 4  ;;  %s147_s26 = sshll.u32 %s16940_s6, 4  ;;  %s128_s27 = int_to_ptr.vmem [resolvable:$true] %s127_s27  ;;  %s148_s26 = int_to_ptr.vmem [resolvable:$true] %s147_s26 }
  0x8c   :  { %s16789_s29 = scalar_lea.vmem %s128_s27, 192  ;;  %p16794_p5 = scmp.lt.s32.totalorder %s128_s27, %s128_s27 }
  0x8d   :  { %p16790_p4 = scmp.ne.s32.totalorder %s128_s27, %s16789_s29  ;;  %p16795_p6 = scmp.lt.s32.totalorder %s16789_s29, %s16789_s29 }
  0x8f   :  { %p16796_p7 = por %p16795_p6, %p16794_p5 }
  0x91   :  { %p16797_p8 = pnand %p16796_p7, %p16790_p4 }
  0x93   :  { %16800 = shalt.err (!%p16797_p8)
}
  0x94   :  { %130 = dma.hbm_to_vmem [thread:$0]  %s17826_s9, 192, %s128_s27, [#allocation15]  }
  0x95   :  { %s16809_s14 = scalar_lea.vmem %s148_s26, 192  ;;  %p16814_p10 = scmp.lt.s32.totalorder %s148_s26, %s148_s26 }
  0x96   :  { %p16810_p9 = scmp.ne.s32.totalorder %s148_s26, %s16809_s14  ;;  %p16815_p11 = scmp.lt.s32.totalorder %s16809_s14, %s16809_s14 }
  0x98   :  { %p16816_p12 = por %p16815_p11, %p16814_p10 }
  0x9a   :  { %p16817_p13 = pnand %p16816_p12, %p16810_p9 }
  0x9c   :  { %16820 = shalt.err (!%p16817_p13)
}
  0x9d   :  { %150 = dma.hbm_to_vmem [thread:$0]  %s17828_s11, 192, %s148_s26, [#allocation18]  }
  0x9e   :  { %s16941_s2 = smov [#allocation22]   ;;  %s16942_s28 = smov [#allocation25]  }
  0x9f   :  { %s167_s8 = sshll.u32 %s16941_s2, 4  ;;  %s189_s16 = sshll.u32 %s16942_s28, 4  ;;  %s168_s8 = int_to_ptr.vmem [resolvable:$true] %s167_s8  ;;  %s190_s16 = int_to_ptr.vmem [resolvable:$true] %s189_s16 }
  0xa0   :  { %s16829_s19 = scalar_lea.vmem %s168_s8, 192  ;;  %p16834_p1 = scmp.lt.s32.totalorder %s168_s8, %s168_s8 }
  0xa1   :  { %p16830_p0 = scmp.ne.s32.totalorder %s168_s8, %s16829_s19  ;;  %p16835_p2 = scmp.lt.s32.totalorder %s16829_s19, %s16829_s19 }
  0xa3   :  { %p16836_p3 = por %p16835_p2, %p16834_p1 }
  0xa5   :  { %p16837_p4 = pnand %p16836_p3, %p16830_p0 }
  0xa7   :  { %16840 = shalt.err (!%p16837_p4)
}
  0xa8   :  { %170 = dma.hbm_to_vmem [thread:$0]  %s17830_s13, 192, %s168_s8, [#allocation21]  }
  0xa9   :  { %s16849_s30 = scalar_lea.vmem %s190_s16, 128  ;;  %p16854_p6 = scmp.lt.s32.totalorder %s190_s16, %s190_s16 }
  0xaa   :  { %p16850_p5 = scmp.ne.s32.totalorder %s190_s16, %s16849_s30  ;;  %p16855_p7 = scmp.lt.s32.totalorder %s16849_s30, %s16849_s30 }
  0xac   :  { %p16856_p8 = por %p16855_p7, %p16854_p6 }
  0xae   :  { %p16857_p9 = pnand %p16856_p8, %p16850_p5 }
  0xb0   :  { %16860 = shalt.err (!%p16857_p9)
}
  0xb1   :  { %192 = dma.hbm_to_vmem [thread:$0]  %s17832_s15, 128, %s190_s16, [#allocation24]  }
  0xb2   :  { %s16943_s20 = smov [#allocation28]  }
  0xb3   :  { %s211_s10 = sshll.u32 %s16943_s20, 4  ;;  %s212_s10 = int_to_ptr.vmem [resolvable:$true] %s211_s10 }
  0xb4   :  { %s16869_s21 = scalar_lea.vmem %s212_s10, 16  ;;  %s16873_s12 = scalar_lea.vmem %s212_s10, 32 }
  0xb5   :  { %p16870_p10 = scmp.ne.s32.totalorder %s212_s10, %s16869_s21  ;;  %p16874_p11 = scmp.lt.s32.totalorder %s212_s10, %s212_s10 }
  0xb6   :  { %p16875_p12 = scmp.lt.s32.totalorder %s16873_s12, %s16869_s21 }
  0xb8   :  { %p16876_p13 = por %p16875_p12, %p16874_p11 }
  0xba   :  { %p16877_p0 = pnand %p16876_p13, %p16870_p10 }
  0xbc   :  { %16880 = shalt.err (!%p16877_p0)
}
  0xbd   :  { %214 = dma.hbm_to_vmem [thread:$0]  %s17834_s17, 16, %s212_s10, [#allocation27]  }
  0xbe   :  { %16901 = dma.done.wait [#allocation3], 128  }
  0xbf   :  { %16902 = vsyncadd [#allocation3], 4294967168 }
  0xc0   :  { %16903 = dma.done.wait [#allocation6], 384  }
  0xc1   :  { %16904 = vsyncadd [#allocation6], 4294966912 }
  0xc2   :  { %16905 = dma.done.wait [#allocation9], 64128  }
  0xc3   :  { %16906 = vsyncadd [#allocation9], 4294903168 }
  0xc4   :  { %16907 = dma.done.wait [#allocation12], 1088  }
  0xc5   :  { %16908 = vsyncadd [#allocation12], 4294966208 }
  0xc6   :  { %16909 = dma.done.wait [#allocation15], 49344  }
  0xc7   :  { %16910 = vsyncadd [#allocation15], 4294917952 }
  0xc8   :  { %16911 = dma.done.wait [#allocation18], 384  }
  0xc9   :  { %16912 = vsyncadd [#allocation18], 4294966912 }
  0xca   :  { %16913 = dma.done.wait [#allocation21], 384  }
  0xcb   :  { %16914 = vsyncadd [#allocation21], 4294966912 }
  0xcc   :  { %16915 = dma.done.wait [#allocation24], 98432  }
  0xcd   :  { %16916 = vsyncadd [#allocation24], 4294868864 }
  0xce   :  { %16917 = dma.done.wait [#allocation27], 16400  }
  0xcf   :  { %16918 = vsyncadd [#allocation27], 4294950896  ;;  %vm299_vm0 = vcmask 1042432   ;;  %s17842_s3 = sld [smem:[#allocation40_spill]]  ;;  %v361_v40 = vlaneseq  ;;  %v16944_v41 = vmov 1983009808  }
  0xd0   :  { %v470_v42 = vunpack.c.l.s4 %v16944_v41  ;;  %v349_v45 = vld [vmem:[#allocation5] sm:$0xff]  ;;  %vm506_vm1 = vcmask 1040384   ;;  %vm507_vm2 = vcmask 1041408   ;;  %v16945_v51 = vmov 65535   ;;  %v350_v59 = vld [vmem:[#allocation5 + $0x8] sm:$0xff]  ;;  %s16948_s16 = smov [#allocation29]  }
  0xd1   :  { %v17144_v43 = vshrl.u32 %v361_v40, 7  ;;  %v468_v47 = vcombine.high %v349_v45, %v349_v45  ;;  %v508_v52 = vsel %vm506_vm1, 4294967295, %v16945_v51  ;;  %v485_v60 = vcombine.high %v350_v59, %v350_v59  ;;  %s14030_s19 = sshll.u32 %s16948_s16, 4  ;;  %s14031_s19 = int_to_ptr.vmem [resolvable:$true] %s14030_s19 }
  0xd2   :  { %v471_v44 = vunpack.c.0.s8 %v470_v42  ;;  %v17147_v53 = vsel %vm507_vm2, %v508_v52, 0  ;;  %v16946_v61 = vmov 0   ;;  %vm451_vm3 = vcmask 1041409   ;;  %s16881_s9 = scalar_lea.vmem %s14031_s19, 128  ;;  %p16886_p2 = scmp.lt.s32.totalorder %s14031_s19, %s14031_s19 }
  0xd3   :  { %566 = vmatprep.mubr.bf16.mxu0 %v16946_v61  ;;  %607 = vmatprep.mubr.bf16.mxu1 %v16946_v61  ;;  %vm453_vm4 = vcmask 1042434   ;;  %vm455_vm5 = vcmask 1043459   ;;  %vm457_vm6 = vcmask 1044484   ;;  %vm459_vm7 = vcmask 1045509   ;;  %p16882_p1 = scmp.ne.s32.totalorder %s14031_s19, %s16881_s9  ;;  %p16887_p3 = scmp.lt.s32.totalorder %s16881_s9, %s16881_s9 }
  0xd4   :  { %v474_v46 = vsub.s32 %v471_v44, %v17144_v43  ;;  %vm461_vm8 = vcmask 1046534   ;;  %vm463_vm9 = vcmask 1047559   ;;  %vm502_vm10 = vcmask 23552  }
  0xd5   :  { %v267_v0 = vld [vmem:[%s17842_s3] sm:$0x77]  ;;  %v269_v1 = vld [vmem:[%s17842_s3 + $0x10] sm:$0x77]  ;;  %v268_v2 = vld [vmem:[%s17842_s3 + $0x8] sm:$0x77]  ;;  %p16888_p4 = por %p16887_p3, %p16886_p2 }
  0xd6   :  { %v283_v3 = vcombine.high %v267_v0, %v267_v0  ;;  %v300_v4 = vsel %vm299_vm0, %v267_v0, 0.0  ;;  %v285_v5 = vcombine.high %v269_v1, %v269_v1  ;;  %v310_v6 = vsel %vm299_vm0, %v269_v1, 0.0  ;;  %v270_v7 = vld [vmem:[%s17842_s3 + $0x18] sm:$0x77]  ;;  %v271_v8 = vld [vmem:[%s17842_s3 + $0x20] sm:$0x77] }
  0xd7   :  { %v284_v9 = vcombine.high %v268_v2, %v268_v2  ;;  %v305_v10 = vsel %vm299_vm0, %v268_v2, 0.0  ;;  %v286_v11 = vcombine.high %v270_v7, %v270_v7  ;;  %v272_v12 = vld [vmem:[%s17842_s3 + $0x28] sm:$0x77]  ;;  %v273_v13 = vld [vmem:[%s17842_s3 + $0x30] sm:$0x77]  ;;  %v315_v16 = vsel %vm299_vm0, %v270_v7, 0.0  ;;  %p16889_p5 = pnand %p16888_p4, %p16882_p1 }
  0xd8   :  { %v301_v14 = vsel %vm299_vm0, %v283_v3, 0.0  ;;  %v311_v15 = vsel %vm299_vm0, %v285_v5, 0.0  ;;  %v287_v17 = vcombine.high %v271_v8, %v271_v8  ;;  %v274_v18 = vld [vmem:[%s17842_s3 + $0x38] sm:$0x77]  ;;  %v288_v23 = vcombine.high %v272_v12, %v272_v12 }
  0xd9   :  { %v302_v19 = vadd.f32 %v301_v14, %v300_v4  ;;  %v312_v20 = vadd.f32 %v311_v15, %v310_v6  ;;  %v306_v21 = vsel %vm299_vm0, %v284_v9, 0.0  ;;  %v316_v22 = vsel %vm299_vm0, %v286_v11, 0.0 }
  0xda   :  { %v307_v24 = vadd.f32 %v306_v21, %v305_v10  ;;  %v317_v25 = vadd.f32 %v316_v22, %v315_v16  ;;  %v320_v26 = vsel %vm299_vm0, %v271_v8, 0.0  ;;  %v321_v27 = vsel %vm299_vm0, %v287_v17, 0.0 }
  0xdb   :  { %303 = vadd.xlane.f32.xlu0 %v302_v19  ;;  %313 = vadd.xlane.f32.xlu1 %v312_v20  ;;  %v325_v28 = vsel %vm299_vm0, %v272_v12, 0.0  ;;  %v326_v29 = vsel %vm299_vm0, %v288_v23, 0.0  ;;  %v289_v30 = vcombine.high %v273_v13, %v273_v13  ;;  %v290_v31 = vcombine.high %v274_v18, %v274_v18 }
  0xdc   :  { %v322_v32 = vadd.f32 %v321_v27, %v320_v26  ;;  %v327_v33 = vadd.f32 %v326_v29, %v325_v28  ;;  %v330_v34 = vsel %vm299_vm0, %v273_v13, 0.0  ;;  %v335_v36 = vsel %vm299_vm0, %v274_v18, 0.0 }
  0xdd   :  { %v331_v35 = vsel %vm299_vm0, %v289_v30, 0.0  ;;  %v336_v37 = vsel %vm299_vm0, %v290_v31, 0.0  ;;  %v475_v48 = vrot.slane %v349_v45, %v474_v46  ;;  %v482_v49 = vrot.slane %v468_v47, %v474_v46 }
  0xde   :  { %v332_v38 = vadd.f32 %v331_v35, %v330_v34  ;;  %v337_v39 = vadd.f32 %v336_v37, %v335_v36  ;;  %v17154_v62 = vrot.slane %v350_v59, %v474_v46  ;;  %v17156_v63 = vrot.slane %v485_v60, %v474_v46  ;;  %v886_v59 = vld [vmem:[#allocation8 + $0x5e0] sm:$0xff] }
  0xdf   :  { %308 = vadd.xlane.f32.xlu0 %v307_v24  ;;  %318 = vadd.xlane.f32.xlu1 %v317_v25  ;;  %v483_v50 = vcombine.high %v475_v48, %v475_v48  ;;  %v484_v54 = vcombine.high %v482_v49, %v482_v49  ;;  %v511_v57 = vand.u32 %v17147_v53, %v475_v48  ;;  %v418_v10 = vand.u32 127, %v361_v40 }
  0xe0   :  { %v517_v58 = vand.u32 %v17147_v53, %v482_v49  ;;  %v500_v0 = vcombine.high %v17154_v62, %v17154_v62  ;;  %v501_v1 = vcombine.high %v17156_v63, %v17156_v63  ;;  %v523_v2 = vand.u32 %v17147_v53, %v17154_v62  ;;  %v738_v62 = vld [vmem:[#allocation8 + $0x140] sm:$0xff] }
  0xe1   :  { %v514_v55 = vand.u32 %v17147_v53, %v483_v50  ;;  %v520_v56 = vand.u32 %v17147_v53, %v484_v54  ;;  %v529_v3 = vand.u32 %v17147_v53, %v17156_v63  ;;  %v421_v17 = vsub.s32 %v418_v10, %v17144_v43 }
  0xe2   :  { %v526_v4 = vand.u32 %v17147_v53, %v500_v0  ;;  %v532_v5 = vand.u32 %v17147_v53, %v501_v1  ;;  %vm3748_vm11 = vcmask 850944   ;;  %vm3752_vm12 = vcmask 1043456  }
  0xe3   :  { %323 = vadd.xlane.f32.xlu0 %v322_v32  ;;  %328 = vadd.xlane.f32.xlu1 %v327_v33  ;;  %vm4464_vm13 = vcmask 89088  }
  0xe4   :  { %548 = vmatprep.subr.bf16.mxu0 %v514_v55  ;;  %589 = vmatprep.subr.bf16.mxu1 %v520_v56  ;;  %v754_v55 = vld [vmem:[#allocation8 + $0x1c0] sm:$0xff] }
  0xe5   :  { %549 = vmatpush1.bf16.msra.mxu0 %v511_v57  ;;  %590 = vmatpush1.bf16.msra.mxu1 %v517_v58  ;;  %v758_v57 = vld [vmem:[#allocation8 + $0x1e0] sm:$0xff] }
  0xe6   :  { %630 = vmatprep.subr.bf16.mxu0 %v526_v4  ;;  %671 = vmatprep.subr.bf16.mxu1 %v532_v5  ;;  %v882_v58 = vld [vmem:[#allocation8 + $0x5c0] sm:$0xff]  ;;  %v14108_v1 = vcombine.high %v754_v55, %v758_v57 }
  0xe7   :  { %333 = vadd.xlane.f32.xlu0 %v332_v38  ;;  %338 = vadd.xlane.f32.xlu1 %v337_v39  ;;  %v14236_v4 = vcombine.high %v882_v58, %v886_v59  ;;  %v746_v5 = vld [vmem:[#allocation8 + $0x180] sm:$0xff]  ;;  %v14235_v10 = vcombine.low %v882_v58, %v886_v59 }
  0xe8   :  { %v822_v58 = vld [vmem:[#allocation8 + $0x3e0] sm:$0xff] }
  0xe9   :  { %v946_v59 = vld [vmem:[#allocation8 + $0x7c0] sm:$0xff] }
 0x164   :  { %v304_v6 = vpop.xlane.xlu0 %303  ;;  %v314_v7 = vpop.xlane.xlu1 %313 }
 0x165   :  { %v341_v8 = vmul.f32 0.00390625, %v304_v6  ;;  %v343_v9 = vmul.f32 0.00390625, %v314_v7  ;;  %v750_v6 = vld [vmem:[#allocation8 + $0x1a0] sm:$0xff] }
 0x166   :  { %v874_v7 = vld [vmem:[#allocation8 + $0x580] sm:$0xff]  ;;  %v14099_v53 = vcombine.low %v746_v5, %v750_v6 }
 0x167   :  { %v352_v11 = vpack.c.bf16 %v341_v8, %v341_v8  ;;  %v354_v12 = vpack.c.bf16 %v343_v9, %v343_v9  ;;  %v878_v8 = vld [vmem:[#allocation8 + $0x5a0] sm:$0xff]  ;;  %v14107_v9 = vcombine.low %v754_v55, %v758_v57 }
 0x168   :  { %v309_v13 = vpop.xlane.xlu0 %308  ;;  %v319_v14 = vpop.xlane.xlu1 %318  ;;  %v818_v57 = vld [vmem:[#allocation8 + $0x3c0] sm:$0xff] }
 0x169   :  { %v342_v15 = vmul.f32 0.00390625, %v309_v13  ;;  %v344_v16 = vmul.f32 0.00390625, %v319_v14  ;;  %v409_v18 = vunpack.c.l.b16 %v352_v11  ;;  %v411_v21 = vunpack.c.l.b16 %v354_v12  ;;  %v866_v13 = vld [vmem:[#allocation8 + $0x540] sm:$0xff] }
 0x16a   :  { %v14100_v11 = vcombine.high %v746_v5, %v750_v6  ;;  %v14228_v12 = vcombine.high %v874_v7, %v878_v8  ;;  %v870_v14 = vld [vmem:[#allocation8 + $0x560] sm:$0xff] }
 0x16b   :  { %v353_v19 = vpack.c.bf16 %v342_v15, %v342_v15  ;;  %v355_v20 = vpack.c.bf16 %v344_v16, %v344_v16  ;;  %v422_v28 = vrot.slane %v409_v18, %v421_v17  ;;  %v430_v33 = vrot.slane %v411_v21, %v421_v17  ;;  %v730_v15 = vld [vmem:[#allocation8 + $0x100] sm:$0xff] }
 0x16c   :  { %v324_v22 = vpop.xlane.xlu0 %323  ;;  %v329_v23 = vpop.xlane.xlu1 %328  ;;  %v734_v16 = vld [vmem:[#allocation8 + $0x120] sm:$0xff] }
 0x16d   :  { %v410_v24 = vunpack.c.l.b16 %v353_v19  ;;  %v412_v25 = vunpack.c.l.b16 %v355_v20  ;;  %v345_v26 = vmul.f32 0.00390625, %v324_v22  ;;  %v346_v27 = vmul.f32 0.00390625, %v329_v23  ;;  %v862_v18 = vld [vmem:[#allocation8 + $0x520] sm:$0xff] }
 0x16e   :  { %v14219_v20 = vcombine.low %v866_v13, %v870_v14  ;;  %v14084_v21 = vcombine.high %v730_v15, %v734_v16  ;;  %v722_v23 = vld [vmem:[#allocation8 + $0xc0] sm:$0xff] }
 0x16f   :  { %v426_v29 = vrot.slane %v410_v24, %v421_v17  ;;  %v434_v30 = vrot.slane %v412_v25, %v421_v17  ;;  %v356_v31 = vpack.c.bf16 %v345_v26, %v345_v26  ;;  %v357_v32 = vpack.c.bf16 %v346_v27, %v346_v27  ;;  %v726_v24 = vld [vmem:[#allocation8 + $0xe0] sm:$0xff] }
 0x170   :  { %v334_v34 = vpop.xlane.xlu0 %333  ;;  %v339_v35 = vpop.xlane.xlu1 %338  ;;  %v850_v25 = vld [vmem:[#allocation8 + $0x4c0] sm:$0xff]  ;;  %v14083_v27 = vcombine.low %v730_v15, %v734_v16 }
 0x171   :  { %v452_v36 = vsel %vm451_vm3, %v426_v29, %v422_v28  ;;  %v413_v37 = vunpack.c.l.b16 %v356_v31  ;;  %v414_v38 = vunpack.c.l.b16 %v357_v32  ;;  %v347_v39 = vmul.f32 0.00390625, %v334_v34  ;;  %v854_v26 = vld [vmem:[#allocation8 + $0x4e0] sm:$0xff] }
 0x172   :  { %v454_v40 = vsel %vm453_vm4, %v430_v33, %v452_v36  ;;  %v348_v41 = vmul.f32 0.00390625, %v339_v35  ;;  %v14076_v29 = vcombine.high %v722_v23, %v726_v24  ;;  %v714_v31 = vld [vmem:[#allocation8 + $0x80] sm:$0xff]  ;;  %v14075_v35 = vcombine.low %v722_v23, %v726_v24 }
 0x173   :  { %v456_v42 = vsel %vm455_vm5, %v434_v30, %v454_v40  ;;  %v438_v44 = vrot.slane %v413_v37, %v421_v17  ;;  %v358_v45 = vpack.c.bf16 %v347_v39, %v347_v39  ;;  %v442_v46 = vrot.slane %v414_v38, %v421_v17  ;;  %v718_v32 = vld [vmem:[#allocation8 + $0xa0] sm:$0xff] }
 0x174   :  { %v359_v47 = vpack.c.bf16 %v348_v41, %v348_v41  ;;  %v14204_v30 = vcombine.high %v850_v25, %v854_v26  ;;  %v842_v33 = vld [vmem:[#allocation8 + $0x480] sm:$0xff]  ;;  %v14203_v36 = vcombine.low %v850_v25, %v854_v26  ;;  %v14068_v37 = vcombine.high %v714_v31, %v718_v32 }
 0x175   :  { %v458_v48 = vsel %vm457_vm6, %v438_v44, %v456_v42  ;;  %v415_v49 = vunpack.c.l.b16 %v358_v45  ;;  %v846_v34 = vld [vmem:[#allocation8 + $0x4a0] sm:$0xff]  ;;  %v14067_v44 = vcombine.low %v714_v31, %v718_v32 }
 0x176   :  { %v416_v50 = vunpack.c.l.b16 %v359_v47  ;;  %v460_v52 = vsel %vm459_vm7, %v442_v46, %v458_v48  ;;  %v14196_v38 = vcombine.high %v842_v33, %v846_v34  ;;  %v706_v39 = vld [vmem:[#allocation8 + $0x40] sm:$0xff]  ;;  %v14195_v45 = vcombine.low %v842_v33, %v846_v34 }
 0x177   :  { %v446_v51 = vrot.slane %v415_v49, %v421_v17  ;;  %v710_v40 = vld [vmem:[#allocation8 + $0x60] sm:$0xff] }
 0x178   :  { %v450_v54 = vrot.slane %v416_v50, %v421_v17  ;;  %v858_v17 = vld [vmem:[#allocation8 + $0x500] sm:$0xff]  ;;  %v14060_v46 = vcombine.high %v706_v39, %v710_v40 }
 0x179   :  { %v462_v56 = vsel %vm461_vm8, %v446_v51, %v460_v52  ;;  %v14212_v22 = vcombine.high %v858_v17, %v862_v18  ;;  %v14211_v28 = vcombine.low %v858_v17, %v862_v18  ;;  %v834_v41 = vld [vmem:[#allocation8 + $0x440] sm:$0xff]  ;;  %v14059_v52 = vcombine.low %v706_v39, %v710_v40 }
 0x17a   :  { %v464_v60 = vsel %vm463_vm9, %v450_v54, %v462_v56  ;;  %v838_v42 = vld [vmem:[#allocation8 + $0x460] sm:$0xff] }
 0x17b   :  { %v465_v0 = vpack.c.b16 %v464_v60, %v464_v60  ;;  %v14188_v47 = vcombine.high %v834_v41, %v838_v42  ;;  %v698_v48 = vld [vmem:[#allocation8] sm:$0xff]  ;;  %v14187_v54 = vcombine.low %v834_v41, %v838_v42 }
 0x17c   :  { %v702_v49 = vld [vmem:[#allocation8 + $0x20] sm:$0xff] }
 0x17d   :  { %14047 = vmatmul.mubr.msk.bf16.vlgmr.msra.gmra.mxu0 %vm502_vm10, %v465_v0  ;;  %14048 = vmatmul.mubr.msk.bf16.vlgmr.msra.gmra.mxu1 %vm502_vm10, %v465_v0  ;;  %v826_v50 = vld [vmem:[#allocation8 + $0x400] sm:$0xff]  ;;  %v14052_v55 = vcombine.high %v698_v48, %v702_v49 }
 0x17e   :  { %631 = vmatpush1.bf16.msra.mxu0 %v523_v2  ;;  %672 = vmatpush1.bf16.msra.mxu1 %v529_v3  ;;  %v742_v2 = vld [vmem:[#allocation8 + $0x160] sm:$0xff]  ;;  %v14220_v3 = vcombine.high %v866_v13, %v870_v14 }
 0x17f   :  { %648 = vmatprep.mubr.bf16.mxu0 %v16946_v61  ;;  %689 = vmatprep.mubr.bf16.mxu1 %v16946_v61  ;;  %v14227_v61 = vcombine.low %v874_v7, %v878_v8  ;;  %v14092_v63 = vcombine.high %v738_v62, %v742_v2  ;;  %v14091_v19 = vcombine.low %v738_v62, %v742_v2  ;;  %v830_v51 = vld [vmem:[#allocation8 + $0x420] sm:$0xff] }
 0x180   :  { %3777 = vmatprep.subr.bf16.mxu0 %v14108_v1  ;;  %3818 = vmatprep.subr.bf16.mxu1 %v14236_v4  ;;  %v14180_v56 = vcombine.high %v826_v50, %v830_v51  ;;  %v950_v60 = vld [vmem:[#allocation8 + $0x7e0] sm:$0xff]  ;;  %v14179_v1 = vcombine.low %v826_v50, %v830_v51  ;;  %v14172_v4 = vcombine.high %v818_v57, %v822_v58 }
 0x181   :  { %v14300_v5 = vcombine.high %v946_v59, %v950_v60  ;;  %v810_v6 = vld [vmem:[#allocation8 + $0x380] sm:$0xff] }
 0x182   :  { %v814_v7 = vld [vmem:[#allocation8 + $0x3a0] sm:$0xff] }
 0x183   :  { %v938_v8 = vld [vmem:[#allocation8 + $0x780] sm:$0xff] }
 0x184   :  { %v802_v2 = vld [vmem:[#allocation8 + $0x340] sm:$0xff] }
 0x185   :  { %14049 = vmatmul.mubr.msk.bf16.vlgmr.msra.gmra.mxu0 %vm502_vm10, %v465_v0  ;;  %14050 = vmatmul.mubr.msk.bf16.vlgmr.msra.gmra.mxu1 %vm502_vm10, %v465_v0  ;;  %v14051_v0 = vcombine.low %v698_v48, %v702_v49  ;;  %v806_v13 = vld [vmem:[#allocation8 + $0x360] sm:$0xff] }
 0x186   :  { %3778 = vmatpush1.bf16.msra.mxu0 %v14107_v9  ;;  %3819 = vmatpush1.bf16.msra.mxu1 %v14235_v10  ;;  %v942_v9 = vld [vmem:[#allocation8 + $0x7a0] sm:$0xff]  ;;  %v14171_v10 = vcombine.low %v818_v57, %v822_v58 }
 0x187   :  { %3779 = vmatprep.subr.bf16.mxu0 %v14100_v11  ;;  %3820 = vmatprep.subr.bf16.mxu1 %v14228_v12  ;;  %v14299_v11 = vcombine.low %v946_v59, %v950_v60  ;;  %v14164_v12 = vcombine.high %v810_v6, %v814_v7  ;;  %v14292_v62 = vcombine.high %v938_v8, %v942_v9  ;;  %v930_v14 = vld [vmem:[#allocation8 + $0x740] sm:$0xff] }
 0x188   :  { %v794_v16 = vld [vmem:[#allocation8 + $0x300] sm:$0xff] }
 0x189   :  { %v798_v17 = vld [vmem:[#allocation8 + $0x320] sm:$0xff] }
 0x18a   :  { %3780 = vmatpush1.bf16.msra.mxu0 %v14099_v53  ;;  %3821 = vmatpush1.bf16.msra.mxu1 %v14227_v61  ;;  %v934_v53 = vld [vmem:[#allocation8 + $0x760] sm:$0xff]  ;;  %v14163_v61 = vcombine.low %v810_v6, %v814_v7 }
 0x18b   :  { %3781 = vmatprep.subr.bf16.mxu0 %v14092_v63  ;;  %3822 = vmatprep.subr.bf16.mxu1 %v14220_v3  ;;  %v14291_v63 = vcombine.low %v938_v8, %v942_v9  ;;  %v14156_v3 = vcombine.high %v802_v2, %v806_v13  ;;  %v14284_v15 = vcombine.high %v930_v14, %v934_v53  ;;  %v922_v18 = vld [vmem:[#allocation8 + $0x700] sm:$0xff]  ;;  %v17183_v9 = vsub.s32 0, %v17144_v43 }
 0x18c   :  { %v786_v24 = vld [vmem:[#allocation8 + $0x2c0] sm:$0xff] }
 0x18d   :  { %v790_v25 = vld [vmem:[#allocation8 + $0x2e0] sm:$0xff] }
 0x18e   :  { %3782 = vmatpush1.bf16.msra.mxu0 %v14091_v19  ;;  %3823 = vmatpush1.bf16.msra.mxu1 %v14219_v20  ;;  %v926_v19 = vld [vmem:[#allocation8 + $0x720] sm:$0xff]  ;;  %v14155_v20 = vcombine.low %v802_v2, %v806_v13 }
 0x18f   :  { %3783 = vmatprep.subr.bf16.mxu0 %v14084_v21  ;;  %3824 = vmatprep.subr.bf16.mxu1 %v14212_v22  ;;  %v14283_v21 = vcombine.low %v930_v14, %v934_v53  ;;  %v14148_v22 = vcombine.high %v794_v16, %v798_v17  ;;  %v14276_v23 = vcombine.high %v922_v18, %v926_v19  ;;  %v914_v26 = vld [vmem:[#allocation8 + $0x6c0] sm:$0xff] }
 0x190   :  { %v778_v32 = vld [vmem:[#allocation8 + $0x280] sm:$0xff] }
 0x191   :  { %v782_v33 = vld [vmem:[#allocation8 + $0x2a0] sm:$0xff] }
 0x192   :  { %3784 = vmatpush1.bf16.msra.mxu0 %v14083_v27  ;;  %3825 = vmatpush1.bf16.msra.mxu1 %v14211_v28  ;;  %v918_v27 = vld [vmem:[#allocation8 + $0x6e0] sm:$0xff]  ;;  %v14147_v28 = vcombine.low %v794_v16, %v798_v17 }
 0x193   :  { %3785 = vmatprep.subr.bf16.mxu0 %v14076_v29  ;;  %3826 = vmatprep.subr.bf16.mxu1 %v14204_v30  ;;  %v14275_v29 = vcombine.low %v922_v18, %v926_v19  ;;  %v14140_v30 = vcombine.high %v786_v24, %v790_v25  ;;  %v14268_v31 = vcombine.high %v914_v26, %v918_v27  ;;  %v906_v34 = vld [vmem:[#allocation8 + $0x680] sm:$0xff] }
 0x194   :  { %v770_v40 = vld [vmem:[#allocation8 + $0x240] sm:$0xff] }
 0x195   :  { %v774_v41 = vld [vmem:[#allocation8 + $0x260] sm:$0xff] }
 0x196   :  { %3786 = vmatpush1.bf16.msra.mxu0 %v14075_v35  ;;  %3827 = vmatpush1.bf16.msra.mxu1 %v14203_v36  ;;  %v910_v35 = vld [vmem:[#allocation8 + $0x6a0] sm:$0xff]  ;;  %v14139_v36 = vcombine.low %v786_v24, %v790_v25  ;;  %v14123_v49 = vcombine.low %v770_v40, %v774_v41 }
 0x197   :  { %3787 = vmatprep.subr.bf16.mxu0 %v14068_v37  ;;  %3828 = vmatprep.subr.bf16.mxu1 %v14196_v38  ;;  %v14267_v37 = vcombine.low %v914_v26, %v918_v27  ;;  %v14132_v38 = vcombine.high %v778_v32, %v782_v33  ;;  %v14260_v39 = vcombine.high %v906_v34, %v910_v35  ;;  %v898_v42 = vld [vmem:[#allocation8 + $0x640] sm:$0xff] }
 0x198   :  { %v762_v51 = vld [vmem:[#allocation8 + $0x200] sm:$0xff] }
 0x199   :  { %v1010_v60 = vld [vmem:[#allocation8 + $0x9c0] sm:$0xff] }
 0x19a   :  { %3788 = vmatpush1.bf16.msra.mxu0 %v14067_v44  ;;  %3829 = vmatpush1.bf16.msra.mxu1 %v14195_v45  ;;  %v902_v44 = vld [vmem:[#allocation8 + $0x660] sm:$0xff]  ;;  %v14131_v45 = vcombine.low %v778_v32, %v782_v33 }
 0x19b   :  { %3789 = vmatprep.subr.bf16.mxu0 %v14060_v46  ;;  %3830 = vmatprep.subr.bf16.mxu1 %v14188_v47  ;;  %v14259_v46 = vcombine.low %v906_v34, %v910_v35  ;;  %v14124_v47 = vcombine.high %v770_v40, %v774_v41  ;;  %v14252_v48 = vcombine.high %v898_v42, %v902_v44  ;;  %v1002_v18 = vld [vmem:[#allocation8 + $0x980] sm:$0xff] }
 0x19c   :  { %v14251_v50 = vcombine.low %v898_v42, %v902_v44  ;;  %v1130_v24 = vld [vmem:[#allocation8 + $0xd80] sm:$0xff] }
 0x19d   :  { %v1134_v25 = vld [vmem:[#allocation8 + $0xda0] sm:$0xff] }
 0x19e   :  { %3790 = vmatpush1.bf16.msra.mxu0 %v14059_v52  ;;  %3831 = vmatpush1.bf16.msra.mxu1 %v14187_v54  ;;  %v766_v52 = vld [vmem:[#allocation8 + $0x220] sm:$0xff]  ;;  %v14484_v35 = vcombine.high %v1130_v24, %v1134_v25 }
 0x19f   :  { %3791 = vmatprep.subr.bf16.mxu0 %v14052_v55  ;;  %3832 = vmatprep.subr.bf16.mxu1 %v14180_v56  ;;  %v890_v54 = vld [vmem:[#allocation8 + $0x600] sm:$0xff]  ;;  %v14116_v55 = vcombine.high %v762_v51, %v766_v52  ;;  %v14115_v57 = vcombine.low %v762_v51, %v766_v52 }
 0x1a0   :  { %v894_v56 = vld [vmem:[#allocation8 + $0x620] sm:$0xff] }
 0x1a1   :  { %v14243_v58 = vcombine.low %v890_v54, %v894_v56  ;;  %v14244_v59 = vcombine.high %v890_v54, %v894_v56  ;;  %v1122_v40 = vld [vmem:[#allocation8 + $0xd40] sm:$0xff] }
 0x1a2   :  { %3792 = vmatpush1.bf16.msra.mxu0 %v14051_v0  ;;  %3833 = vmatpush1.bf16.msra.mxu1 %v14179_v1  ;;  %v1014_v0 = vld [vmem:[#allocation8 + $0x9e0] sm:$0xff] }
 0x1a3   :  { %3793 = vmatprep.subr.bf16.mxu0 %v14172_v4  ;;  %3834 = vmatprep.subr.bf16.mxu1 %v14300_v5  ;;  %v1138_v1 = vld [vmem:[#allocation8 + $0xdc0] sm:$0xff]  ;;  %v14364_v4 = vcombine.high %v1010_v60, %v1014_v0  ;;  %v14363_v6 = vcombine.low %v1010_v60, %v1014_v0 }
 0x1a4   :  { %v1142_v5 = vld [vmem:[#allocation8 + $0xde0] sm:$0xff] }
 0x1a5   :  { %v14491_v7 = vcombine.low %v1138_v1, %v1142_v5  ;;  %v14492_v8 = vcombine.high %v1138_v1, %v1142_v5  ;;  %v1126_v41 = vld [vmem:[#allocation8 + $0xd60] sm:$0xff] }
 0x1a6   :  { %3794 = vmatpush2.bf16.msra.mxu0 %v14171_v10  ;;  %3835 = vmatpush2.bf16.msra.mxu1 %v14299_v11  ;;  %v17186_v10 = vsub.s32 2, %v17144_v43  ;;  %v17189_v11 = vsub.s32 1, %v17144_v43  ;;  %v986_v51 = vld [vmem:[#allocation8 + $0x900] sm:$0xff] }
 0x1a7   :  { %3795 = vmatprep.subr.bf16.mxu0 %v14164_v12  ;;  %3836 = vmatprep.subr.bf16.mxu1 %v14292_v62  ;;  %v17192_v12 = vsub.s32 3, %v17144_v43  ;;  %v17194_v62 = vld [vmem:[#allocation7] sm:$0xff]  ;;  %v1114_v56 = vld [vmem:[#allocation8 + $0xd00] sm:$0xff] }
 0x1a8   :  { %v364_v2 = vrot.slane %v17194_v62, %v17183_v9  ;;  %v372_v13 = vrot.slane %v17194_v62, %v17186_v10  ;;  %v368_v14 = vrot.slane %v17194_v62, %v17189_v11 }
 0x1a9   :  { %v376_v53 = vrot.slane %v17194_v62, %v17192_v12 }
 0x1aa   :  { %3796 = vmatpush2.bf16.msra.mxu0 %v14163_v61  ;;  %3837 = vmatpush2.bf16.msra.mxu1 %v14291_v63 }
 0x1ab   :  { %3797 = vmatprep.subr.bf16.mxu0 %v14156_v3  ;;  %3838 = vmatprep.subr.bf16.mxu1 %v14284_v15 }
 0x1ae   :  { %3798 = vmatpush2.bf16.msra.mxu0 %v14155_v20  ;;  %3839 = vmatpush2.bf16.msra.mxu1 %v14283_v21  ;;  %v17205_v21 = vsub.s32 5, %v17144_v43 }
 0x1af   :  { %3799 = vmatprep.subr.bf16.mxu0 %v14148_v22  ;;  %3840 = vmatprep.subr.bf16.mxu1 %v14276_v23  ;;  %v17208_v22 = vsub.s32 7, %v17144_v43  ;;  %v1006_v23 = vld [vmem:[#allocation8 + $0x9a0] sm:$0xff] }
 0x1b0   :  { %v14356_v34 = vcombine.high %v1002_v18, %v1006_v23 }
 0x1b2   :  { %3800 = vmatpush2.bf16.msra.mxu0 %v14147_v28  ;;  %3841 = vmatpush2.bf16.msra.mxu1 %v14275_v29 }
 0x1b3   :  { %3801 = vmatprep.subr.bf16.mxu0 %v14140_v30  ;;  %3842 = vmatprep.subr.bf16.mxu1 %v14268_v31 }
 0x1b6   :  { %3802 = vmatpush2.bf16.msra.mxu0 %v14139_v36  ;;  %3843 = vmatpush2.bf16.msra.mxu1 %v14267_v37  ;;  %v994_v36 = vld [vmem:[#allocation8 + $0x940] sm:$0xff]  ;;  %v384_v37 = vrot.slane %v17194_v62, %v17205_v21 }
 0x1b7   :  { %3803 = vmatprep.subr.bf16.mxu0 %v14132_v38  ;;  %3844 = vmatprep.subr.bf16.mxu1 %v14260_v39  ;;  %v392_v38 = vrot.slane %v17194_v62, %v17208_v22  ;;  %v998_v39 = vld [vmem:[#allocation8 + $0x960] sm:$0xff] }
 0x1b8   :  { %v14347_v60 = vcombine.low %v994_v36, %v998_v39 }
 0x1ba   :  { %3804 = vmatpush2.bf16.msra.mxu0 %v14131_v45  ;;  %3845 = vmatpush2.bf16.msra.mxu1 %v14259_v46  ;;  %v14355_v45 = vcombine.low %v1002_v18, %v1006_v23  ;;  %v14483_v46 = vcombine.low %v1130_v24, %v1134_v25  ;;  %v1098_v18 = vld [vmem:[#allocation8 + $0xc80] sm:$0xff] }
 0x1bb   :  { %3805 = vmatprep.subr.bf16.mxu0 %v14124_v47  ;;  %3846 = vmatprep.subr.bf16.mxu1 %v14252_v48 }
 0x1be   :  { %3806 = vmatpush2.bf16.msra.mxu0 %v14123_v49  ;;  %3847 = vmatpush2.bf16.msra.mxu1 %v14251_v50  ;;  %v14348_v49 = vcombine.high %v994_v36, %v998_v39  ;;  %v14476_v50 = vcombine.high %v1122_v40, %v1126_v41  ;;  %v958_v39 = vld [vmem:[#allocation8 + $0x820] sm:$0xff] }
 0x1bf   :  { %3807 = vmatprep.subr.bf16.mxu0 %v14116_v55  ;;  %3848 = vmatprep.subr.bf16.mxu1 %v14244_v59  ;;  %v990_v55 = vld [vmem:[#allocation8 + $0x920] sm:$0xff] }
 0x1c2   :  { %3808 = vmatpush2.bf16.msra.mxu0 %v14115_v57  ;;  %3849 = vmatpush2.bf16.msra.mxu1 %v14243_v58  ;;  %v1118_v57 = vld [vmem:[#allocation8 + $0xd20] sm:$0xff] }
 0x1c3   :  { %3859 = vmatprep.subr.bf16.mxu0 %v14364_v4  ;;  %3900 = vmatprep.subr.bf16.mxu1 %v14492_v8  ;;  %v14475_v4 = vcombine.low %v1122_v40, %v1126_v41  ;;  %v14468_v8 = vcombine.high %v1114_v56, %v1118_v57  ;;  %v1082_v40 = vld [vmem:[#allocation8 + $0xc00] sm:$0xff] }
 0x1c4   :  { %v1086_v41 = vld [vmem:[#allocation8 + $0xc20] sm:$0xff] }
 0x23d   :  { %v568_v61 = vpop.f32.mrf.mxu0  ;;  %v609_v63 = vpop.f32.mrf.mxu1 }
 0x23e   :  { %v569_v3 = vadd.f32 %v568_v61, %v364_v2  ;;  %v610_v15 = vadd.f32 %v609_v63, %v372_v13  ;;  %v978_v2 = vld [vmem:[#allocation8 + $0x8c0] sm:$0xff]  ;;  %v14339_v61 = vcombine.low %v986_v51, %v990_v55  ;;  %v14467_v63 = vcombine.low %v1114_v56, %v1118_v57 }
 0x23f   :  { %v570_v16 = vpop.f32.mrf.mxu0  ;;  %v611_v17 = vpop.f32.mrf.mxu1  ;;  %v982_v13 = vld [vmem:[#allocation8 + $0x8e0] sm:$0xff] }
 0x240   :  { %v571_v19 = vadd.f32 %v570_v16, %v368_v14  ;;  %v612_v20 = vadd.f32 %v611_v17, %v376_v53  ;;  %v17214_v30 = vpack.c.bf16 %v569_v3, %v569_v3  ;;  %v17216_v31 = vpack.c.bf16 %v610_v15, %v610_v15  ;;  %v1106_v14 = vld [vmem:[#allocation8 + $0xcc0] sm:$0xff] }
 0x241   :  { %v572_v26 = vpop.f32.mrf.mxu0  ;;  %v613_v27 = vpop.f32.mrf.mxu1  ;;  %v1110_v53 = vld [vmem:[#allocation8 + $0xce0] sm:$0xff]  ;;  %v14332_v3 = vcombine.high %v978_v2, %v982_v13 }
 0x242   :  { %v17210_v28 = vpack.c.bf16 %v571_v19, %v571_v19  ;;  %v17212_v29 = vpack.c.bf16 %v612_v20, %v612_v20  ;;  %v14460_v15 = vcombine.high %v1106_v14, %v1110_v53  ;;  %v970_v16 = vld [vmem:[#allocation8 + $0x880] sm:$0xff]  ;;  %v14331_v20 = vcombine.low %v978_v2, %v982_v13 }
 0x243   :  { %v573_v32 = vpop.f32.mrf.mxu0  ;;  %v614_v33 = vpop.f32.mrf.mxu1  ;;  %v974_v17 = vld [vmem:[#allocation8 + $0x8a0] sm:$0xff]  ;;  %v14459_v23 = vcombine.low %v1106_v14, %v1110_v53 }
 0x244   :  { %3809 = vmatprep.mubr.bf16.mxu0 %v17210_v28  ;;  %3850 = vmatprep.mubr.bf16.mxu1 %v17212_v29  ;;  %v1102_v19 = vld [vmem:[#allocation8 + $0xca0] sm:$0xff]  ;;  %v14324_v24 = vcombine.high %v970_v16, %v974_v17 }
 0x245   :  { %v17224_v42 = vpop.f32.mrf.mxu0  ;;  %v17226_v44 = vpop.f32.mrf.mxu1  ;;  %3810 = vmatmul.mubr.bf16.vlgmr.msra.gmra.mxu0 %v17214_v30  ;;  %3851 = vmatmul.mubr.bf16.vlgmr.msra.gmra.mxu1 %v17216_v31  ;;  %v14452_v25 = vcombine.high %v1098_v18, %v1102_v19  ;;  %v962_v26 = vld [vmem:[#allocation8 + $0x840] sm:$0xff] }
 0x246   :  { %3860 = vmatpush1.bf16.msra.mxu0 %v14363_v6  ;;  %3901 = vmatpush1.bf16.msra.mxu1 %v14491_v7  ;;  %v14340_v7 = vcombine.high %v986_v51, %v990_v55  ;;  %v966_v27 = vld [vmem:[#allocation8 + $0x860] sm:$0xff] }
 0x247   :  { %v652_v47 = vpop.f32.mrf.mxu0  ;;  %v693_v48 = vpop.f32.mrf.mxu1  ;;  %3861 = vmatprep.subr.bf16.mxu0 %v14356_v34  ;;  %3902 = vmatprep.subr.bf16.mxu1 %v14484_v35  ;;  %v1090_v32 = vld [vmem:[#allocation8 + $0xc40] sm:$0xff]  ;;  %v14323_v34 = vcombine.low %v970_v16, %v974_v17  ;;  %v14451_v35 = vcombine.low %v1098_v18, %v1102_v19  ;;  %v14316_v36 = vcombine.high %v962_v26, %v966_v27 }
 0x248   :  { %v653_v52 = vadd.f32 %v652_v47, %v384_v37  ;;  %v694_v54 = vadd.f32 %v693_v48, %v392_v38  ;;  %v1094_v33 = vld [vmem:[#allocation8 + $0xc60] sm:$0xff]  ;;  %v14436_v48 = vcombine.high %v1082_v40, %v1086_v41 }
 0x249   :  { %v654_v58 = vpop.f32.mrf.mxu0  ;;  %v695_v59 = vpop.f32.mrf.mxu1  ;;  %v14444_v37 = vcombine.high %v1090_v32, %v1094_v33  ;;  %v954_v38 = vld [vmem:[#allocation8 + $0x800] sm:$0xff] }
 0x24a   :  { %v17230_v0 = vpack.c.bf16 %v653_v52, %v653_v52  ;;  %v17232_v1 = vpack.c.bf16 %v694_v54, %v694_v54  ;;  %3862 = vmatpush1.bf16.msra.mxu0 %v14355_v45  ;;  %3903 = vmatpush1.bf16.msra.mxu1 %v14483_v46  ;;  %v14315_v45 = vcombine.low %v962_v26, %v966_v27  ;;  %v1194_v51 = vld [vmem:[#allocation8 + $0xf80] sm:$0xff] }
 0x24b   :  { %v655_v5 = vpop.f32.mrf.mxu0  ;;  %v696_v6 = vpop.f32.mrf.mxu1  ;;  %3863 = vmatprep.subr.bf16.mxu0 %v14348_v49  ;;  %3904 = vmatprep.subr.bf16.mxu1 %v14476_v50  ;;  %v14443_v46 = vcombine.low %v1090_v32, %v1094_v33  ;;  %v14308_v47 = vcombine.high %v954_v38, %v958_v39  ;;  %v1074_v49 = vld [vmem:[#allocation8 + $0xbc0] sm:$0xff]  ;;  %v14307_v52 = vcombine.low %v954_v38, %v958_v39 }
 0x24c   :  { %3891 = vmatprep.mubr.bf16.mxu0 %v17230_v0  ;;  %14556 = vmatprep.mubr.msk.bf16.mxu1 %vm3748_vm11, %v17232_v1  ;;  %v1078_v50 = vld [vmem:[#allocation8 + $0xbe0] sm:$0xff]  ;;  %v14435_v54 = vcombine.low %v1082_v40, %v1086_v41  ;;  %v14548_v56 = vcombine.high %v1194_v51, %v1194_v51  ;;  %v14547_v57 = vcombine.low %v1194_v51, %v1194_v51 }
 0x24d   :  { %v14428_v55 = vcombine.high %v1074_v49, %v1078_v50  ;;  %v1066_v58 = vld [vmem:[#allocation8 + $0xb80] sm:$0xff]  ;;  %v14427_v5 = vcombine.low %v1074_v49, %v1078_v50 }
 0x24e   :  { %3864 = vmatpush1.bf16.msra.mxu0 %v14347_v60  ;;  %3905 = vmatpush1.bf16.msra.mxu1 %v14475_v4  ;;  %v1070_v59 = vld [vmem:[#allocation8 + $0xba0] sm:$0xff]  ;;  %v3754_v6 = vsel %vm3752_vm12, %v14547_v57, 0 }
 0x24f   :  { %3865 = vmatprep.subr.bf16.mxu0 %v14340_v7  ;;  %3906 = vmatprep.subr.bf16.mxu1 %v14468_v8  ;;  %v1186_v60 = vld [vmem:[#allocation8 + $0xf40] sm:$0xff]  ;;  %v14420_v7 = vcombine.high %v1066_v58, %v1070_v59 }
 0x250   :  { %v1190_v4 = vld [vmem:[#allocation8 + $0xf60] sm:$0xff] }
 0x251   :  { %v14540_v8 = vcombine.high %v1186_v60, %v1190_v4  ;;  %v1058_v2 = vld [vmem:[#allocation8 + $0xb40] sm:$0xff] }
 0x252   :  { %3866 = vmatpush1.bf16.msra.mxu0 %v14339_v61  ;;  %3907 = vmatpush1.bf16.msra.mxu1 %v14467_v63  ;;  %v1062_v13 = vld [vmem:[#allocation8 + $0xb60] sm:$0xff]  ;;  %v14419_v61 = vcombine.low %v1066_v58, %v1070_v59  ;;  %v14539_v63 = vcombine.low %v1186_v60, %v1190_v4 }
 0x253   :  { %3867 = vmatprep.subr.bf16.mxu0 %v14332_v3  ;;  %3908 = vmatprep.subr.bf16.mxu1 %v14460_v15  ;;  %v1178_v14 = vld [vmem:[#allocation8 + $0xf00] sm:$0xff]  ;;  %v14412_v3 = vcombine.high %v1058_v2, %v1062_v13 }
 0x254   :  { %v1182_v53 = vld [vmem:[#allocation8 + $0xf20] sm:$0xff] }
 0x255   :  { %v14532_v15 = vcombine.high %v1178_v14, %v1182_v53  ;;  %v1050_v16 = vld [vmem:[#allocation8 + $0xb00] sm:$0xff] }
 0x256   :  { %3868 = vmatpush1.bf16.msra.mxu0 %v14331_v20  ;;  %3909 = vmatpush1.bf16.msra.mxu1 %v14459_v23  ;;  %v1054_v17 = vld [vmem:[#allocation8 + $0xb20] sm:$0xff]  ;;  %v14411_v20 = vcombine.low %v1058_v2, %v1062_v13  ;;  %v14531_v23 = vcombine.low %v1178_v14, %v1182_v53 }
 0x257   :  { %3869 = vmatprep.subr.bf16.mxu0 %v14324_v24  ;;  %3910 = vmatprep.subr.bf16.mxu1 %v14452_v25  ;;  %v1170_v18 = vld [vmem:[#allocation8 + $0xec0] sm:$0xff]  ;;  %v14404_v24 = vcombine.high %v1050_v16, %v1054_v17 }
 0x258   :  { %v1174_v19 = vld [vmem:[#allocation8 + $0xee0] sm:$0xff] }
 0x259   :  { %v14524_v25 = vcombine.high %v1170_v18, %v1174_v19  ;;  %v1042_v26 = vld [vmem:[#allocation8 + $0xac0] sm:$0xff] }
 0x25a   :  { %3870 = vmatpush1.bf16.msra.mxu0 %v14323_v34  ;;  %3911 = vmatpush1.bf16.msra.mxu1 %v14451_v35  ;;  %v1046_v27 = vld [vmem:[#allocation8 + $0xae0] sm:$0xff]  ;;  %v14403_v34 = vcombine.low %v1050_v16, %v1054_v17  ;;  %v14523_v35 = vcombine.low %v1170_v18, %v1174_v19 }
 0x25b   :  { %3871 = vmatprep.subr.bf16.mxu0 %v14316_v36  ;;  %3912 = vmatprep.subr.bf16.mxu1 %v14444_v37  ;;  %v1162_v32 = vld [vmem:[#allocation8 + $0xe80] sm:$0xff]  ;;  %v14396_v36 = vcombine.high %v1042_v26, %v1046_v27 }
 0x25c   :  { %v1166_v33 = vld [vmem:[#allocation8 + $0xea0] sm:$0xff] }
 0x25d   :  { %v14516_v37 = vcombine.high %v1162_v32, %v1166_v33  ;;  %v1034_v38 = vld [vmem:[#allocation8 + $0xa80] sm:$0xff] }
 0x25e   :  { %3872 = vmatpush1.bf16.msra.mxu0 %v14315_v45  ;;  %3913 = vmatpush1.bf16.msra.mxu1 %v14443_v46  ;;  %v1038_v39 = vld [vmem:[#allocation8 + $0xaa0] sm:$0xff]  ;;  %v14395_v45 = vcombine.low %v1042_v26, %v1046_v27  ;;  %v14515_v46 = vcombine.low %v1162_v32, %v1166_v33  ;;  %v731_v33 = vld [vmem:[#allocation8 + $0x108] sm:$0xff] }
 0x25f   :  { %3873 = vmatprep.subr.bf16.mxu0 %v14308_v47  ;;  %3914 = vmatprep.subr.bf16.mxu1 %v14436_v48  ;;  %v1154_v40 = vld [vmem:[#allocation8 + $0xe40] sm:$0xff]  ;;  %v17240_v47 = vsub.s32 6, %v17144_v43  ;;  %v14388_v48 = vcombine.high %v1034_v38, %v1038_v39 }
 0x260   :  { %v1158_v41 = vld [vmem:[#allocation8 + $0xe60] sm:$0xff] }
 0x261   :  { %v14508_v49 = vcombine.high %v1154_v40, %v1158_v41  ;;  %v1026_v50 = vld [vmem:[#allocation8 + $0xa40] sm:$0xff]  ;;  %v14507_v57 = vcombine.low %v1154_v40, %v1158_v41  ;;  %v388_v58 = vrot.slane %v17194_v62, %v17240_v47 }
 0x262   :  { %3874 = vmatpush1.bf16.msra.mxu0 %v14307_v52  ;;  %3915 = vmatpush1.bf16.msra.mxu1 %v14435_v54  ;;  %v1030_v51 = vld [vmem:[#allocation8 + $0xa60] sm:$0xff] }
 0x263   :  { %3875 = vmatprep.subr.bf16.mxu0 %v14428_v55  ;;  %14555 = vmatprep.subr.msk.bf16.mxu1 %vm3752_vm12, %v14548_v56  ;;  %v1146_v52 = vld [vmem:[#allocation8 + $0xe00] sm:$0xff]  ;;  %v17243_v55 = vsub.s32 4, %v17144_v43  ;;  %v14387_v56 = vcombine.low %v1034_v38, %v1038_v39  ;;  %v14380_v59 = vcombine.high %v1026_v50, %v1030_v51  ;;  %v14379_v43 = vcombine.low %v1026_v50, %v1030_v51 }
 0x264   :  { %v1150_v54 = vld [vmem:[#allocation8 + $0xe20] sm:$0xff]  ;;  %v692_v13 = vadd.f32 %v17226_v44, %v388_v58  ;;  %v851_v58 = vld [vmem:[#allocation8 + $0x4c8] sm:$0xff] }
 0x265   :  { %v14500_v60 = vcombine.high %v1146_v52, %v1150_v54  ;;  %v1018_v4 = vld [vmem:[#allocation8 + $0xa00] sm:$0xff]  ;;  %v14499_v2 = vcombine.low %v1146_v52, %v1150_v54 }
 0x266   :  { %3876 = vmatpush2.bf16.msra.mxu0 %v14427_v5  ;;  %3919 = vmatpush2.bf16.msra.mxu1 %v3754_v6  ;;  %v1022_v5 = vld [vmem:[#allocation8 + $0xa20] sm:$0xff]  ;;  %v755_v6 = vld [vmem:[#allocation8 + $0x1c8] sm:$0xff]  ;;  %v17251_v18 = vpack.c.bf16 %v692_v13, %v692_v13 }
 0x267   :  { %3877 = vmatprep.subr.bf16.mxu0 %v14420_v7  ;;  %3920 = vmatprep.subr.bf16.mxu1 %v14540_v8  ;;  %v759_v7 = vld [vmem:[#allocation8 + $0x1e8] sm:$0xff]  ;;  %v380_v8 = vrot.slane %v17194_v62, %v17243_v55  ;;  %v14372_v14 = vcombine.high %v1018_v4, %v1022_v5  ;;  %v14371_v16 = vcombine.low %v1018_v4, %v1022_v5 }
 0x268   :  { %v14110_v53 = vcombine.high %v755_v6, %v759_v7  ;;  %v14109_v17 = vcombine.low %v755_v6, %v759_v7  ;;  %v707_v7 = vld [vmem:[#allocation8 + $0x48] sm:$0xff] }
 0x269   :  { %v651_v62 = vadd.f32 %v17224_v42, %v380_v8  ;;  %v711_v8 = vld [vmem:[#allocation8 + $0x68] sm:$0xff] }
 0x26a   :  { %3878 = vmatpush2.bf16.msra.mxu0 %v14419_v61  ;;  %3921 = vmatpush2.bf16.msra.mxu1 %v14539_v63  ;;  %v747_v61 = vld [vmem:[#allocation8 + $0x188] sm:$0xff] }
 0x26b   :  { %3879 = vmatprep.subr.bf16.mxu0 %v14412_v3  ;;  %3922 = vmatprep.subr.bf16.mxu1 %v14532_v15  ;;  %v751_v63 = vld [vmem:[#allocation8 + $0x1a8] sm:$0xff]  ;;  %v17254_v32 = vpack.c.bf16 %v651_v62, %v651_v62 }
 0x26c   :  { %v883_v3 = vld [vmem:[#allocation8 + $0x5c8] sm:$0xff]  ;;  %v14102_v19 = vcombine.high %v747_v61, %v751_v63  ;;  %v14101_v26 = vcombine.low %v747_v61, %v751_v63 }
 0x26d   :  { %v887_v15 = vld [vmem:[#allocation8 + $0x5e8] sm:$0xff] }
 0x26e   :  { %3880 = vmatpush2.bf16.msra.mxu0 %v14411_v20  ;;  %3923 = vmatpush2.bf16.msra.mxu1 %v14531_v23  ;;  %v14238_v44 = vcombine.high %v883_v3, %v887_v15  ;;  %v739_v20 = vld [vmem:[#allocation8 + $0x148] sm:$0xff]  ;;  %v14237_v27 = vcombine.low %v883_v3, %v887_v15 }
 0x26f   :  { %3881 = vmatprep.subr.bf16.mxu0 %v14404_v24  ;;  %3924 = vmatprep.subr.bf16.mxu1 %v14524_v25  ;;  %v743_v23 = vld [vmem:[#allocation8 + $0x168] sm:$0xff] }
 0x270   :  { %v875_v24 = vld [vmem:[#allocation8 + $0x588] sm:$0xff]  ;;  %v14094_v42 = vcombine.high %v739_v20, %v743_v23  ;;  %v14093_v38 = vcombine.low %v739_v20, %v743_v23 }
 0x271   :  { %v879_v25 = vld [vmem:[#allocation8 + $0x5a8] sm:$0xff] }
 0x272   :  { %3882 = vmatpush2.bf16.msra.mxu0 %v14403_v34  ;;  %3925 = vmatpush2.bf16.msra.mxu1 %v14523_v35  ;;  %v14230_v34 = vcombine.high %v875_v24, %v879_v25  ;;  %v735_v35 = vld [vmem:[#allocation8 + $0x128] sm:$0xff]  ;;  %v14229_v39 = vcombine.low %v875_v24, %v879_v25 }
 0x273   :  { %3883 = vmatprep.subr.bf16.mxu0 %v14396_v36  ;;  %3926 = vmatprep.subr.bf16.mxu1 %v14516_v37  ;;  %v867_v36 = vld [vmem:[#allocation8 + $0x548] sm:$0xff]  ;;  %v14086_v40 = vcombine.high %v731_v33, %v735_v35  ;;  %v14085_v50 = vcombine.low %v731_v33, %v735_v35 }
 0x274   :  { %v871_v37 = vld [vmem:[#allocation8 + $0x568] sm:$0xff] }
 0x275   :  { %v14222_v41 = vcombine.high %v867_v36, %v871_v37  ;;  %v14221_v51 = vcombine.low %v867_v36, %v871_v37  ;;  %v699_v63 = vld [vmem:[#allocation8 + $0x8] sm:$0xff] }
 0x276   :  { %3884 = vmatpush2.bf16.msra.mxu0 %v14395_v45  ;;  %3927 = vmatpush2.bf16.msra.mxu1 %v14515_v46  ;;  %v723_v45 = vld [vmem:[#allocation8 + $0xc8] sm:$0xff] }
 0x277   :  { %3885 = vmatprep.subr.bf16.mxu0 %v14388_v48  ;;  %3928 = vmatprep.subr.bf16.mxu1 %v14508_v49  ;;  %v727_v46 = vld [vmem:[#allocation8 + $0xe8] sm:$0xff] }
 0x278   :  { %v859_v48 = vld [vmem:[#allocation8 + $0x508] sm:$0xff]  ;;  %v14078_v52 = vcombine.high %v723_v45, %v727_v46 }
 0x279   :  { %v863_v49 = vld [vmem:[#allocation8 + $0x528] sm:$0xff] }
 0x27a   :  { %3886 = vmatpush2.bf16.msra.mxu0 %v14387_v56  ;;  %3929 = vmatpush2.bf16.msra.mxu1 %v14507_v57  ;;  %v14214_v54 = vcombine.high %v859_v48, %v863_v49  ;;  %v715_v56 = vld [vmem:[#allocation8 + $0x88] sm:$0xff]  ;;  %v14213_v4 = vcombine.low %v859_v48, %v863_v49 }
 0x27b   :  { %3887 = vmatprep.subr.bf16.mxu0 %v14380_v59  ;;  %3930 = vmatprep.subr.bf16.mxu1 %v14500_v60  ;;  %v719_v57 = vld [vmem:[#allocation8 + $0xa8] sm:$0xff]  ;;  %v14077_v60 = vcombine.low %v723_v45, %v727_v46 }
 0x27c   :  { %v855_v59 = vld [vmem:[#allocation8 + $0x4e8] sm:$0xff]  ;;  %v14070_v5 = vcombine.high %v715_v56, %v719_v57  ;;  %v14069_v13 = vcombine.low %v715_v56, %v719_v57 }
 0x27d   :  { %v14206_v6 = vcombine.high %v851_v58, %v855_v59  ;;  %v703_v3 = vld [vmem:[#allocation8 + $0x28] sm:$0xff] }
 0x27e   :  { %3888 = vmatpush2.bf16.msra.mxu0 %v14379_v43  ;;  %3931 = vmatpush2.bf16.msra.mxu1 %v14499_v2  ;;  %v843_v43 = vld [vmem:[#allocation8 + $0x488] sm:$0xff] }
 0x27f   :  { %3889 = vmatprep.subr.bf16.mxu0 %v14372_v14  ;;  %3941 = vmatprep.subr.bf16.mxu1 %v14110_v53  ;;  %v847_v2 = vld [vmem:[#allocation8 + $0x4a8] sm:$0xff]  ;;  %v14205_v14 = vcombine.low %v851_v58, %v855_v59  ;;  %v14062_v53 = vcombine.high %v707_v7, %v711_v8 }
 0x280   :  { %v14198_v61 = vcombine.high %v843_v43, %v847_v2  ;;  %v835_v15 = vld [vmem:[#allocation8 + $0x448] sm:$0xff]  ;;  %v14197_v62 = vcombine.low %v843_v43, %v847_v2 }
 0x281   :  { %3933 = vmatmul.mubr.bf16.vlgmr.msra.gmra.mxu1 %v17251_v18  ;;  %v819_v20 = vld [vmem:[#allocation8 + $0x3c8] sm:$0xff] }
 0x282   :  { %3890 = vmatpush2.bf16.msra.mxu0 %v14371_v16  ;;  %3942 = vmatpush1.bf16.msra.mxu1 %v14109_v17  ;;  %v839_v16 = vld [vmem:[#allocation8 + $0x468] sm:$0xff]  ;;  %v14061_v17 = vcombine.low %v707_v7, %v711_v8 }
 0x283   :  { %3973 = vmatprep.mubr.bf16.mxu1 %v17210_v28  ;;  %3943 = vmatprep.subr.bf16.mxu1 %v14102_v19  ;;  %v14054_v19 = vcombine.high %v699_v63, %v703_v3  ;;  %v823_v23 = vld [vmem:[#allocation8 + $0x3e8] sm:$0xff] }
 0x284   :  { %3982 = vmatprep.subr.bf16.mxu0 %v14238_v44  ;;  %v14190_v44 = vcombine.high %v835_v15, %v839_v16  ;;  %v827_v24 = vld [vmem:[#allocation8 + $0x408] sm:$0xff] }
 0x285   :  { %3892 = vmatmul.mubr.bf16.vlgmr.msra.gmra.mxu0 %v17254_v32  ;;  %v831_v25 = vld [vmem:[#allocation8 + $0x428] sm:$0xff] }
 0x286   :  { %3944 = vmatpush1.bf16.msra.mxu1 %v14101_v26  ;;  %3983 = vmatpush1.bf16.msra.mxu0 %v14237_v27  ;;  %v14053_v26 = vcombine.low %v699_v63, %v703_v3  ;;  %v14189_v27 = vcombine.low %v835_v15, %v839_v16  ;;  %v14182_v33 = vcombine.high %v827_v24, %v831_v25  ;;  %v815_v35 = vld [vmem:[#allocation8 + $0x3a8] sm:$0xff] }
 0x287   :  { %4014 = vmatprep.mubr.bf16.mxu0 %v17212_v29  ;;  %3945 = vmatprep.subr.bf16.mxu1 %v14094_v42  ;;  %v14174_v42 = vcombine.high %v819_v20, %v823_v23  ;;  %v947_v36 = vld [vmem:[#allocation8 + $0x7c8] sm:$0xff] }
 0x288   :  { %3984 = vmatprep.subr.bf16.mxu0 %v14230_v34  ;;  %v811_v34 = vld [vmem:[#allocation8 + $0x388] sm:$0xff] }
 0x289   :  { %v951_v37 = vld [vmem:[#allocation8 + $0x7e8] sm:$0xff] }
 0x28a   :  { %3946 = vmatpush1.bf16.msra.mxu1 %v14093_v38  ;;  %3985 = vmatpush1.bf16.msra.mxu0 %v14229_v39  ;;  %v14173_v38 = vcombine.low %v819_v20, %v823_v23  ;;  %v14181_v39 = vcombine.low %v827_v24, %v831_v25  ;;  %v803_v45 = vld [vmem:[#allocation8 + $0x348] sm:$0xff] }
 0x28b   :  { %3947 = vmatprep.subr.bf16.mxu1 %v14086_v40  ;;  %3986 = vmatprep.subr.bf16.mxu0 %v14222_v41  ;;  %v14166_v40 = vcombine.high %v811_v34, %v815_v35  ;;  %v14302_v41 = vcombine.high %v947_v36, %v951_v37  ;;  %v807_v46 = vld [vmem:[#allocation8 + $0x368] sm:$0xff] }
 0x28c   :  { %v939_v48 = vld [vmem:[#allocation8 + $0x788] sm:$0xff] }
 0x28d   :  { %v943_v49 = vld [vmem:[#allocation8 + $0x7a8] sm:$0xff] }
 0x28e   :  { %3948 = vmatpush1.bf16.msra.mxu1 %v14085_v50  ;;  %3987 = vmatpush1.bf16.msra.mxu0 %v14221_v51  ;;  %v14165_v50 = vcombine.low %v811_v34, %v815_v35  ;;  %v14301_v51 = vcombine.low %v947_v36, %v951_v37  ;;  %v795_v56 = vld [vmem:[#allocation8 + $0x308] sm:$0xff] }
 0x28f   :  { %3949 = vmatprep.subr.bf16.mxu1 %v14078_v52  ;;  %3988 = vmatprep.subr.bf16.mxu0 %v14214_v54  ;;  %v14158_v52 = vcombine.high %v803_v45, %v807_v46  ;;  %v14294_v54 = vcombine.high %v939_v48, %v943_v49  ;;  %v799_v57 = vld [vmem:[#allocation8 + $0x328] sm:$0xff] }
 0x290   :  { %v931_v58 = vld [vmem:[#allocation8 + $0x748] sm:$0xff] }
 0x291   :  { %v935_v59 = vld [vmem:[#allocation8 + $0x768] sm:$0xff] }
 0x292   :  { %3950 = vmatpush1.bf16.msra.mxu1 %v14077_v60  ;;  %3989 = vmatpush1.bf16.msra.mxu0 %v14213_v4  ;;  %v14157_v60 = vcombine.low %v803_v45, %v807_v46  ;;  %v14293_v4 = vcombine.low %v939_v48, %v943_v49  ;;  %v787_v7 = vld [vmem:[#allocation8 + $0x2c8] sm:$0xff] }
 0x293   :  { %3951 = vmatprep.subr.bf16.mxu1 %v14070_v5  ;;  %3990 = vmatprep.subr.bf16.mxu0 %v14206_v6  ;;  %v14150_v5 = vcombine.high %v795_v56, %v799_v57  ;;  %v14286_v6 = vcombine.high %v931_v58, %v935_v59  ;;  %v791_v8 = vld [vmem:[#allocation8 + $0x2e8] sm:$0xff] }
 0x294   :  { %v923_v43 = vld [vmem:[#allocation8 + $0x708] sm:$0xff] }
 0x295   :  { %v927_v2 = vld [vmem:[#allocation8 + $0x728] sm:$0xff] }
 0x296   :  { %3952 = vmatpush1.bf16.msra.mxu1 %v14069_v13  ;;  %3991 = vmatpush1.bf16.msra.mxu0 %v14205_v14  ;;  %v14149_v13 = vcombine.low %v795_v56, %v799_v57  ;;  %v14285_v14 = vcombine.low %v931_v58, %v935_v59  ;;  %v779_v63 = vld [vmem:[#allocation8 + $0x288] sm:$0xff] }
 0x297   :  { %3953 = vmatprep.subr.bf16.mxu1 %v14062_v53  ;;  %3992 = vmatprep.subr.bf16.mxu0 %v14198_v61  ;;  %v14142_v53 = vcombine.high %v787_v7, %v791_v8  ;;  %v14278_v61 = vcombine.high %v923_v43, %v927_v2  ;;  %v783_v3 = vld [vmem:[#allocation8 + $0x2a8] sm:$0xff] }
 0x298   :  { %v915_v15 = vld [vmem:[#allocation8 + $0x6c8] sm:$0xff] }
 0x299   :  { %v919_v16 = vld [vmem:[#allocation8 + $0x6e8] sm:$0xff] }
 0x29a   :  { %3954 = vmatpush1.bf16.msra.mxu1 %v14061_v17  ;;  %3993 = vmatpush1.bf16.msra.mxu0 %v14197_v62  ;;  %v14141_v17 = vcombine.low %v787_v7, %v791_v8  ;;  %v14277_v62 = vcombine.low %v923_v43, %v927_v2  ;;  %v771_v20 = vld [vmem:[#allocation8 + $0x248] sm:$0xff] }
 0x29b   :  { %3955 = vmatprep.subr.bf16.mxu1 %v14054_v19  ;;  %3994 = vmatprep.subr.bf16.mxu0 %v14190_v44  ;;  %v14134_v19 = vcombine.high %v779_v63, %v783_v3  ;;  %v14270_v44 = vcombine.high %v915_v15, %v919_v16  ;;  %v775_v23 = vld [vmem:[#allocation8 + $0x268] sm:$0xff] }
 0x29c   :  { %v907_v24 = vld [vmem:[#allocation8 + $0x688] sm:$0xff] }
 0x29d   :  { %v911_v25 = vld [vmem:[#allocation8 + $0x6a8] sm:$0xff] }
 0x29e   :  { %3956 = vmatpush1.bf16.msra.mxu1 %v14053_v26  ;;  %3995 = vmatpush1.bf16.msra.mxu0 %v14189_v27  ;;  %v14133_v26 = vcombine.low %v779_v63, %v783_v3  ;;  %v14269_v27 = vcombine.low %v915_v15, %v919_v16  ;;  %v763_v34 = vld [vmem:[#allocation8 + $0x208] sm:$0xff] }
 0x29f   :  { %3957 = vmatprep.subr.bf16.mxu1 %v14174_v42  ;;  %3996 = vmatprep.subr.bf16.mxu0 %v14182_v33  ;;  %v14126_v42 = vcombine.high %v771_v20, %v775_v23  ;;  %v14262_v33 = vcombine.high %v907_v24, %v911_v25  ;;  %v767_v35 = vld [vmem:[#allocation8 + $0x228] sm:$0xff] }
 0x2a0   :  { %v899_v36 = vld [vmem:[#allocation8 + $0x648] sm:$0xff] }
 0x2a1   :  { %v903_v37 = vld [vmem:[#allocation8 + $0x668] sm:$0xff] }
 0x2a2   :  { %3958 = vmatpush2.bf16.msra.mxu1 %v14173_v38  ;;  %3997 = vmatpush1.bf16.msra.mxu0 %v14181_v39  ;;  %v14125_v38 = vcombine.low %v771_v20, %v775_v23  ;;  %v14261_v39 = vcombine.low %v907_v24, %v911_v25  ;;  %v891_v45 = vld [vmem:[#allocation8 + $0x608] sm:$0xff] }
 0x2a3   :  { %3959 = vmatprep.subr.bf16.mxu1 %v14166_v40  ;;  %3998 = vmatprep.subr.bf16.mxu0 %v14302_v41  ;;  %v14118_v40 = vcombine.high %v763_v34, %v767_v35  ;;  %v14254_v41 = vcombine.high %v899_v36, %v903_v37  ;;  %v895_v46 = vld [vmem:[#allocation8 + $0x628] sm:$0xff] }
 0x2a4   :  { %v1011_v48 = vld [vmem:[#allocation8 + $0x9c8] sm:$0xff] }
 0x2a5   :  { %v1015_v49 = vld [vmem:[#allocation8 + $0x9e8] sm:$0xff] }
 0x2a6   :  { %3960 = vmatpush2.bf16.msra.mxu1 %v14165_v50  ;;  %3999 = vmatpush2.bf16.msra.mxu0 %v14301_v51  ;;  %v14117_v50 = vcombine.low %v763_v34, %v767_v35  ;;  %v14253_v51 = vcombine.low %v899_v36, %v903_v37  ;;  %v1003_v56 = vld [vmem:[#allocation8 + $0x988] sm:$0xff] }
 0x2a7   :  { %3961 = vmatprep.subr.bf16.mxu1 %v14158_v52  ;;  %4000 = vmatprep.subr.bf16.mxu0 %v14294_v54  ;;  %v14246_v52 = vcombine.high %v891_v45, %v895_v46  ;;  %v14366_v54 = vcombine.high %v1011_v48, %v1015_v49  ;;  %v1007_v57 = vld [vmem:[#allocation8 + $0x9a8] sm:$0xff] }
 0x2a8   :  { %v1139_v58 = vld [vmem:[#allocation8 + $0xdc8] sm:$0xff] }
 0x2a9   :  { %v1143_v59 = vld [vmem:[#allocation8 + $0xde8] sm:$0xff] }
 0x2aa   :  { %3962 = vmatpush2.bf16.msra.mxu1 %v14157_v60  ;;  %4001 = vmatpush2.bf16.msra.mxu0 %v14293_v4  ;;  %v14245_v60 = vcombine.low %v891_v45, %v895_v46  ;;  %v14365_v4 = vcombine.low %v1011_v48, %v1015_v49  ;;  %v995_v7 = vld [vmem:[#allocation8 + $0x948] sm:$0xff] }
 0x2ab   :  { %3963 = vmatprep.subr.bf16.mxu1 %v14150_v5  ;;  %4002 = vmatprep.subr.bf16.mxu0 %v14286_v6  ;;  %v14358_v5 = vcombine.high %v1003_v56, %v1007_v57  ;;  %v14494_v6 = vcombine.high %v1139_v58, %v1143_v59  ;;  %v999_v8 = vld [vmem:[#allocation8 + $0x968] sm:$0xff] }
 0x2ac   :  { %v1131_v43 = vld [vmem:[#allocation8 + $0xd88] sm:$0xff] }
 0x2ad   :  { %v1135_v2 = vld [vmem:[#allocation8 + $0xda8] sm:$0xff] }
 0x2ae   :  { %3964 = vmatpush2.bf16.msra.mxu1 %v14149_v13  ;;  %4003 = vmatpush2.bf16.msra.mxu0 %v14285_v14  ;;  %v14357_v13 = vcombine.low %v1003_v56, %v1007_v57  ;;  %v14493_v14 = vcombine.low %v1139_v58, %v1143_v59  ;;  %v14486_v63 = vcombine.high %v1131_v43, %v1135_v2  ;;  %v991_v3 = vld [vmem:[#allocation8 + $0x928] sm:$0xff] }
 0x2af   :  { %3965 = vmatprep.subr.bf16.mxu1 %v14142_v53  ;;  %4004 = vmatprep.subr.bf16.mxu0 %v14278_v61  ;;  %v14350_v53 = vcombine.high %v995_v7, %v999_v8  ;;  %v987_v61 = vld [vmem:[#allocation8 + $0x908] sm:$0xff] }
 0x2b0   :  { %v1123_v15 = vld [vmem:[#allocation8 + $0xd48] sm:$0xff] }
 0x2b1   :  { %v1127_v16 = vld [vmem:[#allocation8 + $0xd68] sm:$0xff] }
 0x2b2   :  { %3966 = vmatpush2.bf16.msra.mxu1 %v14141_v17  ;;  %4005 = vmatpush2.bf16.msra.mxu0 %v14277_v62  ;;  %v14349_v17 = vcombine.low %v995_v7, %v999_v8  ;;  %v14485_v62 = vcombine.low %v1131_v43, %v1135_v2  ;;  %v979_v20 = vld [vmem:[#allocation8 + $0x8c8] sm:$0xff] }
 0x2b3   :  { %3967 = vmatprep.subr.bf16.mxu1 %v14134_v19  ;;  %4006 = vmatprep.subr.bf16.mxu0 %v14270_v44  ;;  %v14342_v19 = vcombine.high %v987_v61, %v991_v3  ;;  %v14478_v44 = vcombine.high %v1123_v15, %v1127_v16  ;;  %v983_v23 = vld [vmem:[#allocation8 + $0x8e8] sm:$0xff] }
 0x2b4   :  { %v1115_v24 = vld [vmem:[#allocation8 + $0xd08] sm:$0xff] }
 0x2b5   :  { %v1119_v25 = vld [vmem:[#allocation8 + $0xd28] sm:$0xff] }
 0x2b6   :  { %3968 = vmatpush2.bf16.msra.mxu1 %v14133_v26  ;;  %4007 = vmatpush2.bf16.msra.mxu0 %v14269_v27  ;;  %v14341_v26 = vcombine.low %v987_v61, %v991_v3  ;;  %v14477_v27 = vcombine.low %v1123_v15, %v1127_v16  ;;  %v971_v34 = vld [vmem:[#allocation8 + $0x888] sm:$0xff] }
 0x2b7   :  { %3969 = vmatprep.subr.bf16.mxu1 %v14126_v42  ;;  %4008 = vmatprep.subr.bf16.mxu0 %v14262_v33  ;;  %v14334_v42 = vcombine.high %v979_v20, %v983_v23  ;;  %v14470_v33 = vcombine.high %v1115_v24, %v1119_v25  ;;  %v975_v35 = vld [vmem:[#allocation8 + $0x8a8] sm:$0xff] }
 0x2b8   :  { %v1107_v36 = vld [vmem:[#allocation8 + $0xcc8] sm:$0xff] }
 0x2b9   :  { %v1111_v37 = vld [vmem:[#allocation8 + $0xce8] sm:$0xff] }
 0x2ba   :  { %3970 = vmatpush2.bf16.msra.mxu1 %v14125_v38  ;;  %4009 = vmatpush2.bf16.msra.mxu0 %v14261_v39  ;;  %v14333_v38 = vcombine.low %v979_v20, %v983_v23  ;;  %v14469_v39 = vcombine.low %v1115_v24, %v1119_v25  ;;  %v963_v45 = vld [vmem:[#allocation8 + $0x848] sm:$0xff] }
 0x2bb   :  { %3971 = vmatprep.subr.bf16.mxu1 %v14118_v40  ;;  %4010 = vmatprep.subr.bf16.mxu0 %v14254_v41  ;;  %v14326_v40 = vcombine.high %v971_v34, %v975_v35  ;;  %v14462_v41 = vcombine.high %v1107_v36, %v1111_v37  ;;  %v967_v46 = vld [vmem:[#allocation8 + $0x868] sm:$0xff] }
 0x2bc   :  { %v1099_v48 = vld [vmem:[#allocation8 + $0xc88] sm:$0xff] }
 0x2bd   :  { %v1103_v49 = vld [vmem:[#allocation8 + $0xca8] sm:$0xff] }
 0x2be   :  { %3972 = vmatpush2.bf16.msra.mxu1 %v14117_v50  ;;  %4011 = vmatpush2.bf16.msra.mxu0 %v14253_v51  ;;  %v14325_v50 = vcombine.low %v971_v34, %v975_v35  ;;  %v14461_v51 = vcombine.low %v1107_v36, %v1111_v37  ;;  %v955_v56 = vld [vmem:[#allocation8 + $0x808] sm:$0xff] }
 0x2bf   :  { %4012 = vmatprep.subr.bf16.mxu0 %v14246_v52  ;;  %4023 = vmatprep.subr.bf16.mxu1 %v14366_v54  ;;  %v14318_v52 = vcombine.high %v963_v45, %v967_v46  ;;  %v14454_v54 = vcombine.high %v1099_v48, %v1103_v49  ;;  %v959_v57 = vld [vmem:[#allocation8 + $0x828] sm:$0xff] }
 0x2c0   :  { %v1091_v58 = vld [vmem:[#allocation8 + $0xc48] sm:$0xff] }
 0x2c1   :  { %3974 = vmatmul.mubr.bf16.vlgmr.msra.gmra.mxu1 %v17214_v30  ;;  %v1095_v59 = vld [vmem:[#allocation8 + $0xc68] sm:$0xff] }
 0x2c2   :  { %4013 = vmatpush2.bf16.msra.mxu0 %v14245_v60  ;;  %4024 = vmatpush1.bf16.msra.mxu1 %v14365_v4  ;;  %v14317_v60 = vcombine.low %v963_v45, %v967_v46  ;;  %v14453_v4 = vcombine.low %v1099_v48, %v1103_v49  ;;  %v1075_v7 = vld [vmem:[#allocation8 + $0xbc8] sm:$0xff] }
 0x2c3   :  { %4055 = vmatprep.mubr.bf16.mxu1 %v17230_v0  ;;  %4025 = vmatprep.subr.bf16.mxu1 %v14358_v5  ;;  %v14310_v5 = vcombine.high %v955_v56, %v959_v57  ;;  %v1079_v8 = vld [vmem:[#allocation8 + $0xbe8] sm:$0xff] }
 0x2c4   :  { %4064 = vmatprep.subr.bf16.mxu0 %v14494_v6  ;;  %v14446_v6 = vcombine.high %v1091_v58, %v1095_v59  ;;  %v1083_v43 = vld [vmem:[#allocation8 + $0xc08] sm:$0xff]  ;;  %v14429_v16 = vcombine.low %v1075_v7, %v1079_v8 }
 0x2c5   :  { %4015 = vmatmul.mubr.bf16.vlgmr.msra.gmra.mxu0 %v17216_v31  ;;  %v1087_v2 = vld [vmem:[#allocation8 + $0xc28] sm:$0xff] }
 0x2c6   :  { %4026 = vmatpush1.bf16.msra.mxu1 %v14357_v13  ;;  %4065 = vmatpush1.bf16.msra.mxu0 %v14493_v14  ;;  %v14309_v13 = vcombine.low %v955_v56, %v959_v57  ;;  %v14445_v14 = vcombine.low %v1091_v58, %v1095_v59  ;;  %v14438_v61 = vcombine.high %v1083_v43, %v1087_v2  ;;  %v1071_v3 = vld [vmem:[#allocation8 + $0xba8] sm:$0xff] }
 0x2c7   :  { %14558 = vmatprep.mubr.msk.bf16.mxu0 %vm3748_vm11, %v17232_v1  ;;  %4027 = vmatprep.subr.bf16.mxu1 %v14350_v53  ;;  %v14430_v53 = vcombine.high %v1075_v7, %v1079_v8  ;;  %v1195_v15 = vld [vmem:[#allocation8 + $0xf88] sm:$0xff] }
 0x2c8   :  { %4066 = vmatprep.subr.bf16.mxu0 %v14486_v63  ;;  %v1067_v63 = vld [vmem:[#allocation8 + $0xb88] sm:$0xff] }
 0x2c9   :  { %v1059_v20 = vld [vmem:[#allocation8 + $0xb48] sm:$0xff] }
 0x2ca   :  { %4028 = vmatpush1.bf16.msra.mxu1 %v14349_v17  ;;  %4067 = vmatpush1.bf16.msra.mxu0 %v14485_v62  ;;  %v14437_v17 = vcombine.low %v1083_v43, %v1087_v2  ;;  %v14422_v62 = vcombine.high %v1067_v63, %v1071_v3  ;;  %v1063_v23 = vld [vmem:[#allocation8 + $0xb68] sm:$0xff] }
 0x2cb   :  { %4029 = vmatprep.subr.bf16.mxu1 %v14342_v19  ;;  %4068 = vmatprep.subr.bf16.mxu0 %v14478_v44  ;;  %v14550_v19 = vcombine.high %v1195_v15, %v1195_v15  ;;  %v14549_v44 = vcombine.low %v1195_v15, %v1195_v15  ;;  %v1187_v24 = vld [vmem:[#allocation8 + $0xf48] sm:$0xff] }
 0x2cc   :  { %v1191_v25 = vld [vmem:[#allocation8 + $0xf68] sm:$0xff] }
 0x2cd   :  { %v1051_v34 = vld [vmem:[#allocation8 + $0xb08] sm:$0xff] }
 0x2ce   :  { %4030 = vmatpush1.bf16.msra.mxu1 %v14341_v26  ;;  %4069 = vmatpush1.bf16.msra.mxu0 %v14477_v27  ;;  %v14421_v26 = vcombine.low %v1067_v63, %v1071_v3  ;;  %v3760_v27 = vsel %vm3752_vm12, %v14549_v44, 0  ;;  %v1055_v35 = vld [vmem:[#allocation8 + $0xb28] sm:$0xff] }
 0x2cf   :  { %4031 = vmatprep.subr.bf16.mxu1 %v14334_v42  ;;  %4070 = vmatprep.subr.bf16.mxu0 %v14470_v33  ;;  %v14414_v42 = vcombine.high %v1059_v20, %v1063_v23  ;;  %v14542_v33 = vcombine.high %v1187_v24, %v1191_v25  ;;  %v1179_v36 = vld [vmem:[#allocation8 + $0xf08] sm:$0xff] }
 0x2d0   :  { %v1183_v37 = vld [vmem:[#allocation8 + $0xf28] sm:$0xff] }
 0x2d1   :  { %v1043_v45 = vld [vmem:[#allocation8 + $0xac8] sm:$0xff] }
 0x2d2   :  { %4032 = vmatpush1.bf16.msra.mxu1 %v14333_v38  ;;  %4071 = vmatpush1.bf16.msra.mxu0 %v14469_v39  ;;  %v14413_v38 = vcombine.low %v1059_v20, %v1063_v23  ;;  %v14541_v39 = vcombine.low %v1187_v24, %v1191_v25  ;;  %v1047_v46 = vld [vmem:[#allocation8 + $0xae8] sm:$0xff]  ;;  %v756_v20 = vld [vmem:[#allocation8 + $0x1d0] sm:$0xff] }
 0x2d3   :  { %4033 = vmatprep.subr.bf16.mxu1 %v14326_v40  ;;  %4072 = vmatprep.subr.bf16.mxu0 %v14462_v41  ;;  %v14406_v40 = vcombine.high %v1051_v34, %v1055_v35  ;;  %v14534_v41 = vcombine.high %v1179_v36, %v1183_v37  ;;  %v1171_v48 = vld [vmem:[#allocation8 + $0xec8] sm:$0xff]  ;;  %v760_v23 = vld [vmem:[#allocation8 + $0x1f0] sm:$0xff] }
 0x2d4   :  { %v1175_v49 = vld [vmem:[#allocation8 + $0xee8] sm:$0xff]  ;;  %v884_v24 = vld [vmem:[#allocation8 + $0x5d0] sm:$0xff] }
 0x2d5   :  { %v1035_v56 = vld [vmem:[#allocation8 + $0xa88] sm:$0xff]  ;;  %v888_v25 = vld [vmem:[#allocation8 + $0x5f0] sm:$0xff] }
 0x2d6   :  { %4034 = vmatpush1.bf16.msra.mxu1 %v14325_v50  ;;  %4073 = vmatpush1.bf16.msra.mxu0 %v14461_v51  ;;  %v14405_v50 = vcombine.low %v1051_v34, %v1055_v35  ;;  %v14533_v51 = vcombine.low %v1179_v36, %v1183_v37  ;;  %v1039_v57 = vld [vmem:[#allocation8 + $0xaa8] sm:$0xff]  ;;  %v748_v34 = vld [vmem:[#allocation8 + $0x190] sm:$0xff] }
 0x2d7   :  { %4035 = vmatprep.subr.bf16.mxu1 %v14318_v52  ;;  %4074 = vmatprep.subr.bf16.mxu0 %v14454_v54  ;;  %v14398_v52 = vcombine.high %v1043_v45, %v1047_v46  ;;  %v14526_v54 = vcombine.high %v1171_v48, %v1175_v49  ;;  %v1163_v58 = vld [vmem:[#allocation8 + $0xe88] sm:$0xff]  ;;  %v752_v35 = vld [vmem:[#allocation8 + $0x1b0] sm:$0xff] }
 0x2d8   :  { %v1167_v59 = vld [vmem:[#allocation8 + $0xea8] sm:$0xff]  ;;  %v876_v36 = vld [vmem:[#allocation8 + $0x590] sm:$0xff] }
 0x2d9   :  { %v1027_v7 = vld [vmem:[#allocation8 + $0xa48] sm:$0xff]  ;;  %v880_v37 = vld [vmem:[#allocation8 + $0x5b0] sm:$0xff] }
 0x2da   :  { %4036 = vmatpush1.bf16.msra.mxu1 %v14317_v60  ;;  %4075 = vmatpush1.bf16.msra.mxu0 %v14453_v4  ;;  %v14397_v60 = vcombine.low %v1043_v45, %v1047_v46  ;;  %v14525_v4 = vcombine.low %v1171_v48, %v1175_v49  ;;  %v1031_v8 = vld [vmem:[#allocation8 + $0xa68] sm:$0xff]  ;;  %v14232_v45 = vcombine.high %v876_v36, %v880_v37  ;;  %v740_v46 = vld [vmem:[#allocation8 + $0x150] sm:$0xff] }
 0x2db   :  { %4037 = vmatprep.subr.bf16.mxu1 %v14310_v5  ;;  %4076 = vmatprep.subr.bf16.mxu0 %v14446_v6  ;;  %v14390_v5 = vcombine.high %v1035_v56, %v1039_v57  ;;  %v14518_v6 = vcombine.high %v1163_v58, %v1167_v59  ;;  %v1155_v43 = vld [vmem:[#allocation8 + $0xe48] sm:$0xff]  ;;  %v744_v48 = vld [vmem:[#allocation8 + $0x170] sm:$0xff] }
 0x2dc   :  { %v1159_v2 = vld [vmem:[#allocation8 + $0xe68] sm:$0xff]  ;;  %v868_v49 = vld [vmem:[#allocation8 + $0x550] sm:$0xff] }
 0x2dd   :  { %v1019_v63 = vld [vmem:[#allocation8 + $0xa08] sm:$0xff] }
 0x2de   :  { %4038 = vmatpush1.bf16.msra.mxu1 %v14309_v13  ;;  %4077 = vmatpush1.bf16.msra.mxu0 %v14445_v14  ;;  %v14389_v13 = vcombine.low %v1035_v56, %v1039_v57  ;;  %v14517_v14 = vcombine.low %v1163_v58, %v1167_v59  ;;  %v1023_v3 = vld [vmem:[#allocation8 + $0xa28] sm:$0xff]  ;;  %v14096_v56 = vcombine.high %v740_v46, %v744_v48  ;;  %v732_v59 = vld [vmem:[#allocation8 + $0x110] sm:$0xff] }
 0x2df   :  { %4039 = vmatprep.subr.bf16.mxu1 %v14430_v53  ;;  %4078 = vmatprep.subr.bf16.mxu0 %v14438_v61  ;;  %v14382_v53 = vcombine.high %v1027_v7, %v1031_v8  ;;  %v14510_v61 = vcombine.high %v1155_v43, %v1159_v2  ;;  %v1147_v15 = vld [vmem:[#allocation8 + $0xe08] sm:$0xff] }
 0x2e2   :  { %4040 = vmatpush2.bf16.msra.mxu1 %v14429_v16  ;;  %4079 = vmatpush1.bf16.msra.mxu0 %v14437_v17  ;;  %v1151_v16 = vld [vmem:[#allocation8 + $0xe28] sm:$0xff]  ;;  %v14381_v17 = vcombine.low %v1027_v7, %v1031_v8  ;;  %v864_v7 = vld [vmem:[#allocation8 + $0x530] sm:$0xff] }
 0x2e3   :  { %4041 = vmatprep.subr.bf16.mxu1 %v14422_v62  ;;  %14557 = vmatprep.subr.msk.bf16.mxu0 %vm3752_vm12, %v14550_v19  ;;  %v14509_v62 = vcombine.low %v1155_v43, %v1159_v2  ;;  %v14374_v19 = vcombine.high %v1019_v63, %v1023_v3  ;;  %v14502_v44 = vcombine.high %v1147_v15, %v1151_v16 }
 0x2e4   :  { %v14095_v43 = vcombine.low %v740_v46, %v744_v48  ;;  %v712_v46 = vld [vmem:[#allocation8 + $0x70] sm:$0xff] }
 0x2e5   :  { %v836_v48 = vld [vmem:[#allocation8 + $0x450] sm:$0xff] }
 0x2e6   :  { %4042 = vmatpush2.bf16.msra.mxu1 %v14421_v26  ;;  %4083 = vmatpush2.bf16.msra.mxu0 %v3760_v27  ;;  %v14373_v26 = vcombine.low %v1019_v63, %v1023_v3  ;;  %v14501_v27 = vcombine.low %v1147_v15, %v1151_v16  ;;  %v724_v15 = vld [vmem:[#allocation8 + $0xd0] sm:$0xff] }
 0x2e7   :  { %4043 = vmatprep.subr.bf16.mxu1 %v14414_v42  ;;  %4084 = vmatprep.subr.bf16.mxu0 %v14542_v33  ;;  %v14112_v42 = vcombine.high %v756_v20, %v760_v23  ;;  %v14240_v33 = vcombine.high %v884_v24, %v888_v25  ;;  %v728_v16 = vld [vmem:[#allocation8 + $0xf0] sm:$0xff] }
 0x2ea   :  { %4044 = vmatpush2.bf16.msra.mxu1 %v14413_v38  ;;  %4085 = vmatpush2.bf16.msra.mxu0 %v14541_v39  ;;  %v14111_v38 = vcombine.low %v756_v20, %v760_v23  ;;  %v14239_v39 = vcombine.low %v884_v24, %v888_v25 }
 0x2eb   :  { %4045 = vmatprep.subr.bf16.mxu1 %v14406_v40  ;;  %4086 = vmatprep.subr.bf16.mxu0 %v14534_v41  ;;  %v17266_v40 = vld [vmem:[#allocation10] sm:$0xff]  ;;  %v14104_v41 = vcombine.high %v748_v34, %v752_v35 }
 0x2ec   :  { %v1215_v57 = vrot.slane %v17266_v40, %v17189_v11 }
 0x2ee   :  { %4046 = vmatpush2.bf16.msra.mxu1 %v14405_v50  ;;  %4087 = vmatpush2.bf16.msra.mxu0 %v14533_v51  ;;  %v872_v50 = vld [vmem:[#allocation8 + $0x570] sm:$0xff]  ;;  %v14103_v51 = vcombine.low %v748_v34, %v752_v35 }
 0x2ef   :  { %4047 = vmatprep.subr.bf16.mxu1 %v14398_v52  ;;  %4088 = vmatprep.subr.bf16.mxu0 %v14526_v54  ;;  %v1211_v52 = vrot.slane %v17266_v40, %v17183_v9  ;;  %v14231_v54 = vcombine.low %v876_v36, %v880_v37  ;;  %v14224_v58 = vcombine.high %v868_v49, %v872_v50  ;;  %v720_v34 = vld [vmem:[#allocation8 + $0xb0] sm:$0xff] }
 0x2f0   :  { %v844_v35 = vld [vmem:[#allocation8 + $0x490] sm:$0xff]  ;;  %v14079_v37 = vcombine.low %v724_v15, %v728_v16 }
 0x2f1   :  { %v848_v36 = vld [vmem:[#allocation8 + $0x4b0] sm:$0xff] }
 0x2f2   :  { %4048 = vmatpush2.bf16.msra.mxu1 %v14397_v60  ;;  %4089 = vmatpush2.bf16.msra.mxu0 %v14525_v4  ;;  %v736_v60 = vld [vmem:[#allocation8 + $0x130] sm:$0xff] }
 0x2f3   :  { %4049 = vmatprep.subr.bf16.mxu1 %v14390_v5  ;;  %4090 = vmatprep.subr.bf16.mxu0 %v14518_v6  ;;  %v860_v6 = vld [vmem:[#allocation8 + $0x510] sm:$0xff]  ;;  %v14087_v23 = vcombine.low %v732_v59, %v736_v60 }
 0x2f4   :  { %v14216_v3 = vcombine.high %v860_v6, %v864_v7 }
 0x2f6   :  { %4050 = vmatpush2.bf16.msra.mxu1 %v14389_v13  ;;  %4091 = vmatpush2.bf16.msra.mxu0 %v14517_v14  ;;  %v14223_v14 = vcombine.low %v868_v49, %v872_v50  ;;  %v840_v49 = vld [vmem:[#allocation8 + $0x470] sm:$0xff] }
 0x2f7   :  { %4051 = vmatprep.subr.bf16.mxu1 %v14382_v53  ;;  %4092 = vmatprep.subr.bf16.mxu0 %v14510_v61  ;;  %v14088_v53 = vcombine.high %v732_v59, %v736_v60  ;;  %v832_v59 = vld [vmem:[#allocation8 + $0x430] sm:$0xff] }
 0x2fa   :  { %4052 = vmatpush2.bf16.msra.mxu1 %v14381_v17  ;;  %4093 = vmatpush2.bf16.msra.mxu0 %v14509_v62 }
 0x2fb   :  { %4053 = vmatprep.subr.bf16.mxu1 %v14374_v19  ;;  %4094 = vmatprep.subr.bf16.mxu0 %v14502_v44  ;;  %v852_v19 = vld [vmem:[#allocation8 + $0x4d0] sm:$0xff] }
 0x2fc   :  { %v856_v44 = vld [vmem:[#allocation8 + $0x4f0] sm:$0xff] }
 0x2fe   :  { %4054 = vmatpush2.bf16.msra.mxu1 %v14373_v26  ;;  %4095 = vmatpush2.bf16.msra.mxu0 %v14501_v27  ;;  %v14215_v26 = vcombine.low %v860_v6, %v864_v7  ;;  %v14080_v27 = vcombine.high %v724_v15, %v728_v16  ;;  %v820_v7 = vld [vmem:[#allocation8 + $0x3d0] sm:$0xff] }
 0x2ff   :  { %4105 = vmatprep.subr.bf16.mxu0 %v14112_v42  ;;  %4146 = vmatprep.subr.bf16.mxu1 %v14240_v33  ;;  %v14208_v42 = vcombine.high %v852_v19, %v856_v44  ;;  %v716_v33 = vld [vmem:[#allocation8 + $0x90] sm:$0xff] }
 0x300   :  { %v14071_v50 = vcombine.low %v716_v33, %v720_v34  ;;  %v816_v15 = vld [vmem:[#allocation8 + $0x3b0] sm:$0xff] }
 0x301   :  { %4056 = vmatmul.mubr.bf16.vlgmr.msra.gmra.mxu1 %v17254_v32  ;;  %4097 = vmatmul.mubr.bf16.vlgmr.msra.gmra.mxu0 %v17251_v18  ;;  %v940_v16 = vld [vmem:[#allocation8 + $0x790] sm:$0xff] }
 0x302   :  { %4106 = vmatpush1.bf16.msra.mxu0 %v14111_v38  ;;  %4137 = vmatprep.mubr.bf16.mxu0 %v17210_v28  ;;  %v14207_v38 = vcombine.low %v852_v19, %v856_v44 }
 0x303   :  { %4147 = vmatpush1.bf16.msra.mxu1 %v14239_v39  ;;  %4178 = vmatprep.mubr.bf16.mxu1 %v17212_v29  ;;  %v14072_v39 = vcombine.high %v716_v33, %v720_v34 }
 0x304   :  { %4107 = vmatprep.subr.bf16.mxu0 %v14104_v41  ;;  %4148 = vmatprep.subr.bf16.mxu1 %v14232_v45  ;;  %v14200_v41 = vcombine.high %v844_v35, %v848_v36  ;;  %v708_v45 = vld [vmem:[#allocation8 + $0x50] sm:$0xff] }
 0x305   :  { %v3811_v4 = vpop.f32.mrf.mxu0  ;;  %v3852_v5 = vpop.f32.mrf.mxu1  ;;  %v14063_v60 = vcombine.low %v708_v45, %v712_v46 }
 0x306   :  { %v3812_v8 = vadd.f32 %v3811_v4, %v1211_v52  ;;  %4108 = vmatpush1.bf16.msra.mxu0 %v14103_v51  ;;  %v14199_v51 = vcombine.low %v844_v35, %v848_v36  ;;  %v14064_v52 = vcombine.high %v708_v45, %v712_v46  ;;  %v14191_v4 = vcombine.low %v836_v48, %v840_v49  ;;  %v796_v36 = vld [vmem:[#allocation8 + $0x310] sm:$0xff] }
 0x307   :  { %4149 = vmatpush1.bf16.msra.mxu1 %v14231_v54  ;;  %v3813_v2 = vpop.f32.mrf.mxu0  ;;  %v3854_v13 = vpop.f32.mrf.mxu1  ;;  %4109 = vmatprep.subr.bf16.mxu0 %v14096_v56  ;;  %v14192_v54 = vcombine.high %v836_v48, %v840_v49  ;;  %v700_v56 = vld [vmem:[#allocation8 + $0x10] sm:$0xff] }
 0x308   :  { %v17276_v61 = vadd.f32 %v3852_v5, %v3812_v8  ;;  %v3814_v63 = vadd.f32 %v3813_v2, %v1215_v57  ;;  %4150 = vmatprep.subr.bf16.mxu1 %v14224_v58  ;;  %v704_v57 = vld [vmem:[#allocation8 + $0x30] sm:$0xff] }
 0x309   :  { %v3815_v17 = vpop.f32.mrf.mxu0  ;;  %v3856_v62 = vpop.f32.mrf.mxu1  ;;  %v828_v58 = vld [vmem:[#allocation8 + $0x410] sm:$0xff]  ;;  %v14056_v5 = vcombine.high %v700_v56, %v704_v57 }
 0x30a   :  { %v17278_v20 = vadd.f32 %v3854_v13, %v3814_v63  ;;  %4110 = vmatpush1.bf16.msra.mxu0 %v14095_v43  ;;  %v14184_v6 = vcombine.high %v828_v58, %v832_v59  ;;  %v824_v8 = vld [vmem:[#allocation8 + $0x3f0] sm:$0xff]  ;;  %v14055_v13 = vcombine.low %v700_v56, %v704_v57 }
 0x30b   :  { %4151 = vmatpush1.bf16.msra.mxu1 %v14223_v14  ;;  %v3816_v24 = vpop.f32.mrf.mxu0  ;;  %v3857_v25 = vpop.f32.mrf.mxu1  ;;  %4111 = vmatprep.subr.bf16.mxu0 %v14088_v53  ;;  %v948_v43 = vld [vmem:[#allocation8 + $0x7d0] sm:$0xff]  ;;  %v14183_v14 = vcombine.low %v828_v58, %v832_v59  ;;  %v14176_v53 = vcombine.high %v820_v7, %v824_v8  ;;  %v14175_v62 = vcombine.low %v820_v7, %v824_v8 }
 0x30c   :  { %4152 = vmatprep.subr.bf16.mxu1 %v14216_v3  ;;  %v952_v2 = vld [vmem:[#allocation8 + $0x7f0] sm:$0xff] }
 0x30d   :  { %v14304_v63 = vcombine.high %v948_v43, %v952_v2  ;;  %v812_v3 = vld [vmem:[#allocation8 + $0x390] sm:$0xff]  ;;  %v14303_v19 = vcombine.low %v948_v43, %v952_v2 }
 0x30e   :  { %4112 = vmatpush1.bf16.msra.mxu0 %v14087_v23  ;;  %v944_v17 = vld [vmem:[#allocation8 + $0x7b0] sm:$0xff]  ;;  %v14168_v44 = vcombine.high %v812_v3, %v816_v15 }
 0x30f   :  { %4153 = vmatpush1.bf16.msra.mxu1 %v14215_v26  ;;  %4113 = vmatprep.subr.bf16.mxu0 %v14080_v27  ;;  %v14296_v23 = vcombine.high %v940_v16, %v944_v17  ;;  %v804_v24 = vld [vmem:[#allocation8 + $0x350] sm:$0xff]  ;;  %v14295_v33 = vcombine.low %v940_v16, %v944_v17 }
 0x310   :  { %4154 = vmatprep.subr.bf16.mxu1 %v14208_v42  ;;  %v808_v25 = vld [vmem:[#allocation8 + $0x370] sm:$0xff]  ;;  %v14167_v42 = vcombine.low %v812_v3, %v816_v15 }
 0x311   :  { %v932_v26 = vld [vmem:[#allocation8 + $0x750] sm:$0xff]  ;;  %v14160_v34 = vcombine.high %v804_v24, %v808_v25 }
 0x312   :  { %4114 = vmatpush1.bf16.msra.mxu0 %v14079_v37  ;;  %v936_v27 = vld [vmem:[#allocation8 + $0x770] sm:$0xff] }
 0x313   :  { %4155 = vmatpush1.bf16.msra.mxu1 %v14207_v38  ;;  %4115 = vmatprep.subr.bf16.mxu0 %v14072_v39  ;;  %v14288_v35 = vcombine.high %v932_v26, %v936_v27  ;;  %v800_v37 = vld [vmem:[#allocation8 + $0x330] sm:$0xff]  ;;  %v14287_v45 = vcombine.low %v932_v26, %v936_v27 }
 0x314   :  { %4156 = vmatprep.subr.bf16.mxu1 %v14200_v41  ;;  %v924_v38 = vld [vmem:[#allocation8 + $0x710] sm:$0xff]  ;;  %v14159_v41 = vcombine.low %v804_v24, %v808_v25  ;;  %v14152_v46 = vcombine.high %v796_v36, %v800_v37 }
 0x315   :  { %v928_v39 = vld [vmem:[#allocation8 + $0x730] sm:$0xff] }
 0x316   :  { %4116 = vmatpush1.bf16.msra.mxu0 %v14071_v50  ;;  %v14280_v48 = vcombine.high %v924_v38, %v928_v39  ;;  %v788_v49 = vld [vmem:[#allocation8 + $0x2d0] sm:$0xff]  ;;  %v14279_v56 = vcombine.low %v924_v38, %v928_v39 }
 0x317   :  { %4157 = vmatpush1.bf16.msra.mxu1 %v14199_v51  ;;  %4117 = vmatprep.subr.bf16.mxu0 %v14064_v52  ;;  %v792_v50 = vld [vmem:[#allocation8 + $0x2f0] sm:$0xff] }
 0x318   :  { %4158 = vmatprep.subr.bf16.mxu1 %v14192_v54  ;;  %v916_v51 = vld [vmem:[#allocation8 + $0x6d0] sm:$0xff]  ;;  %v14151_v54 = vcombine.low %v796_v36, %v800_v37  ;;  %v14144_v57 = vcombine.high %v788_v49, %v792_v50 }
 0x319   :  { %v920_v52 = vld [vmem:[#allocation8 + $0x6f0] sm:$0xff] }
 0x31a   :  { %4118 = vmatpush1.bf16.msra.mxu0 %v14063_v60  ;;  %v14272_v58 = vcombine.high %v916_v51, %v920_v52  ;;  %v780_v59 = vld [vmem:[#allocation8 + $0x290] sm:$0xff]  ;;  %v14271_v7 = vcombine.low %v916_v51, %v920_v52 }
 0x31b   :  { %4159 = vmatpush1.bf16.msra.mxu1 %v14191_v4  ;;  %4119 = vmatprep.subr.bf16.mxu0 %v14056_v5  ;;  %v784_v60 = vld [vmem:[#allocation8 + $0x2b0] sm:$0xff] }
 0x31c   :  { %4160 = vmatprep.subr.bf16.mxu1 %v14184_v6  ;;  %v908_v4 = vld [vmem:[#allocation8 + $0x690] sm:$0xff]  ;;  %v14143_v6 = vcombine.low %v788_v49, %v792_v50  ;;  %v14136_v8 = vcombine.high %v780_v59, %v784_v60 }
 0x31d   :  { %v912_v5 = vld [vmem:[#allocation8 + $0x6b0] sm:$0xff] }
 0x31e   :  { %4120 = vmatpush1.bf16.msra.mxu0 %v14055_v13  ;;  %v14264_v43 = vcombine.high %v908_v4, %v912_v5  ;;  %v772_v2 = vld [vmem:[#allocation8 + $0x250] sm:$0xff]  ;;  %v14263_v3 = vcombine.low %v908_v4, %v912_v5 }
 0x31f   :  { %4161 = vmatpush1.bf16.msra.mxu1 %v14183_v14  ;;  %4121 = vmatprep.subr.bf16.mxu0 %v14176_v53  ;;  %v776_v13 = vld [vmem:[#allocation8 + $0x270] sm:$0xff] }
 0x320   :  { %4162 = vmatprep.subr.bf16.mxu1 %v14304_v63  ;;  %v900_v14 = vld [vmem:[#allocation8 + $0x650] sm:$0xff]  ;;  %v14135_v63 = vcombine.low %v780_v59, %v784_v60  ;;  %v14128_v15 = vcombine.high %v772_v2, %v776_v13 }
 0x321   :  { %v904_v53 = vld [vmem:[#allocation8 + $0x670] sm:$0xff] }
 0x322   :  { %4122 = vmatpush2.bf16.msra.mxu0 %v14175_v62  ;;  %v14256_v16 = vcombine.high %v900_v14, %v904_v53  ;;  %v764_v17 = vld [vmem:[#allocation8 + $0x210] sm:$0xff]  ;;  %v14255_v24 = vcombine.low %v900_v14, %v904_v53 }
 0x323   :  { %4163 = vmatpush2.bf16.msra.mxu1 %v14303_v19  ;;  %4123 = vmatprep.subr.bf16.mxu0 %v14168_v44  ;;  %v768_v62 = vld [vmem:[#allocation8 + $0x230] sm:$0xff] }
 0x324   :  { %4164 = vmatprep.subr.bf16.mxu1 %v14296_v23  ;;  %v892_v19 = vld [vmem:[#allocation8 + $0x610] sm:$0xff]  ;;  %v14127_v23 = vcombine.low %v772_v2, %v776_v13  ;;  %v14120_v25 = vcombine.high %v764_v17, %v768_v62 }
 0x325   :  { %v896_v44 = vld [vmem:[#allocation8 + $0x630] sm:$0xff] }
 0x326   :  { %4124 = vmatpush2.bf16.msra.mxu0 %v14167_v42  ;;  %v14248_v26 = vcombine.high %v892_v19, %v896_v44  ;;  %v1012_v27 = vld [vmem:[#allocation8 + $0x9d0] sm:$0xff]  ;;  %v14247_v36 = vcombine.low %v892_v19, %v896_v44 }
 0x327   :  { %4165 = vmatpush2.bf16.msra.mxu1 %v14295_v33  ;;  %4125 = vmatprep.subr.bf16.mxu0 %v14160_v34  ;;  %v1016_v42 = vld [vmem:[#allocation8 + $0x9f0] sm:$0xff] }
 0x328   :  { %4166 = vmatprep.subr.bf16.mxu1 %v14288_v35  ;;  %v1140_v33 = vld [vmem:[#allocation8 + $0xdd0] sm:$0xff]  ;;  %v14119_v35 = vcombine.low %v764_v17, %v768_v62  ;;  %v14368_v37 = vcombine.high %v1012_v27, %v1016_v42 }
 0x329   :  { %v1144_v34 = vld [vmem:[#allocation8 + $0xdf0] sm:$0xff] }
 0x32a   :  { %4126 = vmatpush2.bf16.msra.mxu0 %v14159_v41  ;;  %v14496_v38 = vcombine.high %v1140_v33, %v1144_v34  ;;  %v1004_v39 = vld [vmem:[#allocation8 + $0x990] sm:$0xff]  ;;  %v14495_v49 = vcombine.low %v1140_v33, %v1144_v34 }
 0x32b   :  { %4167 = vmatpush2.bf16.msra.mxu1 %v14287_v45  ;;  %4127 = vmatprep.subr.bf16.mxu0 %v14152_v46  ;;  %v1008_v41 = vld [vmem:[#allocation8 + $0x9b0] sm:$0xff]  ;;  %v14367_v45 = vcombine.low %v1012_v27, %v1016_v42 }
 0x32c   :  { %4168 = vmatprep.subr.bf16.mxu1 %v14280_v48  ;;  %v1132_v46 = vld [vmem:[#allocation8 + $0xd90] sm:$0xff]  ;;  %v14360_v50 = vcombine.high %v1004_v39, %v1008_v41  ;;  %v14359_v59 = vcombine.low %v1004_v39, %v1008_v41 }
 0x32d   :  { %v1136_v48 = vld [vmem:[#allocation8 + $0xdb0] sm:$0xff] }
 0x32e   :  { %4128 = vmatpush2.bf16.msra.mxu0 %v14151_v54  ;;  %v996_v51 = vld [vmem:[#allocation8 + $0x950] sm:$0xff]  ;;  %v14487_v4 = vcombine.low %v1132_v46, %v1136_v48 }
 0x32f   :  { %4169 = vmatpush2.bf16.msra.mxu1 %v14279_v56  ;;  %4129 = vmatprep.subr.bf16.mxu0 %v14144_v57  ;;  %v1000_v52 = vld [vmem:[#allocation8 + $0x970] sm:$0xff]  ;;  %v14488_v56 = vcombine.high %v1132_v46, %v1136_v48 }
 0x330   :  { %4170 = vmatprep.subr.bf16.mxu1 %v14272_v58  ;;  %v1124_v57 = vld [vmem:[#allocation8 + $0xd50] sm:$0xff]  ;;  %v14352_v5 = vcombine.high %v996_v51, %v1000_v52 }
 0x331   :  { %v1128_v58 = vld [vmem:[#allocation8 + $0xd70] sm:$0xff] }
 0x332   :  { %4130 = vmatpush2.bf16.msra.mxu0 %v14143_v6  ;;  %v14480_v6 = vcombine.high %v1124_v57, %v1128_v58  ;;  %v1116_v13 = vld [vmem:[#allocation8 + $0xd10] sm:$0xff] }
 0x333   :  { %4171 = vmatpush2.bf16.msra.mxu1 %v14271_v7  ;;  %4131 = vmatprep.subr.bf16.mxu0 %v14136_v8  ;;  %v988_v7 = vld [vmem:[#allocation8 + $0x910] sm:$0xff] }
 0x334   :  { %4172 = vmatprep.subr.bf16.mxu1 %v14264_v43  ;;  %v992_v8 = vld [vmem:[#allocation8 + $0x930] sm:$0xff] }
 0x335   :  { %v1120_v14 = vld [vmem:[#allocation8 + $0xd30] sm:$0xff]  ;;  %v14344_v17 = vcombine.high %v988_v7, %v992_v8  ;;  %v14343_v42 = vcombine.low %v988_v7, %v992_v8 }
 0x336   :  { %4132 = vmatpush2.bf16.msra.mxu0 %v14135_v63  ;;  %v14351_v63 = vcombine.low %v996_v51, %v1000_v52  ;;  %v14472_v44 = vcombine.high %v1116_v13, %v1120_v14  ;;  %v1112_v27 = vld [vmem:[#allocation8 + $0xcf0] sm:$0xff]  ;;  %v14471_v34 = vcombine.low %v1116_v13, %v1120_v14 }
 0x337   :  { %4173 = vmatpush2.bf16.msra.mxu1 %v14263_v3  ;;  %4133 = vmatprep.subr.bf16.mxu0 %v14128_v15  ;;  %v1104_v39 = vld [vmem:[#allocation8 + $0xcb0] sm:$0xff] }
 0x338   :  { %4174 = vmatprep.subr.bf16.mxu1 %v14256_v16  ;;  %v14479_v16 = vcombine.low %v1124_v57, %v1128_v58  ;;  %v1092_v51 = vld [vmem:[#allocation8 + $0xc50] sm:$0xff] }
 0x339   :  { %v1096_v52 = vld [vmem:[#allocation8 + $0xc70] sm:$0xff] }
 0x33a   :  { %4134 = vmatpush2.bf16.msra.mxu0 %v14127_v23  ;;  %v980_v23 = vld [vmem:[#allocation8 + $0x8d0] sm:$0xff]  ;;  %v14448_v58 = vcombine.high %v1092_v51, %v1096_v52  ;;  %v14447_v7 = vcombine.low %v1092_v51, %v1096_v52 }
 0x33b   :  { %4175 = vmatpush2.bf16.msra.mxu1 %v14255_v24  ;;  %4135 = vmatprep.subr.bf16.mxu0 %v14120_v25  ;;  %v984_v24 = vld [vmem:[#allocation8 + $0x8f0] sm:$0xff] }
 0x33c   :  { %4176 = vmatprep.subr.bf16.mxu1 %v14248_v26  ;;  %v1108_v26 = vld [vmem:[#allocation8 + $0xcd0] sm:$0xff]  ;;  %v14335_v41 = vcombine.low %v980_v23, %v984_v24 }
 0x33d   :  { %v1080_v13 = vld [vmem:[#allocation8 + $0xbf0] sm:$0xff] }
 0x33e   :  { %4136 = vmatpush2.bf16.msra.mxu0 %v14119_v35  ;;  %v14336_v35 = vcombine.high %v980_v23, %v984_v24  ;;  %v1196_v14 = vld [vmem:[#allocation8 + $0xf90] sm:$0xff] }
 0x33f   :  { %4177 = vmatpush2.bf16.msra.mxu1 %v14247_v36  ;;  %4187 = vmatprep.subr.bf16.mxu0 %v14368_v37  ;;  %v14464_v36 = vcombine.high %v1108_v26, %v1112_v27  ;;  %v972_v37 = vld [vmem:[#allocation8 + $0x890] sm:$0xff] }
 0x340   :  { %4228 = vmatprep.subr.bf16.mxu1 %v14496_v38  ;;  %v1100_v38 = vld [vmem:[#allocation8 + $0xc90] sm:$0xff] }
 0x341   :  { %v3934_v54 = vpop.f32.mrf.mxu1  ;;  %4138 = vmatmul.mubr.bf16.vlgmr.msra.gmra.mxu0 %v17214_v30  ;;  %v14456_v48 = vcombine.high %v1100_v38, %v1104_v39  ;;  %v1192_v23 = vld [vmem:[#allocation8 + $0xf70] sm:$0xff] }
 0x342   :  { %4179 = vmatmul.mubr.bf16.vlgmr.msra.gmra.mxu1 %v17216_v31  ;;  %4188 = vmatpush1.bf16.msra.mxu0 %v14367_v45  ;;  %v14463_v45 = vcombine.low %v1108_v26, %v1112_v27  ;;  %v1044_v52 = vld [vmem:[#allocation8 + $0xad0] sm:$0xff] }
 0x343   :  { %4219 = vmatprep.mubr.bf16.mxu0 %v17230_v0  ;;  %4229 = vmatpush1.bf16.msra.mxu1 %v14495_v49  ;;  %v3936_v60 = vpop.f32.mrf.mxu1  ;;  %v964_v49 = vld [vmem:[#allocation8 + $0x850] sm:$0xff] }
 0x344   :  { %14560 = vmatprep.mubr.msk.bf16.mxu1 %vm3748_vm11, %v17232_v1  ;;  %4189 = vmatprep.subr.bf16.mxu0 %v14360_v50  ;;  %v968_v50 = vld [vmem:[#allocation8 + $0x870] sm:$0xff] }
 0x345   :  { %v3893_v43 = vpop.f32.mrf.mxu0  ;;  %v3938_v2 = vpop.f32.mrf.mxu1  ;;  %4230 = vmatprep.subr.bf16.mxu1 %v14488_v56  ;;  %v14455_v56 = vcombine.low %v1100_v38, %v1104_v39  ;;  %v14320_v57 = vcombine.high %v964_v49, %v968_v50  ;;  %v1052_v39 = vld [vmem:[#allocation8 + $0xb10] sm:$0xff] }
 0x346   :  { %v3894_v53 = vadd.f32 %v3893_v43, %v17276_v61  ;;  %4190 = vmatpush1.bf16.msra.mxu0 %v14359_v59  ;;  %v956_v59 = vld [vmem:[#allocation8 + $0x810] sm:$0xff] }
 0x347   :  { %4231 = vmatpush1.bf16.msra.mxu1 %v14487_v4  ;;  %v3895_v3 = vpop.f32.mrf.mxu0  ;;  %v3939_v15 = vpop.f32.mrf.mxu1  ;;  %4191 = vmatprep.subr.bf16.mxu0 %v14352_v5  ;;  %v1084_v4 = vld [vmem:[#allocation8 + $0xc10] sm:$0xff] }
 0x348   :  { %v17286_v62 = vadd.f32 %v3934_v54, %v3894_v53  ;;  %v3896_v19 = vadd.f32 %v3895_v3, %v17278_v20  ;;  %4232 = vmatprep.subr.bf16.mxu1 %v14480_v6  ;;  %v976_v20 = vld [vmem:[#allocation8 + $0x8b0] sm:$0xff]  ;;  %v14319_v6 = vcombine.low %v964_v49, %v968_v50  ;;  %v14552_v15 = vcombine.high %v1196_v14, %v1196_v14 }
 0x349   :  { %v3897_v25 = vpop.f32.mrf.mxu0  ;;  %v14328_v46 = vcombine.high %v972_v37, %v976_v20  ;;  %v14327_v54 = vcombine.low %v972_v37, %v976_v20  ;;  %v1088_v5 = vld [vmem:[#allocation8 + $0xc30] sm:$0xff] }
 0x34a   :  { %v17289_v61 = vadd.f32 %v3936_v60, %v3896_v19  ;;  %4192 = vmatpush1.bf16.msra.mxu0 %v14351_v63  ;;  %v960_v60 = vld [vmem:[#allocation8 + $0x830] sm:$0xff]  ;;  %v14440_v43 = vcombine.high %v1084_v4, %v1088_v5  ;;  %v14439_v63 = vcombine.low %v1084_v4, %v1088_v5 }
 0x34b   :  { %4233 = vmatpush1.bf16.msra.mxu1 %v14479_v16  ;;  %v3898_v33 = vpop.f32.mrf.mxu0  ;;  %4193 = vmatprep.subr.bf16.mxu0 %v14344_v17  ;;  %v14312_v8 = vcombine.high %v956_v59, %v960_v60  ;;  %v1076_v2 = vld [vmem:[#allocation8 + $0xbd0] sm:$0xff]  ;;  %v14311_v53 = vcombine.low %v956_v59, %v960_v60  ;;  %v14551_v16 = vcombine.low %v1196_v14, %v1196_v14 }
 0x34c   :  { %4234 = vmatprep.subr.bf16.mxu1 %v14472_v44  ;;  %v14432_v3 = vcombine.high %v1076_v2, %v1080_v13  ;;  %v1068_v17 = vld [vmem:[#allocation8 + $0xb90] sm:$0xff]  ;;  %v14431_v24 = vcombine.low %v1076_v2, %v1080_v13 }
 0x34d   :  { %v1072_v19 = vld [vmem:[#allocation8 + $0xbb0] sm:$0xff]  ;;  %v3766_v26 = vsel %vm3752_vm12, %v14551_v16, 0 }
 0x34e   :  { %4194 = vmatpush1.bf16.msra.mxu0 %v14343_v42  ;;  %v1188_v44 = vld [vmem:[#allocation8 + $0xf50] sm:$0xff]  ;;  %v14424_v25 = vcombine.high %v1068_v17, %v1072_v19 }
 0x34f   :  { %4235 = vmatpush1.bf16.msra.mxu1 %v14471_v34  ;;  %4195 = vmatprep.subr.bf16.mxu0 %v14336_v35  ;;  %v14544_v27 = vcombine.high %v1188_v44, %v1192_v23  ;;  %v1060_v42 = vld [vmem:[#allocation8 + $0xb50] sm:$0xff]  ;;  %v14543_v37 = vcombine.low %v1188_v44, %v1192_v23 }
 0x350   :  { %4236 = vmatprep.subr.bf16.mxu1 %v14464_v36  ;;  %v1064_v33 = vld [vmem:[#allocation8 + $0xb70] sm:$0xff]  ;;  %v14423_v36 = vcombine.low %v1068_v17, %v1072_v19 }
 0x351   :  { %v1180_v34 = vld [vmem:[#allocation8 + $0xf10] sm:$0xff]  ;;  %v14416_v20 = vcombine.high %v1060_v42, %v1064_v33 }
 0x352   :  { %4196 = vmatpush1.bf16.msra.mxu0 %v14335_v41  ;;  %v1184_v35 = vld [vmem:[#allocation8 + $0xf30] sm:$0xff] }
 0x353   :  { %4237 = vmatpush1.bf16.msra.mxu1 %v14463_v45  ;;  %4197 = vmatprep.subr.bf16.mxu0 %v14328_v46  ;;  %v14536_v38 = vcombine.high %v1180_v34, %v1184_v35  ;;  %v1056_v41 = vld [vmem:[#allocation8 + $0xb30] sm:$0xff]  ;;  %v14535_v49 = vcombine.low %v1180_v34, %v1184_v35  ;;  %v749_v35 = vld [vmem:[#allocation8 + $0x198] sm:$0xff] }
 0x354   :  { %4238 = vmatprep.subr.bf16.mxu1 %v14456_v48  ;;  %v1172_v45 = vld [vmem:[#allocation8 + $0xed0] sm:$0xff]  ;;  %v14415_v48 = vcombine.low %v1060_v42, %v1064_v33  ;;  %v14408_v50 = vcombine.high %v1052_v39, %v1056_v41 }
 0x355   :  { %v1176_v46 = vld [vmem:[#allocation8 + $0xef0] sm:$0xff] }
 0x356   :  { %4198 = vmatpush1.bf16.msra.mxu0 %v14327_v54  ;;  %v14528_v51 = vcombine.high %v1172_v45, %v1176_v46  ;;  %v1048_v54 = vld [vmem:[#allocation8 + $0xaf0] sm:$0xff]  ;;  %v14527_v59 = vcombine.low %v1172_v45, %v1176_v46  ;;  %v877_v46 = vld [vmem:[#allocation8 + $0x598] sm:$0xff] }
 0x357   :  { %4239 = vmatpush1.bf16.msra.mxu1 %v14455_v56  ;;  %4199 = vmatprep.subr.bf16.mxu0 %v14320_v57  ;;  %v1164_v56 = vld [vmem:[#allocation8 + $0xe90] sm:$0xff]  ;;  %v14400_v60 = vcombine.high %v1044_v52, %v1048_v54 }
 0x358   :  { %4240 = vmatprep.subr.bf16.mxu1 %v14448_v58  ;;  %v1168_v57 = vld [vmem:[#allocation8 + $0xeb0] sm:$0xff]  ;;  %v14407_v58 = vcombine.low %v1052_v39, %v1056_v41 }
 0x359   :  { %v14520_v4 = vcombine.high %v1164_v56, %v1168_v57  ;;  %v1036_v5 = vld [vmem:[#allocation8 + $0xa90] sm:$0xff]  ;;  %v14519_v2 = vcombine.low %v1164_v56, %v1168_v57  ;;  %v1219_v56 = vrot.slane %v17266_v40, %v17186_v10 }
 0x35a   :  { %4200 = vmatpush1.bf16.msra.mxu0 %v14319_v6  ;;  %v1040_v6 = vld [vmem:[#allocation8 + $0xab0] sm:$0xff] }
 0x35b   :  { %4241 = vmatpush1.bf16.msra.mxu1 %v14447_v7  ;;  %4201 = vmatprep.subr.bf16.mxu0 %v14312_v8  ;;  %v1156_v7 = vld [vmem:[#allocation8 + $0xe50] sm:$0xff]  ;;  %v14392_v13 = vcombine.high %v1036_v5, %v1040_v6  ;;  %v14391_v16 = vcombine.low %v1036_v5, %v1040_v6  ;;  %v737_v5 = vld [vmem:[#allocation8 + $0x138] sm:$0xff] }
 0x35c   :  { %4242 = vmatprep.subr.bf16.mxu1 %v14440_v43  ;;  %v1160_v8 = vld [vmem:[#allocation8 + $0xe70] sm:$0xff]  ;;  %v14399_v43 = vcombine.low %v1044_v52, %v1048_v54 }
 0x35d   :  { %v14512_v14 = vcombine.high %v1156_v7, %v1160_v8  ;;  %v14511_v17 = vcombine.low %v1156_v7, %v1160_v8  ;;  %v1020_v23 = vld [vmem:[#allocation8 + $0xa10] sm:$0xff] }
 0x35e   :  { %4202 = vmatpush1.bf16.msra.mxu0 %v14311_v53  ;;  %v1028_v53 = vld [vmem:[#allocation8 + $0xa50] sm:$0xff] }
 0x35f   :  { %4243 = vmatpush1.bf16.msra.mxu1 %v14439_v63  ;;  %4203 = vmatprep.subr.bf16.mxu0 %v14432_v3  ;;  %v1032_v63 = vld [vmem:[#allocation8 + $0xa70] sm:$0xff] }
 0x360   :  { %14559 = vmatprep.subr.msk.bf16.mxu1 %vm3752_vm12, %v14552_v15  ;;  %v1148_v3 = vld [vmem:[#allocation8 + $0xe10] sm:$0xff]  ;;  %v14384_v19 = vcombine.high %v1028_v53, %v1032_v63 }
 0x361   :  { %v1152_v15 = vld [vmem:[#allocation8 + $0xe30] sm:$0xff] }
 0x362   :  { %4204 = vmatpush2.bf16.msra.mxu0 %v14431_v24  ;;  %v14504_v44 = vcombine.high %v1148_v3, %v1152_v15  ;;  %v1024_v24 = vld [vmem:[#allocation8 + $0xa30] sm:$0xff]  ;;  %v14503_v42 = vcombine.low %v1148_v3, %v1152_v15  ;;  %v725_v15 = vld [vmem:[#allocation8 + $0xd8] sm:$0xff] }
 0x363   :  { %4247 = vmatpush2.bf16.msra.mxu1 %v3766_v26  ;;  %4205 = vmatprep.subr.bf16.mxu0 %v14424_v25  ;;  %v757_v25 = vld [vmem:[#allocation8 + $0x1d8] sm:$0xff]  ;;  %v14376_v33 = vcombine.high %v1020_v23, %v1024_v24 }
 0x364   :  { %4248 = vmatprep.subr.bf16.mxu1 %v14544_v27  ;;  %v761_v26 = vld [vmem:[#allocation8 + $0x1f8] sm:$0xff]  ;;  %v14383_v27 = vcombine.low %v1028_v53, %v1032_v63 }
 0x365   :  { %v14114_v34 = vcombine.high %v757_v25, %v761_v26  ;;  %v14113_v39 = vcombine.low %v757_v25, %v761_v26  ;;  %v865_v53 = vld [vmem:[#allocation8 + $0x538] sm:$0xff] }
 0x366   :  { %4206 = vmatpush2.bf16.msra.mxu0 %v14423_v36  ;;  %v753_v36 = vld [vmem:[#allocation8 + $0x1b8] sm:$0xff] }
 0x367   :  { %4249 = vmatpush2.bf16.msra.mxu1 %v14543_v37  ;;  %4207 = vmatprep.subr.bf16.mxu0 %v14416_v20  ;;  %v885_v37 = vld [vmem:[#allocation8 + $0x5d8] sm:$0xff]  ;;  %v14106_v41 = vcombine.high %v749_v35, %v753_v36  ;;  %v14105_v52 = vcombine.low %v749_v35, %v753_v36 }
 0x368   :  { %4250 = vmatprep.subr.bf16.mxu1 %v14536_v38  ;;  %v889_v20 = vld [vmem:[#allocation8 + $0x5f8] sm:$0xff]  ;;  %v14375_v38 = vcombine.low %v1020_v23, %v1024_v24 }
 0x369   :  { %v14242_v45 = vcombine.high %v885_v37, %v889_v20  ;;  %v721_v35 = vld [vmem:[#allocation8 + $0xb8] sm:$0xff] }
 0x36a   :  { %4208 = vmatpush2.bf16.msra.mxu0 %v14415_v48  ;;  %v881_v48 = vld [vmem:[#allocation8 + $0x5b8] sm:$0xff] }
 0x36b   :  { %4251 = vmatpush2.bf16.msra.mxu1 %v14535_v49  ;;  %4209 = vmatprep.subr.bf16.mxu0 %v14408_v50  ;;  %v741_v49 = vld [vmem:[#allocation8 + $0x158] sm:$0xff]  ;;  %v14234_v54 = vcombine.high %v877_v46, %v881_v48  ;;  %v14233_v6 = vcombine.low %v877_v46, %v881_v48 }
 0x36c   :  { %4252 = vmatprep.subr.bf16.mxu1 %v14528_v51  ;;  %v745_v50 = vld [vmem:[#allocation8 + $0x178] sm:$0xff]  ;;  %v14241_v51 = vcombine.low %v885_v37, %v889_v20 }
 0x36d   :  { %v14098_v57 = vcombine.high %v741_v49, %v745_v50  ;;  %v14097_v8 = vcombine.low %v741_v49, %v745_v50  ;;  %v709_v46 = vld [vmem:[#allocation8 + $0x58] sm:$0xff] }
 0x36e   :  { %4210 = vmatpush2.bf16.msra.mxu0 %v14407_v58  ;;  %v869_v58 = vld [vmem:[#allocation8 + $0x558] sm:$0xff] }
 0x36f   :  { %4253 = vmatpush2.bf16.msra.mxu1 %v14527_v59  ;;  %4211 = vmatprep.subr.bf16.mxu0 %v14400_v60  ;;  %v873_v59 = vld [vmem:[#allocation8 + $0x578] sm:$0xff] }
 0x370   :  { %4254 = vmatprep.subr.bf16.mxu1 %v14520_v4  ;;  %v733_v4 = vld [vmem:[#allocation8 + $0x118] sm:$0xff] }
 0x371   :  { %v14089_v23 = vcombine.low %v733_v4, %v737_v5  ;;  %v713_v48 = vld [vmem:[#allocation8 + $0x78] sm:$0xff] }
 0x372   :  { %4212 = vmatpush2.bf16.msra.mxu0 %v14399_v43  ;;  %v14226_v43 = vcombine.high %v869_v58, %v873_v59 }
 0x373   :  { %4255 = vmatpush2.bf16.msra.mxu1 %v14519_v2  ;;  %4213 = vmatprep.subr.bf16.mxu0 %v14392_v13  ;;  %v14090_v13 = vcombine.high %v733_v4, %v737_v5 }
 0x374   :  { %4256 = vmatprep.subr.bf16.mxu1 %v14512_v14  ;;  %v861_v14 = vld [vmem:[#allocation8 + $0x518] sm:$0xff] }
 0x375   :  { %v14218_v24 = vcombine.high %v861_v14, %v865_v53  ;;  %v14217_v36 = vcombine.low %v861_v14, %v865_v53  ;;  %v949_v53 = vld [vmem:[#allocation8 + $0x7d8] sm:$0xff] }
 0x376   :  { %4214 = vmatpush2.bf16.msra.mxu0 %v14391_v16  ;;  %v729_v16 = vld [vmem:[#allocation8 + $0xf8] sm:$0xff] }
 0x377   :  { %4257 = vmatpush2.bf16.msra.mxu1 %v14511_v17  ;;  %4215 = vmatprep.subr.bf16.mxu0 %v14384_v19  ;;  %v14082_v26 = vcombine.high %v725_v15, %v729_v16  ;;  %v14081_v20 = vcombine.low %v725_v15, %v729_v16  ;;  %v817_v15 = vld [vmem:[#allocation8 + $0x3b8] sm:$0xff] }
 0x378   :  { %4258 = vmatprep.subr.bf16.mxu1 %v14504_v44 }
 0x37a   :  { %4216 = vmatpush2.bf16.msra.mxu0 %v14383_v27  ;;  %v853_v27 = vld [vmem:[#allocation8 + $0x4d8] sm:$0xff] }
 0x37b   :  { %4259 = vmatpush2.bf16.msra.mxu1 %v14503_v42  ;;  %4217 = vmatprep.subr.bf16.mxu0 %v14376_v33  ;;  %v857_v42 = vld [vmem:[#allocation8 + $0x4f8] sm:$0xff] }
 0x37c   :  { %4269 = vmatprep.subr.bf16.mxu1 %v14114_v34  ;;  %v717_v34 = vld [vmem:[#allocation8 + $0x98] sm:$0xff]  ;;  %v14209_v49 = vcombine.low %v853_v27, %v857_v42 }
 0x37d   :  { %v14073_v50 = vcombine.low %v717_v34, %v721_v35 }
 0x37e   :  { %4261 = vmatmul.mubr.bf16.vlgmr.msra.gmra.mxu1 %v17251_v18  ;;  %4218 = vmatpush2.bf16.msra.mxu0 %v14375_v38  ;;  %v14210_v38 = vcombine.high %v853_v27, %v857_v42 }
 0x37f   :  { %4270 = vmatpush1.bf16.msra.mxu1 %v14113_v39  ;;  %4301 = vmatprep.mubr.bf16.mxu1 %v17210_v28  ;;  %v1223_v28 = vrot.slane %v17266_v40, %v17192_v12  ;;  %v14225_v40 = vcombine.low %v869_v58, %v873_v59  ;;  %v14074_v39 = vcombine.high %v717_v34, %v721_v35  ;;  %v705_v58 = vld [vmem:[#allocation8 + $0x38] sm:$0xff] }
 0x380   :  { %4271 = vmatprep.subr.bf16.mxu1 %v14106_v41  ;;  %4310 = vmatprep.subr.bf16.mxu0 %v14242_v45  ;;  %v845_v41 = vld [vmem:[#allocation8 + $0x498] sm:$0xff] }
 0x381   :  { %v3975_v60 = vpop.f32.mrf.mxu1  ;;  %4220 = vmatmul.mubr.bf16.vlgmr.msra.gmra.mxu0 %v17254_v32  ;;  %v849_v45 = vld [vmem:[#allocation8 + $0x4b8] sm:$0xff] }
 0x382   :  { %4311 = vmatpush1.bf16.msra.mxu0 %v14241_v51  ;;  %4342 = vmatprep.mubr.bf16.mxu0 %v17212_v29  ;;  %v3976_v2 = vadd.f32 %v3975_v60, %v1219_v56  ;;  %v14202_v51 = vcombine.high %v845_v41, %v849_v45  ;;  %v841_v56 = vld [vmem:[#allocation8 + $0x478] sm:$0xff]  ;;  %v14201_v59 = vcombine.low %v845_v41, %v849_v45 }
 0x383   :  { %4272 = vmatpush1.bf16.msra.mxu1 %v14105_v52  ;;  %v3977_v7 = vpop.f32.mrf.mxu1  ;;  %4312 = vmatprep.subr.bf16.mxu0 %v14234_v54  ;;  %v14066_v52 = vcombine.high %v709_v46, %v713_v48  ;;  %v837_v54 = vld [vmem:[#allocation8 + $0x458] sm:$0xff]  ;;  %v14065_v60 = vcombine.low %v709_v46, %v713_v48 }
 0x384   :  { %4273 = vmatprep.subr.bf16.mxu1 %v14098_v57  ;;  %v3978_v17 = vadd.f32 %v3977_v7, %v1223_v28  ;;  %v701_v57 = vld [vmem:[#allocation8 + $0x18] sm:$0xff]  ;;  %v14194_v4 = vcombine.high %v837_v54, %v841_v56 }
 0x385   :  { %v3979_v63 = vpop.f32.mrf.mxu1  ;;  %v4016_v3 = vpop.f32.mrf.mxu0  ;;  %v14058_v5 = vcombine.high %v701_v57, %v705_v58  ;;  %v829_v28 = vld [vmem:[#allocation8 + $0x418] sm:$0xff] }
 0x386   :  { %v17301_v29 = vadd.f32 %v4016_v3, %v3976_v2  ;;  %4313 = vmatpush1.bf16.msra.mxu0 %v14233_v6  ;;  %v833_v6 = vld [vmem:[#allocation8 + $0x438] sm:$0xff]  ;;  %v14057_v2 = vcombine.low %v701_v57, %v705_v58 }
 0x387   :  { %4274 = vmatpush1.bf16.msra.mxu1 %v14097_v8  ;;  %v3980_v19 = vpop.f32.mrf.mxu1  ;;  %v4018_v44 = vpop.f32.mrf.mxu0  ;;  %4314 = vmatprep.subr.bf16.mxu0 %v14226_v43  ;;  %v821_v7 = vld [vmem:[#allocation8 + $0x3d8] sm:$0xff]  ;;  %v14193_v43 = vcombine.low %v837_v54, %v841_v56  ;;  %v14185_v16 = vcombine.low %v829_v28, %v833_v6 }
 0x388   :  { %v17303_v25 = vadd.f32 %v4018_v44, %v3978_v17  ;;  %4275 = vmatprep.subr.bf16.mxu1 %v14090_v13  ;;  %v825_v8 = vld [vmem:[#allocation8 + $0x3f8] sm:$0xff]  ;;  %v14186_v13 = vcombine.high %v829_v28, %v833_v6 }
 0x389   :  { %v4020_v33 = vpop.f32.mrf.mxu0  ;;  %v14178_v14 = vcombine.high %v821_v7, %v825_v8  ;;  %v953_v63 = vld [vmem:[#allocation8 + $0x7f8] sm:$0xff]  ;;  %v14177_v17 = vcombine.low %v821_v7, %v825_v8 }
 0x38a   :  { %4315 = vmatpush1.bf16.msra.mxu0 %v14225_v40  ;;  %v813_v3 = vld [vmem:[#allocation8 + $0x398] sm:$0xff]  ;;  %v14306_v40 = vcombine.high %v949_v53, %v953_v63  ;;  %v14305_v27 = vcombine.low %v949_v53, %v953_v63 }
 0x38b   :  { %4276 = vmatpush1.bf16.msra.mxu1 %v14089_v23  ;;  %v4021_v37 = vpop.f32.mrf.mxu0  ;;  %4316 = vmatprep.subr.bf16.mxu0 %v14218_v24  ;;  %v14170_v19 = vcombine.high %v813_v3, %v817_v15  ;;  %v941_v44 = vld [vmem:[#allocation8 + $0x798] sm:$0xff]  ;;  %v14169_v42 = vcombine.low %v813_v3, %v817_v15 }
 0x38c   :  { %4277 = vmatprep.subr.bf16.mxu1 %v14082_v26  ;;  %v945_v23 = vld [vmem:[#allocation8 + $0x7b8] sm:$0xff] }
 0x38d   :  { %v805_v24 = vld [vmem:[#allocation8 + $0x358] sm:$0xff]  ;;  %v14298_v33 = vcombine.high %v941_v44, %v945_v23 }
 0x38e   :  { %4317 = vmatpush1.bf16.msra.mxu0 %v14217_v36  ;;  %v809_v26 = vld [vmem:[#allocation8 + $0x378] sm:$0xff] }
 0x38f   :  { %4278 = vmatpush1.bf16.msra.mxu1 %v14081_v20  ;;  %4318 = vmatprep.subr.bf16.mxu0 %v14210_v38  ;;  %v14162_v34 = vcombine.high %v805_v24, %v809_v26  ;;  %v933_v35 = vld [vmem:[#allocation8 + $0x758] sm:$0xff]  ;;  %v14297_v38 = vcombine.low %v941_v44, %v945_v23 }
 0x390   :  { %4279 = vmatprep.subr.bf16.mxu1 %v14074_v39  ;;  %v937_v36 = vld [vmem:[#allocation8 + $0x778] sm:$0xff]  ;;  %v14161_v39 = vcombine.low %v805_v24, %v809_v26 }
 0x391   :  { %v797_v37 = vld [vmem:[#allocation8 + $0x318] sm:$0xff]  ;;  %v14290_v41 = vcombine.high %v933_v35, %v937_v36 }
 0x392   :  { %4319 = vmatpush1.bf16.msra.mxu0 %v14209_v49  ;;  %v801_v20 = vld [vmem:[#allocation8 + $0x338] sm:$0xff] }
 0x393   :  { %4280 = vmatpush1.bf16.msra.mxu1 %v14073_v50  ;;  %4320 = vmatprep.subr.bf16.mxu0 %v14202_v51  ;;  %v14154_v45 = vcombine.high %v797_v37, %v801_v20  ;;  %v925_v46 = vld [vmem:[#allocation8 + $0x718] sm:$0xff]  ;;  %v14289_v51 = vcombine.low %v933_v35, %v937_v36 }
 0x394   :  { %4281 = vmatprep.subr.bf16.mxu1 %v14066_v52  ;;  %v929_v48 = vld [vmem:[#allocation8 + $0x738] sm:$0xff]  ;;  %v14153_v52 = vcombine.low %v797_v37, %v801_v20 }
 0x395   :  { %v789_v49 = vld [vmem:[#allocation8 + $0x2d8] sm:$0xff]  ;;  %v14282_v54 = vcombine.high %v925_v46, %v929_v48 }
 0x396   :  { %4321 = vmatpush1.bf16.msra.mxu0 %v14201_v59  ;;  %v793_v50 = vld [vmem:[#allocation8 + $0x2f8] sm:$0xff] }
 0x397   :  { %4282 = vmatpush1.bf16.msra.mxu1 %v14065_v60  ;;  %4322 = vmatprep.subr.bf16.mxu0 %v14194_v4  ;;  %v14146_v56 = vcombine.high %v789_v49, %v793_v50  ;;  %v917_v57 = vld [vmem:[#allocation8 + $0x6d8] sm:$0xff]  ;;  %v14281_v4 = vcombine.low %v925_v46, %v929_v48 }
 0x398   :  { %4283 = vmatprep.subr.bf16.mxu1 %v14058_v5  ;;  %v921_v58 = vld [vmem:[#allocation8 + $0x6f8] sm:$0xff]  ;;  %v14145_v5 = vcombine.low %v789_v49, %v793_v50 }
 0x399   :  { %v781_v59 = vld [vmem:[#allocation8 + $0x298] sm:$0xff]  ;;  %v14274_v28 = vcombine.high %v917_v57, %v921_v58 }
 0x39a   :  { %4323 = vmatpush1.bf16.msra.mxu0 %v14193_v43  ;;  %v785_v60 = vld [vmem:[#allocation8 + $0x2b8] sm:$0xff] }
 0x39b   :  { %4284 = vmatpush1.bf16.msra.mxu1 %v14057_v2  ;;  %4324 = vmatprep.subr.bf16.mxu0 %v14186_v13  ;;  %v14138_v6 = vcombine.high %v781_v59, %v785_v60  ;;  %v909_v7 = vld [vmem:[#allocation8 + $0x698] sm:$0xff]  ;;  %v14273_v13 = vcombine.low %v917_v57, %v921_v58 }
 0x39c   :  { %4285 = vmatprep.subr.bf16.mxu1 %v14178_v14  ;;  %v913_v8 = vld [vmem:[#allocation8 + $0x6b8] sm:$0xff]  ;;  %v14137_v14 = vcombine.low %v781_v59, %v785_v60 }
 0x39d   :  { %v773_v43 = vld [vmem:[#allocation8 + $0x258] sm:$0xff]  ;;  %v14266_v53 = vcombine.high %v909_v7, %v913_v8 }
 0x39e   :  { %4325 = vmatpush1.bf16.msra.mxu0 %v14185_v16  ;;  %v777_v2 = vld [vmem:[#allocation8 + $0x278] sm:$0xff] }
 0x39f   :  { %4286 = vmatpush2.bf16.msra.mxu1 %v14177_v17  ;;  %4326 = vmatprep.subr.bf16.mxu0 %v14306_v40  ;;  %v14130_v63 = vcombine.high %v773_v43, %v777_v2  ;;  %v901_v3 = vld [vmem:[#allocation8 + $0x658] sm:$0xff]  ;;  %v14265_v40 = vcombine.low %v909_v7, %v913_v8 }
 0x3a0   :  { %4287 = vmatprep.subr.bf16.mxu1 %v14170_v19  ;;  %v905_v15 = vld [vmem:[#allocation8 + $0x678] sm:$0xff]  ;;  %v14129_v19 = vcombine.low %v773_v43, %v777_v2 }
 0x3a1   :  { %v765_v16 = vld [vmem:[#allocation8 + $0x218] sm:$0xff]  ;;  %v14258_v44 = vcombine.high %v901_v3, %v905_v15 }
 0x3a2   :  { %4327 = vmatpush2.bf16.msra.mxu0 %v14305_v27  ;;  %v769_v17 = vld [vmem:[#allocation8 + $0x238] sm:$0xff] }
 0x3a3   :  { %4288 = vmatpush2.bf16.msra.mxu1 %v14169_v42  ;;  %4328 = vmatprep.subr.bf16.mxu0 %v14298_v33  ;;  %v14122_v23 = vcombine.high %v765_v16, %v769_v17  ;;  %v893_v24 = vld [vmem:[#allocation8 + $0x618] sm:$0xff]  ;;  %v14257_v33 = vcombine.low %v901_v3, %v905_v15 }
 0x3a4   :  { %4289 = vmatprep.subr.bf16.mxu1 %v14162_v34  ;;  %v897_v26 = vld [vmem:[#allocation8 + $0x638] sm:$0xff]  ;;  %v14121_v34 = vcombine.low %v765_v16, %v769_v17 }
 0x3a5   :  { %v1013_v27 = vld [vmem:[#allocation8 + $0x9d8] sm:$0xff]  ;;  %v14250_v35 = vcombine.high %v893_v24, %v897_v26 }
 0x3a6   :  { %4329 = vmatpush2.bf16.msra.mxu0 %v14297_v38  ;;  %v1017_v42 = vld [vmem:[#allocation8 + $0x9f8] sm:$0xff] }
 0x3a7   :  { %4290 = vmatpush2.bf16.msra.mxu1 %v14161_v39  ;;  %4330 = vmatprep.subr.bf16.mxu0 %v14290_v41  ;;  %v14370_v36 = vcombine.high %v1013_v27, %v1017_v42  ;;  %v1005_v37 = vld [vmem:[#allocation8 + $0x998] sm:$0xff]  ;;  %v14249_v41 = vcombine.low %v893_v24, %v897_v26 }
 0x3a8   :  { %4291 = vmatprep.subr.bf16.mxu1 %v14154_v45  ;;  %v1009_v20 = vld [vmem:[#allocation8 + $0x9b8] sm:$0xff]  ;;  %v14369_v45 = vcombine.low %v1013_v27, %v1017_v42 }
 0x3a9   :  { %v1141_v38 = vld [vmem:[#allocation8 + $0xdd8] sm:$0xff]  ;;  %v14362_v46 = vcombine.high %v1005_v37, %v1009_v20 }
 0x3aa   :  { %4331 = vmatpush2.bf16.msra.mxu0 %v14289_v51  ;;  %v1145_v39 = vld [vmem:[#allocation8 + $0xdf8] sm:$0xff] }
 0x3ab   :  { %4292 = vmatpush2.bf16.msra.mxu1 %v14153_v52  ;;  %4332 = vmatprep.subr.bf16.mxu0 %v14282_v54  ;;  %v14498_v48 = vcombine.high %v1141_v38, %v1145_v39  ;;  %v1133_v49 = vld [vmem:[#allocation8 + $0xd98] sm:$0xff]  ;;  %v14497_v54 = vcombine.low %v1141_v38, %v1145_v39 }
 0x3ac   :  { %4293 = vmatprep.subr.bf16.mxu1 %v14146_v56  ;;  %v1137_v50 = vld [vmem:[#allocation8 + $0xdb8] sm:$0xff]  ;;  %v14361_v56 = vcombine.low %v1005_v37, %v1009_v20 }
 0x3ad   :  { %v997_v51 = vld [vmem:[#allocation8 + $0x958] sm:$0xff]  ;;  %v14490_v57 = vcombine.high %v1133_v49, %v1137_v50 }
 0x3ae   :  { %4333 = vmatpush2.bf16.msra.mxu0 %v14281_v4  ;;  %v1001_v52 = vld [vmem:[#allocation8 + $0x978] sm:$0xff] }
 0x3af   :  { %4294 = vmatpush2.bf16.msra.mxu1 %v14145_v5  ;;  %4334 = vmatprep.subr.bf16.mxu0 %v14274_v28  ;;  %v14354_v58 = vcombine.high %v997_v51, %v1001_v52  ;;  %v1125_v59 = vld [vmem:[#allocation8 + $0xd58] sm:$0xff]  ;;  %v14353_v43 = vcombine.low %v997_v51, %v1001_v52 }
 0x3b0   :  { %4295 = vmatprep.subr.bf16.mxu1 %v14138_v6  ;;  %v1129_v60 = vld [vmem:[#allocation8 + $0xd78] sm:$0xff] }
 0x3b1   :  { %v989_v28 = vld [vmem:[#allocation8 + $0x918] sm:$0xff]  ;;  %v14482_v2 = vcombine.high %v1125_v59, %v1129_v60  ;;  %v14481_v17 = vcombine.low %v1125_v59, %v1129_v60 }
 0x3b2   :  { %4335 = vmatpush2.bf16.msra.mxu0 %v14273_v13  ;;  %v993_v6 = vld [vmem:[#allocation8 + $0x938] sm:$0xff] }
 0x3b3   :  { %4296 = vmatpush2.bf16.msra.mxu1 %v14137_v14  ;;  %4336 = vmatprep.subr.bf16.mxu0 %v14266_v53  ;;  %v1117_v53 = vld [vmem:[#allocation8 + $0xd18] sm:$0xff] }
 0x3b4   :  { %4297 = vmatprep.subr.bf16.mxu1 %v14130_v63  ;;  %v1121_v63 = vld [vmem:[#allocation8 + $0xd38] sm:$0xff] }
 0x3b5   :  { %v981_v15 = vld [vmem:[#allocation8 + $0x8d8] sm:$0xff] }
 0x3b6   :  { %4337 = vmatpush2.bf16.msra.mxu0 %v14265_v40  ;;  %v985_v16 = vld [vmem:[#allocation8 + $0x8f8] sm:$0xff] }
 0x3b7   :  { %4298 = vmatpush2.bf16.msra.mxu1 %v14129_v19  ;;  %4338 = vmatprep.subr.bf16.mxu0 %v14258_v44  ;;  %v14345_v44 = vcombine.low %v989_v28, %v993_v6  ;;  %v1109_v24 = vld [vmem:[#allocation8 + $0xcd8] sm:$0xff] }
 0x3b8   :  { %4299 = vmatprep.subr.bf16.mxu1 %v14122_v23  ;;  %v14474_v23 = vcombine.high %v1117_v53, %v1121_v63  ;;  %v1113_v26 = vld [vmem:[#allocation8 + $0xcf8] sm:$0xff] }
 0x3b9   :  { %v973_v27 = vld [vmem:[#allocation8 + $0x898] sm:$0xff] }
 0x3ba   :  { %4339 = vmatpush2.bf16.msra.mxu0 %v14257_v33  ;;  %v977_v42 = vld [vmem:[#allocation8 + $0x8b8] sm:$0xff]  ;;  %v14473_v33 = vcombine.low %v1117_v53, %v1121_v63 }
 0x3bb   :  { %4300 = vmatpush2.bf16.msra.mxu1 %v14121_v34  ;;  %4340 = vmatprep.subr.bf16.mxu0 %v14250_v35  ;;  %v14337_v34 = vcombine.low %v981_v15, %v985_v16  ;;  %v14466_v35 = vcombine.high %v1109_v24, %v1113_v26  ;;  %v1101_v37 = vld [vmem:[#allocation8 + $0xc98] sm:$0xff] }
 0x3bc   :  { %4351 = vmatprep.subr.bf16.mxu1 %v14370_v36  ;;  %v14330_v36 = vcombine.high %v973_v27, %v977_v42  ;;  %v1105_v20 = vld [vmem:[#allocation8 + $0xcb8] sm:$0xff] }
 0x3bd   :  { %v965_v38 = vld [vmem:[#allocation8 + $0x858] sm:$0xff] }
 0x3be   :  { %4302 = vmatmul.mubr.bf16.vlgmr.msra.gmra.mxu1 %v17214_v30  ;;  %4341 = vmatpush2.bf16.msra.mxu0 %v14249_v41  ;;  %v969_v39 = vld [vmem:[#allocation8 + $0x878] sm:$0xff]  ;;  %v14465_v41 = vcombine.low %v1109_v24, %v1113_v26 }
 0x3bf   :  { %4352 = vmatpush1.bf16.msra.mxu1 %v14369_v45  ;;  %4383 = vmatprep.mubr.bf16.mxu1 %v17230_v0  ;;  %v14489_v0 = vcombine.low %v1133_v49, %v1137_v50  ;;  %v14329_v45 = vcombine.low %v973_v27, %v977_v42  ;;  %v1093_v49 = vld [vmem:[#allocation8 + $0xc58] sm:$0xff] }
 0x3c0   :  { %4353 = vmatprep.subr.bf16.mxu1 %v14362_v46  ;;  %4392 = vmatprep.subr.bf16.mxu0 %v14498_v48  ;;  %v14458_v46 = vcombine.high %v1101_v37, %v1105_v20  ;;  %v14322_v48 = vcombine.high %v965_v38, %v969_v39  ;;  %v1097_v50 = vld [vmem:[#allocation8 + $0xc78] sm:$0xff] }
 0x3c1   :  { %v4057_v4 = vpop.f32.mrf.mxu1  ;;  %v4098_v5 = vpop.f32.mrf.mxu0  ;;  %4343 = vmatmul.mubr.bf16.vlgmr.msra.gmra.mxu0 %v17216_v31  ;;  %v14346_v31 = vcombine.high %v989_v28, %v993_v6  ;;  %v957_v51 = vld [vmem:[#allocation8 + $0x818] sm:$0xff]  ;;  %v14449_v28 = vcombine.low %v1093_v49, %v1097_v50 }
 0x3c2   :  { %v4058_v30 = vadd.f32 %v4057_v4, %v17301_v29  ;;  %4393 = vmatpush1.bf16.msra.mxu0 %v14497_v54  ;;  %14562 = vmatprep.mubr.msk.bf16.mxu0 %vm3748_vm11, %v17232_v1  ;;  %v961_v52 = vld [vmem:[#allocation8 + $0x838] sm:$0xff]  ;;  %v14457_v54 = vcombine.low %v1101_v37, %v1105_v20 }
 0x3c3   :  { %4354 = vmatpush1.bf16.msra.mxu1 %v14361_v56  ;;  %v4059_v7 = vpop.f32.mrf.mxu1  ;;  %v4100_v8 = vpop.f32.mrf.mxu0  ;;  %4394 = vmatprep.subr.bf16.mxu0 %v14490_v57  ;;  %v14321_v56 = vcombine.low %v965_v38, %v969_v39  ;;  %v14450_v57 = vcombine.high %v1093_v49, %v1097_v50  ;;  %v1085_v59 = vld [vmem:[#allocation8 + $0xc18] sm:$0xff]  ;;  %v14313_v6 = vcombine.low %v957_v51, %v961_v52 }
 0x3c4   :  { %v17311_v13 = vadd.f32 %v4098_v5, %v4058_v30  ;;  %v4060_v14 = vadd.f32 %v4059_v7, %v17303_v25  ;;  %4355 = vmatprep.subr.bf16.mxu1 %v14354_v58  ;;  %v14338_v25 = vcombine.high %v981_v15, %v985_v16  ;;  %v14314_v58 = vcombine.high %v957_v51, %v961_v52  ;;  %v1089_v60 = vld [vmem:[#allocation8 + $0xc38] sm:$0xff] }
 0x3c5   :  { %v4061_v29 = vpop.f32.mrf.mxu1  ;;  %v4102_v3 = vpop.f32.mrf.mxu0  ;;  %v1077_v4 = vld [vmem:[#allocation8 + $0xbd8] sm:$0xff]  ;;  %v14442_v30 = vcombine.high %v1085_v59, %v1089_v60 }
 0x3c6   :  { %v17314_v1 = vadd.f32 %v4100_v8, %v4060_v14  ;;  %4395 = vmatpush1.bf16.msra.mxu0 %v14489_v0  ;;  %v1081_v5 = vld [vmem:[#allocation8 + $0xbf8] sm:$0xff] }
 0x3c7   :  { %4356 = vmatpush1.bf16.msra.mxu1 %v14353_v43  ;;  %v4062_v40 = vpop.f32.mrf.mxu1  ;;  %v4103_v19 = vpop.f32.mrf.mxu0  ;;  %4396 = vmatprep.subr.bf16.mxu0 %v14482_v2  ;;  %v14434_v0 = vcombine.high %v1077_v4, %v1081_v5  ;;  %v1197_v7 = vld [vmem:[#allocation8 + $0xf98] sm:$0xff]  ;;  %v14441_v2 = vcombine.low %v1085_v59, %v1089_v60  ;;  %v14433_v14 = vcombine.low %v1077_v4, %v1081_v5 }
 0x3c8   :  { %4357 = vmatprep.subr.bf16.mxu1 %v14346_v31  ;;  %v1069_v8 = vld [vmem:[#allocation8 + $0xb98] sm:$0xff]  ;;  %v14554_v31 = vcombine.high %v1197_v7, %v1197_v7  ;;  %v14553_v53 = vcombine.low %v1197_v7, %v1197_v7 }
 0x3c9   :  { %v1073_v43 = vld [vmem:[#allocation8 + $0xbb8] sm:$0xff] }
 0x3ca   :  { %4397 = vmatpush1.bf16.msra.mxu0 %v14481_v17  ;;  %v14426_v63 = vcombine.high %v1069_v8, %v1073_v43  ;;  %v1189_v29 = vld [vmem:[#allocation8 + $0xf58] sm:$0xff]  ;;  %v14425_v17 = vcombine.low %v1069_v8, %v1073_v43  ;;  %v3772_v40 = vsel %vm3752_vm12, %v14553_v53, 0 }
 0x3cb   :  { %4358 = vmatpush1.bf16.msra.mxu1 %v14345_v44  ;;  %4398 = vmatprep.subr.bf16.mxu0 %v14474_v23  ;;  %v1193_v3 = vld [vmem:[#allocation8 + $0xf78] sm:$0xff] }
 0x3cc   :  { %4359 = vmatprep.subr.bf16.mxu1 %v14338_v25  ;;  %v1061_v15 = vld [vmem:[#allocation8 + $0xb58] sm:$0xff]  ;;  %v14546_v19 = vcombine.high %v1189_v29, %v1193_v3  ;;  %v14545_v27 = vcombine.low %v1189_v29, %v1193_v3  ;;  %v4439_v29 = vld [vmem:[#allocation11 + $0x28] sm:$0x7]  ;;  %v4441_v3 = vld [vmem:[#allocation11 + $0x38] sm:$0x7] }
 0x3cd   :  { %v1065_v16 = vld [vmem:[#allocation8 + $0xb78] sm:$0xff] }
 0x3ce   :  { %4399 = vmatpush1.bf16.msra.mxu0 %v14473_v33  ;;  %v14418_v44 = vcombine.high %v1061_v15, %v1065_v16  ;;  %v1181_v23 = vld [vmem:[#allocation8 + $0xf18] sm:$0xff]  ;;  %v14417_v42 = vcombine.low %v1061_v15, %v1065_v16  ;;  %v4438_v15 = vld [vmem:[#allocation11 + $0x20] sm:$0x7] }
 0x3cf   :  { %4360 = vmatpush1.bf16.msra.mxu1 %v14337_v34  ;;  %4400 = vmatprep.subr.bf16.mxu0 %v14466_v35  ;;  %v1185_v25 = vld [vmem:[#allocation8 + $0xf38] sm:$0xff] }
 0x3d0   :  { %4361 = vmatprep.subr.bf16.mxu1 %v14330_v36  ;;  %v1053_v24 = vld [vmem:[#allocation8 + $0xb18] sm:$0xff]  ;;  %v14538_v33 = vcombine.high %v1181_v23, %v1185_v25  ;;  %v14537_v38 = vcombine.low %v1181_v23, %v1185_v25 }
 0x3d1   :  { %v1057_v26 = vld [vmem:[#allocation8 + $0xb38] sm:$0xff] }
 0x3d2   :  { %4401 = vmatpush1.bf16.msra.mxu0 %v14465_v41  ;;  %v14410_v34 = vcombine.high %v1053_v24, %v1057_v26  ;;  %v1173_v35 = vld [vmem:[#allocation8 + $0xed8] sm:$0xff]  ;;  %v14409_v39 = vcombine.low %v1053_v24, %v1057_v26  ;;  %v16947_v26 = vmov 0.0  }
 0x3d3   :  { %4362 = vmatpush1.bf16.msra.mxu1 %v14329_v45  ;;  %4402 = vmatprep.subr.bf16.mxu0 %v14458_v46  ;;  %v1177_v36 = vld [vmem:[#allocation8 + $0xef8] sm:$0xff] }
 0x3d4   :  { %4363 = vmatprep.subr.bf16.mxu1 %v14322_v48  ;;  %v1045_v37 = vld [vmem:[#allocation8 + $0xad8] sm:$0xff]  ;;  %v14530_v41 = vcombine.high %v1173_v35, %v1177_v36  ;;  %v14529_v51 = vcombine.low %v1173_v35, %v1177_v36 }
 0x3d5   :  { %v1049_v20 = vld [vmem:[#allocation8 + $0xaf8] sm:$0xff] }
 0x3d6   :  { %4403 = vmatpush1.bf16.msra.mxu0 %v14457_v54  ;;  %v14402_v45 = vcombine.high %v1045_v37, %v1049_v20  ;;  %v1165_v46 = vld [vmem:[#allocation8 + $0xe98] sm:$0xff]  ;;  %v14401_v52 = vcombine.low %v1045_v37, %v1049_v20 }
 0x3d7   :  { %4364 = vmatpush1.bf16.msra.mxu1 %v14321_v56  ;;  %4404 = vmatprep.subr.bf16.mxu0 %v14450_v57  ;;  %v1169_v48 = vld [vmem:[#allocation8 + $0xeb8] sm:$0xff] }
 0x3d8   :  { %4365 = vmatprep.subr.bf16.mxu1 %v14314_v58  ;;  %v1037_v49 = vld [vmem:[#allocation8 + $0xa98] sm:$0xff]  ;;  %v14522_v54 = vcombine.high %v1165_v46, %v1169_v48  ;;  %v14521_v4 = vcombine.low %v1165_v46, %v1169_v48 }
 0x3d9   :  { %v1041_v50 = vld [vmem:[#allocation8 + $0xab8] sm:$0xff] }
 0x3da   :  { %4405 = vmatpush1.bf16.msra.mxu0 %v14449_v28  ;;  %v14394_v56 = vcombine.high %v1037_v49, %v1041_v50  ;;  %v1157_v57 = vld [vmem:[#allocation8 + $0xe58] sm:$0xff]  ;;  %v14393_v5 = vcombine.low %v1037_v49, %v1041_v50  ;;  %v15913_v49 = vld [vmem:[#allocation14 + $0x8a4] ss:$48 sps:$4 sm:$0xff]  }
 0x3db   :  { %4366 = vmatpush1.bf16.msra.mxu1 %v14313_v6  ;;  %4406 = vmatprep.subr.bf16.mxu0 %v14442_v30  ;;  %v1161_v58 = vld [vmem:[#allocation8 + $0xe78] sm:$0xff]  ;;  %v15916_v50 = vld [vmem:[#allocation14 + $0x244] ss:$48 sps:$4 sm:$0xff]  }
 0x3dc   :  { %4367 = vmatprep.subr.bf16.mxu1 %v14434_v0  ;;  %v1029_v59 = vld [vmem:[#allocation8 + $0xa58] sm:$0xff]  ;;  %v14514_v28 = vcombine.high %v1157_v57, %v1161_v58  ;;  %v14513_v43 = vcombine.low %v1157_v57, %v1161_v58  ;;  %v15925_v57 = vld [vmem:[#allocation14 + $0x7e4] ss:$48 sps:$4 sm:$0xff]  }
 0x3dd   :  { %v1033_v60 = vld [vmem:[#allocation8 + $0xa78] sm:$0xff] }
 0x3de   :  { %4407 = vmatpush1.bf16.msra.mxu0 %v14441_v2  ;;  %v14386_v6 = vcombine.high %v1029_v59, %v1033_v60  ;;  %v1149_v30 = vld [vmem:[#allocation8 + $0xe18] sm:$0xff]  ;;  %v14385_v2 = vcombine.low %v1029_v59, %v1033_v60  ;;  %v15928_v60 = vld [vmem:[#allocation14 + $0x184] ss:$48 sps:$4 sm:$0xff]  }
 0x3df   :  { %4368 = vmatpush2.bf16.msra.mxu1 %v14433_v14  ;;  %14561 = vmatprep.subr.msk.bf16.mxu0 %vm3752_vm12, %v14554_v31  ;;  %v1153_v0 = vld [vmem:[#allocation8 + $0xe38] sm:$0xff] }
 0x3e0   :  { %4369 = vmatprep.subr.bf16.mxu1 %v14426_v63  ;;  %v1021_v7 = vld [vmem:[#allocation8 + $0xa18] sm:$0xff]  ;;  %v14506_v14 = vcombine.high %v1149_v30, %v1153_v0  ;;  %v14505_v53 = vcombine.low %v1149_v30, %v1153_v0  ;;  %v15937_v30 = vld [vmem:[#allocation14 + $0x724] ss:$48 sps:$4 sm:$0xff]  }
 0x3e1   :  { %v1025_v8 = vld [vmem:[#allocation8 + $0xa38] sm:$0xff] }
 0x3e2   :  { %4411 = vmatpush2.bf16.msra.mxu0 %v3772_v40  ;;  %v14378_v31 = vcombine.high %v1021_v7, %v1025_v8  ;;  %v14377_v63 = vcombine.low %v1021_v7, %v1025_v8  ;;  %v4440_v16 = vld [vmem:[#allocation11 + $0x30] sm:$0x7]  ;;  %v4434_v40 = vld [vmem:[#allocation11] sm:$0xff]  ;;  %v15940_v8 = vld [vmem:[#allocation14 + $0xc4] ss:$48 sps:$4 sm:$0xff]  }
 0x3e3   :  { %4370 = vmatpush2.bf16.msra.mxu1 %v14425_v17  ;;  %4412 = vmatprep.subr.bf16.mxu0 %v14546_v19  ;;  %v4435_v17 = vld [vmem:[#allocation11 + $0x8] sm:$0xff]  ;;  %v4437_v19 = vld [vmem:[#allocation11 + $0x18] sm:$0xff]  ;;  %v4436_v25 = vld [vmem:[#allocation11 + $0x10] sm:$0xff] }
 0x3e4   :  { %4371 = vmatprep.subr.bf16.mxu1 %v14418_v44  ;;  %v17323_v44 = vld [vmem:[#allocation10] sm:$0xff]  ;;  %v15911_v46 = vld [vmem:[#allocation14 + $0x8a0] ss:$48 sps:$4 sm:$0xff]  }
 0x3e5   :  { %v1227_v23 = vrot.slane %v17323_v44, %v17243_v55  ;;  %v1231_v24 = vrot.slane %v17323_v44, %v17205_v21  ;;  %v15920_v58 = vld [vmem:[#allocation14 + $0x1e0] ss:$48 sps:$4 sm:$0xff]  }
 0x3e6   :  { %4413 = vmatpush2.bf16.msra.mxu0 %v14545_v27  ;;  %v15923_v59 = vld [vmem:[#allocation14 + $0x7e0] ss:$48 sps:$4 sm:$0xff]  }
 0x3e7   :  { %4372 = vmatpush2.bf16.msra.mxu1 %v14417_v42  ;;  %4414 = vmatprep.subr.bf16.mxu0 %v14538_v33  ;;  %v4433_v42 = vld [vmem:[#allocation2] sm:$0xff]  ;;  %v15932_v0 = vld [vmem:[#allocation14 + $0x120] ss:$48 sps:$4 sm:$0xff]  }
 0x3e8   :  { %4373 = vmatprep.subr.bf16.mxu1 %v14410_v34  ;;  %v15935_v7 = vld [vmem:[#allocation14 + $0x720] ss:$48 sps:$4 sm:$0xff]  }
 0x3ea   :  { %4415 = vmatpush2.bf16.msra.mxu0 %v14537_v38 }
 0x3eb   :  { %4374 = vmatpush2.bf16.msra.mxu1 %v14409_v39  ;;  %4416 = vmatprep.subr.bf16.mxu0 %v14530_v41  ;;  %v15908_v41 = vld [vmem:[#allocation14 + $0x2a0] ss:$48 sps:$4 sm:$0xff]  }
 0x3ec   :  { %4375 = vmatprep.subr.bf16.mxu1 %v14402_v45  ;;  %v15910_v45 = vld [vmem:[#allocation14 + $0x2a4] ss:$48 sps:$4 sm:$0xff]  }
 0x3ee   :  { %4417 = vmatpush2.bf16.msra.mxu0 %v14529_v51  ;;  %v15919_v51 = vld [vmem:[#allocation14 + $0x844] ss:$48 sps:$4 sm:$0xff]  }
 0x3ef   :  { %4376 = vmatpush2.bf16.msra.mxu1 %v14401_v52  ;;  %4418 = vmatprep.subr.bf16.mxu0 %v14522_v54  ;;  %v15914_v52 = vld [vmem:[#allocation14 + $0x240] ss:$48 sps:$4 sm:$0xff]  }
 0x3f0   :  { %4377 = vmatprep.subr.bf16.mxu1 %v14394_v56  ;;  %v15917_v54 = vld [vmem:[#allocation14 + $0x840] ss:$48 sps:$4 sm:$0xff]   ;;  %v15922_v56 = vld [vmem:[#allocation14 + $0x1e4] ss:$48 sps:$4 sm:$0xff]  }
 0x3f2   :  { %4419 = vmatpush2.bf16.msra.mxu0 %v14521_v4  ;;  %v15931_v4 = vld [vmem:[#allocation14 + $0x784] ss:$48 sps:$4 sm:$0xff]  }
 0x3f3   :  { %4378 = vmatpush2.bf16.msra.mxu1 %v14393_v5  ;;  %4420 = vmatprep.subr.bf16.mxu0 %v14514_v28  ;;  %v15926_v5 = vld [vmem:[#allocation14 + $0x180] ss:$48 sps:$4 sm:$0xff]  }
 0x3f4   :  { %4379 = vmatprep.subr.bf16.mxu1 %v14386_v6  ;;  %v15929_v28 = vld [vmem:[#allocation14 + $0x780] ss:$48 sps:$4 sm:$0xff]   ;;  %v15934_v6 = vld [vmem:[#allocation14 + $0x124] ss:$48 sps:$4 sm:$0xff]  }
 0x3f6   :  { %4421 = vmatpush2.bf16.msra.mxu0 %v14513_v43  ;;  %v15943_v43 = vld [vmem:[#allocation14 + $0x6c4] ss:$48 sps:$4 sm:$0xff]  }
 0x3f7   :  { %4380 = vmatpush2.bf16.msra.mxu1 %v14385_v2  ;;  %4422 = vmatprep.subr.bf16.mxu0 %v14506_v14  ;;  %v15938_v2 = vld [vmem:[#allocation14 + $0xc0] ss:$48 sps:$4 sm:$0xff]  }
 0x3f8   :  { %4381 = vmatprep.subr.bf16.mxu1 %v14378_v31  ;;  %v15941_v14 = vld [vmem:[#allocation14 + $0x6c0] ss:$48 sps:$4 sm:$0xff]   ;;  %v15946_v31 = vld [vmem:[#allocation14 + $0x64] ss:$48 sps:$4 sm:$0xff]  }
 0x3fa   :  { %4423 = vmatpush2.bf16.msra.mxu0 %v14505_v53  ;;  %v15949_v53 = vld [vmem:[#allocation14 + $0x664] ss:$48 sps:$4 sm:$0xff]  }
 0x3fb   :  { %4382 = vmatpush2.bf16.msra.mxu1 %v14377_v63  ;;  %14563 = vmatprep.subr.msk.mxu0 %vm299_vm0, %v4439_v29  ;;  %v15944_v63 = vld [vmem:[#allocation14 + $0x60] ss:$48 sps:$4 sm:$0xff]  }
 0x3fc   :  { %14566 = vmatprep.subr.msk.mxu1 %vm299_vm0, %v4441_v3  ;;  %v15947_v29 = vld [vmem:[#allocation14 + $0x660] ss:$48 sps:$4 sm:$0xff]   ;;  %v15952_v3 = vld [vmem:[#allocation14 + $0x4] ss:$48 sps:$4 sm:$0xff]  }
 0x3fd   :  { %4425 = vmatmul.mubr.bf16.vlgmr.msra.gmra.mxu0 %v17251_v18 }
 0x3fe   :  { %4384 = vmatmul.mubr.bf16.vlgmr.msra.gmra.mxu1 %v17254_v32  ;;  %14564 = vmatpush1.msk.msra.mxu0 %vm299_vm0, %v4438_v15  ;;  %v15955_v15 = vld [vmem:[#allocation14 + $0x604] ss:$48 sps:$4 sm:$0xff]  }
 0x3ff   :  { %14567 = vmatpush1.msk.msra.mxu1 %vm299_vm0, %v4440_v16  ;;  %4510 = vmatprep.subr.mxu0 %v4435_v17  ;;  %v15950_v16 = vld [vmem:[#allocation14] ss:$48 sps:$4 sm:$0xff]  }
 0x400   :  { %4511 = vmatpush1.msra.mxu0 %v4434_v40  ;;  %4581 = vmatprep.subr.mxu1 %v4437_v19  ;;  %v15953_v17 = vld [vmem:[#allocation14 + $0x600] ss:$48 sps:$4 sm:$0xff]   ;;  %v15958_v40 = vld [vmem:[#allocation14 + $0x5a4] ss:$48 sps:$4 sm:$0xff]  }
 0x401   :  { %v4139_v18 = vpop.f32.mrf.mxu0  ;;  %4544 = vmatprep.mubr.f32.mxu0 %v16947_v26  ;;  %4582 = vmatpush1.msra.mxu1 %v4436_v25  ;;  %v15961_v19 = vld [vmem:[#allocation14 + $0xba4] ss:$48 sps:$4 sm:$0xff]   ;;  %v15959_v25 = vld [vmem:[#allocation14 + $0xba0] ss:$48 sps:$4 sm:$0xff]  }
 0x402   :  { %v4140_v32 = vadd.f32 %v4139_v18, %v1227_v23  ;;  %v4180_v27 = vpop.f32.mrf.mxu1  ;;  %4615 = vmatprep.mubr.f32.mxu1 %v16947_v26  ;;  %6994 = vmatprep.subr.bf16.mxu0 %v15910_v45  ;;  %v15956_v23 = vld [vmem:[#allocation14 + $0x5a0] ss:$48 sps:$4 sm:$0xff]   ;;  %v15967_v18 = vld [vmem:[#allocation14 + $0xb44] ss:$48 sps:$4 sm:$0xff]  }
 0x403   :  { %v4141_v33 = vpop.f32.mrf.mxu0  ;;  %7035 = vmatprep.subr.bf16.mxu1 %v15913_v49  ;;  %v15962_v26 = vld [vmem:[#allocation14 + $0x540] ss:$48 sps:$4 sm:$0xff]   ;;  %v15985_v45 = vld [vmem:[#allocation14 + $0xa24] ss:$48 sps:$4 sm:$0xff]  }
 0x404   :  { %v17330_v34 = vadd.f32 %v4180_v27, %v4140_v32  ;;  %v4142_v35 = vadd.f32 %v4141_v33, %v1231_v24  ;;  %v4182_v36 = vpop.f32.mrf.mxu1  ;;  %v15964_v24 = vld [vmem:[#allocation14 + $0x544] ss:$48 sps:$4 sm:$0xff]   ;;  %v15965_v32 = vld [vmem:[#allocation14 + $0xb40] ss:$48 sps:$4 sm:$0xff]  }
 0x405   :  { %v4143_v37 = vpop.f32.mrf.mxu0  ;;  %14565 = vmatmul.mubr.msk.f32.vlgmr.msra.gmra.mxu0 %vm4464_vm13, %v4433_v42  ;;  %v15970_v27 = vld [vmem:[#allocation14 + $0x4e4] ss:$48 sps:$4 sm:$0xff]   ;;  %v15968_v33 = vld [vmem:[#allocation14 + $0x4e0] ss:$48 sps:$4 sm:$0xff]  }
 0x406   :  { %v17332_v20 = vadd.f32 %v4182_v36, %v4142_v35  ;;  %v4184_v38 = vpop.f32.mrf.mxu1  ;;  %14568 = vmatmul.mubr.msk.f32.vlgmr.msra.gmra.mxu1 %vm4464_vm13, %v4433_v42  ;;  %6995 = vmatpush1.bf16.msra.mxu0 %v15908_v41  ;;  %v15973_v42 = vld [vmem:[#allocation14 + $0xae4] ss:$48 sps:$4 sm:$0xff]   ;;  %v15971_v35 = vld [vmem:[#allocation14 + $0xae0] ss:$48 sps:$4 sm:$0xff]  }
 0x407   :  { %v4144_v39 = vpop.f32.mrf.mxu0  ;;  %7036 = vmatpush1.bf16.msra.mxu1 %v15911_v46  ;;  %6996 = vmatprep.subr.bf16.mxu0 %v15916_v50  ;;  %v15976_v36 = vld [vmem:[#allocation14 + $0x484] ss:$48 sps:$4 sm:$0xff]   ;;  %v15974_v38 = vld [vmem:[#allocation14 + $0x480] ss:$48 sps:$4 sm:$0xff]  }
 0x408   :  { %v4185_v48 = vpop.f32.mrf.mxu1  ;;  %7037 = vmatprep.subr.bf16.mxu1 %v15919_v51  ;;  %v15979_v37 = vld [vmem:[#allocation14 + $0xa84] ss:$48 sps:$4 sm:$0xff]   ;;  %v15977_v39 = vld [vmem:[#allocation14 + $0xa80] ss:$48 sps:$4 sm:$0xff]  }
 0x409   :  { %v15982_v41 = vld [vmem:[#allocation14 + $0x424] ss:$48 sps:$4 sm:$0xff]   ;;  %v15980_v46 = vld [vmem:[#allocation14 + $0x420] ss:$48 sps:$4 sm:$0xff]  }
 0x40a   :  { %6997 = vmatpush1.bf16.msra.mxu0 %v15914_v52  ;;  %v15983_v48 = vld [vmem:[#allocation14 + $0xa20] ss:$48 sps:$4 sm:$0xff]   ;;  %v15988_v51 = vld [vmem:[#allocation14 + $0x3c4] ss:$48 sps:$4 sm:$0xff]  }
 0x40b   :  { %7038 = vmatpush1.bf16.msra.mxu1 %v15917_v54  ;;  %6998 = vmatprep.subr.bf16.mxu0 %v15922_v56  ;;  %v15991_v52 = vld [vmem:[#allocation14 + $0x9c4] ss:$48 sps:$4 sm:$0xff]   ;;  %v15986_v56 = vld [vmem:[#allocation14 + $0x3c0] ss:$48 sps:$4 sm:$0xff]  }
 0x40c   :  { %7039 = vmatprep.subr.bf16.mxu1 %v15925_v57  ;;  %v15989_v57 = vld [vmem:[#allocation14 + $0x9c0] ss:$48 sps:$4 sm:$0xff]  }
 0x40e   :  { %6999 = vmatpush1.bf16.msra.mxu0 %v15920_v58 }
 0x40f   :  { %7040 = vmatpush1.bf16.msra.mxu1 %v15923_v59  ;;  %7000 = vmatprep.subr.bf16.mxu0 %v15928_v60 }
 0x410   :  { %7041 = vmatprep.subr.bf16.mxu1 %v15931_v4 }
 0x412   :  { %7001 = vmatpush1.bf16.msra.mxu0 %v15926_v5 }
 0x413   :  { %7042 = vmatpush1.bf16.msra.mxu1 %v15929_v28  ;;  %7002 = vmatprep.subr.bf16.mxu0 %v15934_v6  ;;  %v15992_v6 = vld [vmem:[#allocation14 + $0x360] ss:$48 sps:$4 sm:$0xff]  }
 0x414   :  { %7043 = vmatprep.subr.bf16.mxu1 %v15937_v30  ;;  %v15994_v30 = vld [vmem:[#allocation14 + $0x364] ss:$48 sps:$4 sm:$0xff]  }
 0x416   :  { %7003 = vmatpush1.bf16.msra.mxu0 %v15932_v0  ;;  %v15995_v0 = vld [vmem:[#allocation14 + $0x960] ss:$48 sps:$4 sm:$0xff]  }
 0x417   :  { %7044 = vmatpush1.bf16.msra.mxu1 %v15935_v7  ;;  %7004 = vmatprep.subr.bf16.mxu0 %v15940_v8  ;;  %v15997_v8 = vld [vmem:[#allocation14 + $0x964] ss:$48 sps:$4 sm:$0xff]  }
 0x418   :  { %7045 = vmatprep.subr.bf16.mxu1 %v15943_v43 }
 0x41a   :  { %7005 = vmatpush1.bf16.msra.mxu0 %v15938_v2  ;;  %v16000_v2 = vld [vmem:[#allocation14 + $0x304] ss:$48 sps:$4 sm:$0xff]  }
 0x41b   :  { %7046 = vmatpush1.bf16.msra.mxu1 %v15941_v14  ;;  %7006 = vmatprep.subr.bf16.mxu0 %v15946_v31  ;;  %v16003_v14 = vld [vmem:[#allocation14 + $0x904] ss:$48 sps:$4 sm:$0xff]   ;;  %v15998_v31 = vld [vmem:[#allocation14 + $0x300] ss:$48 sps:$4 sm:$0xff]  }
 0x41c   :  { %7047 = vmatprep.subr.bf16.mxu1 %v15949_v53  ;;  %v16001_v53 = vld [vmem:[#allocation14 + $0x900] ss:$48 sps:$4 sm:$0xff]  }
 0x41e   :  { %7007 = vmatpush1.bf16.msra.mxu0 %v15944_v63  ;;  %v16009_v63 = vld [vmem:[#allocation14 + $0x8ac] ss:$48 sps:$4 sm:$0xff]  }
 0x41f   :  { %7048 = vmatpush1.bf16.msra.mxu1 %v15947_v29  ;;  %7008 = vmatprep.subr.bf16.mxu0 %v15952_v3  ;;  %v1235_v29 = vrot.slane %v17323_v44, %v17240_v47 }
 0x420   :  { %7049 = vmatprep.subr.bf16.mxu1 %v15955_v15  ;;  %v1239_v15 = vrot.slane %v17323_v44, %v17208_v22 }
 0x422   :  { %7009 = vmatpush1.bf16.msra.mxu0 %v15950_v16 }
 0x423   :  { %7050 = vmatpush1.bf16.msra.mxu1 %v15953_v17  ;;  %7010 = vmatprep.subr.bf16.mxu0 %v15958_v40 }
 0x424   :  { %7051 = vmatprep.subr.bf16.mxu1 %v15961_v19 }
 0x426   :  { %7011 = vmatpush2.bf16.msra.mxu0 %v15956_v23 }
 0x427   :  { %7052 = vmatpush2.bf16.msra.mxu1 %v15959_v25  ;;  %7012 = vmatprep.subr.bf16.mxu0 %v15964_v24 }
 0x428   :  { %7053 = vmatprep.subr.bf16.mxu1 %v15967_v18 }
 0x42a   :  { %7013 = vmatpush2.bf16.msra.mxu0 %v15962_v26 }
 0x42b   :  { %7054 = vmatpush2.bf16.msra.mxu1 %v15965_v32  ;;  %7014 = vmatprep.subr.bf16.mxu0 %v15970_v27 }
 0x42c   :  { %7055 = vmatprep.subr.bf16.mxu1 %v15973_v42 }
 0x42e   :  { %7015 = vmatpush2.bf16.msra.mxu0 %v15968_v33 }
 0x42f   :  { %7056 = vmatpush2.bf16.msra.mxu1 %v15971_v35  ;;  %7016 = vmatprep.subr.bf16.mxu0 %v15976_v36 }
 0x430   :  { %7057 = vmatprep.subr.bf16.mxu1 %v15979_v37 }
 0x432   :  { %7017 = vmatpush2.bf16.msra.mxu0 %v15974_v38  ;;  %v4442_v38 = vld [vmem:[#allocation13] sm:$0xf] }
 0x433   :  { %7058 = vmatpush2.bf16.msra.mxu1 %v15977_v39  ;;  %7018 = vmatprep.subr.bf16.mxu0 %v15982_v41 }
 0x434   :  { %7059 = vmatprep.subr.bf16.mxu1 %v15985_v45 }
 0x436   :  { %7019 = vmatpush2.bf16.msra.mxu0 %v15980_v46 }
 0x437   :  { %7060 = vmatpush2.bf16.msra.mxu1 %v15983_v48  ;;  %7020 = vmatprep.subr.bf16.mxu0 %v15988_v51 }
 0x438   :  { %7061 = vmatprep.subr.bf16.mxu1 %v15991_v52  ;;  %v4451_v52 = vrot.slane %v4442_v38, %v17189_v11 }
 0x43a   :  { %7021 = vmatpush2.bf16.msra.mxu0 %v15986_v56  ;;  %v4459_v56 = vrot.slane %v4442_v38, %v17192_v12 }
 0x43b   :  { %7062 = vmatpush2.bf16.msra.mxu1 %v15989_v57  ;;  %7022 = vmatprep.subr.bf16.mxu0 %v15994_v30 }
 0x43c   :  { %7063 = vmatprep.subr.bf16.mxu1 %v15997_v8 }
 0x43e   :  { %v4262_v49 = vpop.f32.mrf.mxu1  ;;  %7023 = vmatpush2.bf16.msra.mxu0 %v15992_v6 }
 0x43f   :  { %7064 = vmatpush2.bf16.msra.mxu1 %v15995_v0  ;;  %7024 = vmatprep.subr.bf16.mxu0 %v16000_v2  ;;  %v16007_v2 = vld [vmem:[#allocation14 + $0x8a8] ss:$48 sps:$4 sm:$0xff]  }
 0x440   :  { %v4264_v50 = vpop.f32.mrf.mxu1  ;;  %7065 = vmatprep.subr.bf16.mxu1 %v16003_v14  ;;  %v16012_v14 = vld [vmem:[#allocation14 + $0x24c] ss:$48 sps:$4 sm:$0xff]  }
 0x441   :  { %v4221_v54 = vpop.f32.mrf.mxu0 }
 0x442   :  { %v4222_v58 = vadd.f32 %v4221_v54, %v17330_v34  ;;  %v4266_v59 = vpop.f32.mrf.mxu1  ;;  %7025 = vmatpush2.bf16.msra.mxu0 %v15998_v31  ;;  %v16015_v31 = vld [vmem:[#allocation14 + $0x84c] ss:$48 sps:$4 sm:$0xff]  }
 0x443   :  { %v4223_v60 = vpop.f32.mrf.mxu0  ;;  %7066 = vmatpush2.bf16.msra.mxu1 %v16001_v53  ;;  %v16010_v53 = vld [vmem:[#allocation14 + $0x248] ss:$48 sps:$4 sm:$0xff]  }
 0x444   :  { %v17335_v4 = vadd.f32 %v4262_v49, %v4222_v58  ;;  %v4224_v5 = vadd.f32 %v4223_v60, %v17332_v20  ;;  %v4267_v28 = vpop.f32.mrf.mxu1  ;;  %v16006_v20 = vld [vmem:[#allocation14 + $0x2ac] ss:$48 sps:$4 sm:$0xff]   ;;  %7117 = vmatprep.subr.bf16.mxu1 %v16009_v63  ;;  %v4447_v49 = vrot.slane %v4442_v38, %v17183_v9 }
 0x445   :  { %v4225_v7 = vpop.f32.mrf.mxu0  ;;  %7076 = vmatprep.subr.bf16.mxu0 %v16006_v20  ;;  %v16013_v20 = vld [vmem:[#allocation14 + $0x848] ss:$48 sps:$4 sm:$0xff]   ;;  %v16018_v63 = vld [vmem:[#allocation14 + $0x1ec] ss:$48 sps:$4 sm:$0xff]  }
 0x446   :  { %v17338_v43 = vadd.f32 %v4264_v50, %v4224_v5  ;;  %v4455_v50 = vrot.slane %v4442_v38, %v17186_v10  ;;  %v16004_v7 = vld [vmem:[#allocation14 + $0x2a8] ss:$48 sps:$4 sm:$0xff]   ;;  %v16048_v38 = vld [vmem:[#allocation14 + $0xc] ss:$48 sps:$4 sm:$0xff]  }
 0x447   :  { %v4226_v34 = vpop.f32.mrf.mxu0 }
 0x47e   :  { %v4303_v3 = vpop.f32.mrf.mxu1 }
 0x47f   :  { %v4304_v16 = vadd.f32 %v4303_v3, %v1235_v29  ;;  %v16021_v29 = vld [vmem:[#allocation14 + $0x7ec] ss:$48 sps:$4 sm:$0xff]   ;;  %v16016_v3 = vld [vmem:[#allocation14 + $0x1e8] ss:$48 sps:$4 sm:$0xff]  }
 0x480   :  { %v4305_v17 = vpop.f32.mrf.mxu1 }
 0x481   :  { %v4344_v40 = vpop.f32.mrf.mxu0  ;;  %v4306_v19 = vadd.f32 %v4305_v17, %v1239_v15  ;;  %v16019_v15 = vld [vmem:[#allocation14 + $0x7e8] ss:$48 sps:$4 sm:$0xff]   ;;  %v16027_v17 = vld [vmem:[#allocation14 + $0x78c] ss:$48 sps:$4 sm:$0xff]  }
 0x482   :  { %v4307_v23 = vpop.f32.mrf.mxu1  ;;  %v4345_v25 = vadd.f32 %v4344_v40, %v4304_v16  ;;  %v16024_v16 = vld [vmem:[#allocation14 + $0x18c] ss:$48 sps:$4 sm:$0xff]   ;;  %v16022_v40 = vld [vmem:[#allocation14 + $0x188] ss:$48 sps:$4 sm:$0xff]  }
 0x483   :  { %v4346_v24 = vpop.f32.mrf.mxu0  ;;  %v16030_v23 = vld [vmem:[#allocation14 + $0x12c] ss:$48 sps:$4 sm:$0xff]  }
 0x484   :  { %v4308_v18 = vpop.f32.mrf.mxu1  ;;  %v4347_v26 = vadd.f32 %v4346_v24, %v4306_v19  ;;  %v16025_v19 = vld [vmem:[#allocation14 + $0x788] ss:$48 sps:$4 sm:$0xff]  }
 0x485   :  { %v4348_v32 = vpop.f32.mrf.mxu0  ;;  %v16028_v24 = vld [vmem:[#allocation14 + $0x128] ss:$48 sps:$4 sm:$0xff]  }
 0x486   :  { %v16031_v18 = vld [vmem:[#allocation14 + $0x728] ss:$48 sps:$4 sm:$0xff]   ;;  %v16039_v32 = vld [vmem:[#allocation14 + $0x6cc] ss:$48 sps:$4 sm:$0xff]  }
 0x487   :  { %v4349_v27 = vpop.f32.mrf.mxu0 }
 0x488   :  { %v16034_v27 = vld [vmem:[#allocation14 + $0xc8] ss:$48 sps:$4 sm:$0xff]  }
 0x4bd   :  { %v4426_v42 = vpop.f32.mrf.mxu0 }
 0x4be   :  { %v4385_v33 = vpop.f32.mrf.mxu1 }
 0x4bf   :  { %v4386_v35 = vadd.f32 %v4385_v33, %v4345_v25  ;;  %v4428_v36 = vpop.f32.mrf.mxu0  ;;  %v16033_v25 = vld [vmem:[#allocation14 + $0x72c] ss:$48 sps:$4 sm:$0xff]  }
 0x4c0   :  { %v4387_v37 = vpop.f32.mrf.mxu1  ;;  %v16042_v33 = vld [vmem:[#allocation14 + $0x6c] ss:$48 sps:$4 sm:$0xff]  }
 0x4c1   :  { %v17344_v39 = vadd.f32 %v4426_v42, %v4386_v35  ;;  %v4388_v44 = vadd.f32 %v4387_v37, %v4347_v26  ;;  %v4430_v41 = vpop.f32.mrf.mxu0  ;;  %v16036_v26 = vld [vmem:[#allocation14 + $0xcc] ss:$48 sps:$4 sm:$0xff]   ;;  %v16037_v42 = vld [vmem:[#allocation14 + $0x6c8] ss:$48 sps:$4 sm:$0xff]  }
 0x4c2   :  { %v4389_v45 = vpop.f32.mrf.mxu1  ;;  %v16045_v35 = vld [vmem:[#allocation14 + $0x66c] ss:$48 sps:$4 sm:$0xff]   ;;  %v16043_v37 = vld [vmem:[#allocation14 + $0x668] ss:$48 sps:$4 sm:$0xff]  }
 0x4c3   :  { %v17346_v46 = vadd.f32 %v4428_v36, %v4388_v44  ;;  %v4431_v48 = vpop.f32.mrf.mxu0  ;;  %v16040_v36 = vld [vmem:[#allocation14 + $0x68] ss:$48 sps:$4 sm:$0xff]   ;;  %v16051_v44 = vld [vmem:[#allocation14 + $0x60c] ss:$48 sps:$4 sm:$0xff]  }
 0x4c4   :  { %v4390_v51 = vpop.f32.mrf.mxu1  ;;  %v16046_v41 = vld [vmem:[#allocation14 + $0x8] ss:$48 sps:$4 sm:$0xff]   ;;  %v16054_v48 = vld [vmem:[#allocation14 + $0x5ac] ss:$48 sps:$4 sm:$0xff]  }
 0x4c5   :  { %v4546_v54 = vpop.f32.mrf.mxu0  ;;  %v16049_v45 = vld [vmem:[#allocation14 + $0x608] ss:$48 sps:$4 sm:$0xff]  }
 0x4c6   :  { %v4617_v57 = vpop.f32.mrf.mxu1  ;;  %v4547_v58 = vadd.f32 %v4546_v54, %v4447_v49  ;;  %v16057_v49 = vld [vmem:[#allocation14 + $0xbac] ss:$48 sps:$4 sm:$0xff]   ;;  %v16055_v51 = vld [vmem:[#allocation14 + $0xba8] ss:$48 sps:$4 sm:$0xff]  }
 0x4c7   :  { %v4618_v59 = vadd.f32 %v4617_v57, %v4455_v50  ;;  %v4548_v60 = vpop.f32.mrf.mxu0  ;;  %v16052_v50 = vld [vmem:[#allocation14 + $0x5a8] ss:$48 sps:$4 sm:$0xff]   ;;  %v16063_v54 = vld [vmem:[#allocation14 + $0xb4c] ss:$48 sps:$4 sm:$0xff]  }
 0x4c8   :  { %v4549_v5 = vadd.f32 %v4548_v60, %v4451_v52  ;;  %v4619_v28 = vpop.f32.mrf.mxu1  ;;  %v17356_v8 = vpack.c.bf16 %v4547_v58, %v4547_v58  ;;  %v16060_v52 = vld [vmem:[#allocation14 + $0x54c] ss:$48 sps:$4 sm:$0xff]   ;;  %v16061_v57 = vld [vmem:[#allocation14 + $0xb48] ss:$48 sps:$4 sm:$0xff]  }
 0x4c9   :  { %v4620_v6 = vadd.f32 %v4619_v28, %v4459_v56  ;;  %v17352_v30 = vpack.c.bf16 %v4618_v59, %v4618_v59  ;;  %v16058_v56 = vld [vmem:[#allocation14 + $0x548] ss:$48 sps:$4 sm:$0xff]   ;;  %v16066_v58 = vld [vmem:[#allocation14 + $0x4ec] ss:$48 sps:$4 sm:$0xff]  }
 0x4ca   :  { %v17354_v0 = vpack.c.bf16 %v4549_v5, %v4549_v5  ;;  %v16069_v59 = vld [vmem:[#allocation14 + $0xaec] ss:$48 sps:$4 sm:$0xff]   ;;  %v16064_v60 = vld [vmem:[#allocation14 + $0x4e8] ss:$48 sps:$4 sm:$0xff]  }
 0x4cb   :  { %v17358_v34 = vpack.c.bf16 %v4620_v6, %v4620_v6  ;;  %v16067_v5 = vld [vmem:[#allocation14 + $0xae8] ss:$48 sps:$4 sm:$0xff]   ;;  %v16072_v28 = vld [vmem:[#allocation14 + $0x48c] ss:$48 sps:$4 sm:$0xff]  }
 0x4cc   :  { %7026 = vmatprep.mubr.bf16.mxu0 %v17354_v0  ;;  %v16075_v6 = vld [vmem:[#allocation14 + $0xa8c] ss:$48 sps:$4 sm:$0xff]  }
 0x4cd   :  { %7067 = vmatprep.mubr.bf16.mxu1 %v17358_v34  ;;  %7027 = vmatmul.mubr.bf16.vlgmr.msra.gmra.mxu0 %v17356_v8 }
 0x4ce   :  { %7068 = vmatmul.mubr.bf16.vlgmr.msra.gmra.mxu1 %v17352_v30  ;;  %7077 = vmatpush1.bf16.msra.mxu0 %v16004_v7  ;;  %v16070_v7 = vld [vmem:[#allocation14 + $0x488] ss:$48 sps:$4 sm:$0xff]  }
 0x4cf   :  { %7118 = vmatpush1.bf16.msra.mxu1 %v16007_v2  ;;  %7108 = vmatprep.mubr.bf16.mxu0 %v17354_v0  ;;  %v16073_v2 = vld [vmem:[#allocation14 + $0xa88] ss:$48 sps:$4 sm:$0xff]  }
 0x4d0   :  { %7149 = vmatprep.mubr.bf16.mxu1 %v17358_v34  ;;  %7078 = vmatprep.subr.bf16.mxu0 %v16012_v14  ;;  %v16078_v14 = vld [vmem:[#allocation14 + $0x42c] ss:$48 sps:$4 sm:$0xff]  }
 0x4d1   :  { %7119 = vmatprep.subr.bf16.mxu1 %v16015_v31  ;;  %v16081_v31 = vld [vmem:[#allocation14 + $0xa2c] ss:$48 sps:$4 sm:$0xff]  }
 0x4d2   :  { %7079 = vmatpush1.bf16.msra.mxu0 %v16010_v53  ;;  %v16076_v53 = vld [vmem:[#allocation14 + $0x428] ss:$48 sps:$4 sm:$0xff]  }
 0x4d3   :  { %7120 = vmatpush1.bf16.msra.mxu1 %v16013_v20  ;;  %7080 = vmatprep.subr.bf16.mxu0 %v16018_v63  ;;  %v16079_v20 = vld [vmem:[#allocation14 + $0xa28] ss:$48 sps:$4 sm:$0xff]   ;;  %v16084_v63 = vld [vmem:[#allocation14 + $0x3cc] ss:$48 sps:$4 sm:$0xff]  }
 0x4d4   :  { %7121 = vmatprep.subr.bf16.mxu1 %v16021_v29  ;;  %v16087_v29 = vld [vmem:[#allocation14 + $0x9cc] ss:$48 sps:$4 sm:$0xff]  }
 0x4d6   :  { %7081 = vmatpush1.bf16.msra.mxu0 %v16016_v3  ;;  %v16082_v3 = vld [vmem:[#allocation14 + $0x3c8] ss:$48 sps:$4 sm:$0xff]  }
 0x4d7   :  { %7122 = vmatpush1.bf16.msra.mxu1 %v16019_v15  ;;  %7082 = vmatprep.subr.bf16.mxu0 %v16024_v16  ;;  %v16085_v15 = vld [vmem:[#allocation14 + $0x9c8] ss:$48 sps:$4 sm:$0xff]   ;;  %v16090_v16 = vld [vmem:[#allocation14 + $0x36c] ss:$48 sps:$4 sm:$0xff]  }
 0x4d8   :  { %7123 = vmatprep.subr.bf16.mxu1 %v16027_v17  ;;  %v16093_v17 = vld [vmem:[#allocation14 + $0x96c] ss:$48 sps:$4 sm:$0xff]  }
 0x4da   :  { %7083 = vmatpush1.bf16.msra.mxu0 %v16022_v40  ;;  %v16088_v40 = vld [vmem:[#allocation14 + $0x368] ss:$48 sps:$4 sm:$0xff]  }
 0x4db   :  { %7124 = vmatpush1.bf16.msra.mxu1 %v16025_v19  ;;  %7084 = vmatprep.subr.bf16.mxu0 %v16030_v23  ;;  %v16091_v19 = vld [vmem:[#allocation14 + $0x968] ss:$48 sps:$4 sm:$0xff]   ;;  %v16096_v23 = vld [vmem:[#allocation14 + $0x30c] ss:$48 sps:$4 sm:$0xff]  }
 0x4dc   :  { %7125 = vmatprep.subr.bf16.mxu1 %v16033_v25  ;;  %v16099_v25 = vld [vmem:[#allocation14 + $0x90c] ss:$48 sps:$4 sm:$0xff]  }
 0x4de   :  { %7085 = vmatpush1.bf16.msra.mxu0 %v16028_v24  ;;  %v16094_v24 = vld [vmem:[#allocation14 + $0x308] ss:$48 sps:$4 sm:$0xff]  }
 0x4df   :  { %7126 = vmatpush1.bf16.msra.mxu1 %v16031_v18  ;;  %7086 = vmatprep.subr.bf16.mxu0 %v16036_v26  ;;  %v16097_v18 = vld [vmem:[#allocation14 + $0x908] ss:$48 sps:$4 sm:$0xff]   ;;  %v16102_v26 = vld [vmem:[#allocation14 + $0x2b4] ss:$48 sps:$4 sm:$0xff]  }
 0x4e0   :  { %7127 = vmatprep.subr.bf16.mxu1 %v16039_v32  ;;  %v16105_v32 = vld [vmem:[#allocation14 + $0x8b4] ss:$48 sps:$4 sm:$0xff]  }
 0x4e2   :  { %7087 = vmatpush1.bf16.msra.mxu0 %v16034_v27  ;;  %v16100_v27 = vld [vmem:[#allocation14 + $0x2b0] ss:$48 sps:$4 sm:$0xff]  }
 0x4e3   :  { %7128 = vmatpush1.bf16.msra.mxu1 %v16037_v42  ;;  %7088 = vmatprep.subr.bf16.mxu0 %v16042_v33  ;;  %v16103_v42 = vld [vmem:[#allocation14 + $0x8b0] ss:$48 sps:$4 sm:$0xff]   ;;  %v16108_v33 = vld [vmem:[#allocation14 + $0x254] ss:$48 sps:$4 sm:$0xff]  }
 0x4e4   :  { %7129 = vmatprep.subr.bf16.mxu1 %v16045_v35  ;;  %v16111_v35 = vld [vmem:[#allocation14 + $0x854] ss:$48 sps:$4 sm:$0xff]  }
 0x4e6   :  { %7089 = vmatpush1.bf16.msra.mxu0 %v16040_v36  ;;  %v16106_v36 = vld [vmem:[#allocation14 + $0x250] ss:$48 sps:$4 sm:$0xff]  }
 0x4e7   :  { %7130 = vmatpush1.bf16.msra.mxu1 %v16043_v37  ;;  %7090 = vmatprep.subr.bf16.mxu0 %v16048_v38  ;;  %v16109_v37 = vld [vmem:[#allocation14 + $0x850] ss:$48 sps:$4 sm:$0xff]   ;;  %v16114_v38 = vld [vmem:[#allocation14 + $0x1f4] ss:$48 sps:$4 sm:$0xff]  }
 0x4e8   :  { %7131 = vmatprep.subr.bf16.mxu1 %v16051_v44  ;;  %v16117_v44 = vld [vmem:[#allocation14 + $0x7f4] ss:$48 sps:$4 sm:$0xff]  }
 0x4ea   :  { %7091 = vmatpush1.bf16.msra.mxu0 %v16046_v41  ;;  %v16112_v41 = vld [vmem:[#allocation14 + $0x1f0] ss:$48 sps:$4 sm:$0xff]  }
 0x4eb   :  { %7132 = vmatpush1.bf16.msra.mxu1 %v16049_v45  ;;  %7092 = vmatprep.subr.bf16.mxu0 %v16054_v48  ;;  %v16115_v45 = vld [vmem:[#allocation14 + $0x7f0] ss:$48 sps:$4 sm:$0xff]   ;;  %v16120_v48 = vld [vmem:[#allocation14 + $0x194] ss:$48 sps:$4 sm:$0xff]  }
 0x4ec   :  { %7133 = vmatprep.subr.bf16.mxu1 %v16057_v49  ;;  %v16123_v49 = vld [vmem:[#allocation14 + $0x794] ss:$48 sps:$4 sm:$0xff]  }
 0x4ee   :  { %7093 = vmatpush2.bf16.msra.mxu0 %v16052_v50  ;;  %v16118_v50 = vld [vmem:[#allocation14 + $0x190] ss:$48 sps:$4 sm:$0xff]  }
 0x4ef   :  { %7134 = vmatpush2.bf16.msra.mxu1 %v16055_v51  ;;  %7094 = vmatprep.subr.bf16.mxu0 %v16060_v52  ;;  %v16121_v51 = vld [vmem:[#allocation14 + $0x790] ss:$48 sps:$4 sm:$0xff]   ;;  %v16126_v52 = vld [vmem:[#allocation14 + $0x134] ss:$48 sps:$4 sm:$0xff]  }
 0x4f0   :  { %7135 = vmatprep.subr.bf16.mxu1 %v16063_v54  ;;  %v16129_v54 = vld [vmem:[#allocation14 + $0x734] ss:$48 sps:$4 sm:$0xff]  }
 0x4f2   :  { %7095 = vmatpush2.bf16.msra.mxu0 %v16058_v56  ;;  %v16124_v56 = vld [vmem:[#allocation14 + $0x130] ss:$48 sps:$4 sm:$0xff]  }
 0x4f3   :  { %7136 = vmatpush2.bf16.msra.mxu1 %v16061_v57  ;;  %7096 = vmatprep.subr.bf16.mxu0 %v16066_v58  ;;  %v16127_v57 = vld [vmem:[#allocation14 + $0x730] ss:$48 sps:$4 sm:$0xff]   ;;  %v16132_v58 = vld [vmem:[#allocation14 + $0xd4] ss:$48 sps:$4 sm:$0xff]  }
 0x4f4   :  { %7137 = vmatprep.subr.bf16.mxu1 %v16069_v59  ;;  %v16135_v59 = vld [vmem:[#allocation14 + $0x6d4] ss:$48 sps:$4 sm:$0xff]  }
 0x4f6   :  { %7097 = vmatpush2.bf16.msra.mxu0 %v16064_v60  ;;  %v16130_v60 = vld [vmem:[#allocation14 + $0xd0] ss:$48 sps:$4 sm:$0xff]  }
 0x4f7   :  { %7138 = vmatpush2.bf16.msra.mxu1 %v16067_v5  ;;  %7098 = vmatprep.subr.bf16.mxu0 %v16072_v28  ;;  %v16133_v5 = vld [vmem:[#allocation14 + $0x6d0] ss:$48 sps:$4 sm:$0xff]   ;;  %v16138_v28 = vld [vmem:[#allocation14 + $0x74] ss:$48 sps:$4 sm:$0xff]  }
 0x4f8   :  { %7139 = vmatprep.subr.bf16.mxu1 %v16075_v6  ;;  %v16141_v6 = vld [vmem:[#allocation14 + $0x674] ss:$48 sps:$4 sm:$0xff]  }
 0x4fa   :  { %7099 = vmatpush2.bf16.msra.mxu0 %v16070_v7  ;;  %v16136_v7 = vld [vmem:[#allocation14 + $0x70] ss:$48 sps:$4 sm:$0xff]  }
 0x4fb   :  { %7140 = vmatpush2.bf16.msra.mxu1 %v16073_v2  ;;  %7100 = vmatprep.subr.bf16.mxu0 %v16078_v14  ;;  %v16139_v2 = vld [vmem:[#allocation14 + $0x670] ss:$48 sps:$4 sm:$0xff]   ;;  %v16144_v14 = vld [vmem:[#allocation14 + $0x14] ss:$48 sps:$4 sm:$0xff]  }
 0x4fc   :  { %7141 = vmatprep.subr.bf16.mxu1 %v16081_v31  ;;  %v16147_v31 = vld [vmem:[#allocation14 + $0x614] ss:$48 sps:$4 sm:$0xff]  }
 0x4fe   :  { %7101 = vmatpush2.bf16.msra.mxu0 %v16076_v53  ;;  %v16142_v53 = vld [vmem:[#allocation14 + $0x10] ss:$48 sps:$4 sm:$0xff]  }
 0x4ff   :  { %7142 = vmatpush2.bf16.msra.mxu1 %v16079_v20  ;;  %7102 = vmatprep.subr.bf16.mxu0 %v16084_v63  ;;  %v16145_v20 = vld [vmem:[#allocation14 + $0x610] ss:$48 sps:$4 sm:$0xff]   ;;  %v16150_v63 = vld [vmem:[#allocation14 + $0x5b4] ss:$48 sps:$4 sm:$0xff]  }
 0x500   :  { %7143 = vmatprep.subr.bf16.mxu1 %v16087_v29  ;;  %v16153_v29 = vld [vmem:[#allocation14 + $0xbb4] ss:$48 sps:$4 sm:$0xff]  }
 0x502   :  { %7103 = vmatpush2.bf16.msra.mxu0 %v16082_v3  ;;  %v16148_v3 = vld [vmem:[#allocation14 + $0x5b0] ss:$48 sps:$4 sm:$0xff]  }
 0x503   :  { %7144 = vmatpush2.bf16.msra.mxu1 %v16085_v15  ;;  %7104 = vmatprep.subr.bf16.mxu0 %v16090_v16  ;;  %v16151_v15 = vld [vmem:[#allocation14 + $0xbb0] ss:$48 sps:$4 sm:$0xff]   ;;  %v16156_v16 = vld [vmem:[#allocation14 + $0x554] ss:$48 sps:$4 sm:$0xff]  }
 0x504   :  { %7145 = vmatprep.subr.bf16.mxu1 %v16093_v17  ;;  %v16159_v17 = vld [vmem:[#allocation14 + $0xb54] ss:$48 sps:$4 sm:$0xff]  }
 0x506   :  { %7105 = vmatpush2.bf16.msra.mxu0 %v16088_v40  ;;  %v16154_v40 = vld [vmem:[#allocation14 + $0x550] ss:$48 sps:$4 sm:$0xff]  }
 0x507   :  { %7146 = vmatpush2.bf16.msra.mxu1 %v16091_v19  ;;  %7106 = vmatprep.subr.bf16.mxu0 %v16096_v23  ;;  %v16157_v19 = vld [vmem:[#allocation14 + $0xb50] ss:$48 sps:$4 sm:$0xff]   ;;  %v16162_v23 = vld [vmem:[#allocation14 + $0x4f4] ss:$48 sps:$4 sm:$0xff]  }
 0x508   :  { %7147 = vmatprep.subr.bf16.mxu1 %v16099_v25  ;;  %v16165_v25 = vld [vmem:[#allocation14 + $0xaf4] ss:$48 sps:$4 sm:$0xff]  }
 0x50a   :  { %7107 = vmatpush2.bf16.msra.mxu0 %v16094_v24  ;;  %v16160_v24 = vld [vmem:[#allocation14 + $0x4f0] ss:$48 sps:$4 sm:$0xff]  }
 0x50b   :  { %7148 = vmatpush2.bf16.msra.mxu1 %v16097_v18  ;;  %7158 = vmatprep.subr.bf16.mxu0 %v16102_v26  ;;  %v16163_v18 = vld [vmem:[#allocation14 + $0xaf0] ss:$48 sps:$4 sm:$0xff]   ;;  %v16168_v26 = vld [vmem:[#allocation14 + $0x494] ss:$48 sps:$4 sm:$0xff]  }
 0x50c   :  { %7199 = vmatprep.subr.bf16.mxu1 %v16105_v32  ;;  %v16171_v32 = vld [vmem:[#allocation14 + $0xa94] ss:$48 sps:$4 sm:$0xff]  }
 0x50d   :  { %7109 = vmatmul.mubr.bf16.vlgmr.msra.gmra.mxu0 %v17356_v8 }
 0x50e   :  { %7150 = vmatmul.mubr.bf16.vlgmr.msra.gmra.mxu1 %v17352_v30  ;;  %7159 = vmatpush1.bf16.msra.mxu0 %v16100_v27  ;;  %v16166_v27 = vld [vmem:[#allocation14 + $0x490] ss:$48 sps:$4 sm:$0xff]  }
 0x50f   :  { %7190 = vmatprep.mubr.bf16.mxu0 %v17354_v0  ;;  %7200 = vmatpush1.bf16.msra.mxu1 %v16103_v42  ;;  %v16169_v42 = vld [vmem:[#allocation14 + $0xa90] ss:$48 sps:$4 sm:$0xff]  }
 0x510   :  { %7231 = vmatprep.mubr.bf16.mxu1 %v17358_v34  ;;  %7160 = vmatprep.subr.bf16.mxu0 %v16108_v33  ;;  %v16174_v33 = vld [vmem:[#allocation14 + $0x434] ss:$48 sps:$4 sm:$0xff]  }
 0x511   :  { %7201 = vmatprep.subr.bf16.mxu1 %v16111_v35  ;;  %v16177_v35 = vld [vmem:[#allocation14 + $0xa34] ss:$48 sps:$4 sm:$0xff]  }
 0x512   :  { %7161 = vmatpush1.bf16.msra.mxu0 %v16106_v36  ;;  %v16172_v36 = vld [vmem:[#allocation14 + $0x430] ss:$48 sps:$4 sm:$0xff]  }
 0x513   :  { %7202 = vmatpush1.bf16.msra.mxu1 %v16109_v37  ;;  %7162 = vmatprep.subr.bf16.mxu0 %v16114_v38  ;;  %v16175_v37 = vld [vmem:[#allocation14 + $0xa30] ss:$48 sps:$4 sm:$0xff]   ;;  %v16180_v38 = vld [vmem:[#allocation14 + $0x3d4] ss:$48 sps:$4 sm:$0xff]  }
 0x514   :  { %7203 = vmatprep.subr.bf16.mxu1 %v16117_v44  ;;  %v16183_v44 = vld [vmem:[#allocation14 + $0x9d4] ss:$48 sps:$4 sm:$0xff]  }
 0x516   :  { %7163 = vmatpush1.bf16.msra.mxu0 %v16112_v41  ;;  %v16178_v41 = vld [vmem:[#allocation14 + $0x3d0] ss:$48 sps:$4 sm:$0xff]  }
 0x517   :  { %7204 = vmatpush1.bf16.msra.mxu1 %v16115_v45  ;;  %7164 = vmatprep.subr.bf16.mxu0 %v16120_v48  ;;  %v16181_v45 = vld [vmem:[#allocation14 + $0x9d0] ss:$48 sps:$4 sm:$0xff]   ;;  %v16186_v48 = vld [vmem:[#allocation14 + $0x374] ss:$48 sps:$4 sm:$0xff]  }
 0x518   :  { %7205 = vmatprep.subr.bf16.mxu1 %v16123_v49  ;;  %v16189_v49 = vld [vmem:[#allocation14 + $0x974] ss:$48 sps:$4 sm:$0xff]  }
 0x51a   :  { %7165 = vmatpush1.bf16.msra.mxu0 %v16118_v50  ;;  %v16184_v50 = vld [vmem:[#allocation14 + $0x370] ss:$48 sps:$4 sm:$0xff]  }
 0x51b   :  { %7206 = vmatpush1.bf16.msra.mxu1 %v16121_v51  ;;  %7166 = vmatprep.subr.bf16.mxu0 %v16126_v52  ;;  %v16187_v51 = vld [vmem:[#allocation14 + $0x970] ss:$48 sps:$4 sm:$0xff]   ;;  %v16192_v52 = vld [vmem:[#allocation14 + $0x314] ss:$48 sps:$4 sm:$0xff]  }
 0x51c   :  { %7207 = vmatprep.subr.bf16.mxu1 %v16129_v54  ;;  %v16195_v54 = vld [vmem:[#allocation14 + $0x914] ss:$48 sps:$4 sm:$0xff]  }
 0x51e   :  { %7167 = vmatpush1.bf16.msra.mxu0 %v16124_v56  ;;  %v16190_v56 = vld [vmem:[#allocation14 + $0x310] ss:$48 sps:$4 sm:$0xff]  }
 0x51f   :  { %7208 = vmatpush1.bf16.msra.mxu1 %v16127_v57  ;;  %7168 = vmatprep.subr.bf16.mxu0 %v16132_v58  ;;  %v16193_v57 = vld [vmem:[#allocation14 + $0x910] ss:$48 sps:$4 sm:$0xff]   ;;  %v16198_v58 = vld [vmem:[#allocation14 + $0x2bc] ss:$48 sps:$4 sm:$0xff]  }
 0x520   :  { %7209 = vmatprep.subr.bf16.mxu1 %v16135_v59  ;;  %v16201_v59 = vld [vmem:[#allocation14 + $0x8bc] ss:$48 sps:$4 sm:$0xff]  }
 0x522   :  { %7169 = vmatpush1.bf16.msra.mxu0 %v16130_v60  ;;  %v16196_v60 = vld [vmem:[#allocation14 + $0x2b8] ss:$48 sps:$4 sm:$0xff]  }
 0x523   :  { %7210 = vmatpush1.bf16.msra.mxu1 %v16133_v5  ;;  %7170 = vmatprep.subr.bf16.mxu0 %v16138_v28  ;;  %v16199_v5 = vld [vmem:[#allocation14 + $0x8b8] ss:$48 sps:$4 sm:$0xff]   ;;  %v16204_v28 = vld [vmem:[#allocation14 + $0x25c] ss:$48 sps:$4 sm:$0xff]  }
 0x524   :  { %7211 = vmatprep.subr.bf16.mxu1 %v16141_v6  ;;  %v16207_v6 = vld [vmem:[#allocation14 + $0x85c] ss:$48 sps:$4 sm:$0xff]  }
 0x526   :  { %7171 = vmatpush1.bf16.msra.mxu0 %v16136_v7  ;;  %v16202_v7 = vld [vmem:[#allocation14 + $0x258] ss:$48 sps:$4 sm:$0xff]  }
 0x527   :  { %7212 = vmatpush1.bf16.msra.mxu1 %v16139_v2  ;;  %7172 = vmatprep.subr.bf16.mxu0 %v16144_v14  ;;  %v16205_v2 = vld [vmem:[#allocation14 + $0x858] ss:$48 sps:$4 sm:$0xff]   ;;  %v16210_v14 = vld [vmem:[#allocation14 + $0x1fc] ss:$48 sps:$4 sm:$0xff]  }
 0x528   :  { %7213 = vmatprep.subr.bf16.mxu1 %v16147_v31  ;;  %v16213_v31 = vld [vmem:[#allocation14 + $0x7fc] ss:$48 sps:$4 sm:$0xff]  }
 0x52a   :  { %7173 = vmatpush1.bf16.msra.mxu0 %v16142_v53  ;;  %v16208_v53 = vld [vmem:[#allocation14 + $0x1f8] ss:$48 sps:$4 sm:$0xff]  }
 0x52b   :  { %7214 = vmatpush1.bf16.msra.mxu1 %v16145_v20  ;;  %7174 = vmatprep.subr.bf16.mxu0 %v16150_v63  ;;  %v16211_v20 = vld [vmem:[#allocation14 + $0x7f8] ss:$48 sps:$4 sm:$0xff]   ;;  %v16216_v63 = vld [vmem:[#allocation14 + $0x19c] ss:$48 sps:$4 sm:$0xff]  }
 0x52c   :  { %7215 = vmatprep.subr.bf16.mxu1 %v16153_v29  ;;  %v16219_v29 = vld [vmem:[#allocation14 + $0x79c] ss:$48 sps:$4 sm:$0xff]  }
 0x52e   :  { %7175 = vmatpush2.bf16.msra.mxu0 %v16148_v3  ;;  %v16214_v3 = vld [vmem:[#allocation14 + $0x198] ss:$48 sps:$4 sm:$0xff]  }
 0x52f   :  { %7216 = vmatpush2.bf16.msra.mxu1 %v16151_v15  ;;  %7176 = vmatprep.subr.bf16.mxu0 %v16156_v16  ;;  %v16217_v15 = vld [vmem:[#allocation14 + $0x798] ss:$48 sps:$4 sm:$0xff]   ;;  %v16222_v16 = vld [vmem:[#allocation14 + $0x13c] ss:$48 sps:$4 sm:$0xff]  }
 0x530   :  { %7217 = vmatprep.subr.bf16.mxu1 %v16159_v17  ;;  %v16225_v17 = vld [vmem:[#allocation14 + $0x73c] ss:$48 sps:$4 sm:$0xff]  }
 0x532   :  { %7177 = vmatpush2.bf16.msra.mxu0 %v16154_v40  ;;  %v16220_v40 = vld [vmem:[#allocation14 + $0x138] ss:$48 sps:$4 sm:$0xff]  }
 0x533   :  { %7218 = vmatpush2.bf16.msra.mxu1 %v16157_v19  ;;  %7178 = vmatprep.subr.bf16.mxu0 %v16162_v23  ;;  %v16223_v19 = vld [vmem:[#allocation14 + $0x738] ss:$48 sps:$4 sm:$0xff]   ;;  %v16228_v23 = vld [vmem:[#allocation14 + $0xdc] ss:$48 sps:$4 sm:$0xff]  }
 0x534   :  { %7219 = vmatprep.subr.bf16.mxu1 %v16165_v25  ;;  %v16231_v25 = vld [vmem:[#allocation14 + $0x6dc] ss:$48 sps:$4 sm:$0xff]  }
 0x536   :  { %7179 = vmatpush2.bf16.msra.mxu0 %v16160_v24  ;;  %v16226_v24 = vld [vmem:[#allocation14 + $0xd8] ss:$48 sps:$4 sm:$0xff]  }
 0x537   :  { %7220 = vmatpush2.bf16.msra.mxu1 %v16163_v18  ;;  %7180 = vmatprep.subr.bf16.mxu0 %v16168_v26  ;;  %v16229_v18 = vld [vmem:[#allocation14 + $0x6d8] ss:$48 sps:$4 sm:$0xff]   ;;  %v16234_v26 = vld [vmem:[#allocation14 + $0x7c] ss:$48 sps:$4 sm:$0xff]  }
 0x538   :  { %7221 = vmatprep.subr.bf16.mxu1 %v16171_v32  ;;  %v16237_v32 = vld [vmem:[#allocation14 + $0x67c] ss:$48 sps:$4 sm:$0xff]  }
 0x53a   :  { %7181 = vmatpush2.bf16.msra.mxu0 %v16166_v27  ;;  %v16232_v27 = vld [vmem:[#allocation14 + $0x78] ss:$48 sps:$4 sm:$0xff]  }
 0x53b   :  { %7222 = vmatpush2.bf16.msra.mxu1 %v16169_v42  ;;  %7182 = vmatprep.subr.bf16.mxu0 %v16174_v33  ;;  %v16235_v42 = vld [vmem:[#allocation14 + $0x678] ss:$48 sps:$4 sm:$0xff]   ;;  %v16240_v33 = vld [vmem:[#allocation14 + $0x1c] ss:$48 sps:$4 sm:$0xff]  }
 0x53c   :  { %7223 = vmatprep.subr.bf16.mxu1 %v16177_v35  ;;  %v16243_v35 = vld [vmem:[#allocation14 + $0x61c] ss:$48 sps:$4 sm:$0xff]  }
 0x53e   :  { %7183 = vmatpush2.bf16.msra.mxu0 %v16172_v36  ;;  %v16238_v36 = vld [vmem:[#allocation14 + $0x18] ss:$48 sps:$4 sm:$0xff]  }
 0x53f   :  { %7224 = vmatpush2.bf16.msra.mxu1 %v16175_v37  ;;  %7184 = vmatprep.subr.bf16.mxu0 %v16180_v38  ;;  %v16241_v37 = vld [vmem:[#allocation14 + $0x618] ss:$48 sps:$4 sm:$0xff]   ;;  %v16246_v38 = vld [vmem:[#allocation14 + $0x5bc] ss:$48 sps:$4 sm:$0xff]  }
 0x540   :  { %7225 = vmatprep.subr.bf16.mxu1 %v16183_v44  ;;  %v16249_v44 = vld [vmem:[#allocation14 + $0xbbc] ss:$48 sps:$4 sm:$0xff]  }
 0x542   :  { %7185 = vmatpush2.bf16.msra.mxu0 %v16178_v41  ;;  %v16244_v41 = vld [vmem:[#allocation14 + $0x5b8] ss:$48 sps:$4 sm:$0xff]  }
 0x543   :  { %7226 = vmatpush2.bf16.msra.mxu1 %v16181_v45  ;;  %7186 = vmatprep.subr.bf16.mxu0 %v16186_v48  ;;  %v16247_v45 = vld [vmem:[#allocation14 + $0xbb8] ss:$48 sps:$4 sm:$0xff]   ;;  %v16252_v48 = vld [vmem:[#allocation14 + $0x55c] ss:$48 sps:$4 sm:$0xff]  }
 0x544   :  { %7227 = vmatprep.subr.bf16.mxu1 %v16189_v49  ;;  %v16255_v49 = vld [vmem:[#allocation14 + $0xb5c] ss:$48 sps:$4 sm:$0xff]  }
 0x546   :  { %7187 = vmatpush2.bf16.msra.mxu0 %v16184_v50  ;;  %v16250_v50 = vld [vmem:[#allocation14 + $0x558] ss:$48 sps:$4 sm:$0xff]  }
 0x547   :  { %7228 = vmatpush2.bf16.msra.mxu1 %v16187_v51  ;;  %7188 = vmatprep.subr.bf16.mxu0 %v16192_v52  ;;  %v16253_v51 = vld [vmem:[#allocation14 + $0xb58] ss:$48 sps:$4 sm:$0xff]   ;;  %v16258_v52 = vld [vmem:[#allocation14 + $0x4fc] ss:$48 sps:$4 sm:$0xff]  }
 0x548   :  { %7229 = vmatprep.subr.bf16.mxu1 %v16195_v54  ;;  %v16261_v54 = vld [vmem:[#allocation14 + $0xafc] ss:$48 sps:$4 sm:$0xff]  }
 0x54a   :  { %7189 = vmatpush2.bf16.msra.mxu0 %v16190_v56  ;;  %v16256_v56 = vld [vmem:[#allocation14 + $0x4f8] ss:$48 sps:$4 sm:$0xff]  }
 0x54b   :  { %7230 = vmatpush2.bf16.msra.mxu1 %v16193_v57  ;;  %7240 = vmatprep.subr.bf16.mxu0 %v16198_v58  ;;  %v16259_v57 = vld [vmem:[#allocation14 + $0xaf8] ss:$48 sps:$4 sm:$0xff]   ;;  %v16264_v58 = vld [vmem:[#allocation14 + $0x49c] ss:$48 sps:$4 sm:$0xff]  }
 0x54c   :  { %7281 = vmatprep.subr.bf16.mxu1 %v16201_v59  ;;  %v16267_v59 = vld [vmem:[#allocation14 + $0xa9c] ss:$48 sps:$4 sm:$0xff]  }
 0x54d   :  { %7191 = vmatmul.mubr.bf16.vlgmr.msra.gmra.mxu0 %v17356_v8 }
 0x54e   :  { %7232 = vmatmul.mubr.bf16.vlgmr.msra.gmra.mxu1 %v17352_v30  ;;  %7241 = vmatpush1.bf16.msra.mxu0 %v16196_v60  ;;  %v16262_v60 = vld [vmem:[#allocation14 + $0x498] ss:$48 sps:$4 sm:$0xff]  }
 0x54f   :  { %7272 = vmatprep.mubr.bf16.mxu0 %v17354_v0  ;;  %7282 = vmatpush1.bf16.msra.mxu1 %v16199_v5  ;;  %v16265_v5 = vld [vmem:[#allocation14 + $0xa98] ss:$48 sps:$4 sm:$0xff]  }
 0x550   :  { %7313 = vmatprep.mubr.bf16.mxu1 %v17358_v34  ;;  %7242 = vmatprep.subr.bf16.mxu0 %v16204_v28  ;;  %v16270_v28 = vld [vmem:[#allocation14 + $0x43c] ss:$48 sps:$4 sm:$0xff]  }
 0x551   :  { %7283 = vmatprep.subr.bf16.mxu1 %v16207_v6  ;;  %v16273_v6 = vld [vmem:[#allocation14 + $0xa3c] ss:$48 sps:$4 sm:$0xff]  }
 0x552   :  { %7243 = vmatpush1.bf16.msra.mxu0 %v16202_v7  ;;  %v16268_v7 = vld [vmem:[#allocation14 + $0x438] ss:$48 sps:$4 sm:$0xff]  }
 0x553   :  { %7284 = vmatpush1.bf16.msra.mxu1 %v16205_v2  ;;  %7244 = vmatprep.subr.bf16.mxu0 %v16210_v14  ;;  %v16271_v2 = vld [vmem:[#allocation14 + $0xa38] ss:$48 sps:$4 sm:$0xff]   ;;  %v16276_v14 = vld [vmem:[#allocation14 + $0x3dc] ss:$48 sps:$4 sm:$0xff]  }
 0x554   :  { %7285 = vmatprep.subr.bf16.mxu1 %v16213_v31  ;;  %v16279_v31 = vld [vmem:[#allocation14 + $0x9dc] ss:$48 sps:$4 sm:$0xff]  }
 0x556   :  { %7245 = vmatpush1.bf16.msra.mxu0 %v16208_v53  ;;  %v16274_v53 = vld [vmem:[#allocation14 + $0x3d8] ss:$48 sps:$4 sm:$0xff]  }
 0x557   :  { %7286 = vmatpush1.bf16.msra.mxu1 %v16211_v20  ;;  %7246 = vmatprep.subr.bf16.mxu0 %v16216_v63  ;;  %v16277_v20 = vld [vmem:[#allocation14 + $0x9d8] ss:$48 sps:$4 sm:$0xff]   ;;  %v16282_v63 = vld [vmem:[#allocation14 + $0x37c] ss:$48 sps:$4 sm:$0xff]  }
 0x558   :  { %7287 = vmatprep.subr.bf16.mxu1 %v16219_v29  ;;  %v16285_v29 = vld [vmem:[#allocation14 + $0x97c] ss:$48 sps:$4 sm:$0xff]  }
 0x55a   :  { %7247 = vmatpush1.bf16.msra.mxu0 %v16214_v3  ;;  %v16280_v3 = vld [vmem:[#allocation14 + $0x378] ss:$48 sps:$4 sm:$0xff]  }
 0x55b   :  { %7288 = vmatpush1.bf16.msra.mxu1 %v16217_v15  ;;  %7248 = vmatprep.subr.bf16.mxu0 %v16222_v16  ;;  %v16283_v15 = vld [vmem:[#allocation14 + $0x978] ss:$48 sps:$4 sm:$0xff]   ;;  %v16288_v16 = vld [vmem:[#allocation14 + $0x31c] ss:$48 sps:$4 sm:$0xff]  }
 0x55c   :  { %7289 = vmatprep.subr.bf16.mxu1 %v16225_v17  ;;  %v16291_v17 = vld [vmem:[#allocation14 + $0x91c] ss:$48 sps:$4 sm:$0xff]  }
 0x55e   :  { %7249 = vmatpush1.bf16.msra.mxu0 %v16220_v40  ;;  %v16286_v40 = vld [vmem:[#allocation14 + $0x318] ss:$48 sps:$4 sm:$0xff]  }
 0x55f   :  { %7290 = vmatpush1.bf16.msra.mxu1 %v16223_v19  ;;  %7250 = vmatprep.subr.bf16.mxu0 %v16228_v23  ;;  %v16289_v19 = vld [vmem:[#allocation14 + $0x918] ss:$48 sps:$4 sm:$0xff]   ;;  %v16294_v23 = vld [vmem:[#allocation14 + $0x2c4] ss:$48 sps:$4 sm:$0xff]  }
 0x560   :  { %7291 = vmatprep.subr.bf16.mxu1 %v16231_v25  ;;  %v17374_v25 = vld [vmem:[#allocation16] sm:$0xff] }
 0x562   :  { %7251 = vmatpush1.bf16.msra.mxu0 %v16226_v24  ;;  %v16297_v24 = vld [vmem:[#allocation14 + $0x8c4] ss:$48 sps:$4 sm:$0xff]  }
 0x563   :  { %7292 = vmatpush1.bf16.msra.mxu1 %v16229_v18  ;;  %7252 = vmatprep.subr.bf16.mxu0 %v16234_v26  ;;  %v16292_v18 = vld [vmem:[#allocation14 + $0x2c0] ss:$48 sps:$4 sm:$0xff]   ;;  %v5017_v26 = vrot.slane %v17374_v25, %v17183_v9 }
 0x564   :  { %7293 = vmatprep.subr.bf16.mxu1 %v16237_v32  ;;  %v16295_v32 = vld [vmem:[#allocation14 + $0x8c0] ss:$48 sps:$4 sm:$0xff]  }
 0x566   :  { %7253 = vmatpush1.bf16.msra.mxu0 %v16232_v27  ;;  %v5021_v27 = vrot.slane %v17374_v25, %v17189_v11 }
 0x567   :  { %7294 = vmatpush1.bf16.msra.mxu1 %v16235_v42  ;;  %7254 = vmatprep.subr.bf16.mxu0 %v16240_v33  ;;  %v16300_v42 = vld [vmem:[#allocation14 + $0x264] ss:$48 sps:$4 sm:$0xff]  }
 0x568   :  { %7295 = vmatprep.subr.bf16.mxu1 %v16243_v35  ;;  %v16303_v35 = vld [vmem:[#allocation14 + $0x864] ss:$48 sps:$4 sm:$0xff]  }
 0x56a   :  { %7255 = vmatpush1.bf16.msra.mxu0 %v16238_v36 }
 0x56b   :  { %7296 = vmatpush1.bf16.msra.mxu1 %v16241_v37  ;;  %7256 = vmatprep.subr.bf16.mxu0 %v16246_v38  ;;  %v16298_v38 = vld [vmem:[#allocation14 + $0x260] ss:$48 sps:$4 sm:$0xff]  }
 0x56c   :  { %7297 = vmatprep.subr.bf16.mxu1 %v16249_v44 }
 0x56e   :  { %7257 = vmatpush2.bf16.msra.mxu0 %v16244_v41  ;;  %v16301_v41 = vld [vmem:[#allocation14 + $0x860] ss:$48 sps:$4 sm:$0xff]  }
 0x56f   :  { %7298 = vmatpush2.bf16.msra.mxu1 %v16247_v45  ;;  %7258 = vmatprep.subr.bf16.mxu0 %v16252_v48  ;;  %v16306_v45 = vld [vmem:[#allocation14 + $0x204] ss:$48 sps:$4 sm:$0xff]  }
 0x570   :  { %7299 = vmatprep.subr.bf16.mxu1 %v16255_v49 }
 0x572   :  { %7259 = vmatpush2.bf16.msra.mxu0 %v16250_v50 }
 0x573   :  { %7300 = vmatpush2.bf16.msra.mxu1 %v16253_v51  ;;  %7260 = vmatprep.subr.bf16.mxu0 %v16258_v52  ;;  %v16309_v51 = vld [vmem:[#allocation14 + $0x804] ss:$48 sps:$4 sm:$0xff]  }
 0x574   :  { %7301 = vmatprep.subr.bf16.mxu1 %v16261_v54 }
 0x576   :  { %7261 = vmatpush2.bf16.msra.mxu0 %v16256_v56 }
 0x577   :  { %7302 = vmatpush2.bf16.msra.mxu1 %v16259_v57  ;;  %7262 = vmatprep.subr.bf16.mxu0 %v16264_v58  ;;  %v16304_v57 = vld [vmem:[#allocation14 + $0x200] ss:$48 sps:$4 sm:$0xff]  }
 0x578   :  { %7303 = vmatprep.subr.bf16.mxu1 %v16267_v59  ;;  %v16307_v59 = vld [vmem:[#allocation14 + $0x800] ss:$48 sps:$4 sm:$0xff]  }
 0x57a   :  { %7263 = vmatpush2.bf16.msra.mxu0 %v16262_v60  ;;  %v16312_v60 = vld [vmem:[#allocation14 + $0x1a4] ss:$48 sps:$4 sm:$0xff]  }
 0x57b   :  { %7304 = vmatpush2.bf16.msra.mxu1 %v16265_v5  ;;  %7264 = vmatprep.subr.bf16.mxu0 %v16270_v28  ;;  %v16315_v28 = vld [vmem:[#allocation14 + $0x7a4] ss:$48 sps:$4 sm:$0xff]  }
 0x57c   :  { %7305 = vmatprep.subr.bf16.mxu1 %v16273_v6  ;;  %v16310_v6 = vld [vmem:[#allocation14 + $0x1a0] ss:$48 sps:$4 sm:$0xff]  }
 0x57e   :  { %7265 = vmatpush2.bf16.msra.mxu0 %v16268_v7  ;;  %v16313_v7 = vld [vmem:[#allocation14 + $0x7a0] ss:$48 sps:$4 sm:$0xff]  }
 0x57f   :  { %7306 = vmatpush2.bf16.msra.mxu1 %v16271_v2  ;;  %7266 = vmatprep.subr.bf16.mxu0 %v16276_v14  ;;  %v16318_v2 = vld [vmem:[#allocation14 + $0x144] ss:$48 sps:$4 sm:$0xff]  }
 0x580   :  { %7307 = vmatprep.subr.bf16.mxu1 %v16279_v31  ;;  %v16321_v14 = vld [vmem:[#allocation14 + $0x744] ss:$48 sps:$4 sm:$0xff]   ;;  %v16316_v31 = vld [vmem:[#allocation14 + $0x140] ss:$48 sps:$4 sm:$0xff]  }
 0x582   :  { %7267 = vmatpush2.bf16.msra.mxu0 %v16274_v53  ;;  %v16319_v53 = vld [vmem:[#allocation14 + $0x740] ss:$48 sps:$4 sm:$0xff]  }
 0x583   :  { %7308 = vmatpush2.bf16.msra.mxu1 %v16277_v20  ;;  %7268 = vmatprep.subr.bf16.mxu0 %v16282_v63  ;;  %v16324_v20 = vld [vmem:[#allocation14 + $0xe4] ss:$48 sps:$4 sm:$0xff]  }
 0x584   :  { %7309 = vmatprep.subr.bf16.mxu1 %v16285_v29  ;;  %v16327_v63 = vld [vmem:[#allocation14 + $0x6e4] ss:$48 sps:$4 sm:$0xff]   ;;  %v16322_v29 = vld [vmem:[#allocation14 + $0xe0] ss:$48 sps:$4 sm:$0xff]  }
 0x586   :  { %7269 = vmatpush2.bf16.msra.mxu0 %v16280_v3  ;;  %v16325_v3 = vld [vmem:[#allocation14 + $0x6e0] ss:$48 sps:$4 sm:$0xff]  }
 0x587   :  { %7310 = vmatpush2.bf16.msra.mxu1 %v16283_v15  ;;  %7270 = vmatprep.subr.bf16.mxu0 %v16288_v16  ;;  %v16330_v15 = vld [vmem:[#allocation14 + $0x84] ss:$48 sps:$4 sm:$0xff]  }
 0x588   :  { %7311 = vmatprep.subr.bf16.mxu1 %v16291_v17  ;;  %v16333_v16 = vld [vmem:[#allocation14 + $0x684] ss:$48 sps:$4 sm:$0xff]   ;;  %v16328_v17 = vld [vmem:[#allocation14 + $0x80] ss:$48 sps:$4 sm:$0xff]  }
 0x58a   :  { %7271 = vmatpush2.bf16.msra.mxu0 %v16286_v40  ;;  %v16331_v40 = vld [vmem:[#allocation14 + $0x680] ss:$48 sps:$4 sm:$0xff]  }
 0x58b   :  { %7312 = vmatpush2.bf16.msra.mxu1 %v16289_v19  ;;  %7322 = vmatprep.subr.bf16.mxu0 %v16294_v23  ;;  %v16336_v19 = vld [vmem:[#allocation14 + $0x24] ss:$48 sps:$4 sm:$0xff]  }
 0x58c   :  { %7363 = vmatprep.subr.bf16.mxu1 %v16297_v24  ;;  %v16339_v23 = vld [vmem:[#allocation14 + $0x624] ss:$48 sps:$4 sm:$0xff]   ;;  %v16334_v24 = vld [vmem:[#allocation14 + $0x20] ss:$48 sps:$4 sm:$0xff]  }
 0x58d   :  { %7273 = vmatmul.mubr.bf16.vlgmr.msra.gmra.mxu0 %v17356_v8  ;;  %v7028_v33 = vpop.f32.mrf.mxu0 }
 0x58e   :  { %7314 = vmatmul.mubr.bf16.vlgmr.msra.gmra.mxu1 %v17352_v30  ;;  %v7029_v36 = vadd.f32 %v7028_v33, %v5017_v26  ;;  %v7069_v37 = vpop.f32.mrf.mxu1  ;;  %7323 = vmatpush1.bf16.msra.mxu0 %v16292_v18  ;;  %v16337_v18 = vld [vmem:[#allocation14 + $0x620] ss:$48 sps:$4 sm:$0xff]   ;;  %v16342_v26 = vld [vmem:[#allocation14 + $0x5c4] ss:$48 sps:$4 sm:$0xff]  }
 0x58f   :  { %7354 = vmatprep.mubr.bf16.mxu0 %v17354_v0  ;;  %7364 = vmatpush1.bf16.msra.mxu1 %v16295_v32  ;;  %v7030_v44 = vpop.f32.mrf.mxu0  ;;  %v16345_v32 = vld [vmem:[#allocation14 + $0xbc4] ss:$48 sps:$4 sm:$0xff]  }
 0x590   :  { %v17383_v48 = vadd.f32 %v7069_v37, %v7029_v36  ;;  %7395 = vmatprep.mubr.bf16.mxu1 %v17358_v34  ;;  %v7031_v49 = vadd.f32 %v7030_v44, %v5021_v27  ;;  %v7071_v50 = vpop.f32.mrf.mxu1  ;;  %7324 = vmatprep.subr.bf16.mxu0 %v16300_v42  ;;  %v16340_v27 = vld [vmem:[#allocation14 + $0x5c0] ss:$48 sps:$4 sm:$0xff]   ;;  %v16348_v33 = vld [vmem:[#allocation14 + $0x564] ss:$48 sps:$4 sm:$0xff]  }
 0x591   :  { %7365 = vmatprep.subr.bf16.mxu1 %v16303_v35  ;;  %v7032_v52 = vpop.f32.mrf.mxu0  ;;  %v16343_v42 = vld [vmem:[#allocation14 + $0xbc0] ss:$48 sps:$4 sm:$0xff]   ;;  %v16351_v35 = vld [vmem:[#allocation14 + $0xb64] ss:$48 sps:$4 sm:$0xff]  }
 0x592   :  { %v17386_v54 = vadd.f32 %v7071_v50, %v7031_v49  ;;  %v7073_v56 = vpop.f32.mrf.mxu1  ;;  %7325 = vmatpush1.bf16.msra.mxu0 %v16298_v38  ;;  %v16346_v36 = vld [vmem:[#allocation14 + $0x560] ss:$48 sps:$4 sm:$0xff]   ;;  %v16354_v38 = vld [vmem:[#allocation14 + $0x504] ss:$48 sps:$4 sm:$0xff]  }
 0x593   :  { %7366 = vmatpush1.bf16.msra.mxu1 %v16301_v41  ;;  %v7033_v58 = vpop.f32.mrf.mxu0  ;;  %7326 = vmatprep.subr.bf16.mxu0 %v16306_v45  ;;  %v16349_v37 = vld [vmem:[#allocation14 + $0xb60] ss:$48 sps:$4 sm:$0xff]   ;;  %v16357_v44 = vld [vmem:[#allocation14 + $0xb04] ss:$48 sps:$4 sm:$0xff]  }
 0x594   :  { %v7074_v5 = vpop.f32.mrf.mxu1  ;;  %7367 = vmatprep.subr.bf16.mxu1 %v16309_v51  ;;  %v16352_v41 = vld [vmem:[#allocation14 + $0x500] ss:$48 sps:$4 sm:$0xff]   ;;  %v16360_v49 = vld [vmem:[#allocation14 + $0x4a4] ss:$48 sps:$4 sm:$0xff]  }
 0x595   :  { %v16355_v45 = vld [vmem:[#allocation14 + $0xb00] ss:$48 sps:$4 sm:$0xff]   ;;  %v16363_v50 = vld [vmem:[#allocation14 + $0xaa4] ss:$48 sps:$4 sm:$0xff]  }
 0x596   :  { %7327 = vmatpush1.bf16.msra.mxu0 %v16304_v57  ;;  %v16358_v51 = vld [vmem:[#allocation14 + $0x4a0] ss:$48 sps:$4 sm:$0xff]   ;;  %v16366_v56 = vld [vmem:[#allocation14 + $0x444] ss:$48 sps:$4 sm:$0xff]  }
 0x597   :  { %7368 = vmatpush1.bf16.msra.mxu1 %v16307_v59  ;;  %7328 = vmatprep.subr.bf16.mxu0 %v16312_v60  ;;  %v16361_v52 = vld [vmem:[#allocation14 + $0xaa0] ss:$48 sps:$4 sm:$0xff]   ;;  %v16369_v57 = vld [vmem:[#allocation14 + $0xa44] ss:$48 sps:$4 sm:$0xff]  }
 0x598   :  { %7369 = vmatprep.subr.bf16.mxu1 %v16315_v28  ;;  %v16364_v58 = vld [vmem:[#allocation14 + $0x440] ss:$48 sps:$4 sm:$0xff]   ;;  %v16372_v60 = vld [vmem:[#allocation14 + $0x3e4] ss:$48 sps:$4 sm:$0xff]  }
 0x599   :  { %v16367_v59 = vld [vmem:[#allocation14 + $0xa40] ss:$48 sps:$4 sm:$0xff]   ;;  %v16375_v5 = vld [vmem:[#allocation14 + $0x9e4] ss:$48 sps:$4 sm:$0xff]  }
 0x59a   :  { %7329 = vmatpush1.bf16.msra.mxu0 %v16310_v6  ;;  %v16370_v28 = vld [vmem:[#allocation14 + $0x3e0] ss:$48 sps:$4 sm:$0xff]  }
 0x59b   :  { %7370 = vmatpush1.bf16.msra.mxu1 %v16313_v7  ;;  %7330 = vmatprep.subr.bf16.mxu0 %v16318_v2  ;;  %v16373_v6 = vld [vmem:[#allocation14 + $0x9e0] ss:$48 sps:$4 sm:$0xff]   ;;  %v16378_v7 = vld [vmem:[#allocation14 + $0x384] ss:$48 sps:$4 sm:$0xff]  }
 0x59c   :  { %7371 = vmatprep.subr.bf16.mxu1 %v16321_v14  ;;  %v16381_v2 = vld [vmem:[#allocation14 + $0x984] ss:$48 sps:$4 sm:$0xff]   ;;  %v16376_v14 = vld [vmem:[#allocation14 + $0x380] ss:$48 sps:$4 sm:$0xff]  }
 0x59e   :  { %7331 = vmatpush1.bf16.msra.mxu0 %v16316_v31  ;;  %v16379_v31 = vld [vmem:[#allocation14 + $0x980] ss:$48 sps:$4 sm:$0xff]  }
 0x59f   :  { %7372 = vmatpush1.bf16.msra.mxu1 %v16319_v53  ;;  %7332 = vmatprep.subr.bf16.mxu0 %v16324_v20  ;;  %v16384_v53 = vld [vmem:[#allocation14 + $0x324] ss:$48 sps:$4 sm:$0xff]  }
 0x5a0   :  { %7373 = vmatprep.subr.bf16.mxu1 %v16327_v63  ;;  %v16387_v20 = vld [vmem:[#allocation14 + $0x924] ss:$48 sps:$4 sm:$0xff]   ;;  %v16382_v63 = vld [vmem:[#allocation14 + $0x320] ss:$48 sps:$4 sm:$0xff]  }
 0x5a2   :  { %7333 = vmatpush1.bf16.msra.mxu0 %v16322_v29  ;;  %v16385_v29 = vld [vmem:[#allocation14 + $0x920] ss:$48 sps:$4 sm:$0xff]  }
 0x5a3   :  { %7374 = vmatpush1.bf16.msra.mxu1 %v16325_v3  ;;  %7334 = vmatprep.subr.bf16.mxu0 %v16330_v15  ;;  %v16390_v3 = vld [vmem:[#allocation14 + $0x2cc] ss:$48 sps:$4 sm:$0xff]  }
 0x5a4   :  { %7375 = vmatprep.subr.bf16.mxu1 %v16333_v16  ;;  %v16393_v15 = vld [vmem:[#allocation14 + $0x8cc] ss:$48 sps:$4 sm:$0xff]   ;;  %v5025_v16 = vrot.slane %v17374_v25, %v17186_v10 }
 0x5a6   :  { %7335 = vmatpush1.bf16.msra.mxu0 %v16328_v17  ;;  %v16388_v17 = vld [vmem:[#allocation14 + $0x2c8] ss:$48 sps:$4 sm:$0xff]  }
 0x5a7   :  { %7376 = vmatpush1.bf16.msra.mxu1 %v16331_v40  ;;  %7336 = vmatprep.subr.bf16.mxu0 %v16336_v19  ;;  %v16391_v40 = vld [vmem:[#allocation14 + $0x8c8] ss:$48 sps:$4 sm:$0xff]   ;;  %v16396_v19 = vld [vmem:[#allocation14 + $0x26c] ss:$48 sps:$4 sm:$0xff]  }
 0x5a8   :  { %7377 = vmatprep.subr.bf16.mxu1 %v16339_v23 }
 0x5aa   :  { %7337 = vmatpush1.bf16.msra.mxu0 %v16334_v24  ;;  %v16399_v24 = vld [vmem:[#allocation14 + $0x86c] ss:$48 sps:$4 sm:$0xff]  }
 0x5ab   :  { %7378 = vmatpush1.bf16.msra.mxu1 %v16337_v18  ;;  %7338 = vmatprep.subr.bf16.mxu0 %v16342_v26 }
 0x5ac   :  { %7379 = vmatprep.subr.bf16.mxu1 %v16345_v32  ;;  %v16394_v32 = vld [vmem:[#allocation14 + $0x268] ss:$48 sps:$4 sm:$0xff]  }
 0x5ae   :  { %7339 = vmatpush2.bf16.msra.mxu0 %v16340_v27 }
 0x5af   :  { %7380 = vmatpush2.bf16.msra.mxu1 %v16343_v42  ;;  %7340 = vmatprep.subr.bf16.mxu0 %v16348_v33  ;;  %v16397_v42 = vld [vmem:[#allocation14 + $0x868] ss:$48 sps:$4 sm:$0xff]   ;;  %v16402_v33 = vld [vmem:[#allocation14 + $0x20c] ss:$48 sps:$4 sm:$0xff]  }
 0x5b0   :  { %7381 = vmatprep.subr.bf16.mxu1 %v16351_v35 }
 0x5b2   :  { %7341 = vmatpush2.bf16.msra.mxu0 %v16346_v36 }
 0x5b3   :  { %7382 = vmatpush2.bf16.msra.mxu1 %v16349_v37  ;;  %7342 = vmatprep.subr.bf16.mxu0 %v16354_v38  ;;  %v16405_v37 = vld [vmem:[#allocation14 + $0x80c] ss:$48 sps:$4 sm:$0xff]  }
 0x5b4   :  { %7383 = vmatprep.subr.bf16.mxu1 %v16357_v44 }
 0x5b6   :  { %7343 = vmatpush2.bf16.msra.mxu0 %v16352_v41  ;;  %v16400_v41 = vld [vmem:[#allocation14 + $0x208] ss:$48 sps:$4 sm:$0xff]  }
 0x5b7   :  { %7384 = vmatpush2.bf16.msra.mxu1 %v16355_v45  ;;  %7344 = vmatprep.subr.bf16.mxu0 %v16360_v49  ;;  %v16403_v45 = vld [vmem:[#allocation14 + $0x808] ss:$48 sps:$4 sm:$0xff]   ;;  %v16408_v49 = vld [vmem:[#allocation14 + $0x1ac] ss:$48 sps:$4 sm:$0xff]  }
 0x5b8   :  { %7385 = vmatprep.subr.bf16.mxu1 %v16363_v50 }
 0x5ba   :  { %7345 = vmatpush2.bf16.msra.mxu0 %v16358_v51  ;;  %v16411_v51 = vld [vmem:[#allocation14 + $0x7ac] ss:$48 sps:$4 sm:$0xff]  }
 0x5bb   :  { %7386 = vmatpush2.bf16.msra.mxu1 %v16361_v52  ;;  %7346 = vmatprep.subr.bf16.mxu0 %v16366_v56  ;;  %v16406_v52 = vld [vmem:[#allocation14 + $0x1a8] ss:$48 sps:$4 sm:$0xff]   ;;  %v16414_v56 = vld [vmem:[#allocation14 + $0x14c] ss:$48 sps:$4 sm:$0xff]  }
 0x5bc   :  { %7387 = vmatprep.subr.bf16.mxu1 %v16369_v57  ;;  %v16417_v57 = vld [vmem:[#allocation14 + $0x74c] ss:$48 sps:$4 sm:$0xff]  }
 0x5be   :  { %7347 = vmatpush2.bf16.msra.mxu0 %v16364_v58  ;;  %v16412_v58 = vld [vmem:[#allocation14 + $0x148] ss:$48 sps:$4 sm:$0xff]  }
 0x5bf   :  { %7388 = vmatpush2.bf16.msra.mxu1 %v16367_v59  ;;  %7348 = vmatprep.subr.bf16.mxu0 %v16372_v60  ;;  %v16415_v59 = vld [vmem:[#allocation14 + $0x748] ss:$48 sps:$4 sm:$0xff]   ;;  %v16420_v60 = vld [vmem:[#allocation14 + $0xec] ss:$48 sps:$4 sm:$0xff]  }
 0x5c0   :  { %7389 = vmatprep.subr.bf16.mxu1 %v16375_v5  ;;  %v16423_v5 = vld [vmem:[#allocation14 + $0x6ec] ss:$48 sps:$4 sm:$0xff]  }
 0x5c2   :  { %7349 = vmatpush2.bf16.msra.mxu0 %v16370_v28  ;;  %v16418_v28 = vld [vmem:[#allocation14 + $0xe8] ss:$48 sps:$4 sm:$0xff]  }
 0x5c3   :  { %7390 = vmatpush2.bf16.msra.mxu1 %v16373_v6  ;;  %7350 = vmatprep.subr.bf16.mxu0 %v16378_v7  ;;  %v16421_v6 = vld [vmem:[#allocation14 + $0x6e8] ss:$48 sps:$4 sm:$0xff]   ;;  %v16426_v7 = vld [vmem:[#allocation14 + $0x8c] ss:$48 sps:$4 sm:$0xff]  }
 0x5c4   :  { %7391 = vmatprep.subr.bf16.mxu1 %v16381_v2  ;;  %v16429_v2 = vld [vmem:[#allocation14 + $0x68c] ss:$48 sps:$4 sm:$0xff]  }
 0x5c6   :  { %7351 = vmatpush2.bf16.msra.mxu0 %v16376_v14  ;;  %v16424_v14 = vld [vmem:[#allocation14 + $0x88] ss:$48 sps:$4 sm:$0xff]  }
 0x5c7   :  { %7392 = vmatpush2.bf16.msra.mxu1 %v16379_v31  ;;  %7352 = vmatprep.subr.bf16.mxu0 %v16384_v53  ;;  %v16427_v31 = vld [vmem:[#allocation14 + $0x688] ss:$48 sps:$4 sm:$0xff]   ;;  %v16432_v53 = vld [vmem:[#allocation14 + $0x2c] ss:$48 sps:$4 sm:$0xff]  }
 0x5c8   :  { %7393 = vmatprep.subr.bf16.mxu1 %v16387_v20  ;;  %v16435_v20 = vld [vmem:[#allocation14 + $0x62c] ss:$48 sps:$4 sm:$0xff]  }
 0x5ca   :  { %7353 = vmatpush2.bf16.msra.mxu0 %v16382_v63  ;;  %v16430_v63 = vld [vmem:[#allocation14 + $0x28] ss:$48 sps:$4 sm:$0xff]  }
 0x5cb   :  { %7394 = vmatpush2.bf16.msra.mxu1 %v16385_v29  ;;  %7404 = vmatprep.subr.bf16.mxu0 %v16390_v3  ;;  %v16433_v29 = vld [vmem:[#allocation14 + $0x628] ss:$48 sps:$4 sm:$0xff]   ;;  %v16438_v3 = vld [vmem:[#allocation14 + $0x5cc] ss:$48 sps:$4 sm:$0xff]  }
 0x5cc   :  { %7445 = vmatprep.subr.bf16.mxu1 %v16393_v15  ;;  %v7486_v15 = vld [vmem:[#allocation22] sm:$0xff] }
 0x5cd   :  { %v7110_v23 = vpop.f32.mrf.mxu0  ;;  %7355 = vmatmul.mubr.bf16.vlgmr.msra.gmra.mxu0 %v17356_v8 }
 0x5ce   :  { %v7111_v18 = vadd.f32 %v7110_v23, %v5025_v16  ;;  %v7151_v26 = vpop.f32.mrf.mxu1  ;;  %7396 = vmatmul.mubr.bf16.vlgmr.msra.gmra.mxu1 %v17352_v30  ;;  %7405 = vmatpush1.bf16.msra.mxu0 %v16388_v17  ;;  %v16441_v16 = vld [vmem:[#allocation14 + $0xbcc] ss:$48 sps:$4 sm:$0xff]   ;;  %v16436_v17 = vld [vmem:[#allocation14 + $0x5c8] ss:$48 sps:$4 sm:$0xff]  }
 0x5cf   :  { %7436 = vmatprep.mubr.bf16.mxu0 %v17354_v0  ;;  %7446 = vmatpush1.bf16.msra.mxu1 %v16391_v40  ;;  %v17393_v27 = vpop.f32.mrf.mxu0  ;;  %v7488_v40 = vadd.f32 1e-05, %v7486_v15  ;;  %v16444_v23 = vld [vmem:[#allocation14 + $0x56c] ss:$48 sps:$4 sm:$0xff]   ;;  %v16472_v15 = vld [vmem:[#allocation14 + $0x388] ss:$48 sps:$4 sm:$0xff]  }
 0x5d0   :  { %v17395_v35 = vadd.f32 %v7151_v26, %v7111_v18  ;;  %7477 = vmatprep.mubr.bf16.mxu1 %v17358_v34  ;;  %v17398_v36 = vpop.f32.mrf.mxu1  ;;  %7406 = vmatprep.subr.bf16.mxu0 %v16396_v19  ;;  %v16409_v34 = vld [vmem:[#allocation14 + $0x7a8] ss:$48 sps:$4 sm:$0xff]  }
 0x5d1   :  { %v7114_v38 = vpop.f32.mrf.mxu0  ;;  %7447 = vmatprep.subr.bf16.mxu1 %v16399_v24  ;;  %v16439_v19 = vld [vmem:[#allocation14 + $0xbc8] ss:$48 sps:$4 sm:$0xff]   ;;  %v16447_v24 = vld [vmem:[#allocation14 + $0xb6c] ss:$48 sps:$4 sm:$0xff]   ;;  %16484 = vrsqrt.f32 %v7488_v40 }
 0x5d2   :  { %v7155_v44 = vpop.f32.mrf.mxu1  ;;  %7407 = vmatpush1.bf16.msra.mxu0 %v16394_v32  ;;  %v16442_v18 = vld [vmem:[#allocation14 + $0x568] ss:$48 sps:$4 sm:$0xff]   ;;  %v16450_v32 = vld [vmem:[#allocation14 + $0x50c] ss:$48 sps:$4 sm:$0xff]  }
 0x5d3   :  { %7448 = vmatpush1.bf16.msra.mxu1 %v16397_v42  ;;  %v7115_v0 = vpop.f32.mrf.mxu0  ;;  %7408 = vmatprep.subr.bf16.mxu0 %v16402_v33  ;;  %v16445_v26 = vld [vmem:[#allocation14 + $0xb68] ss:$48 sps:$4 sm:$0xff]   ;;  %v16453_v42 = vld [vmem:[#allocation14 + $0xb0c] ss:$48 sps:$4 sm:$0xff]   ;;  %v5029_v33 = vrot.slane %v17374_v25, %v17192_v12 }
 0x5d4   :  { %v7156_v50 = vpop.f32.mrf.mxu1  ;;  %7449 = vmatprep.subr.bf16.mxu1 %v16405_v37  ;;  %v16448_v37 = vld [vmem:[#allocation14 + $0x508] ss:$48 sps:$4 sm:$0xff]   ;;  %v16456_v44 = vld [vmem:[#allocation14 + $0x4ac] ss:$48 sps:$4 sm:$0xff]  }
 0x5d5   :  { %v16451_v38 = vld [vmem:[#allocation14 + $0xb08] ss:$48 sps:$4 sm:$0xff]   ;;  %v7113_v0 = vadd.f32 %v17393_v27, %v5029_v33  ;;  %v16462_v50 = vld [vmem:[#allocation14 + $0x44c] ss:$48 sps:$4 sm:$0xff]  }
 0x5d6   :  { %7409 = vmatpush1.bf16.msra.mxu0 %v16400_v41  ;;  %v16459_v41 = vld [vmem:[#allocation14 + $0xaac] ss:$48 sps:$4 sm:$0xff]   ;;  %v16460_v27 = vld [vmem:[#allocation14 + $0x448] ss:$48 sps:$4 sm:$0xff]  }
 0x5d7   :  { %7450 = vmatpush1.bf16.msra.mxu1 %v16403_v45  ;;  %7410 = vmatprep.subr.bf16.mxu0 %v16408_v49  ;;  %v16454_v45 = vld [vmem:[#allocation14 + $0x4a8] ss:$48 sps:$4 sm:$0xff]  }
 0x5d8   :  { %7451 = vmatprep.subr.bf16.mxu1 %v16411_v51  ;;  %v16457_v49 = vld [vmem:[#allocation14 + $0xaa8] ss:$48 sps:$4 sm:$0xff]  }
 0x5d9   :  { %v17403_v51 = vld [vmem:[#allocation20] sm:$0xff]  ;;  %v17423_v40 = vld [vmem:[#allocation19] sm:$0xff] }
 0x5da   :  { %7411 = vmatpush1.bf16.msra.mxu0 %v16406_v52  ;;  %v16465_v52 = vld [vmem:[#allocation14 + $0xa4c] ss:$48 sps:$4 sm:$0xff]  }
 0x5db   :  { %7452 = vmatpush1.bf16.msra.mxu1 %v16409_v34  ;;  %7412 = vmatprep.subr.bf16.mxu0 %v16414_v56  ;;  %v7503_v34 = vrot.slane %v17403_v51, %v17189_v11  ;;  %v7154_v56 = vadd.f32 %v17398_v36, %v7113_v0 }
 0x5dc   :  { %7453 = vmatprep.subr.bf16.mxu1 %v16417_v57  ;;  %v7511_v57 = vrot.slane %v17403_v51, %v17192_v12 }
 0x5de   :  { %7413 = vmatpush1.bf16.msra.mxu0 %v16412_v58  ;;  %v16463_v58 = vld [vmem:[#allocation14 + $0xa48] ss:$48 sps:$4 sm:$0xff]  }
 0x5df   :  { %7454 = vmatpush1.bf16.msra.mxu1 %v16415_v59  ;;  %7414 = vmatprep.subr.bf16.mxu0 %v16420_v60  ;;  %v16468_v59 = vld [vmem:[#allocation14 + $0x3ec] ss:$48 sps:$4 sm:$0xff]   ;;  %v17410_v60 = vpop.eup %16484 }
 0x5e0   :  { %7455 = vmatprep.subr.bf16.mxu1 %v16423_v5  ;;  %v16471_v5 = vld [vmem:[#allocation14 + $0x9ec] ss:$48 sps:$4 sm:$0xff]   ;;  %v7585_v36 = vrot.slane %v17410_v60, %v17192_v12 }
 0x5e2   :  { %7415 = vmatpush1.bf16.msra.mxu0 %v16418_v28  ;;  %v7557_v28 = vsub.f32 %v17386_v54, %v7503_v34 }
 0x5e3   :  { %7456 = vmatpush1.bf16.msra.mxu1 %v16421_v6  ;;  %7416 = vmatprep.subr.bf16.mxu0 %v16426_v7  ;;  %v7577_v6 = vrot.slane %v17410_v60, %v17189_v11  ;;  %v7559_v7 = vsub.f32 %v7154_v56, %v7511_v57  ;;  %v7970_v57 = vld [vmem:[#allocation23 + $0x580] sm:$0xff] }
 0x5e4   :  { %7457 = vmatprep.subr.bf16.mxu1 %v16429_v2  ;;  %v16466_v2 = vld [vmem:[#allocation14 + $0x3e8] ss:$48 sps:$4 sm:$0xff]  }
 0x5e6   :  { %7417 = vmatpush1.bf16.msra.mxu0 %v16424_v14  ;;  %v16469_v14 = vld [vmem:[#allocation14 + $0x9e8] ss:$48 sps:$4 sm:$0xff]  }
 0x5e7   :  { %7458 = vmatpush1.bf16.msra.mxu1 %v16427_v31  ;;  %7418 = vmatprep.subr.bf16.mxu0 %v16432_v53  ;;  %v16474_v31 = vld [vmem:[#allocation14 + $0x38c] ss:$48 sps:$4 sm:$0xff]  }
 0x5e8   :  { %7459 = vmatprep.subr.bf16.mxu1 %v16435_v20  ;;  %v17417_v53 = vld [vmem:[#allocation17] sm:$0xff] }
 0x5e9   :  { %v16477_v20 = vld [vmem:[#allocation14 + $0x98c] ss:$48 sps:$4 sm:$0xff]   ;;  %v7653_v54 = vrot.slane %v17417_v53, %v17189_v11 }
 0x5ea   :  { %7419 = vmatpush1.bf16.msra.mxu0 %v16430_v63  ;;  %v7631_v63 = vmul.f32 %v7577_v6, %v7557_v28  ;;  %v7838_v28 = vld [vmem:[#allocation23 + $0x160] sm:$0xff] }
 0x5eb   :  { %7460 = vmatpush1.bf16.msra.mxu1 %v16433_v29  ;;  %7420 = vmatprep.subr.bf16.mxu0 %v16438_v3  ;;  %v7633_v29 = vmul.f32 %v7585_v36, %v7559_v7  ;;  %v7661_v3 = vrot.slane %v17417_v53, %v17192_v12 }
 0x5ec   :  { %7461 = vmatprep.subr.bf16.mxu1 %v16441_v16  ;;  %v16475_v16 = vld [vmem:[#allocation14 + $0x988] ss:$48 sps:$4 sm:$0xff]  }
 0x5ed   :  { %v7709_v33 = vmul.f32 %v7661_v3, %v7633_v29 }
 0x5ee   :  { %7421 = vmatpush2.bf16.msra.mxu0 %v16436_v17  ;;  %v16480_v17 = vld [vmem:[#allocation14 + $0x32c] ss:$48 sps:$4 sm:$0xff]  }
 0x5ef   :  { %7462 = vmatpush2.bf16.msra.mxu1 %v16439_v19  ;;  %7422 = vmatprep.subr.bf16.mxu0 %v16444_v23  ;;  %v16483_v19 = vld [vmem:[#allocation14 + $0x92c] ss:$48 sps:$4 sm:$0xff]  }
 0x5f0   :  { %7463 = vmatprep.subr.bf16.mxu1 %v16447_v24  ;;  %v7850_v23 = vld [vmem:[#allocation23 + $0x1c0] sm:$0xff] }
 0x5f1   :  { %v7854_v24 = vld [vmem:[#allocation23 + $0x1e0] sm:$0xff] }
 0x5f2   :  { %7423 = vmatpush2.bf16.msra.mxu0 %v16442_v18  ;;  %v7707_v18 = vmul.f32 %v7653_v54, %v7631_v63  ;;  %v15009_v34 = vcombine.low %v7850_v23, %v7854_v24 }
 0x5f3   :  { %7464 = vmatpush2.bf16.msra.mxu1 %v16445_v26  ;;  %7424 = vmatprep.subr.bf16.mxu0 %v16450_v32  ;;  %v7978_v26 = vld [vmem:[#allocation23 + $0x5c0] sm:$0xff] }
 0x5f4   :  { %7465 = vmatprep.subr.bf16.mxu1 %v16453_v42  ;;  %v7982_v32 = vld [vmem:[#allocation23 + $0x5e0] sm:$0xff]  ;;  %v7729_v42 = vrot.slane %v17423_v40, %v17189_v11 }
 0x5f5   :  { %v15138_v0 = vcombine.high %v7978_v26, %v7982_v32 }
 0x5f6   :  { %7425 = vmatpush2.bf16.msra.mxu0 %v16448_v37  ;;  %v16478_v37 = vld [vmem:[#allocation14 + $0x328] ss:$48 sps:$4 sm:$0xff]  }
 0x5f7   :  { %7466 = vmatpush2.bf16.msra.mxu1 %v16451_v38  ;;  %7426 = vmatprep.subr.bf16.mxu0 %v16456_v44  ;;  %v7737_v38 = vrot.slane %v17423_v40, %v17192_v12  ;;  %v16481_v44 = vld [vmem:[#allocation14 + $0x928] ss:$48 sps:$4 sm:$0xff]  }
 0x5f8   :  { %7467 = vmatprep.subr.bf16.mxu1 %v16459_v41  ;;  %v15010_v41 = vcombine.high %v7850_v23, %v7854_v24  ;;  %v7954_v24 = vld [vmem:[#allocation23 + $0x500] sm:$0xff] }
 0x5f9   :  { %v7785_v56 = vadd.f32 %v7737_v38, %v7709_v33 }
 0x5fa   :  { %7427 = vmatpush2.bf16.msra.mxu0 %v16454_v45  ;;  %v7783_v45 = vadd.f32 %v7729_v42, %v7707_v18  ;;  %v7958_v18 = vld [vmem:[#allocation23 + $0x520] sm:$0xff] }
 0x5fb   :  { %7468 = vmatpush2.bf16.msra.mxu1 %v16457_v49  ;;  %7428 = vmatprep.subr.bf16.mxu0 %v16462_v50  ;;  %v7842_v49 = vld [vmem:[#allocation23 + $0x180] sm:$0xff]  ;;  %v17435_v63 = vpack.c.bf16 %v7785_v56, %v7785_v56 }
 0x5fc   :  { %7469 = vmatprep.subr.bf16.mxu1 %v16465_v52  ;;  %v7846_v50 = vld [vmem:[#allocation23 + $0x1a0] sm:$0xff]  ;;  %v5033_v52 = vrot.slane %v17374_v25, %v17243_v55  ;;  %v17432_v7 = vpack.c.bf16 %v7783_v45, %v7783_v45 }
 0x5fd   :  { %v15001_v54 = vcombine.low %v7842_v49, %v7846_v50  ;;  %v7946_v45 = vld [vmem:[#allocation23 + $0x4c0] sm:$0xff] }
 0x5fe   :  { %7429 = vmatpush2.bf16.msra.mxu0 %v16460_v27  ;;  %v7974_v27 = vld [vmem:[#allocation23 + $0x5a0] sm:$0xff] }
 0x5ff   :  { %7470 = vmatpush2.bf16.msra.mxu1 %v16463_v58  ;;  %7430 = vmatprep.subr.bf16.mxu0 %v16468_v59  ;;  %v15137_v58 = vcombine.low %v7978_v26, %v7982_v32  ;;  %v15002_v59 = vcombine.high %v7842_v49, %v7846_v50  ;;  %v15130_v36 = vcombine.high %v7970_v57, %v7974_v27  ;;  %v7950_v49 = vld [vmem:[#allocation23 + $0x4e0] sm:$0xff] }
 0x600   :  { %7471 = vmatprep.subr.bf16.mxu1 %v16471_v5  ;;  %v7834_v5 = vld [vmem:[#allocation23 + $0x140] sm:$0xff]  ;;  %v15129_v3 = vcombine.low %v7970_v57, %v7974_v27  ;;  %v15106_v56 = vcombine.high %v7946_v45, %v7950_v49 }
 0x601   :  { %v14993_v32 = vcombine.low %v7834_v5, %v7838_v28  ;;  %v7810_v57 = vld [vmem:[#allocation23 + $0x80] sm:$0xff] }
 0x602   :  { %7431 = vmatpush2.bf16.msra.mxu0 %v16466_v2  ;;  %v7962_v2 = vld [vmem:[#allocation23 + $0x540] sm:$0xff] }
 0x603   :  { %7472 = vmatpush2.bf16.msra.mxu1 %v16469_v14  ;;  %7432 = vmatprep.subr.bf16.mxu0 %v16474_v31  ;;  %v7966_v14 = vld [vmem:[#allocation23 + $0x560] sm:$0xff] }
 0x604   :  { %7473 = vmatprep.subr.bf16.mxu1 %v16477_v20  ;;  %v15121_v33 = vcombine.low %v7962_v2, %v7966_v14  ;;  %v7814_v27 = vld [vmem:[#allocation23 + $0xa0] sm:$0xff] }
 0x606   :  { %7433 = vmatpush2.bf16.msra.mxu0 %v16472_v15 }
 0x607   :  { %7474 = vmatpush2.bf16.msra.mxu1 %v16475_v16  ;;  %7434 = vmatprep.subr.bf16.mxu0 %v16480_v17  ;;  %v15122_v17 = vcombine.high %v7962_v2, %v7966_v14  ;;  %v7802_v2 = vld [vmem:[#allocation23 + $0x40] sm:$0xff] }
 0x608   :  { %7475 = vmatprep.subr.bf16.mxu1 %v16483_v19  ;;  %v7830_v19 = vld [vmem:[#allocation23 + $0x120] sm:$0xff] }
 0x609   :  { %v7806_v14 = vld [vmem:[#allocation23 + $0x60] sm:$0xff] }
 0x60a   :  { %7435 = vmatpush2.bf16.msra.mxu0 %v16478_v37 }
 0x60b   :  { %7476 = vmatpush2.bf16.msra.mxu1 %v16481_v44  ;;  %12456 = vmatprep.subr.bf16.mxu0 %v15010_v41  ;;  %v15114_v44 = vcombine.high %v7954_v24, %v7958_v18  ;;  %v7818_v41 = vld [vmem:[#allocation23 + $0xc0] sm:$0xff] }
 0x60c   :  { %12497 = vmatprep.subr.bf16.mxu1 %v15138_v0  ;;  %v7822_v0 = vld [vmem:[#allocation23 + $0xe0] sm:$0xff] }
 0x60d   :  { %v7192_v6 = vpop.f32.mrf.mxu0  ;;  %7437 = vmatmul.mubr.bf16.vlgmr.msra.gmra.mxu0 %v17356_v8  ;;  %v14994_v8 = vcombine.high %v7834_v5, %v7838_v28  ;;  %v14977_v5 = vcombine.low %v7818_v41, %v7822_v0  ;;  %v15105_v28 = vcombine.low %v7946_v45, %v7950_v49 }
 0x60e   :  { %v7193_v31 = vadd.f32 %v7192_v6, %v5033_v52  ;;  %v7233_v20 = vpop.f32.mrf.mxu1  ;;  %7478 = vmatmul.mubr.bf16.vlgmr.msra.gmra.mxu1 %v17352_v30  ;;  %12457 = vmatpush1.bf16.msra.mxu0 %v15009_v34  ;;  %v7826_v30 = vld [vmem:[#allocation23 + $0x100] sm:$0xff]  ;;  %v15113_v52 = vcombine.low %v7954_v24, %v7958_v18  ;;  %v14978_v34 = vcombine.high %v7818_v41, %v7822_v0 }
 0x60f   :  { %12488 = vmatprep.mubr.bf16.mxu0 %v17432_v7  ;;  %12498 = vmatpush1.bf16.msra.mxu1 %v15137_v58  ;;  %v17438_v29 = vpop.f32.mrf.mxu0  ;;  %v14986_v37 = vcombine.high %v7826_v30, %v7830_v19  ;;  %v14985_v50 = vcombine.low %v7826_v30, %v7830_v19  ;;  %v7938_v58 = vld [vmem:[#allocation23 + $0x480] sm:$0xff]  ;;  %v14970_v6 = vcombine.high %v7810_v57, %v7814_v27 }
 0x610   :  { %v17440_v15 = vadd.f32 %v7233_v20, %v7193_v31  ;;  %12529 = vmatprep.mubr.bf16.mxu1 %v17435_v63  ;;  %v17443_v16 = vpop.f32.mrf.mxu1  ;;  %12458 = vmatprep.subr.bf16.mxu0 %v15002_v59  ;;  %v7942_v59 = vld [vmem:[#allocation23 + $0x4a0] sm:$0xff]  ;;  %v14961_v18 = vcombine.low %v7802_v2, %v7806_v14 }
 0x611   :  { %v7196_v23 = vpop.f32.mrf.mxu0  ;;  %12499 = vmatprep.subr.bf16.mxu1 %v15130_v36  ;;  %v15098_v36 = vcombine.high %v7938_v58, %v7942_v59  ;;  %v7930_v31 = vld [vmem:[#allocation23 + $0x440] sm:$0xff] }
 0x612   :  { %v7237_v26 = vpop.f32.mrf.mxu1  ;;  %12459 = vmatpush1.bf16.msra.mxu0 %v15001_v54  ;;  %v7934_v20 = vld [vmem:[#allocation23 + $0x460] sm:$0xff]  ;;  %v14969_v54 = vcombine.low %v7810_v57, %v7814_v27 }
 0x613   :  { %12500 = vmatpush1.bf16.msra.mxu1 %v15129_v3  ;;  %v7197_v42 = vpop.f32.mrf.mxu0  ;;  %12460 = vmatprep.subr.bf16.mxu0 %v14994_v8  ;;  %v15097_v3 = vcombine.low %v7938_v58, %v7942_v59  ;;  %v14962_v8 = vcombine.high %v7802_v2, %v7806_v14  ;;  %v7794_v30 = vld [vmem:[#allocation23] sm:$0xff]  ;;  %v15089_v26 = vcombine.low %v7930_v31, %v7934_v20 }
 0x614   :  { %v7238_v38 = vpop.f32.mrf.mxu1  ;;  %12501 = vmatprep.subr.bf16.mxu1 %v15122_v17  ;;  %v15090_v17 = vcombine.high %v7930_v31, %v7934_v20  ;;  %v7798_v19 = vld [vmem:[#allocation23 + $0x20] sm:$0xff] }
 0x615   :  { %v7922_v23 = vld [vmem:[#allocation23 + $0x400] sm:$0xff]  ;;  %v14953_v41 = vcombine.low %v7794_v30, %v7798_v19 }
 0x616   :  { %12461 = vmatpush1.bf16.msra.mxu0 %v14993_v32  ;;  %v7926_v24 = vld [vmem:[#allocation23 + $0x420] sm:$0xff]  ;;  %v14954_v32 = vcombine.high %v7794_v30, %v7798_v19 }
 0x617   :  { %12502 = vmatpush1.bf16.msra.mxu1 %v15121_v33  ;;  %12462 = vmatprep.subr.bf16.mxu0 %v14986_v37  ;;  %v15082_v42 = vcombine.high %v7922_v23, %v7926_v24  ;;  %v7914_v33 = vld [vmem:[#allocation23 + $0x3c0] sm:$0xff]  ;;  %v15081_v0 = vcombine.low %v7922_v23, %v7926_v24 }
 0x618   :  { %12503 = vmatprep.subr.bf16.mxu1 %v15114_v44  ;;  %v7918_v37 = vld [vmem:[#allocation23 + $0x3e0] sm:$0xff] }
 0x619   :  { %v8042_v38 = vld [vmem:[#allocation23 + $0x7c0] sm:$0xff]  ;;  %v15074_v45 = vcombine.high %v7914_v33, %v7918_v37  ;;  %v15073_v57 = vcombine.low %v7914_v33, %v7918_v37 }
 0x61a   :  { %12463 = vmatpush1.bf16.msra.mxu0 %v14985_v50  ;;  %v8046_v44 = vld [vmem:[#allocation23 + $0x7e0] sm:$0xff] }
 0x61b   :  { %12504 = vmatpush1.bf16.msra.mxu1 %v15113_v52  ;;  %12464 = vmatprep.subr.bf16.mxu0 %v14978_v34  ;;  %v15202_v49 = vcombine.high %v8042_v38, %v8046_v44  ;;  %v7906_v50 = vld [vmem:[#allocation23 + $0x380] sm:$0xff]  ;;  %v15201_v27 = vcombine.low %v8042_v38, %v8046_v44 }
 0x61c   :  { %12505 = vmatprep.subr.bf16.mxu1 %v15106_v56  ;;  %v7910_v52 = vld [vmem:[#allocation23 + $0x3a0] sm:$0xff] }
 0x61d   :  { %v8034_v34 = vld [vmem:[#allocation23 + $0x780] sm:$0xff]  ;;  %v15066_v58 = vcombine.high %v7906_v50, %v7910_v52  ;;  %v15065_v2 = vcombine.low %v7906_v50, %v7910_v52  ;;  %v7519_v52 = vrot.slane %v17403_v51, %v17205_v21 }
 0x61e   :  { %12465 = vmatpush1.bf16.msra.mxu0 %v14977_v5  ;;  %v8038_v56 = vld [vmem:[#allocation23 + $0x7a0] sm:$0xff] }
 0x61f   :  { %12506 = vmatpush1.bf16.msra.mxu1 %v15105_v28  ;;  %12466 = vmatprep.subr.bf16.mxu0 %v14970_v6  ;;  %v15194_v59 = vcombine.high %v8034_v34, %v8038_v56  ;;  %v7898_v5 = vld [vmem:[#allocation23 + $0x340] sm:$0xff]  ;;  %v15193_v14 = vcombine.low %v8034_v34, %v8038_v56 }
 0x620   :  { %12507 = vmatprep.subr.bf16.mxu1 %v15098_v36  ;;  %v7902_v28 = vld [vmem:[#allocation23 + $0x360] sm:$0xff] }
 0x621   :  { %v8026_v6 = vld [vmem:[#allocation23 + $0x740] sm:$0xff]  ;;  %v15058_v31 = vcombine.high %v7898_v5, %v7902_v28  ;;  %v15057_v19 = vcombine.low %v7898_v5, %v7902_v28 }
 0x622   :  { %12467 = vmatpush1.bf16.msra.mxu0 %v14969_v54  ;;  %v8030_v36 = vld [vmem:[#allocation23 + $0x760] sm:$0xff] }
 0x623   :  { %12508 = vmatpush1.bf16.msra.mxu1 %v15097_v3  ;;  %12468 = vmatprep.subr.bf16.mxu0 %v14962_v8  ;;  %v15186_v20 = vcombine.high %v8026_v6, %v8030_v36  ;;  %v7890_v54 = vld [vmem:[#allocation23 + $0x300] sm:$0xff]  ;;  %v5037_v8 = vrot.slane %v17374_v25, %v17205_v21  ;;  %v15185_v23 = vcombine.low %v8026_v6, %v8030_v36 }
 0x624   :  { %12509 = vmatprep.subr.bf16.mxu1 %v15090_v17  ;;  %v7894_v3 = vld [vmem:[#allocation23 + $0x320] sm:$0xff]  ;;  %v7499_v25 = vrot.slane %v17403_v51, %v17183_v9 }
 0x625   :  { %v8018_v17 = vld [vmem:[#allocation23 + $0x700] sm:$0xff]  ;;  %v15050_v24 = vcombine.high %v7890_v54, %v7894_v3  ;;  %v15049_v38 = vcombine.low %v7890_v54, %v7894_v3 }
 0x626   :  { %12469 = vmatpush1.bf16.msra.mxu0 %v14961_v18  ;;  %v8022_v30 = vld [vmem:[#allocation23 + $0x720] sm:$0xff] }
 0x627   :  { %12510 = vmatpush1.bf16.msra.mxu1 %v15089_v26  ;;  %12470 = vmatprep.subr.bf16.mxu0 %v14954_v32  ;;  %v15178_v18 = vcombine.high %v8018_v17, %v8022_v30  ;;  %v7882_v26 = vld [vmem:[#allocation23 + $0x2c0] sm:$0xff]  ;;  %v15177_v44 = vcombine.low %v8018_v17, %v8022_v30 }
 0x628   :  { %12511 = vmatprep.subr.bf16.mxu1 %v15082_v42  ;;  %v7886_v32 = vld [vmem:[#allocation23 + $0x2e0] sm:$0xff]  ;;  %v7195_v42 = vadd.f32 %v17438_v29, %v5037_v8 }
 0x629   :  { %v8010_v33 = vld [vmem:[#allocation23 + $0x6c0] sm:$0xff] }
 0x62a   :  { %12471 = vmatpush1.bf16.msra.mxu0 %v14953_v41  ;;  %v8014_v37 = vld [vmem:[#allocation23 + $0x6e0] sm:$0xff]  ;;  %v15042_v41 = vcombine.high %v7882_v26, %v7886_v32  ;;  %v7236_v29 = vadd.f32 %v17443_v16, %v7195_v42  ;;  %v7581_v16 = vrot.slane %v17410_v60, %v17186_v10 }
 0x62b   :  { %12512 = vmatpush1.bf16.msra.mxu1 %v15081_v0  ;;  %12472 = vmatprep.subr.bf16.mxu0 %v15074_v45  ;;  %v7507_v0 = vrot.slane %v17403_v51, %v17186_v10  ;;  %v15170_v45 = vcombine.high %v8010_v33, %v8014_v37  ;;  %v7878_v50 = vld [vmem:[#allocation23 + $0x2a0] sm:$0xff] }
 0x62c   :  { %12513 = vmatprep.subr.bf16.mxu1 %v15202_v49  ;;  %v7874_v49 = vld [vmem:[#allocation23 + $0x280] sm:$0xff] }
 0x62d   :  { %v8002_v34 = vld [vmem:[#allocation23 + $0x680] sm:$0xff]  ;;  %v15034_v5 = vcombine.high %v7874_v49, %v7878_v50  ;;  %v7558_v28 = vsub.f32 %v17395_v35, %v7507_v0  ;;  %v15033_v3 = vcombine.low %v7874_v49, %v7878_v50  ;;  %v7733_v49 = vrot.slane %v17423_v40, %v17186_v10 }
 0x62e   :  { %12473 = vmatpush2.bf16.msra.mxu0 %v15073_v57  ;;  %v8006_v56 = vld [vmem:[#allocation23 + $0x6a0] sm:$0xff]  ;;  %v7573_v57 = vrot.slane %v17410_v60, %v17183_v9 }
 0x62f   :  { %12514 = vmatpush2.bf16.msra.mxu1 %v15201_v27  ;;  %12474 = vmatprep.subr.bf16.mxu0 %v15066_v58  ;;  %v15041_v27 = vcombine.low %v7882_v26, %v7886_v32  ;;  %v7556_v58 = vsub.f32 %v17383_v48, %v7499_v25  ;;  %v15162_v6 = vcombine.high %v8002_v34, %v8006_v56  ;;  %v7866_v36 = vld [vmem:[#allocation23 + $0x240] sm:$0xff] }
 0x630   :  { %12515 = vmatprep.subr.bf16.mxu1 %v15194_v59  ;;  %v15169_v59 = vcombine.low %v8010_v33, %v8014_v37  ;;  %v7998_v54 = vld [vmem:[#allocation23 + $0x660] sm:$0xff]  ;;  %v7649_v48 = vrot.slane %v17417_v53, %v17183_v9  ;;  %v15161_v35 = vcombine.low %v8002_v34, %v8006_v56  ;;  %v7632_v30 = vmul.f32 %v7581_v16, %v7558_v28 }
 0x631   :  { %v7630_v8 = vmul.f32 %v7573_v57, %v7556_v58  ;;  %v7669_v32 = vrot.slane %v17417_v53, %v17205_v21  ;;  %v7986_v42 = vld [vmem:[#allocation23 + $0x600] sm:$0xff]  ;;  %v7745_v57 = vrot.slane %v17423_v40, %v17205_v21 }
 0x632   :  { %12475 = vmatpush2.bf16.msra.mxu0 %v15065_v2  ;;  %v7870_v2 = vld [vmem:[#allocation23 + $0x260] sm:$0xff] }
 0x633   :  { %12516 = vmatpush2.bf16.msra.mxu1 %v15193_v14  ;;  %12476 = vmatprep.subr.bf16.mxu0 %v15058_v31  ;;  %v7561_v14 = vsub.f32 %v7236_v29, %v7519_v52  ;;  %v7593_v31 = vrot.slane %v17410_v60, %v17205_v21  ;;  %v15026_v17 = vcombine.high %v7866_v36, %v7870_v2  ;;  %v7990_v33 = vld [vmem:[#allocation23 + $0x620] sm:$0xff] }
 0x634   :  { %12517 = vmatprep.subr.bf16.mxu1 %v15186_v20  ;;  %v7994_v20 = vld [vmem:[#allocation23 + $0x640] sm:$0xff]  ;;  %v15025_v37 = vcombine.low %v7866_v36, %v7870_v2  ;;  %v7706_v25 = vmul.f32 %v7649_v48, %v7630_v8  ;;  %v15145_v58 = vcombine.low %v7986_v42, %v7990_v33 }
 0x635   :  { %v7635_v26 = vmul.f32 %v7593_v31, %v7561_v14  ;;  %v8106_v50 = vld [vmem:[#allocation23 + $0x9c0] sm:$0xff] }
 0x636   :  { %12477 = vmatpush2.bf16.msra.mxu0 %v15057_v19  ;;  %v7657_v19 = vrot.slane %v17417_v53, %v17186_v10  ;;  %v8110_v29 = vld [vmem:[#allocation23 + $0x9e0] sm:$0xff] }
 0x637   :  { %12518 = vmatpush2.bf16.msra.mxu1 %v15185_v23  ;;  %12478 = vmatprep.subr.bf16.mxu0 %v15050_v24  ;;  %v15154_v23 = vcombine.high %v7994_v20, %v7998_v54  ;;  %v7858_v24 = vld [vmem:[#allocation23 + $0x200] sm:$0xff]  ;;  %v7711_v52 = vmul.f32 %v7669_v32, %v7635_v26 }
 0x638   :  { %12519 = vmatprep.subr.bf16.mxu1 %v15178_v18  ;;  %v7862_v18 = vld [vmem:[#allocation23 + $0x220] sm:$0xff]  ;;  %v7708_v0 = vmul.f32 %v7657_v19, %v7632_v30 }
 0x639   :  { %v8234_v34 = vld [vmem:[#allocation23 + $0xdc0] sm:$0xff]  ;;  %v7787_v36 = vadd.f32 %v7745_v57, %v7711_v52  ;;  %v7601_v57 = vrot.slane %v17410_v60, %v17208_v22 }
 0x63a   :  { %12479 = vmatpush2.bf16.msra.mxu0 %v15049_v38  ;;  %v7725_v38 = vrot.slane %v17423_v40, %v17183_v9  ;;  %v8238_v56 = vld [vmem:[#allocation23 + $0xde0] sm:$0xff]  ;;  %v7784_v28 = vadd.f32 %v7733_v49, %v7708_v0  ;;  %v7527_v0 = vrot.slane %v17403_v51, %v17208_v22 }
 0x63b   :  { %12520 = vmatpush2.bf16.msra.mxu1 %v15177_v44  ;;  %12480 = vmatprep.subr.bf16.mxu0 %v15042_v41  ;;  %v15153_v44 = vcombine.low %v7994_v20, %v7998_v54  ;;  %v15018_v41 = vcombine.high %v7858_v24, %v7862_v18  ;;  %v15394_v16 = vcombine.high %v8234_v34, %v8238_v56  ;;  %v8102_v2 = vld [vmem:[#allocation23 + $0x9a0] sm:$0xff] }
 0x63c   :  { %12521 = vmatprep.subr.bf16.mxu1 %v15170_v45  ;;  %v15146_v45 = vcombine.high %v7986_v42, %v7990_v33  ;;  %v8226_v14 = vld [vmem:[#allocation23 + $0xd80] sm:$0xff]  ;;  %v15265_v20 = vcombine.low %v8106_v50, %v8110_v29  ;;  %v15393_v48 = vcombine.low %v8234_v34, %v8238_v56 }
 0x63d   :  { %v8230_v31 = vld [vmem:[#allocation23 + $0xda0] sm:$0xff] }
 0x63e   :  { %12481 = vmatpush2.bf16.msra.mxu0 %v15041_v27  ;;  %v15017_v27 = vcombine.low %v7858_v24, %v7862_v18  ;;  %v17479_v8 = vld [vmem:[#allocation16] sm:$0xff]  ;;  %v15386_v30 = vcombine.high %v8226_v14, %v8230_v31  ;;  %v17486_v18 = vpack.c.bf16 %v7787_v36, %v7787_v36 }
 0x63f   :  { %12522 = vmatpush2.bf16.msra.mxu1 %v15169_v59  ;;  %12482 = vmatprep.subr.bf16.mxu0 %v15034_v5  ;;  %v7782_v59 = vadd.f32 %v7725_v38, %v7706_v25  ;;  %v15266_v5 = vcombine.high %v8106_v50, %v8110_v29  ;;  %v8090_v19 = vld [vmem:[#allocation23 + $0x940] sm:$0xff]  ;;  %v15385_v38 = vcombine.low %v8226_v14, %v8230_v31 }
 0x640   :  { %12523 = vmatprep.subr.bf16.mxu1 %v15162_v6  ;;  %v8098_v6 = vld [vmem:[#allocation23 + $0x980] sm:$0xff] }
 0x641   :  { %v17475_v54 = vpack.c.bf16 %v7782_v59, %v7782_v59  ;;  %v8218_v26 = vld [vmem:[#allocation23 + $0xd40] sm:$0xff]  ;;  %v15257_v33 = vcombine.low %v8098_v6, %v8102_v2 }
 0x642   :  { %12483 = vmatpush2.bf16.msra.mxu0 %v15033_v3  ;;  %v17477_v3 = vpack.c.bf16 %v7784_v28, %v7784_v28  ;;  %v8222_v32 = vld [vmem:[#allocation23 + $0xd60] sm:$0xff] }
 0x643   :  { %12524 = vmatpush2.bf16.msra.mxu1 %v15161_v35  ;;  %12484 = vmatprep.subr.bf16.mxu0 %v15026_v17  ;;  %v5045_v35 = vrot.slane %v17479_v8, %v17208_v22  ;;  %v15258_v17 = vcombine.high %v8098_v6, %v8102_v2  ;;  %v8082_v49 = vld [vmem:[#allocation23 + $0x900] sm:$0xff]  ;;  %v7677_v6 = vrot.slane %v17417_v53, %v17208_v22 }
 0x644   :  { %12525 = vmatprep.subr.bf16.mxu1 %v15154_v23  ;;  %v8094_v23 = vld [vmem:[#allocation23 + $0x960] sm:$0xff] }
 0x645   :  { %v15250_v25 = vcombine.high %v8090_v19, %v8094_v23  ;;  %v8086_v50 = vld [vmem:[#allocation23 + $0x920] sm:$0xff] }
 0x646   :  { %12485 = vmatpush2.bf16.msra.mxu0 %v15025_v37  ;;  %v8210_v52 = vld [vmem:[#allocation23 + $0xd00] sm:$0xff]  ;;  %v15242_v28 = vcombine.high %v8082_v49, %v8086_v50 }
 0x647   :  { %12526 = vmatpush2.bf16.msra.mxu1 %v15153_v44  ;;  %12486 = vmatprep.subr.bf16.mxu0 %v15018_v41  ;;  %v8214_v34 = vld [vmem:[#allocation23 + $0xd20] sm:$0xff] }
 0x648   :  { %12527 = vmatprep.subr.bf16.mxu1 %v15146_v45  ;;  %v15378_v45 = vcombine.high %v8218_v26, %v8222_v32  ;;  %v15370_v2 = vcombine.high %v8210_v52, %v8214_v34  ;;  %v8074_v14 = vld [vmem:[#allocation23 + $0x8c0] sm:$0xff] }
 0x649   :  { %v8078_v31 = vld [vmem:[#allocation23 + $0x8e0] sm:$0xff] }
 0x64a   :  { %12487 = vmatpush2.bf16.msra.mxu0 %v15017_v27 }
 0x64b   :  { %12528 = vmatpush2.bf16.msra.mxu1 %v15145_v58  ;;  %12538 = vmatprep.subr.bf16.mxu0 %v15266_v5  ;;  %v15249_v58 = vcombine.low %v8090_v19, %v8094_v23  ;;  %v15377_v5 = vcombine.low %v8218_v26, %v8222_v32  ;;  %v15369_v19 = vcombine.low %v8210_v52, %v8214_v34  ;;  %v8062_v52 = vld [vmem:[#allocation23 + $0x860] sm:$0xff] }
 0x64c   :  { %12579 = vmatprep.subr.bf16.mxu1 %v15394_v16  ;;  %v15234_v23 = vcombine.high %v8074_v14, %v8078_v31  ;;  %v8186_v34 = vld [vmem:[#allocation23 + $0xc40] sm:$0xff] }
 0x64d   :  { %v17483_v24 = vpop.f32.mrf.mxu0  ;;  %12489 = vmatmul.mubr.bf16.vlgmr.msra.gmra.mxu0 %v17475_v54 }
 0x64e   :  { %v17488_v42 = vpop.f32.mrf.mxu1  ;;  %12530 = vmatmul.mubr.bf16.vlgmr.msra.gmra.mxu1 %v17477_v3  ;;  %12539 = vmatpush1.bf16.msra.mxu0 %v15265_v20  ;;  %v8202_v20 = vld [vmem:[#allocation23 + $0xcc0] sm:$0xff] }
 0x64f   :  { %12570 = vmatprep.mubr.bf16.mxu0 %v17486_v18  ;;  %12580 = vmatpush1.bf16.msra.mxu1 %v15393_v48  ;;  %v7276_v37 = vpop.f32.mrf.mxu0  ;;  %v8206_v48 = vld [vmem:[#allocation23 + $0xce0] sm:$0xff] }
 0x650   :  { %v7277_v44 = vadd.f32 %v7276_v37, %v5045_v35  ;;  %v7317_v41 = vpop.f32.mrf.mxu1  ;;  %12540 = vmatprep.subr.bf16.mxu0 %v15258_v17  ;;  %12581 = vmatprep.subr.bf16.mxu1 %v15386_v30  ;;  %v15241_v17 = vcombine.low %v8082_v49, %v8086_v50  ;;  %v7753_v30 = vrot.slane %v17423_v40, %v17208_v22  ;;  %v8070_v37 = vld [vmem:[#allocation23 + $0x8a0] sm:$0xff] }
 0x651   :  { %v7278_v29 = vpop.f32.mrf.mxu0  ;;  %v15362_v32 = vcombine.high %v8202_v20, %v8206_v48 }
 0x652   :  { %v7318_v56 = vadd.f32 %v7317_v41, %v7277_v44  ;;  %v7319_v27 = vpop.f32.mrf.mxu1  ;;  %12541 = vmatpush1.bf16.msra.mxu0 %v15257_v33  ;;  %v8066_v33 = vld [vmem:[#allocation23 + $0x880] sm:$0xff]  ;;  %v15233_v44 = vcombine.low %v8074_v14, %v8078_v31 }
 0x653   :  { %12582 = vmatpush1.bf16.msra.mxu1 %v15385_v38  ;;  %v7279_v59 = vpop.f32.mrf.mxu0  ;;  %12542 = vmatprep.subr.bf16.mxu0 %v15250_v25  ;;  %v8194_v38 = vld [vmem:[#allocation23 + $0xc80] sm:$0xff] }
 0x654   :  { %v7563_v16 = vsub.f32 %v7318_v56, %v7527_v0  ;;  %v7320_v36 = vpop.f32.mrf.mxu1  ;;  %12583 = vmatprep.subr.bf16.mxu1 %v15378_v45  ;;  %v8198_v25 = vld [vmem:[#allocation23 + $0xca0] sm:$0xff]  ;;  %v15361_v0 = vcombine.low %v8202_v20, %v8206_v48  ;;  %v15226_v45 = vcombine.high %v8066_v33, %v8070_v37 }
 0x655   :  { %v15354_v50 = vcombine.high %v8194_v38, %v8198_v25  ;;  %v8058_v29 = vld [vmem:[#allocation23 + $0x840] sm:$0xff]  ;;  %v15353_v27 = vcombine.low %v8194_v38, %v8198_v25 }
 0x656   :  { %v7637_v35 = vmul.f32 %v7601_v57, %v7563_v16  ;;  %12543 = vmatpush1.bf16.msra.mxu0 %v15249_v58  ;;  %v8190_v56 = vld [vmem:[#allocation23 + $0xc60] sm:$0xff]  ;;  %v15225_v57 = vcombine.low %v8066_v33, %v8070_v37  ;;  %v15218_v58 = vcombine.high %v8058_v29, %v8062_v52  ;;  %v15217_v36 = vcombine.low %v8058_v29, %v8062_v52 }
 0x657   :  { %12584 = vmatpush1.bf16.msra.mxu1 %v15377_v5  ;;  %12544 = vmatprep.subr.bf16.mxu0 %v15242_v28  ;;  %v15346_v59 = vcombine.high %v8186_v34, %v8190_v56  ;;  %v8050_v5 = vld [vmem:[#allocation23 + $0x800] sm:$0xff] }
 0x658   :  { %v7713_v26 = vmul.f32 %v7677_v6, %v7637_v35  ;;  %12585 = vmatprep.subr.bf16.mxu1 %v15370_v2  ;;  %v8054_v28 = vld [vmem:[#allocation23 + $0x820] sm:$0xff]  ;;  %v15345_v2 = vcombine.low %v8186_v34, %v8190_v56 }
 0x659   :  { %v8178_v16 = vld [vmem:[#allocation23 + $0xc00] sm:$0xff]  ;;  %v15210_v14 = vcombine.high %v8050_v5, %v8054_v28 }
 0x65a   :  { %12545 = vmatpush1.bf16.msra.mxu0 %v15241_v17  ;;  %v7789_v41 = vadd.f32 %v7753_v30, %v7713_v26  ;;  %v8182_v6 = vld [vmem:[#allocation23 + $0xc20] sm:$0xff]  ;;  %v15209_v30 = vcombine.low %v8050_v5, %v8054_v28 }
 0x65b   :  { %12586 = vmatpush1.bf16.msra.mxu1 %v15369_v19  ;;  %12546 = vmatprep.subr.bf16.mxu0 %v15234_v23  ;;  %v15338_v31 = vcombine.high %v8178_v16, %v8182_v6  ;;  %v8170_v20 = vld [vmem:[#allocation23 + $0xbc0] sm:$0xff]  ;;  %v15337_v19 = vcombine.low %v8178_v16, %v8182_v6 }
 0x65c   :  { %12587 = vmatprep.subr.bf16.mxu1 %v15362_v32  ;;  %v17500_v49 = vpack.c.bf16 %v7789_v41, %v7789_v41  ;;  %v8174_v48 = vld [vmem:[#allocation23 + $0xbe0] sm:$0xff] }
 0x65d   :  { %v8298_v35 = vld [vmem:[#allocation23 + $0xfc0] sm:$0xff]  ;;  %v15330_v23 = vcombine.high %v8170_v20, %v8174_v48  ;;  %v15329_v25 = vcombine.low %v8170_v20, %v8174_v48 }
 0x65e   :  { %12547 = vmatpush1.bf16.msra.mxu0 %v15233_v44  ;;  %12611 = vmatprep.mubr.bf16.mxu1 %v17500_v49  ;;  %v8302_v17 = vld [vmem:[#allocation23 + $0xfe0] sm:$0xff] }
 0x65f   :  { %12588 = vmatpush1.bf16.msra.mxu1 %v15361_v0  ;;  %12548 = vmatprep.subr.bf16.mxu0 %v15226_v45  ;;  %v15458_v26 = vcombine.high %v8298_v35, %v8302_v17  ;;  %v8162_v32 = vld [vmem:[#allocation23 + $0xb80] sm:$0xff]  ;;  %v15457_v44 = vcombine.low %v8298_v35, %v8302_v17 }
 0x660   :  { %12589 = vmatprep.subr.bf16.mxu1 %v15354_v50  ;;  %v8166_v33 = vld [vmem:[#allocation23 + $0xba0] sm:$0xff] }
 0x661   :  { %v8290_v37 = vld [vmem:[#allocation23 + $0xf80] sm:$0xff]  ;;  %v15322_v41 = vcombine.high %v8162_v32, %v8166_v33  ;;  %v15321_v34 = vcombine.low %v8162_v32, %v8166_v33 }
 0x662   :  { %12549 = vmatpush1.bf16.msra.mxu0 %v15225_v57  ;;  %v8294_v38 = vld [vmem:[#allocation23 + $0xfa0] sm:$0xff] }
 0x663   :  { %12590 = vmatpush1.bf16.msra.mxu1 %v15353_v27  ;;  %12550 = vmatprep.subr.bf16.mxu0 %v15218_v58  ;;  %v15450_v0 = vcombine.high %v8290_v37, %v8294_v38  ;;  %v8154_v45 = vld [vmem:[#allocation23 + $0xb40] sm:$0xff]  ;;  %v15449_v56 = vcombine.low %v8290_v37, %v8294_v38  ;;  %v5041_v27 = vrot.slane %v17479_v8, %v17240_v47 }
 0x664   :  { %12591 = vmatprep.subr.bf16.mxu1 %v15346_v59  ;;  %v8158_v50 = vld [vmem:[#allocation23 + $0xb60] sm:$0xff] }
 0x665   :  { %v8282_v29 = vld [vmem:[#allocation23 + $0xf40] sm:$0xff]  ;;  %v15314_v57 = vcombine.high %v8154_v45, %v8158_v50  ;;  %v15313_v6 = vcombine.low %v8154_v45, %v8158_v50 }
 0x666   :  { %12551 = vmatpush1.bf16.msra.mxu0 %v15217_v36  ;;  %v8286_v52 = vld [vmem:[#allocation23 + $0xf60] sm:$0xff] }
 0x667   :  { %12592 = vmatpush1.bf16.msra.mxu1 %v15345_v2  ;;  %12552 = vmatprep.subr.bf16.mxu0 %v15210_v14  ;;  %v15442_v58 = vcombine.high %v8282_v29, %v8286_v52  ;;  %v8146_v59 = vld [vmem:[#allocation23 + $0xb00] sm:$0xff]  ;;  %v15441_v36 = vcombine.low %v8282_v29, %v8286_v52  ;;  %v7275_v14 = vadd.f32 %v17483_v24, %v5041_v27  ;;  %v7487_v27 = vld [vmem:[#allocation22 + $0x8] sm:$0xf] }
 0x668   :  { %12593 = vmatprep.subr.bf16.mxu1 %v15338_v31  ;;  %v8150_v5 = vld [vmem:[#allocation23 + $0xb20] sm:$0xff]  ;;  %v7523_v24 = vrot.slane %v17403_v51, %v17240_v47 }
 0x669   :  { %v8274_v28 = vld [vmem:[#allocation23 + $0xf00] sm:$0xff]  ;;  %v15306_v2 = vcombine.high %v8146_v59, %v8150_v5  ;;  %v15305_v17 = vcombine.low %v8146_v59, %v8150_v5 }
 0x66a   :  { %12553 = vmatpush1.bf16.msra.mxu0 %v15209_v30  ;;  %v8278_v16 = vld [vmem:[#allocation23 + $0xf20] sm:$0xff]  ;;  %v7515_v30 = vrot.slane %v17403_v51, %v17243_v55  ;;  %v7597_v51 = vrot.slane %v17410_v60, %v17240_v47 }
 0x66b   :  { %12594 = vmatpush1.bf16.msra.mxu1 %v15337_v19  ;;  %12554 = vmatprep.subr.bf16.mxu0 %v15330_v23  ;;  %v15434_v31 = vcombine.high %v8274_v28, %v8278_v16  ;;  %v8138_v20 = vld [vmem:[#allocation23 + $0xac0] sm:$0xff]  ;;  %v15433_v19 = vcombine.low %v8274_v28, %v8278_v16 }
 0x66c   :  { %12595 = vmatprep.subr.bf16.mxu1 %v15458_v26  ;;  %v8142_v48 = vld [vmem:[#allocation23 + $0xae0] sm:$0xff]  ;;  %v7316_v26 = vadd.f32 %v17488_v42, %v7275_v14  ;;  %v7489_v14 = vadd.f32 1e-05, %v7487_v27 }
 0x66d   :  { %v8266_v35 = vld [vmem:[#allocation23 + $0xec0] sm:$0xff]  ;;  %v15298_v23 = vcombine.high %v8138_v20, %v8142_v48 }
 0x66e   :  { %12555 = vmatpush2.bf16.msra.mxu0 %v15329_v25  ;;  %v8270_v8 = vld [vmem:[#allocation23 + $0xee0] sm:$0xff]  ;;  %v7562_v50 = vsub.f32 %v7316_v26, %v7523_v24  ;;  %16486 = vrsqrt.f32 %v7489_v14 }
 0x66f   :  { %12596 = vmatpush2.bf16.msra.mxu1 %v15457_v44  ;;  %12556 = vmatprep.subr.bf16.mxu0 %v15322_v41  ;;  %v15426_v32 = vcombine.high %v8266_v35, %v8270_v8  ;;  %v8130_v33 = vld [vmem:[#allocation23 + $0xa80] sm:$0xff]  ;;  %v7589_v44 = vrot.slane %v17410_v60, %v17243_v55  ;;  %v15297_v41 = vcombine.low %v8138_v20, %v8142_v48 }
 0x670   :  { %12597 = vmatprep.subr.bf16.mxu1 %v15450_v0  ;;  %v8134_v37 = vld [vmem:[#allocation23 + $0xaa0] sm:$0xff]  ;;  %v7560_v0 = vsub.f32 %v17440_v15, %v7515_v30  ;;  %v15425_v45 = vcombine.low %v8266_v35, %v8270_v8  ;;  %v7636_v16 = vmul.f32 %v7597_v51, %v7562_v50  ;;  %v7673_v60 = vrot.slane %v17417_v53, %v17240_v47 }
 0x671   :  { %v8258_v38 = vld [vmem:[#allocation23 + $0xe80] sm:$0xff]  ;;  %v15290_v42 = vcombine.high %v8130_v33, %v8134_v37  ;;  %v15289_v15 = vcombine.low %v8130_v33, %v8134_v37  ;;  %v7741_v35 = vrot.slane %v17423_v40, %v17243_v55 }
 0x672   :  { %12557 = vmatpush2.bf16.msra.mxu0 %v15321_v34  ;;  %v8262_v25 = vld [vmem:[#allocation23 + $0xea0] sm:$0xff]  ;;  %v7634_v59 = vmul.f32 %v7589_v44, %v7560_v0 }
 0x673   :  { %12598 = vmatpush2.bf16.msra.mxu1 %v15449_v56  ;;  %12558 = vmatprep.subr.bf16.mxu0 %v15314_v57  ;;  %v15418_v29 = vcombine.high %v8258_v38, %v8262_v25  ;;  %v8122_v52 = vld [vmem:[#allocation23 + $0xa40] sm:$0xff]  ;;  %v15417_v5 = vcombine.low %v8258_v38, %v8262_v25 }
 0x674   :  { %12599 = vmatprep.subr.bf16.mxu1 %v15442_v58  ;;  %v8126_v34 = vld [vmem:[#allocation23 + $0xa60] sm:$0xff]  ;;  %v7665_v58 = vrot.slane %v17417_v53, %v17243_v55 }
 0x675   :  { %v8250_v56 = vld [vmem:[#allocation23 + $0xe40] sm:$0xff]  ;;  %v15282_v28 = vcombine.high %v8122_v52, %v8126_v34  ;;  %v15281_v48 = vcombine.low %v8122_v52, %v8126_v34 }
 0x676   :  { %12559 = vmatpush2.bf16.msra.mxu0 %v15313_v6  ;;  %v8254_v57 = vld [vmem:[#allocation23 + $0xe60] sm:$0xff]  ;;  %v7710_v8 = vmul.f32 %v7665_v58, %v7634_v59 }
 0x677   :  { %12600 = vmatpush2.bf16.msra.mxu1 %v15441_v36  ;;  %12560 = vmatprep.subr.bf16.mxu0 %v15306_v2  ;;  %v15410_v6 = vcombine.high %v8250_v56, %v8254_v57  ;;  %v8114_v36 = vld [vmem:[#allocation23 + $0xa00] sm:$0xff] }
 0x678   :  { %12601 = vmatprep.subr.bf16.mxu1 %v15434_v31  ;;  %v8118_v2 = vld [vmem:[#allocation23 + $0xa20] sm:$0xff]  ;;  %v7786_v25 = vadd.f32 %v7741_v35, %v7710_v8 }
 0x679   :  { %v8242_v31 = vld [vmem:[#allocation23 + $0xe00] sm:$0xff]  ;;  %v15274_v30 = vcombine.high %v8114_v36, %v8118_v2  ;;  %v15273_v37 = vcombine.low %v8114_v36, %v8118_v2  ;;  %v17538_v36 = vld [vmem:[#allocation20 + $0x8] sm:$0xf] }
 0x67a   :  { %12561 = vmatpush2.bf16.msra.mxu0 %v15305_v17  ;;  %v8246_v20 = vld [vmem:[#allocation23 + $0xe20] sm:$0xff]  ;;  %v15409_v17 = vcombine.low %v8250_v56, %v8254_v57  ;;  %v17526_v52 = vpack.c.bf16 %v7786_v25, %v7786_v25  ;;  %v7535_v35 = vrot.slane %v17538_v36, %v17189_v11 }
 0x67b   :  { %12602 = vmatpush2.bf16.msra.mxu1 %v15433_v19  ;;  %12562 = vmatprep.subr.bf16.mxu0 %v15298_v23  ;;  %v7712_v19 = vmul.f32 %v7673_v60, %v7636_v16  ;;  %v15402_v53 = vcombine.high %v8242_v31, %v8246_v20  ;;  %v7749_v23 = vrot.slane %v17423_v40, %v17240_v47  ;;  %v8362_v26 = vld [vmem:[#allocation23 + $0x11c0] sm:$0xff] }
 0x67c   :  { %12603 = vmatprep.subr.bf16.mxu1 %v15426_v32  ;;  %v8366_v24 = vld [vmem:[#allocation23 + $0x11e0] sm:$0xff]  ;;  %v15401_v38 = vcombine.low %v8242_v31, %v8246_v20 }
 0x67d   :  { %v8490_v32 = vld [vmem:[#allocation23 + $0x15c0] sm:$0xff]  ;;  %v15522_v44 = vcombine.high %v8362_v26, %v8366_v24  ;;  %v15521_v40 = vcombine.low %v8362_v26, %v8366_v24 }
 0x67e   :  { %12563 = vmatpush2.bf16.msra.mxu0 %v15297_v41  ;;  %v8494_v33 = vld [vmem:[#allocation23 + $0x15e0] sm:$0xff]  ;;  %v7788_v41 = vadd.f32 %v7749_v23, %v7712_v19  ;;  %v17542_v19 = vpop.eup %16486 }
 0x67f   :  { %12604 = vmatpush2.bf16.msra.mxu1 %v15425_v45  ;;  %12564 = vmatprep.subr.bf16.mxu0 %v15290_v42  ;;  %v8354_v0 = vld [vmem:[#allocation23 + $0x1180] sm:$0xff]  ;;  %v15650_v42 = vcombine.high %v8490_v32, %v8494_v33  ;;  %v15649_v56 = vcombine.low %v8490_v32, %v8494_v33  ;;  %v7609_v32 = vrot.slane %v17542_v19, %v17189_v11 }
 0x680   :  { %12605 = vmatprep.subr.bf16.mxu1 %v15418_v29  ;;  %v8358_v45 = vld [vmem:[#allocation23 + $0x11a0] sm:$0xff]  ;;  %v17524_v29 = vld [vmem:[#allocation16 + $0x8] sm:$0xf]  ;;  %v17528_v57 = vpack.c.bf16 %v7788_v41, %v7788_v41 }
 0x681   :  { %v8482_v50 = vld [vmem:[#allocation23 + $0x1580] sm:$0xff]  ;;  %v15514_v34 = vcombine.high %v8354_v0, %v8358_v45  ;;  %v5053_v27 = vrot.slane %v17524_v29, %v17189_v11 }
 0x682   :  { %12565 = vmatpush2.bf16.msra.mxu0 %v15289_v15  ;;  %v8486_v51 = vld [vmem:[#allocation23 + $0x15a0] sm:$0xff] }
 0x683   :  { %12606 = vmatpush2.bf16.msra.mxu1 %v15417_v5  ;;  %12566 = vmatprep.subr.bf16.mxu0 %v15282_v28  ;;  %v8346_v58 = vld [vmem:[#allocation23 + $0x1140] sm:$0xff]  ;;  %v15642_v59 = vcombine.high %v8482_v50, %v8486_v51  ;;  %v15641_v31 = vcombine.low %v8482_v50, %v8486_v51 }
 0x684   :  { %12607 = vmatprep.subr.bf16.mxu1 %v15410_v6  ;;  %v8350_v15 = vld [vmem:[#allocation23 + $0x1160] sm:$0xff]  ;;  %v15513_v6 = vcombine.low %v8354_v0, %v8358_v45 }
 0x685   :  { %v8474_v28 = vld [vmem:[#allocation23 + $0x1540] sm:$0xff]  ;;  %v15506_v14 = vcombine.high %v8346_v58, %v8350_v15 }
 0x686   :  { %12567 = vmatpush2.bf16.msra.mxu0 %v15281_v48  ;;  %v8478_v16 = vld [vmem:[#allocation23 + $0x1560] sm:$0xff] }
 0x687   :  { %12608 = vmatpush2.bf16.msra.mxu1 %v15409_v17  ;;  %12568 = vmatprep.subr.bf16.mxu0 %v15274_v30  ;;  %v8338_v8 = vld [vmem:[#allocation23 + $0x1100] sm:$0xff]  ;;  %v15634_v30 = vcombine.high %v8474_v28, %v8478_v16  ;;  %v15633_v41 = vcombine.low %v8474_v28, %v8478_v16 }
 0x688   :  { %12609 = vmatprep.subr.bf16.mxu1 %v15402_v53  ;;  %v8342_v17 = vld [vmem:[#allocation23 + $0x1120] sm:$0xff] }
 0x689   :  { %v8466_v23 = vld [vmem:[#allocation23 + $0x1500] sm:$0xff] }
 0x68a   :  { %12569 = vmatpush2.bf16.msra.mxu0 %v15273_v37  ;;  %v8470_v26 = vld [vmem:[#allocation23 + $0x1520] sm:$0xff]  ;;  %v15505_v37 = vcombine.low %v8346_v58, %v8350_v15  ;;  %v15497_v15 = vcombine.low %v8338_v8, %v8342_v17 }
 0x68b   :  { %12610 = vmatpush2.bf16.msra.mxu1 %v15401_v38  ;;  %12620 = vmatprep.subr.bf16.mxu0 %v15522_v44  ;;  %v17546_v38 = vld [vmem:[#allocation17 + $0x8] sm:$0xf]  ;;  %v15498_v44 = vcombine.high %v8338_v8, %v8342_v17  ;;  %v8330_v50 = vld [vmem:[#allocation23 + $0x10c0] sm:$0xff]  ;;  %v15625_v16 = vcombine.low %v8466_v23, %v8470_v26 }
 0x68c   :  { %12661 = vmatprep.subr.bf16.mxu1 %v15650_v42  ;;  %v7685_v45 = vrot.slane %v17546_v38, %v17189_v11  ;;  %v8334_v51 = vld [vmem:[#allocation23 + $0x10e0] sm:$0xff] }
 0x68d   :  { %v17532_v5 = vpop.f32.mrf.mxu0  ;;  %12571 = vmatmul.mubr.bf16.vlgmr.msra.gmra.mxu0 %v17526_v52  ;;  %v15490_v28 = vcombine.high %v8330_v50, %v8334_v51 }
 0x68e   :  { %v17535_v60 = vpop.f32.mrf.mxu1  ;;  %12612 = vmatmul.mubr.bf16.vlgmr.msra.gmra.mxu1 %v17528_v57  ;;  %12621 = vmatpush1.bf16.msra.mxu0 %v15521_v40  ;;  %v15626_v40 = vcombine.high %v8466_v23, %v8470_v26  ;;  %v8442_v26 = vld [vmem:[#allocation23 + $0x1440] sm:$0xff] }
 0x68f   :  { %v7358_v2 = vpop.f32.mrf.mxu0  ;;  %12622 = vmatprep.subr.bf16.mxu0 %v15514_v34  ;;  %12662 = vmatpush1.bf16.msra.mxu1 %v15649_v56  ;;  %v17550_v34 = vld [vmem:[#allocation19 + $0x8] sm:$0xf] }
 0x690   :  { %v7359_v20 = vadd.f32 %v7358_v2, %v5053_v27  ;;  %v7399_v48 = vpop.f32.mrf.mxu1  ;;  %12663 = vmatprep.subr.bf16.mxu1 %v15642_v59  ;;  %v8458_v56 = vld [vmem:[#allocation23 + $0x14c0] sm:$0xff]  ;;  %v7761_v59 = vrot.slane %v17550_v34, %v17189_v11 }
 0x691   :  { %v7360_v53 = vpop.f32.mrf.mxu0  ;;  %v8462_v27 = vld [vmem:[#allocation23 + $0x14e0] sm:$0xff] }
 0x692   :  { %v7400_v24 = vadd.f32 %v7399_v48, %v7359_v20  ;;  %v7401_v33 = vpop.f32.mrf.mxu1  ;;  %12623 = vmatpush1.bf16.msra.mxu0 %v15513_v6  ;;  %v8322_v2 = vld [vmem:[#allocation23 + $0x1080] sm:$0xff]  ;;  %v15617_v8 = vcombine.low %v8458_v56, %v8462_v27 }
 0x693   :  { %v7361_v25 = vpop.f32.mrf.mxu0  ;;  %12624 = vmatprep.subr.bf16.mxu0 %v15506_v14  ;;  %12664 = vmatpush1.bf16.msra.mxu1 %v15641_v31  ;;  %v8326_v14 = vld [vmem:[#allocation23 + $0x10a0] sm:$0xff]  ;;  %v15618_v31 = vcombine.high %v8458_v56, %v8462_v27 }
 0x694   :  { %v7565_v0 = vsub.f32 %v7400_v24, %v7535_v35  ;;  %v7402_v42 = vpop.f32.mrf.mxu1  ;;  %12665 = vmatprep.subr.bf16.mxu1 %v15634_v30  ;;  %v8450_v20 = vld [vmem:[#allocation23 + $0x1480] sm:$0xff]  ;;  %v15489_v35 = vcombine.low %v8330_v50, %v8334_v51  ;;  %v15482_v53 = vcombine.high %v8322_v2, %v8326_v14 }
 0x695   :  { %v8454_v48 = vld [vmem:[#allocation23 + $0x14a0] sm:$0xff] }
 0x696   :  { %v7639_v58 = vmul.f32 %v7609_v32, %v7565_v0  ;;  %12625 = vmatpush1.bf16.msra.mxu0 %v15505_v37  ;;  %v8314_v24 = vld [vmem:[#allocation23 + $0x1040] sm:$0xff]  ;;  %v15610_v23 = vcombine.high %v8450_v20, %v8454_v48  ;;  %v15481_v37 = vcombine.low %v8322_v2, %v8326_v14 }
 0x697   :  { %12626 = vmatprep.subr.bf16.mxu0 %v15498_v44  ;;  %12666 = vmatpush1.bf16.msra.mxu1 %v15633_v41  ;;  %v8318_v32 = vld [vmem:[#allocation23 + $0x1060] sm:$0xff]  ;;  %v15609_v44 = vcombine.low %v8450_v20, %v8454_v48 }
 0x698   :  { %v7715_v6 = vmul.f32 %v7685_v45, %v7639_v58  ;;  %12667 = vmatprep.subr.bf16.mxu1 %v15626_v40  ;;  %v8446_v33 = vld [vmem:[#allocation23 + $0x1460] sm:$0xff]  ;;  %v15474_v25 = vcombine.high %v8314_v24, %v8318_v32  ;;  %v15473_v51 = vcombine.low %v8314_v24, %v8318_v32 }
 0x699   :  { %v8306_v41 = vld [vmem:[#allocation23 + $0x1000] sm:$0xff]  ;;  %v15602_v45 = vcombine.high %v8442_v26, %v8446_v33  ;;  %v15601_v56 = vcombine.low %v8442_v26, %v8446_v33 }
 0x69a   :  { %12627 = vmatpush1.bf16.msra.mxu0 %v15497_v15  ;;  %v7791_v30 = vadd.f32 %v7761_v59, %v7715_v6  ;;  %v8310_v0 = vld [vmem:[#allocation23 + $0x1020] sm:$0xff] }
 0x69b   :  { %12628 = vmatprep.subr.bf16.mxu0 %v15490_v28  ;;  %12668 = vmatpush1.bf16.msra.mxu1 %v15625_v16  ;;  %v8434_v42 = vld [vmem:[#allocation23 + $0x1400] sm:$0xff]  ;;  %v15466_v40 = vcombine.high %v8306_v41, %v8310_v0  ;;  %v15465_v16 = vcombine.low %v8306_v41, %v8310_v0 }
 0x69c   :  { %v17554_v17 = vpack.c.bf16 %v7791_v30, %v7791_v30  ;;  %12669 = vmatprep.subr.bf16.mxu1 %v15618_v31  ;;  %v8438_v50 = vld [vmem:[#allocation23 + $0x1420] sm:$0xff] }
 0x69d   :  { %v8426_v27 = vld [vmem:[#allocation23 + $0x13c0] sm:$0xff]  ;;  %v15594_v15 = vcombine.high %v8434_v42, %v8438_v50  ;;  %v15593_v2 = vcombine.low %v8434_v42, %v8438_v50 }
 0x69e   :  { %12629 = vmatpush1.bf16.msra.mxu0 %v15489_v35  ;;  %12652 = vmatprep.mubr.bf16.mxu0 %v17554_v17  ;;  %v8430_v58 = vld [vmem:[#allocation23 + $0x13e0] sm:$0xff] }
 0x69f   :  { %12630 = vmatprep.subr.bf16.mxu0 %v15482_v53  ;;  %12670 = vmatpush1.bf16.msra.mxu1 %v15617_v8  ;;  %v8554_v59 = vld [vmem:[#allocation23 + $0x17c0] sm:$0xff]  ;;  %v15586_v6 = vcombine.high %v8426_v27, %v8430_v58  ;;  %v15585_v30 = vcombine.low %v8426_v27, %v8430_v58 }
 0x6a0   :  { %12671 = vmatprep.subr.bf16.mxu1 %v15610_v23  ;;  %v8558_v28 = vld [vmem:[#allocation23 + $0x17e0] sm:$0xff] }
 0x6a1   :  { %v8418_v14 = vld [vmem:[#allocation23 + $0x1380] sm:$0xff]  ;;  %v15714_v20 = vcombine.high %v8554_v59, %v8558_v28  ;;  %v15713_v8 = vcombine.low %v8554_v59, %v8558_v28 }
 0x6a2   :  { %12631 = vmatpush1.bf16.msra.mxu0 %v15481_v37  ;;  %v8422_v31 = vld [vmem:[#allocation23 + $0x13a0] sm:$0xff] }
 0x6a3   :  { %12632 = vmatprep.subr.bf16.mxu0 %v15474_v25  ;;  %12672 = vmatpush1.bf16.msra.mxu1 %v15609_v44  ;;  %v8546_v48 = vld [vmem:[#allocation23 + $0x1780] sm:$0xff]  ;;  %v15578_v53 = vcombine.high %v8418_v14, %v8422_v31  ;;  %v15577_v37 = vcombine.low %v8418_v14, %v8422_v31  ;;  %v5049_v25 = vrot.slane %v17524_v29, %v17183_v9 }
 0x6a4   :  { %12673 = vmatprep.subr.bf16.mxu1 %v15602_v45  ;;  %v8550_v35 = vld [vmem:[#allocation23 + $0x17a0] sm:$0xff] }
 0x6a5   :  { %v8410_v24 = vld [vmem:[#allocation23 + $0x1340] sm:$0xff]  ;;  %v15706_v23 = vcombine.high %v8546_v48, %v8550_v35  ;;  %v15705_v41 = vcombine.low %v8546_v48, %v8550_v35 }
 0x6a6   :  { %12633 = vmatpush1.bf16.msra.mxu0 %v15473_v51  ;;  %v8414_v32 = vld [vmem:[#allocation23 + $0x1360] sm:$0xff] }
 0x6a7   :  { %12634 = vmatprep.subr.bf16.mxu0 %v15466_v40  ;;  %12674 = vmatpush1.bf16.msra.mxu1 %v15601_v56  ;;  %v8538_v26 = vld [vmem:[#allocation23 + $0x1740] sm:$0xff]  ;;  %v15570_v44 = vcombine.high %v8410_v24, %v8414_v32  ;;  %v15569_v40 = vcombine.low %v8410_v24, %v8414_v32  ;;  %v7357_v56 = vadd.f32 %v17532_v5, %v5049_v25 }
 0x6a8   :  { %12675 = vmatprep.subr.bf16.mxu1 %v15594_v15  ;;  %v8542_v33 = vld [vmem:[#allocation23 + $0x1760] sm:$0xff]  ;;  %v7605_v24 = vrot.slane %v17542_v19, %v17183_v9 }
 0x6a9   :  { %v8402_v0 = vld [vmem:[#allocation23 + $0x1300] sm:$0xff]  ;;  %v15698_v42 = vcombine.high %v8538_v26, %v8542_v33  ;;  %v15697_v58 = vcombine.low %v8538_v26, %v8542_v33  ;;  %v7398_v31 = vadd.f32 %v17535_v60, %v7357_v56 }
 0x6aa   :  { %12635 = vmatpush1.bf16.msra.mxu0 %v15465_v16  ;;  %v8406_v45 = vld [vmem:[#allocation23 + $0x1320] sm:$0xff] }
 0x6ab   :  { %12636 = vmatprep.subr.bf16.mxu0 %v15586_v6  ;;  %12676 = vmatpush1.bf16.msra.mxu1 %v15593_v2  ;;  %v8530_v50 = vld [vmem:[#allocation23 + $0x1700] sm:$0xff]  ;;  %v15562_v27 = vcombine.high %v8402_v0, %v8406_v45  ;;  %v7531_v2 = vrot.slane %v17538_v36, %v17183_v9  ;;  %v15561_v14 = vcombine.low %v8402_v0, %v8406_v45 }
 0x6ac   :  { %12677 = vmatprep.subr.bf16.mxu1 %v15714_v20  ;;  %v8534_v51 = vld [vmem:[#allocation23 + $0x1720] sm:$0xff]  ;;  %v7681_v0 = vrot.slane %v17546_v38, %v17183_v9 }
 0x6ad   :  { %v8394_v15 = vld [vmem:[#allocation23 + $0x12c0] sm:$0xff]  ;;  %v15690_v28 = vcombine.high %v8530_v50, %v8534_v51  ;;  %v15689_v5 = vcombine.low %v8530_v50, %v8534_v51 }
 0x6ae   :  { %12637 = vmatpush2.bf16.msra.mxu0 %v15585_v30  ;;  %v8398_v59 = vld [vmem:[#allocation23 + $0x12e0] sm:$0xff] }
 0x6af   :  { %12638 = vmatprep.subr.bf16.mxu0 %v15578_v53  ;;  %12678 = vmatpush2.bf16.msra.mxu1 %v15713_v8  ;;  %v8522_v16 = vld [vmem:[#allocation23 + $0x16c0] sm:$0xff]  ;;  %v15554_v20 = vcombine.high %v8394_v15, %v8398_v59  ;;  %v15553_v32 = vcombine.low %v8394_v15, %v8398_v59 }
 0x6b0   :  { %12679 = vmatprep.subr.bf16.mxu1 %v15706_v23  ;;  %v8526_v6 = vld [vmem:[#allocation23 + $0x16e0] sm:$0xff]  ;;  %v7564_v23 = vsub.f32 %v7398_v31, %v7531_v2  ;;  %v7855_v31 = vld [vmem:[#allocation23 + $0x1e8] sm:$0xff] }
 0x6b1   :  { %v8386_v48 = vld [vmem:[#allocation23 + $0x1280] sm:$0xff]  ;;  %v15682_v30 = vcombine.high %v8522_v16, %v8526_v6  ;;  %v15681_v60 = vcombine.low %v8522_v16, %v8526_v6 }
 0x6b2   :  { %12639 = vmatpush2.bf16.msra.mxu0 %v15577_v37  ;;  %v8390_v35 = vld [vmem:[#allocation23 + $0x12a0] sm:$0xff] }
 0x6b3   :  { %12640 = vmatprep.subr.bf16.mxu0 %v15570_v44  ;;  %12680 = vmatpush2.bf16.msra.mxu1 %v15705_v41  ;;  %v8514_v53 = vld [vmem:[#allocation23 + $0x1680] sm:$0xff]  ;;  %v15546_v26 = vcombine.high %v8386_v48, %v8390_v35  ;;  %v15545_v45 = vcombine.low %v8386_v48, %v8390_v35  ;;  %v17571_v48 = vld [vmem:[#allocation23 + $0x5e8] sm:$0xff] }
 0x6b4   :  { %12681 = vmatprep.subr.bf16.mxu1 %v15698_v42  ;;  %v8518_v8 = vld [vmem:[#allocation23 + $0x16a0] sm:$0xff]  ;;  %v7638_v42 = vmul.f32 %v7605_v24, %v7564_v23  ;;  %v7843_v24 = vld [vmem:[#allocation23 + $0x188] sm:$0xff] }
 0x6b5   :  { %v8378_v33 = vld [vmem:[#allocation23 + $0x1240] sm:$0xff]  ;;  %v15674_v25 = vcombine.high %v8514_v53, %v8518_v8  ;;  %v15673_v51 = vcombine.low %v8514_v53, %v8518_v8 }
 0x6b6   :  { %12641 = vmatpush2.bf16.msra.mxu0 %v15569_v40  ;;  %v8382_v37 = vld [vmem:[#allocation23 + $0x1260] sm:$0xff]  ;;  %v7714_v16 = vmul.f32 %v7681_v0, %v7638_v42 }
 0x6b7   :  { %12642 = vmatprep.subr.bf16.mxu0 %v15562_v27  ;;  %12682 = vmatpush2.bf16.msra.mxu1 %v15697_v58  ;;  %v8506_v44 = vld [vmem:[#allocation23 + $0x1640] sm:$0xff]  ;;  %v15538_v50 = vcombine.high %v8378_v33, %v8382_v37  ;;  %v15537_v59 = vcombine.low %v8378_v33, %v8382_v37 }
 0x6b8   :  { %12683 = vmatprep.subr.bf16.mxu1 %v15690_v28  ;;  %v8510_v41 = vld [vmem:[#allocation23 + $0x1660] sm:$0xff]  ;;  %v7757_v28 = vrot.slane %v17550_v34, %v17183_v9 }
 0x6b9   :  { %v8370_v40 = vld [vmem:[#allocation23 + $0x1200] sm:$0xff]  ;;  %v15666_v27 = vcombine.high %v8506_v44, %v8510_v41  ;;  %v15665_v2 = vcombine.low %v8506_v44, %v8510_v41  ;;  %v7835_v44 = vld [vmem:[#allocation23 + $0x148] sm:$0xff] }
 0x6ba   :  { %12643 = vmatpush2.bf16.msra.mxu0 %v15561_v14  ;;  %v8374_v56 = vld [vmem:[#allocation23 + $0x1220] sm:$0xff]  ;;  %v7851_v14 = vld [vmem:[#allocation23 + $0x1c8] sm:$0xff] }
 0x6bb   :  { %12644 = vmatprep.subr.bf16.mxu0 %v15554_v20  ;;  %12684 = vmatpush2.bf16.msra.mxu1 %v15689_v5  ;;  %v8498_v58 = vld [vmem:[#allocation23 + $0x1600] sm:$0xff]  ;;  %v15530_v6 = vcombine.high %v8370_v40, %v8374_v56  ;;  %v17569_v5 = vld [vmem:[#allocation23 + $0x5c8] sm:$0xff]  ;;  %v15529_v35 = vcombine.low %v8370_v40, %v8374_v56  ;;  %v15012_v53 = vcombine.high %v7851_v14, %v7855_v31 }
 0x6bc   :  { %12685 = vmatprep.subr.bf16.mxu1 %v15682_v30  ;;  %v8502_v15 = vld [vmem:[#allocation23 + $0x1620] sm:$0xff]  ;;  %v7790_v30 = vadd.f32 %v7757_v28, %v7714_v16  ;;  %v15140_v23 = vcombine.high %v17569_v5, %v17571_v48  ;;  %v7839_v41 = vld [vmem:[#allocation23 + $0x168] sm:$0xff] }
 0x6bd   :  { %v15658_v20 = vcombine.high %v8498_v58, %v8502_v15  ;;  %v15657_v8 = vcombine.low %v8498_v58, %v8502_v15  ;;  %v14996_v56 = vcombine.high %v7835_v44, %v7839_v41  ;;  %v7827_v28 = vld [vmem:[#allocation23 + $0x108] sm:$0xff] }
 0x6be   :  { %12645 = vmatpush2.bf16.msra.mxu0 %v15553_v32  ;;  %v7847_v32 = vld [vmem:[#allocation23 + $0x1a8] sm:$0xff]  ;;  %v17577_v33 = vpack.c.bf16 %v7790_v30, %v7790_v30  ;;  %v14995_v30 = vcombine.low %v7835_v44, %v7839_v41  ;;  %v7769_v44 = vrot.slane %v17550_v34, %v17192_v12 }
 0x6bf   :  { %12646 = vmatprep.subr.bf16.mxu0 %v15546_v26  ;;  %12686 = vmatpush2.bf16.msra.mxu1 %v15681_v60  ;;  %v5057_v26 = vrot.slane %v17524_v29, %v17186_v10  ;;  %v15011_v60 = vcombine.low %v7851_v14, %v7855_v31  ;;  %v15004_v37 = vcombine.high %v7843_v24, %v7847_v32  ;;  %v7831_v16 = vld [vmem:[#allocation23 + $0x128] sm:$0xff] }
 0x6c0   :  { %12687 = vmatprep.subr.bf16.mxu1 %v15674_v25  ;;  %v5061_v25 = vrot.slane %v17524_v29, %v17192_v12  ;;  %v7613_v29 = vrot.slane %v17542_v19, %v17186_v10 }
 0x6c2   :  { %12647 = vmatpush2.bf16.msra.mxu0 %v15545_v45 }
 0x6c3   :  { %12648 = vmatprep.subr.bf16.mxu0 %v15538_v50  ;;  %12688 = vmatpush2.bf16.msra.mxu1 %v15673_v51  ;;  %v7539_v50 = vrot.slane %v17538_v36, %v17186_v10  ;;  %v15003_v51 = vcombine.low %v7843_v24, %v7847_v32 }
 0x6c4   :  { %12689 = vmatprep.subr.bf16.mxu1 %v15666_v27 }
 0x6c6   :  { %12649 = vmatpush2.bf16.msra.mxu0 %v15537_v59  ;;  %v7543_v59 = vrot.slane %v17538_v36, %v17192_v12  ;;  %v7693_v36 = vrot.slane %v17546_v38, %v17192_v12 }
 0x6c7   :  { %12650 = vmatprep.subr.bf16.mxu0 %v15530_v6  ;;  %12690 = vmatpush2.bf16.msra.mxu1 %v15665_v2  ;;  %v7689_v6 = vrot.slane %v17546_v38, %v17186_v10 }
 0x6c8   :  { %12691 = vmatprep.subr.bf16.mxu1 %v15658_v20  ;;  %v7617_v20 = vrot.slane %v17542_v19, %v17192_v12  ;;  %v14987_v19 = vcombine.low %v7827_v28, %v7831_v16 }
 0x6ca   :  { %12651 = vmatpush2.bf16.msra.mxu0 %v15529_v35 }
 0x6cb   :  { %12702 = vmatprep.subr.bf16.mxu0 %v15012_v53  ;;  %12692 = vmatpush2.bf16.msra.mxu1 %v15657_v8  ;;  %v14988_v8 = vcombine.high %v7827_v28, %v7831_v16 }
 0x6cc   :  { %12743 = vmatprep.subr.bf16.mxu1 %v15140_v23 }
 0x6cd   :  { %v7438_v0 = vpop.f32.mrf.mxu0  ;;  %12653 = vmatmul.mubr.bf16.vlgmr.msra.gmra.mxu0 %v17577_v33 }
 0x6ce   :  { %v7439_v45 = vadd.f32 %v7438_v0, %v5057_v26  ;;  %v7479_v42 = vpop.f32.mrf.mxu1  ;;  %12703 = vmatpush1.bf16.msra.mxu0 %v15011_v60  ;;  %12734 = vmatprep.mubr.bf16.mxu0 %v17432_v7  ;;  %v7819_v26 = vld [vmem:[#allocation23 + $0xc8] sm:$0xff] }
 0x6cf   :  { %v7440_v40 = vpop.f32.mrf.mxu0  ;;  %12704 = vmatprep.subr.bf16.mxu0 %v15004_v37  ;;  %v7823_v60 = vld [vmem:[#allocation23 + $0xe8] sm:$0xff]  ;;  %v7765_v37 = vrot.slane %v17550_v34, %v17186_v10 }
 0x6d0   :  { %v7480_v27 = vadd.f32 %v7479_v42, %v7439_v45  ;;  %v7441_v58 = vadd.f32 %v7440_v40, %v5061_v25  ;;  %v7481_v15 = vpop.f32.mrf.mxu1  ;;  %v14980_v41 = vcombine.high %v7819_v26, %v7823_v60  ;;  %v7811_v42 = vld [vmem:[#allocation23 + $0x88] sm:$0xff]  ;;  %v14979_v38 = vcombine.low %v7819_v26, %v7823_v60 }
 0x6d1   :  { %v7442_v2 = vpop.f32.mrf.mxu0  ;;  %v7807_v34 = vld [vmem:[#allocation23 + $0x68] sm:$0xff] }
 0x6d2   :  { %v7566_v14 = vsub.f32 %v7480_v27, %v7539_v50  ;;  %v7482_v31 = vadd.f32 %v7481_v15, %v7441_v58  ;;  %v7483_v35 = vpop.f32.mrf.mxu1  ;;  %12705 = vmatpush1.bf16.msra.mxu0 %v15003_v51  ;;  %v7815_v50 = vld [vmem:[#allocation23 + $0xa8] sm:$0xff]  ;;  %v15139_v15 = vcombine.low %v17569_v5, %v17571_v48 }
 0x6d3   :  { %v7443_v53 = vpop.f32.mrf.mxu0  ;;  %12706 = vmatprep.subr.bf16.mxu0 %v14996_v56  ;;  %v7971_v56 = vld [vmem:[#allocation23 + $0x588] sm:$0xff] }
 0x6d4   :  { %v7640_v24 = vmul.f32 %v7613_v29, %v7566_v14  ;;  %v7567_v32 = vsub.f32 %v7482_v31, %v7543_v59  ;;  %v7484_v23 = vpop.f32.mrf.mxu1  ;;  %v7975_v27 = vld [vmem:[#allocation23 + $0x5a8] sm:$0xff]  ;;  %v14972_v29 = vcombine.high %v7811_v42, %v7815_v50 }
 0x6d5   :  { %v7803_v59 = vld [vmem:[#allocation23 + $0x48] sm:$0xff]  ;;  %v15132_v16 = vcombine.high %v7971_v56, %v7975_v27 }
 0x6d6   :  { %v7716_v25 = vmul.f32 %v7689_v6, %v7640_v24  ;;  %v7641_v0 = vmul.f32 %v7617_v20, %v7567_v32  ;;  %12707 = vmatpush1.bf16.msra.mxu0 %v14995_v30  ;;  %v14971_v6 = vcombine.low %v7811_v42, %v7815_v50  ;;  %v7963_v2 = vld [vmem:[#allocation23 + $0x548] sm:$0xff]  ;;  %v14964_v31 = vcombine.high %v7803_v59, %v7807_v34 }
 0x6d7   :  { %12708 = vmatprep.subr.bf16.mxu0 %v14988_v8  ;;  %v7967_v14 = vld [vmem:[#allocation23 + $0x568] sm:$0xff]  ;;  %v15131_v20 = vcombine.low %v7971_v56, %v7975_v27  ;;  %v14963_v30 = vcombine.low %v7803_v59, %v7807_v34 }
 0x6d8   :  { %v7717_v45 = vmul.f32 %v7693_v36, %v7641_v0  ;;  %v7792_v51 = vadd.f32 %v7765_v37, %v7716_v25  ;;  %v7795_v5 = vld [vmem:[#allocation23 + $0x8] sm:$0xff]  ;;  %v15124_v35 = vcombine.high %v7963_v2, %v7967_v14  ;;  %v15123_v32 = vcombine.low %v7963_v2, %v7967_v14 }
 0x6d9   :  { %v7799_v48 = vld [vmem:[#allocation23 + $0x28] sm:$0xff] }
 0x6da   :  { %12709 = vmatpush1.bf16.msra.mxu0 %v14987_v19  ;;  %v7793_v40 = vadd.f32 %v7769_v44, %v7717_v45  ;;  %v17603_v28 = vpack.c.bf16 %v7792_v51, %v7792_v51  ;;  %v7955_v53 = vld [vmem:[#allocation23 + $0x508] sm:$0xff]  ;;  %v14956_v24 = vcombine.high %v7795_v5, %v7799_v48  ;;  %v14955_v60 = vcombine.low %v7795_v5, %v7799_v48 }
 0x6db   :  { %12710 = vmatprep.subr.bf16.mxu0 %v14980_v41  ;;  %v7959_v8 = vld [vmem:[#allocation23 + $0x528] sm:$0xff] }
 0x6dc   :  { %v17599_v58 = vpack.c.bf16 %v7793_v40, %v7793_v40  ;;  %v7915_v36 = vld [vmem:[#allocation23 + $0x3c8] sm:$0xff]  ;;  %v15116_v26 = vcombine.high %v7955_v53, %v7959_v8  ;;  %v15115_v19 = vcombine.low %v7955_v53, %v7959_v8 }
 0x6dd   :  { %v7919_v23 = vld [vmem:[#allocation23 + $0x3e8] sm:$0xff] }
 0x6de   :  { %12693 = vmatprep.mubr.bf16.mxu1 %v17599_v58  ;;  %12711 = vmatpush1.bf16.msra.mxu0 %v14979_v38  ;;  %v7947_v37 = vld [vmem:[#allocation23 + $0x4c8] sm:$0xff]  ;;  %v15076_v0 = vcombine.high %v7915_v36, %v7919_v23  ;;  %v15075_v42 = vcombine.low %v7915_v36, %v7919_v23 }
 0x6df   :  { %12694 = vmatmul.mubr.bf16.vlgmr.msra.gmra.mxu1 %v17603_v28  ;;  %12712 = vmatprep.subr.bf16.mxu0 %v14972_v29  ;;  %v7951_v25 = vld [vmem:[#allocation23 + $0x4e8] sm:$0xff] }
 0x6e0   :  { %12744 = vmatpush1.bf16.msra.mxu1 %v15139_v15  ;;  %12775 = vmatprep.mubr.bf16.mxu1 %v17435_v63  ;;  %v7907_v44 = vld [vmem:[#allocation23 + $0x388] sm:$0xff]  ;;  %v15108_v45 = vcombine.high %v7947_v37, %v7951_v25  ;;  %v15107_v40 = vcombine.low %v7947_v37, %v7951_v25 }
 0x6e1   :  { %12745 = vmatprep.subr.bf16.mxu1 %v15132_v16  ;;  %v7911_v41 = vld [vmem:[#allocation23 + $0x3a8] sm:$0xff] }
 0x6e2   :  { %12713 = vmatpush1.bf16.msra.mxu0 %v14971_v6  ;;  %v7939_v50 = vld [vmem:[#allocation23 + $0x488] sm:$0xff]  ;;  %v15068_v38 = vcombine.high %v7907_v44, %v7911_v41  ;;  %v15067_v15 = vcombine.low %v7907_v44, %v7911_v41 }
 0x6e3   :  { %12714 = vmatprep.subr.bf16.mxu0 %v14964_v31  ;;  %v7943_v51 = vld [vmem:[#allocation23 + $0x4a8] sm:$0xff] }
 0x6e4   :  { %12746 = vmatpush1.bf16.msra.mxu1 %v15131_v20  ;;  %v7899_v56 = vld [vmem:[#allocation23 + $0x348] sm:$0xff]  ;;  %v15100_v29 = vcombine.high %v7939_v50, %v7943_v51  ;;  %v15099_v6 = vcombine.low %v7939_v50, %v7943_v51 }
 0x6e5   :  { %12747 = vmatprep.subr.bf16.mxu1 %v15124_v35  ;;  %v7903_v27 = vld [vmem:[#allocation23 + $0x368] sm:$0xff] }
 0x6e6   :  { %12715 = vmatpush1.bf16.msra.mxu0 %v14963_v30  ;;  %v7931_v59 = vld [vmem:[#allocation23 + $0x448] sm:$0xff]  ;;  %v15060_v16 = vcombine.high %v7899_v56, %v7903_v27  ;;  %v15059_v20 = vcombine.low %v7899_v56, %v7903_v27 }
 0x6e7   :  { %12716 = vmatprep.subr.bf16.mxu0 %v14956_v24  ;;  %v7935_v34 = vld [vmem:[#allocation23 + $0x468] sm:$0xff] }
 0x6e8   :  { %12748 = vmatpush1.bf16.msra.mxu1 %v15123_v32  ;;  %v7891_v2 = vld [vmem:[#allocation23 + $0x308] sm:$0xff]  ;;  %v15092_v31 = vcombine.high %v7931_v59, %v7935_v34  ;;  %v15091_v30 = vcombine.low %v7931_v59, %v7935_v34 }
 0x6e9   :  { %12749 = vmatprep.subr.bf16.mxu1 %v15116_v26  ;;  %v7895_v14 = vld [vmem:[#allocation23 + $0x328] sm:$0xff] }
 0x6ea   :  { %12717 = vmatpush1.bf16.msra.mxu0 %v14955_v60  ;;  %v7923_v5 = vld [vmem:[#allocation23 + $0x408] sm:$0xff]  ;;  %v15052_v35 = vcombine.high %v7891_v2, %v7895_v14  ;;  %v15051_v32 = vcombine.low %v7891_v2, %v7895_v14 }
 0x6eb   :  { %12718 = vmatprep.subr.bf16.mxu0 %v15076_v0  ;;  %v7927_v48 = vld [vmem:[#allocation23 + $0x428] sm:$0xff] }
 0x6ec   :  { %12750 = vmatpush1.bf16.msra.mxu1 %v15115_v19  ;;  %v7883_v53 = vld [vmem:[#allocation23 + $0x2c8] sm:$0xff]  ;;  %v15084_v24 = vcombine.high %v7923_v5, %v7927_v48  ;;  %v15083_v60 = vcombine.low %v7923_v5, %v7927_v48 }
 0x6ed   :  { %12751 = vmatprep.subr.bf16.mxu1 %v15108_v45  ;;  %v7887_v8 = vld [vmem:[#allocation23 + $0x2e8] sm:$0xff] }
 0x6ee   :  { %12719 = vmatpush2.bf16.msra.mxu0 %v15075_v42  ;;  %v8043_v36 = vld [vmem:[#allocation23 + $0x7c8] sm:$0xff]  ;;  %v15044_v26 = vcombine.high %v7883_v53, %v7887_v8  ;;  %v15043_v19 = vcombine.low %v7883_v53, %v7887_v8 }
 0x6ef   :  { %12720 = vmatprep.subr.bf16.mxu0 %v15068_v38  ;;  %v8047_v23 = vld [vmem:[#allocation23 + $0x7e8] sm:$0xff] }
 0x6f0   :  { %12752 = vmatpush1.bf16.msra.mxu1 %v15107_v40  ;;  %v7875_v37 = vld [vmem:[#allocation23 + $0x288] sm:$0xff]  ;;  %v15204_v0 = vcombine.high %v8043_v36, %v8047_v23  ;;  %v15203_v42 = vcombine.low %v8043_v36, %v8047_v23 }
 0x6f1   :  { %12753 = vmatprep.subr.bf16.mxu1 %v15100_v29  ;;  %v7879_v25 = vld [vmem:[#allocation23 + $0x2a8] sm:$0xff] }
 0x6f2   :  { %12721 = vmatpush2.bf16.msra.mxu0 %v15067_v15  ;;  %v8035_v44 = vld [vmem:[#allocation23 + $0x788] sm:$0xff]  ;;  %v15036_v45 = vcombine.high %v7875_v37, %v7879_v25  ;;  %v15035_v40 = vcombine.low %v7875_v37, %v7879_v25 }
 0x6f3   :  { %12722 = vmatprep.subr.bf16.mxu0 %v15060_v16  ;;  %v8039_v41 = vld [vmem:[#allocation23 + $0x7a8] sm:$0xff] }
 0x6f4   :  { %12754 = vmatpush1.bf16.msra.mxu1 %v15099_v6  ;;  %v7867_v50 = vld [vmem:[#allocation23 + $0x248] sm:$0xff]  ;;  %v15196_v38 = vcombine.high %v8035_v44, %v8039_v41  ;;  %v15195_v15 = vcombine.low %v8035_v44, %v8039_v41 }
 0x6f5   :  { %12755 = vmatprep.subr.bf16.mxu1 %v15092_v31  ;;  %v7871_v51 = vld [vmem:[#allocation23 + $0x268] sm:$0xff] }
 0x6f6   :  { %12723 = vmatpush2.bf16.msra.mxu0 %v15059_v20  ;;  %v8027_v56 = vld [vmem:[#allocation23 + $0x748] sm:$0xff]  ;;  %v15028_v29 = vcombine.high %v7867_v50, %v7871_v51  ;;  %v15027_v6 = vcombine.low %v7867_v50, %v7871_v51 }
 0x6f7   :  { %12724 = vmatprep.subr.bf16.mxu0 %v15052_v35  ;;  %v8031_v27 = vld [vmem:[#allocation23 + $0x768] sm:$0xff] }
 0x6f8   :  { %12756 = vmatpush1.bf16.msra.mxu1 %v15091_v30  ;;  %v7859_v59 = vld [vmem:[#allocation23 + $0x208] sm:$0xff]  ;;  %v15188_v16 = vcombine.high %v8027_v56, %v8031_v27  ;;  %v15187_v20 = vcombine.low %v8027_v56, %v8031_v27 }
 0x6f9   :  { %12757 = vmatprep.subr.bf16.mxu1 %v15084_v24  ;;  %v7863_v34 = vld [vmem:[#allocation23 + $0x228] sm:$0xff]  ;;  %v8562_v24 = vld [vmem:[#allocation25] sm:$0xff] }
 0x6fa   :  { %12725 = vmatpush2.bf16.msra.mxu0 %v15051_v32  ;;  %v8019_v2 = vld [vmem:[#allocation23 + $0x708] sm:$0xff]  ;;  %v15020_v31 = vcombine.high %v7859_v59, %v7863_v34  ;;  %v15019_v30 = vcombine.low %v7859_v59, %v7863_v34  ;;  %v8579_v37 = vrot.slane %v8562_v24, %v17183_v9 }
 0x6fb   :  { %12726 = vmatprep.subr.bf16.mxu0 %v15044_v26  ;;  %v8023_v14 = vld [vmem:[#allocation23 + $0x728] sm:$0xff] }
 0x6fc   :  { %12758 = vmatpush1.bf16.msra.mxu1 %v15083_v60  ;;  %v8107_v5 = vld [vmem:[#allocation23 + $0x9c8] sm:$0xff]  ;;  %v15180_v35 = vcombine.high %v8019_v2, %v8023_v14  ;;  %v15179_v36 = vcombine.low %v8019_v2, %v8023_v14 }
 0x6fd   :  { %12759 = vmatprep.subr.bf16.mxu1 %v15204_v0  ;;  %v8111_v48 = vld [vmem:[#allocation23 + $0x9e8] sm:$0xff] }
 0x6fe   :  { %12727 = vmatpush2.bf16.msra.mxu0 %v15043_v19  ;;  %v8011_v53 = vld [vmem:[#allocation23 + $0x6c8] sm:$0xff]  ;;  %v15268_v32 = vcombine.high %v8107_v5, %v8111_v48  ;;  %v15267_v25 = vcombine.low %v8107_v5, %v8111_v48 }
 0x6ff   :  { %12728 = vmatprep.subr.bf16.mxu0 %v15036_v45  ;;  %v8015_v8 = vld [vmem:[#allocation23 + $0x6e8] sm:$0xff]  ;;  %v8583_v45 = vrot.slane %v8562_v24, %v17189_v11 }
 0x700   :  { %12760 = vmatpush2.bf16.msra.mxu1 %v15203_v42  ;;  %v8099_v23 = vld [vmem:[#allocation23 + $0x988] sm:$0xff]  ;;  %v15172_v60 = vcombine.high %v8011_v53, %v8015_v8  ;;  %v15171_v41 = vcombine.low %v8011_v53, %v8015_v8 }
 0x701   :  { %12761 = vmatprep.subr.bf16.mxu1 %v15196_v38  ;;  %v8103_v26 = vld [vmem:[#allocation23 + $0x9a8] sm:$0xff] }
 0x702   :  { %12729 = vmatpush2.bf16.msra.mxu0 %v15035_v40  ;;  %v8003_v0 = vld [vmem:[#allocation23 + $0x688] sm:$0xff]  ;;  %v15260_v44 = vcombine.high %v8099_v23, %v8103_v26  ;;  %v15259_v9 = vcombine.low %v8099_v23, %v8103_v26 }
 0x703   :  { %12730 = vmatprep.subr.bf16.mxu0 %v15028_v29  ;;  %v8007_v19 = vld [vmem:[#allocation23 + $0x6a8] sm:$0xff] }
 0x704   :  { %12762 = vmatpush2.bf16.msra.mxu1 %v15195_v15  ;;  %v8091_v42 = vld [vmem:[#allocation23 + $0x948] sm:$0xff]  ;;  %v15164_v38 = vcombine.high %v8003_v0, %v8007_v19 }
 0x705   :  { %12763 = vmatprep.subr.bf16.mxu1 %v15188_v16  ;;  %v8095_v50 = vld [vmem:[#allocation23 + $0x968] sm:$0xff] }
 0x706   :  { %12731 = vmatpush2.bf16.msra.mxu0 %v15027_v6  ;;  %v7995_v27 = vld [vmem:[#allocation23 + $0x648] sm:$0xff]  ;;  %v15252_v59 = vcombine.high %v8091_v42, %v8095_v50  ;;  %v15163_v6 = vcombine.low %v8003_v0, %v8007_v19 }
 0x707   :  { %12732 = vmatprep.subr.bf16.mxu0 %v15020_v31  ;;  %v7999_v29 = vld [vmem:[#allocation23 + $0x668] sm:$0xff] }
 0x708   :  { %12764 = vmatpush2.bf16.msra.mxu1 %v15187_v20  ;;  %v8083_v2 = vld [vmem:[#allocation23 + $0x908] sm:$0xff]  ;;  %v15156_v20 = vcombine.high %v7995_v27, %v7999_v29 }
 0x709   :  { %12765 = vmatprep.subr.bf16.mxu1 %v15180_v35  ;;  %v8087_v14 = vld [vmem:[#allocation23 + $0x928] sm:$0xff]  ;;  %v15251_v35 = vcombine.low %v8091_v42, %v8095_v50 }
 0x70a   :  { %12733 = vmatpush2.bf16.msra.mxu0 %v15019_v30  ;;  %v7987_v30 = vld [vmem:[#allocation23 + $0x608] sm:$0xff]  ;;  %v15244_v24 = vcombine.high %v8083_v2, %v8087_v14 }
 0x70b   :  { %12784 = vmatprep.subr.bf16.mxu0 %v15268_v32  ;;  %v7991_v53 = vld [vmem:[#allocation23 + $0x628] sm:$0xff] }
 0x70c   :  { %12766 = vmatpush2.bf16.msra.mxu1 %v15179_v36  ;;  %v15155_v36 = vcombine.low %v7995_v27, %v7999_v29  ;;  %v8075_v23 = vld [vmem:[#allocation23 + $0x8c8] sm:$0xff] }
 0x70d   :  { %v12490_v51 = vpop.f32.mrf.mxu0  ;;  %12735 = vmatmul.mubr.bf16.vlgmr.msra.gmra.mxu0 %v17475_v54  ;;  %12767 = vmatprep.subr.bf16.mxu1 %v15172_v60  ;;  %v8079_v26 = vld [vmem:[#allocation23 + $0x8e8] sm:$0xff]  ;;  %v15148_v60 = vcombine.high %v7987_v30, %v7991_v53 }
 0x70e   :  { %v12491_v40 = vadd.f32 %v12490_v51, %v8579_v37  ;;  %v12531_v56 = vpop.f32.mrf.mxu1  ;;  %12785 = vmatpush1.bf16.msra.mxu0 %v15267_v25  ;;  %12816 = vmatprep.mubr.bf16.mxu0 %v17486_v18  ;;  %v15243_v37 = vcombine.low %v8083_v2, %v8087_v14  ;;  %v8235_v25 = vld [vmem:[#allocation23 + $0xdc8] sm:$0xff]  ;;  %v15236_v19 = vcombine.high %v8075_v23, %v8079_v26 }
 0x70f   :  { %v12492_v15 = vpop.f32.mrf.mxu0  ;;  %12786 = vmatprep.subr.bf16.mxu0 %v15260_v44  ;;  %v8239_v0 = vld [vmem:[#allocation23 + $0xde8] sm:$0xff]  ;;  %v15147_v44 = vcombine.low %v7987_v30, %v7991_v53  ;;  %v15235_v50 = vcombine.low %v8075_v23, %v8079_v26 }
 0x710   :  { %v17612_v34 = vadd.f32 %v12531_v56, %v12491_v40  ;;  %v12493_v11 = vadd.f32 %v12492_v15, %v8583_v45  ;;  %v12533_v16 = vpop.f32.mrf.mxu1  ;;  %12768 = vmatpush2.bf16.msra.mxu1 %v15171_v41  ;;  %v8067_v41 = vld [vmem:[#allocation23 + $0x888] sm:$0xff]  ;;  %v15396_v42 = vcombine.high %v8235_v25, %v8239_v0  ;;  %v15395_v56 = vcombine.low %v8235_v25, %v8239_v0 }
 0x711   :  { %v12494_v31 = vpop.f32.mrf.mxu0  ;;  %12769 = vmatprep.subr.bf16.mxu1 %v15164_v38  ;;  %v8071_v45 = vld [vmem:[#allocation23 + $0x8a8] sm:$0xff] }
 0x712   :  { %v17614_v5 = vadd.f32 %v12533_v16, %v12493_v11  ;;  %v12535_v48 = vpop.f32.mrf.mxu1  ;;  %12787 = vmatpush1.bf16.msra.mxu0 %v15259_v9  ;;  %v8227_v51 = vld [vmem:[#allocation23 + $0xd88] sm:$0xff]  ;;  %v15228_v40 = vcombine.high %v8067_v41, %v8071_v45  ;;  %v15227_v15 = vcombine.low %v8067_v41, %v8071_v45 }
 0x713   :  { %v12495_v8 = vpop.f32.mrf.mxu0  ;;  %12788 = vmatprep.subr.bf16.mxu0 %v15252_v59  ;;  %v8231_v38 = vld [vmem:[#allocation23 + $0xda8] sm:$0xff] }
 0x714   :  { %v12536_v32 = vpop.f32.mrf.mxu1  ;;  %12770 = vmatpush2.bf16.msra.mxu1 %v15163_v6  ;;  %v8059_v9 = vld [vmem:[#allocation23 + $0x848] sm:$0xff]  ;;  %v15388_v29 = vcombine.high %v8227_v51, %v8231_v38  ;;  %v15387_v6 = vcombine.low %v8227_v51, %v8231_v38 }
 0x715   :  { %12771 = vmatprep.subr.bf16.mxu1 %v15156_v20  ;;  %v8063_v27 = vld [vmem:[#allocation23 + $0x868] sm:$0xff] }
 0x716   :  { %12789 = vmatpush1.bf16.msra.mxu0 %v15251_v35  ;;  %v8219_v59 = vld [vmem:[#allocation23 + $0xd48] sm:$0xff]  ;;  %v15220_v16 = vcombine.high %v8059_v9, %v8063_v27  ;;  %v15219_v20 = vcombine.low %v8059_v9, %v8063_v27 }
 0x717   :  { %12790 = vmatprep.subr.bf16.mxu0 %v15244_v24  ;;  %v8223_v11 = vld [vmem:[#allocation23 + $0xd68] sm:$0xff] }
 0x718   :  { %12772 = vmatpush2.bf16.msra.mxu1 %v15155_v36  ;;  %v8051_v2 = vld [vmem:[#allocation23 + $0x808] sm:$0xff]  ;;  %v15380_v31 = vcombine.high %v8219_v59, %v8223_v11  ;;  %v15379_v53 = vcombine.low %v8219_v59, %v8223_v11 }
 0x719   :  { %12773 = vmatprep.subr.bf16.mxu1 %v15148_v60  ;;  %v8055_v14 = vld [vmem:[#allocation23 + $0x828] sm:$0xff] }
 0x71a   :  { %12791 = vmatpush1.bf16.msra.mxu0 %v15243_v37  ;;  %v8211_v48 = vld [vmem:[#allocation23 + $0xd08] sm:$0xff]  ;;  %v15212_v30 = vcombine.high %v8051_v2, %v8055_v14  ;;  %v15211_v36 = vcombine.low %v8051_v2, %v8055_v14 }
 0x71b   :  { %12792 = vmatprep.subr.bf16.mxu0 %v15236_v19  ;;  %v8215_v35 = vld [vmem:[#allocation23 + $0xd28] sm:$0xff] }
 0x71c   :  { %12774 = vmatpush2.bf16.msra.mxu1 %v15147_v44  ;;  %v8171_v8 = vld [vmem:[#allocation23 + $0xbc8] sm:$0xff]  ;;  %v15372_v32 = vcombine.high %v8211_v48, %v8215_v35  ;;  %v15371_v37 = vcombine.low %v8211_v48, %v8215_v35 }
 0x71d   :  { %12825 = vmatprep.subr.bf16.mxu1 %v15396_v42  ;;  %v8175_v24 = vld [vmem:[#allocation23 + $0xbe8] sm:$0xff] }
 0x71e   :  { %12793 = vmatpush1.bf16.msra.mxu0 %v15235_v50  ;;  %v8203_v23 = vld [vmem:[#allocation23 + $0xcc8] sm:$0xff]  ;;  %v15332_v60 = vcombine.high %v8171_v8, %v8175_v24  ;;  %v15331_v44 = vcombine.low %v8171_v8, %v8175_v24 }
 0x71f   :  { %12776 = vmatmul.mubr.bf16.vlgmr.msra.gmra.mxu1 %v17477_v3  ;;  %12794 = vmatprep.subr.bf16.mxu0 %v15228_v40  ;;  %v8207_v26 = vld [vmem:[#allocation23 + $0xce8] sm:$0xff] }
 0x720   :  { %12826 = vmatpush1.bf16.msra.mxu1 %v15395_v56  ;;  %12857 = vmatprep.mubr.bf16.mxu1 %v17500_v49  ;;  %v8163_v25 = vld [vmem:[#allocation23 + $0xb88] sm:$0xff]  ;;  %v15364_v19 = vcombine.high %v8203_v23, %v8207_v26  ;;  %v15363_v50 = vcombine.low %v8203_v23, %v8207_v26 }
 0x721   :  { %12827 = vmatprep.subr.bf16.mxu1 %v15388_v29  ;;  %v8167_v0 = vld [vmem:[#allocation23 + $0xba8] sm:$0xff] }
 0x722   :  { %12795 = vmatpush1.bf16.msra.mxu0 %v15227_v15  ;;  %v8195_v41 = vld [vmem:[#allocation23 + $0xc88] sm:$0xff]  ;;  %v15324_v42 = vcombine.high %v8163_v25, %v8167_v0  ;;  %v15323_v56 = vcombine.low %v8163_v25, %v8167_v0 }
 0x723   :  { %12796 = vmatprep.subr.bf16.mxu0 %v15220_v16  ;;  %v8199_v45 = vld [vmem:[#allocation23 + $0xca8] sm:$0xff] }
 0x724   :  { %12828 = vmatpush1.bf16.msra.mxu1 %v15387_v6  ;;  %v8155_v51 = vld [vmem:[#allocation23 + $0xb48] sm:$0xff]  ;;  %v15356_v40 = vcombine.high %v8195_v41, %v8199_v45  ;;  %v15355_v15 = vcombine.low %v8195_v41, %v8199_v45 }
 0x725   :  { %12829 = vmatprep.subr.bf16.mxu1 %v15380_v31  ;;  %v8159_v38 = vld [vmem:[#allocation23 + $0xb68] sm:$0xff] }
 0x726   :  { %12797 = vmatpush1.bf16.msra.mxu0 %v15219_v20  ;;  %v8187_v9 = vld [vmem:[#allocation23 + $0xc48] sm:$0xff]  ;;  %v15316_v29 = vcombine.high %v8155_v51, %v8159_v38  ;;  %v15315_v6 = vcombine.low %v8155_v51, %v8159_v38 }
 0x727   :  { %12798 = vmatprep.subr.bf16.mxu0 %v15212_v30  ;;  %v8191_v27 = vld [vmem:[#allocation23 + $0xc68] sm:$0xff] }
 0x728   :  { %12830 = vmatpush1.bf16.msra.mxu1 %v15379_v53  ;;  %v8147_v59 = vld [vmem:[#allocation23 + $0xb08] sm:$0xff]  ;;  %v15348_v16 = vcombine.high %v8187_v9, %v8191_v27  ;;  %v15347_v20 = vcombine.low %v8187_v9, %v8191_v27 }
 0x729   :  { %12831 = vmatprep.subr.bf16.mxu1 %v15372_v32  ;;  %v8151_v11 = vld [vmem:[#allocation23 + $0xb28] sm:$0xff] }
 0x72a   :  { %12799 = vmatpush1.bf16.msra.mxu0 %v15211_v36  ;;  %v8179_v2 = vld [vmem:[#allocation23 + $0xc08] sm:$0xff]  ;;  %v15308_v31 = vcombine.high %v8147_v59, %v8151_v11  ;;  %v15307_v53 = vcombine.low %v8147_v59, %v8151_v11 }
 0x72b   :  { %12800 = vmatprep.subr.bf16.mxu0 %v15332_v60  ;;  %v8183_v14 = vld [vmem:[#allocation23 + $0xc28] sm:$0xff] }
 0x72c   :  { %12832 = vmatpush1.bf16.msra.mxu1 %v15371_v37  ;;  %v8139_v48 = vld [vmem:[#allocation23 + $0xac8] sm:$0xff]  ;;  %v15340_v30 = vcombine.high %v8179_v2, %v8183_v14  ;;  %v15339_v36 = vcombine.low %v8179_v2, %v8183_v14 }
 0x72d   :  { %12833 = vmatprep.subr.bf16.mxu1 %v15364_v19  ;;  %v8143_v35 = vld [vmem:[#allocation23 + $0xae8] sm:$0xff] }
 0x72e   :  { %12801 = vmatpush2.bf16.msra.mxu0 %v15331_v44  ;;  %v8299_v8 = vld [vmem:[#allocation23 + $0xfc8] sm:$0xff]  ;;  %v15300_v32 = vcombine.high %v8139_v48, %v8143_v35  ;;  %v15299_v37 = vcombine.low %v8139_v48, %v8143_v35 }
 0x72f   :  { %12802 = vmatprep.subr.bf16.mxu0 %v15324_v42  ;;  %v8303_v24 = vld [vmem:[#allocation23 + $0xfe8] sm:$0xff] }
 0x730   :  { %12834 = vmatpush1.bf16.msra.mxu1 %v15363_v50  ;;  %v8131_v23 = vld [vmem:[#allocation23 + $0xa88] sm:$0xff]  ;;  %v15460_v60 = vcombine.high %v8299_v8, %v8303_v24  ;;  %v15459_v44 = vcombine.low %v8299_v8, %v8303_v24 }
 0x731   :  { %12835 = vmatprep.subr.bf16.mxu1 %v15356_v40  ;;  %v8135_v26 = vld [vmem:[#allocation23 + $0xaa8] sm:$0xff] }
 0x732   :  { %12803 = vmatpush2.bf16.msra.mxu0 %v15323_v56  ;;  %v8291_v25 = vld [vmem:[#allocation23 + $0xf88] sm:$0xff]  ;;  %v15292_v19 = vcombine.high %v8131_v23, %v8135_v26  ;;  %v15291_v50 = vcombine.low %v8131_v23, %v8135_v26 }
 0x733   :  { %12804 = vmatprep.subr.bf16.mxu0 %v15316_v29  ;;  %v8295_v0 = vld [vmem:[#allocation23 + $0xfa8] sm:$0xff] }
 0x734   :  { %12836 = vmatpush1.bf16.msra.mxu1 %v15355_v15  ;;  %v8123_v41 = vld [vmem:[#allocation23 + $0xa48] sm:$0xff]  ;;  %v15452_v42 = vcombine.high %v8291_v25, %v8295_v0  ;;  %v15451_v56 = vcombine.low %v8291_v25, %v8295_v0 }
 0x735   :  { %12837 = vmatprep.subr.bf16.mxu1 %v15348_v16  ;;  %v8127_v45 = vld [vmem:[#allocation23 + $0xa68] sm:$0xff] }
 0x736   :  { %12805 = vmatpush2.bf16.msra.mxu0 %v15315_v6  ;;  %v8283_v51 = vld [vmem:[#allocation23 + $0xf48] sm:$0xff]  ;;  %v15284_v40 = vcombine.high %v8123_v41, %v8127_v45  ;;  %v15283_v15 = vcombine.low %v8123_v41, %v8127_v45 }
 0x737   :  { %12806 = vmatprep.subr.bf16.mxu0 %v15308_v31  ;;  %v8287_v38 = vld [vmem:[#allocation23 + $0xf68] sm:$0xff] }
 0x738   :  { %12838 = vmatpush1.bf16.msra.mxu1 %v15347_v20  ;;  %v8115_v9 = vld [vmem:[#allocation23 + $0xa08] sm:$0xff]  ;;  %v15444_v29 = vcombine.high %v8283_v51, %v8287_v38  ;;  %v15443_v6 = vcombine.low %v8283_v51, %v8287_v38 }
 0x739   :  { %12839 = vmatprep.subr.bf16.mxu1 %v15340_v30  ;;  %v8119_v27 = vld [vmem:[#allocation23 + $0xa28] sm:$0xff] }
 0x73a   :  { %12807 = vmatpush2.bf16.msra.mxu0 %v15307_v53  ;;  %v8275_v59 = vld [vmem:[#allocation23 + $0xf08] sm:$0xff]  ;;  %v15276_v16 = vcombine.high %v8115_v9, %v8119_v27  ;;  %v15275_v20 = vcombine.low %v8115_v9, %v8119_v27 }
 0x73b   :  { %12808 = vmatprep.subr.bf16.mxu0 %v15300_v32  ;;  %v8279_v11 = vld [vmem:[#allocation23 + $0xf28] sm:$0xff] }
 0x73c   :  { %12840 = vmatpush1.bf16.msra.mxu1 %v15339_v36  ;;  %v8363_v2 = vld [vmem:[#allocation23 + $0x11c8] sm:$0xff]  ;;  %v15436_v31 = vcombine.high %v8275_v59, %v8279_v11  ;;  %v15435_v53 = vcombine.low %v8275_v59, %v8279_v11 }
 0x73d   :  { %12841 = vmatprep.subr.bf16.mxu1 %v15460_v60  ;;  %v8367_v14 = vld [vmem:[#allocation23 + $0x11e8] sm:$0xff] }
 0x73e   :  { %12809 = vmatpush2.bf16.msra.mxu0 %v15299_v37  ;;  %v8267_v48 = vld [vmem:[#allocation23 + $0xec8] sm:$0xff]  ;;  %v15524_v30 = vcombine.high %v8363_v2, %v8367_v14  ;;  %v15523_v36 = vcombine.low %v8363_v2, %v8367_v14 }
 0x73f   :  { %12810 = vmatprep.subr.bf16.mxu0 %v15292_v19  ;;  %v8271_v35 = vld [vmem:[#allocation23 + $0xee8] sm:$0xff] }
 0x740   :  { %12842 = vmatpush2.bf16.msra.mxu1 %v15459_v44  ;;  %v8355_v8 = vld [vmem:[#allocation23 + $0x1188] sm:$0xff]  ;;  %v15428_v32 = vcombine.high %v8267_v48, %v8271_v35  ;;  %v15427_v37 = vcombine.low %v8267_v48, %v8271_v35 }
 0x741   :  { %12843 = vmatprep.subr.bf16.mxu1 %v15452_v42  ;;  %v8359_v24 = vld [vmem:[#allocation23 + $0x11a8] sm:$0xff] }
 0x742   :  { %12811 = vmatpush2.bf16.msra.mxu0 %v15291_v50  ;;  %v8259_v23 = vld [vmem:[#allocation23 + $0xe88] sm:$0xff]  ;;  %v15516_v60 = vcombine.high %v8355_v8, %v8359_v24  ;;  %v15515_v42 = vcombine.low %v8355_v8, %v8359_v24 }
 0x743   :  { %12812 = vmatprep.subr.bf16.mxu0 %v15284_v40  ;;  %v8263_v26 = vld [vmem:[#allocation23 + $0xea8] sm:$0xff] }
 0x744   :  { %12844 = vmatpush2.bf16.msra.mxu1 %v15451_v56  ;;  %v8347_v25 = vld [vmem:[#allocation23 + $0x1148] sm:$0xff]  ;;  %v15420_v44 = vcombine.high %v8259_v23, %v8263_v26 }
 0x745   :  { %12845 = vmatprep.subr.bf16.mxu1 %v15444_v29  ;;  %v8351_v0 = vld [vmem:[#allocation23 + $0x1168] sm:$0xff]  ;;  %v15419_v29 = vcombine.low %v8259_v23, %v8263_v26 }
 0x746   :  { %12813 = vmatpush2.bf16.msra.mxu0 %v15283_v15  ;;  %v8251_v50 = vld [vmem:[#allocation23 + $0xe48] sm:$0xff]  ;;  %v15508_v40 = vcombine.high %v8347_v25, %v8351_v0  ;;  %v15507_v2 = vcombine.low %v8347_v25, %v8351_v0 }
 0x747   :  { %12814 = vmatprep.subr.bf16.mxu0 %v15276_v16  ;;  %v8255_v51 = vld [vmem:[#allocation23 + $0xe68] sm:$0xff] }
 0x748   :  { %12846 = vmatpush2.bf16.msra.mxu1 %v15443_v6  ;;  %v8339_v15 = vld [vmem:[#allocation23 + $0x1108] sm:$0xff]  ;;  %v15412_v11 = vcombine.high %v8251_v50, %v8255_v51 }
 0x749   :  { %12847 = vmatprep.subr.bf16.mxu1 %v15436_v31  ;;  %v8343_v59 = vld [vmem:[#allocation23 + $0x1128] sm:$0xff] }
 0x74a   :  { %12815 = vmatpush2.bf16.msra.mxu0 %v15275_v20  ;;  %v8243_v14 = vld [vmem:[#allocation23 + $0xe08] sm:$0xff]  ;;  %v15500_v48 = vcombine.high %v8339_v15, %v8343_v59  ;;  %v15499_v24 = vcombine.low %v8339_v15, %v8343_v59 }
 0x74b   :  { %12866 = vmatprep.subr.bf16.mxu0 %v15524_v30  ;;  %v8247_v31 = vld [vmem:[#allocation23 + $0xe28] sm:$0xff] }
 0x74c   :  { %12848 = vmatpush2.bf16.msra.mxu1 %v15435_v53  ;;  %v8331_v30 = vld [vmem:[#allocation23 + $0x10c8] sm:$0xff]  ;;  %v15404_v8 = vcombine.high %v8243_v14, %v8247_v31  ;;  %v15403_v26 = vcombine.low %v8243_v14, %v8247_v31 }
 0x74d   :  { %v12572_v19 = vpop.f32.mrf.mxu0  ;;  %12817 = vmatmul.mubr.bf16.vlgmr.msra.gmra.mxu0 %v17526_v52  ;;  %12849 = vmatprep.subr.bf16.mxu1 %v15428_v32  ;;  %v8335_v53 = vld [vmem:[#allocation23 + $0x10e8] sm:$0xff] }
 0x74e   :  { %v12573_v41 = vadd.f32 %v12572_v19, %v17612_v34  ;;  %v12613_v45 = vpop.f32.mrf.mxu1  ;;  %12867 = vmatpush1.bf16.msra.mxu0 %v15523_v36  ;;  %12898 = vmatprep.mubr.bf16.mxu0 %v17554_v17  ;;  %v8491_v32 = vld [vmem:[#allocation23 + $0x15c8] sm:$0xff]  ;;  %v15492_v23 = vcombine.high %v8331_v30, %v8335_v53  ;;  %v15491_v0 = vcombine.low %v8331_v30, %v8335_v53 }
 0x74f   :  { %v12574_v38 = vpop.f32.mrf.mxu0  ;;  %12868 = vmatprep.subr.bf16.mxu0 %v15516_v60  ;;  %v8495_v36 = vld [vmem:[#allocation23 + $0x15e8] sm:$0xff] }
 0x750   :  { %v17621_v56 = vadd.f32 %v12613_v45, %v12573_v41  ;;  %v12575_v9 = vadd.f32 %v12574_v38, %v17614_v5  ;;  %v12615_v27 = vpop.f32.mrf.mxu1  ;;  %12850 = vmatpush2.bf16.msra.mxu1 %v15427_v37  ;;  %v15411_v5 = vcombine.low %v8251_v50, %v8255_v51  ;;  %v8323_v60 = vld [vmem:[#allocation23 + $0x1088] sm:$0xff]  ;;  %v15652_v25 = vcombine.high %v8491_v32, %v8495_v36 }
 0x751   :  { %v12576_v34 = vpop.f32.mrf.mxu0  ;;  %12851 = vmatprep.subr.bf16.mxu1 %v15420_v44  ;;  %v8327_v37 = vld [vmem:[#allocation23 + $0x10a8] sm:$0xff]  ;;  %v15651_v45 = vcombine.low %v8491_v32, %v8495_v36 }
 0x752   :  { %v17624_v16 = vadd.f32 %v12615_v27, %v12575_v9  ;;  %v12617_v6 = vpop.f32.mrf.mxu1  ;;  %12869 = vmatpush1.bf16.msra.mxu0 %v15515_v42  ;;  %v8483_v19 = vld [vmem:[#allocation23 + $0x1588] sm:$0xff]  ;;  %v15484_v41 = vcombine.high %v8323_v60, %v8327_v37  ;;  %v15483_v38 = vcombine.low %v8323_v60, %v8327_v37 }
 0x753   :  { %v12577_v20 = vpop.f32.mrf.mxu0  ;;  %12870 = vmatprep.subr.bf16.mxu0 %v15508_v40  ;;  %v8487_v44 = vld [vmem:[#allocation23 + $0x15a8] sm:$0xff] }
 0x754   :  { %v12618_v35 = vpop.f32.mrf.mxu1  ;;  %12852 = vmatpush2.bf16.msra.mxu1 %v15419_v29  ;;  %v8315_v42 = vld [vmem:[#allocation23 + $0x1048] sm:$0xff]  ;;  %v15644_v51 = vcombine.high %v8483_v19, %v8487_v44  ;;  %v15643_v29 = vcombine.low %v8483_v19, %v8487_v44 }
 0x755   :  { %12853 = vmatprep.subr.bf16.mxu1 %v15412_v11  ;;  %v8319_v50 = vld [vmem:[#allocation23 + $0x1068] sm:$0xff] }
 0x756   :  { %12871 = vmatpush1.bf16.msra.mxu0 %v15507_v2  ;;  %v8475_v40 = vld [vmem:[#allocation23 + $0x1548] sm:$0xff]  ;;  %v15476_v27 = vcombine.high %v8315_v42, %v8319_v50  ;;  %v15475_v11 = vcombine.low %v8315_v42, %v8319_v50 }
 0x757   :  { %12872 = vmatprep.subr.bf16.mxu0 %v15500_v48  ;;  %v8479_v9 = vld [vmem:[#allocation23 + $0x1568] sm:$0xff] }
 0x758   :  { %12854 = vmatpush2.bf16.msra.mxu1 %v15411_v5  ;;  %v8307_v15 = vld [vmem:[#allocation23 + $0x1008] sm:$0xff]  ;;  %v15636_v34 = vcombine.high %v8475_v40, %v8479_v9  ;;  %v15635_v31 = vcombine.low %v8475_v40, %v8479_v9 }
 0x759   :  { %12855 = vmatprep.subr.bf16.mxu1 %v15404_v8  ;;  %v8311_v59 = vld [vmem:[#allocation23 + $0x1028] sm:$0xff] }
 0x75a   :  { %12873 = vmatpush1.bf16.msra.mxu0 %v15499_v24  ;;  %v8467_v6 = vld [vmem:[#allocation23 + $0x1508] sm:$0xff]  ;;  %v15468_v14 = vcombine.high %v8307_v15, %v8311_v59  ;;  %v15467_v5 = vcombine.low %v8307_v15, %v8311_v59 }
 0x75b   :  { %12874 = vmatprep.subr.bf16.mxu0 %v15492_v23  ;;  %v8471_v2 = vld [vmem:[#allocation23 + $0x1528] sm:$0xff] }
 0x75c   :  { %12856 = vmatpush2.bf16.msra.mxu1 %v15403_v26  ;;  %v8427_v20 = vld [vmem:[#allocation23 + $0x13c8] sm:$0xff]  ;;  %v15628_v35 = vcombine.high %v8467_v6, %v8471_v2  ;;  %v15627_v24 = vcombine.low %v8467_v6, %v8471_v2 }
 0x75d   :  { %12907 = vmatprep.subr.bf16.mxu1 %v15652_v25  ;;  %v8431_v48 = vld [vmem:[#allocation23 + $0x13e8] sm:$0xff] }
 0x75e   :  { %12875 = vmatpush1.bf16.msra.mxu0 %v15491_v0  ;;  %v8459_v30 = vld [vmem:[#allocation23 + $0x14c8] sm:$0xff]  ;;  %v15588_v8 = vcombine.high %v8427_v20, %v8431_v48  ;;  %v15587_v26 = vcombine.low %v8427_v20, %v8431_v48 }
 0x75f   :  { %12858 = vmatmul.mubr.bf16.vlgmr.msra.gmra.mxu1 %v17528_v57  ;;  %12876 = vmatprep.subr.bf16.mxu0 %v15484_v41  ;;  %v8463_v53 = vld [vmem:[#allocation23 + $0x14e8] sm:$0xff] }
 0x760   :  { %12908 = vmatpush1.bf16.msra.mxu1 %v15651_v45  ;;  %12939 = vmatprep.mubr.bf16.mxu1 %v17599_v58  ;;  %v8419_v32 = vld [vmem:[#allocation23 + $0x1388] sm:$0xff]  ;;  %v15620_v23 = vcombine.high %v8459_v30, %v8463_v53  ;;  %v15619_v0 = vcombine.low %v8459_v30, %v8463_v53 }
 0x761   :  { %12909 = vmatprep.subr.bf16.mxu1 %v15644_v51  ;;  %v8423_v36 = vld [vmem:[#allocation23 + $0x13a8] sm:$0xff] }
 0x762   :  { %12877 = vmatpush1.bf16.msra.mxu0 %v15483_v38  ;;  %v8451_v60 = vld [vmem:[#allocation23 + $0x1488] sm:$0xff]  ;;  %v15580_v25 = vcombine.high %v8419_v32, %v8423_v36  ;;  %v15579_v45 = vcombine.low %v8419_v32, %v8423_v36 }
 0x763   :  { %12878 = vmatprep.subr.bf16.mxu0 %v15476_v27  ;;  %v8455_v37 = vld [vmem:[#allocation23 + $0x14a8] sm:$0xff] }
 0x764   :  { %12910 = vmatpush1.bf16.msra.mxu1 %v15643_v29  ;;  %v8411_v19 = vld [vmem:[#allocation23 + $0x1348] sm:$0xff]  ;;  %v15612_v41 = vcombine.high %v8451_v60, %v8455_v37  ;;  %v15611_v38 = vcombine.low %v8451_v60, %v8455_v37 }
 0x765   :  { %12911 = vmatprep.subr.bf16.mxu1 %v15636_v34  ;;  %v8415_v44 = vld [vmem:[#allocation23 + $0x1368] sm:$0xff] }
 0x766   :  { %12879 = vmatpush1.bf16.msra.mxu0 %v15475_v11  ;;  %v8443_v42 = vld [vmem:[#allocation23 + $0x1448] sm:$0xff]  ;;  %v15572_v51 = vcombine.high %v8411_v19, %v8415_v44  ;;  %v15571_v29 = vcombine.low %v8411_v19, %v8415_v44 }
 0x767   :  { %12880 = vmatprep.subr.bf16.mxu0 %v15468_v14  ;;  %v8447_v50 = vld [vmem:[#allocation23 + $0x1468] sm:$0xff] }
 0x768   :  { %12912 = vmatpush1.bf16.msra.mxu1 %v15635_v31  ;;  %v8403_v40 = vld [vmem:[#allocation23 + $0x1308] sm:$0xff]  ;;  %v15604_v27 = vcombine.high %v8443_v42, %v8447_v50  ;;  %v15603_v11 = vcombine.low %v8443_v42, %v8447_v50 }
 0x769   :  { %12913 = vmatprep.subr.bf16.mxu1 %v15628_v35  ;;  %v8407_v9 = vld [vmem:[#allocation23 + $0x1328] sm:$0xff] }
 0x76a   :  { %12881 = vmatpush1.bf16.msra.mxu0 %v15467_v5  ;;  %v8435_v15 = vld [vmem:[#allocation23 + $0x1408] sm:$0xff]  ;;  %v15564_v34 = vcombine.high %v8403_v40, %v8407_v9  ;;  %v15563_v31 = vcombine.low %v8403_v40, %v8407_v9 }
 0x76b   :  { %12882 = vmatprep.subr.bf16.mxu0 %v15588_v8  ;;  %v8439_v59 = vld [vmem:[#allocation23 + $0x1428] sm:$0xff] }
 0x76c   :  { %12914 = vmatpush1.bf16.msra.mxu1 %v15627_v24  ;;  %v8395_v6 = vld [vmem:[#allocation23 + $0x12c8] sm:$0xff]  ;;  %v15596_v14 = vcombine.high %v8435_v15, %v8439_v59  ;;  %v15595_v5 = vcombine.low %v8435_v15, %v8439_v59  ;;  %v7852_v15 = vld [vmem:[#allocation23 + $0x1d0] sm:$0xff] }
 0x76d   :  { %12915 = vmatprep.subr.bf16.mxu1 %v15620_v23  ;;  %v8399_v2 = vld [vmem:[#allocation23 + $0x12e8] sm:$0xff]  ;;  %v7856_v59 = vld [vmem:[#allocation23 + $0x1f0] sm:$0xff] }
 0x76e   :  { %12883 = vmatpush2.bf16.msra.mxu0 %v15587_v26  ;;  %v8555_v20 = vld [vmem:[#allocation23 + $0x17c8] sm:$0xff]  ;;  %v15556_v35 = vcombine.high %v8395_v6, %v8399_v2  ;;  %v15555_v24 = vcombine.low %v8395_v6, %v8399_v2 }
 0x76f   :  { %12884 = vmatprep.subr.bf16.mxu0 %v15580_v25  ;;  %v8559_v48 = vld [vmem:[#allocation23 + $0x17e8] sm:$0xff] }
 0x770   :  { %12916 = vmatpush1.bf16.msra.mxu1 %v15619_v0  ;;  %v8387_v30 = vld [vmem:[#allocation23 + $0x1288] sm:$0xff]  ;;  %v15716_v8 = vcombine.high %v8555_v20, %v8559_v48  ;;  %v15715_v26 = vcombine.low %v8555_v20, %v8559_v48  ;;  %v7844_v20 = vld [vmem:[#allocation23 + $0x190] sm:$0xff] }
 0x771   :  { %12917 = vmatprep.subr.bf16.mxu1 %v15612_v41  ;;  %v8391_v53 = vld [vmem:[#allocation23 + $0x12a8] sm:$0xff]  ;;  %v7848_v48 = vld [vmem:[#allocation23 + $0x1b0] sm:$0xff] }
 0x772   :  { %12885 = vmatpush2.bf16.msra.mxu0 %v15579_v45  ;;  %v8547_v32 = vld [vmem:[#allocation23 + $0x1788] sm:$0xff]  ;;  %v15548_v23 = vcombine.high %v8387_v30, %v8391_v53  ;;  %v15547_v0 = vcombine.low %v8387_v30, %v8391_v53 }
 0x773   :  { %12886 = vmatprep.subr.bf16.mxu0 %v15572_v51  ;;  %v8551_v36 = vld [vmem:[#allocation23 + $0x17a8] sm:$0xff] }
 0x774   :  { %12918 = vmatpush1.bf16.msra.mxu1 %v15611_v38  ;;  %v8379_v60 = vld [vmem:[#allocation23 + $0x1248] sm:$0xff]  ;;  %v15708_v25 = vcombine.high %v8547_v32, %v8551_v36  ;;  %v15707_v45 = vcombine.low %v8547_v32, %v8551_v36  ;;  %v7836_v32 = vld [vmem:[#allocation23 + $0x150] sm:$0xff] }
 0x775   :  { %12919 = vmatprep.subr.bf16.mxu1 %v15604_v27  ;;  %v8383_v37 = vld [vmem:[#allocation23 + $0x1268] sm:$0xff]  ;;  %v7840_v36 = vld [vmem:[#allocation23 + $0x170] sm:$0xff] }
 0x776   :  { %12887 = vmatpush2.bf16.msra.mxu0 %v15571_v29  ;;  %v8539_v19 = vld [vmem:[#allocation23 + $0x1748] sm:$0xff]  ;;  %v15540_v41 = vcombine.high %v8379_v60, %v8383_v37  ;;  %v15539_v38 = vcombine.low %v8379_v60, %v8383_v37  ;;  %v15005_v37 = vcombine.low %v7844_v20, %v7848_v48 }
 0x777   :  { %12888 = vmatprep.subr.bf16.mxu0 %v15564_v34  ;;  %v8543_v44 = vld [vmem:[#allocation23 + $0x1768] sm:$0xff] }
 0x778   :  { %12920 = vmatpush1.bf16.msra.mxu1 %v15603_v11  ;;  %v8371_v42 = vld [vmem:[#allocation23 + $0x1208] sm:$0xff]  ;;  %v15700_v51 = vcombine.high %v8539_v19, %v8543_v44  ;;  %v15699_v29 = vcombine.low %v8539_v19, %v8543_v44  ;;  %v14998_v44 = vcombine.high %v7836_v32, %v7840_v36 }
 0x779   :  { %12921 = vmatprep.subr.bf16.mxu1 %v15596_v14  ;;  %v8375_v50 = vld [vmem:[#allocation23 + $0x1228] sm:$0xff]  ;;  %v15014_v14 = vcombine.high %v7852_v15, %v7856_v59 }
 0x77a   :  { %12889 = vmatpush2.bf16.msra.mxu0 %v15563_v31  ;;  %v8531_v40 = vld [vmem:[#allocation23 + $0x1708] sm:$0xff]  ;;  %v15532_v27 = vcombine.high %v8371_v42, %v8375_v50  ;;  %v15531_v11 = vcombine.low %v8371_v42, %v8375_v50  ;;  %v7828_v42 = vld [vmem:[#allocation23 + $0x110] sm:$0xff] }
 0x77b   :  { %12890 = vmatprep.subr.bf16.mxu0 %v15556_v35  ;;  %v8535_v9 = vld [vmem:[#allocation23 + $0x1728] sm:$0xff]  ;;  %v7832_v50 = vld [vmem:[#allocation23 + $0x130] sm:$0xff] }
 0x77c   :  { %12922 = vmatpush1.bf16.msra.mxu1 %v15595_v5  ;;  %v15692_v34 = vcombine.high %v8531_v40, %v8535_v9  ;;  %v8523_v6 = vld [vmem:[#allocation23 + $0x16c8] sm:$0xff]  ;;  %v15691_v31 = vcombine.low %v8531_v40, %v8535_v9  ;;  %v15013_v5 = vcombine.low %v7852_v15, %v7856_v59  ;;  %v7820_v59 = vld [vmem:[#allocation23 + $0xd0] sm:$0xff] }
 0x77d   :  { %12923 = vmatprep.subr.bf16.mxu1 %v15716_v8  ;;  %v8527_v2 = vld [vmem:[#allocation23 + $0x16e8] sm:$0xff]  ;;  %v15006_v8 = vcombine.high %v7844_v20, %v7848_v48  ;;  %v7812_v20 = vld [vmem:[#allocation23 + $0x90] sm:$0xff] }
 0x77e   :  { %12891 = vmatpush2.bf16.msra.mxu0 %v15555_v24  ;;  %v15684_v35 = vcombine.high %v8523_v6, %v8527_v2  ;;  %v8515_v30 = vld [vmem:[#allocation23 + $0x1688] sm:$0xff]  ;;  %v15683_v24 = vcombine.low %v8523_v6, %v8527_v2  ;;  %v7980_v6 = vld [vmem:[#allocation23 + $0x5d0] sm:$0xff] }
 0x77f   :  { %12892 = vmatprep.subr.bf16.mxu0 %v15548_v23  ;;  %v8519_v53 = vld [vmem:[#allocation23 + $0x16a8] sm:$0xff]  ;;  %v7984_v2 = vld [vmem:[#allocation23 + $0x5f0] sm:$0xff] }
 0x780   :  { %12924 = vmatpush2.bf16.msra.mxu1 %v15715_v26  ;;  %v15676_v26 = vcombine.high %v8515_v30, %v8519_v53  ;;  %v8499_v40 = vld [vmem:[#allocation23 + $0x1608] sm:$0xff]  ;;  %v7816_v48 = vld [vmem:[#allocation23 + $0xb0] sm:$0xff] }
 0x781   :  { %12925 = vmatprep.subr.bf16.mxu1 %v15708_v25  ;;  %v8507_v25 = vld [vmem:[#allocation23 + $0x1648] sm:$0xff] }
 0x782   :  { %12893 = vmatpush2.bf16.msra.mxu0 %v15547_v0  ;;  %v8511_v0 = vld [vmem:[#allocation23 + $0x1668] sm:$0xff] }
 0x783   :  { %12894 = vmatprep.subr.bf16.mxu0 %v15540_v41  ;;  %v8503_v9 = vld [vmem:[#allocation23 + $0x1628] sm:$0xff]  ;;  %v15667_v15 = vcombine.low %v8507_v25, %v8511_v0 }
 0x784   :  { %12926 = vmatpush2.bf16.msra.mxu1 %v15707_v45  ;;  %v15675_v45 = vcombine.low %v8515_v30, %v8519_v53  ;;  %v7972_v30 = vld [vmem:[#allocation23 + $0x590] sm:$0xff] }
 0x785   :  { %12927 = vmatprep.subr.bf16.mxu1 %v15700_v51  ;;  %v7976_v53 = vld [vmem:[#allocation23 + $0x5b0] sm:$0xff] }
 0x786   :  { %12895 = vmatpush2.bf16.msra.mxu0 %v15539_v38  ;;  %v15668_v38 = vcombine.high %v8507_v25, %v8511_v0  ;;  %v7968_v25 = vld [vmem:[#allocation23 + $0x570] sm:$0xff] }
 0x787   :  { %12896 = vmatprep.subr.bf16.mxu0 %v15532_v27 }
 0x788   :  { %12928 = vmatpush2.bf16.msra.mxu1 %v15699_v29  ;;  %v14990_v29 = vcombine.high %v7828_v42, %v7832_v50 }
 0x789   :  { %12929 = vmatprep.subr.bf16.mxu1 %v15692_v34  ;;  %v7824_v34 = vld [vmem:[#allocation23 + $0xf0] sm:$0xff] }
 0x78a   :  { %12897 = vmatpush2.bf16.msra.mxu0 %v15531_v11  ;;  %v14989_v11 = vcombine.low %v7828_v42, %v7832_v50  ;;  %v7796_v42 = vld [vmem:[#allocation23 + $0x10] sm:$0xff] }
 0x78b   :  { %12948 = vmatprep.subr.bf16.mxu0 %v15014_v14  ;;  %v14982_v14 = vcombine.high %v7820_v59, %v7824_v34  ;;  %v7800_v50 = vld [vmem:[#allocation23 + $0x30] sm:$0xff] }
 0x78c   :  { %12930 = vmatpush2.bf16.msra.mxu1 %v15691_v31  ;;  %v15659_v31 = vcombine.low %v8499_v40, %v8503_v9 }
 0x78d   :  { %v12654_v23 = vpop.f32.mrf.mxu0  ;;  %12899 = vmatmul.mubr.bf16.vlgmr.msra.gmra.mxu0 %v17577_v33  ;;  %12931 = vmatprep.subr.bf16.mxu1 %v15684_v35  ;;  %v15142_v35 = vcombine.high %v7980_v6, %v7984_v2 }
 0x78e   :  { %v12655_v60 = vadd.f32 %v12654_v23, %v17621_v56  ;;  %12949 = vmatpush1.bf16.msra.mxu0 %v15013_v5  ;;  %12980 = vmatprep.mubr.bf16.mxu0 %v17432_v7  ;;  %v14997_v56 = vcombine.low %v7836_v32, %v7840_v36  ;;  %v14981_v5 = vcombine.low %v7820_v59, %v7824_v34  ;;  %v7804_v32 = vld [vmem:[#allocation23 + $0x50] sm:$0xff] }
 0x78f   :  { %v12656_v19 = vpop.f32.mrf.mxu0  ;;  %12950 = vmatprep.subr.bf16.mxu0 %v15006_v8  ;;  %v14974_v8 = vcombine.high %v7812_v20, %v7816_v48  ;;  %v7808_v36 = vld [vmem:[#allocation23 + $0x70] sm:$0xff]  ;;  %v15134_v23 = vcombine.high %v7972_v30, %v7976_v53 }
 0x790   :  { %v17632_v41 = vadd.f32 %v12656_v19, %v17624_v16  ;;  %12932 = vmatpush2.bf16.msra.mxu1 %v15683_v24  ;;  %v15660_v16 = vcombine.high %v8499_v40, %v8503_v9  ;;  %v15141_v24 = vcombine.low %v7980_v6, %v7984_v2  ;;  %v14966_v19 = vcombine.high %v7804_v32, %v7808_v36  ;;  %v7920_v6 = vld [vmem:[#allocation23 + $0x3f0] sm:$0xff] }
 0x791   :  { %v12658_v51 = vpop.f32.mrf.mxu0  ;;  %12933 = vmatprep.subr.bf16.mxu1 %v15676_v26  ;;  %v14973_v26 = vcombine.low %v7812_v20, %v7816_v48  ;;  %v14965_v9 = vcombine.low %v7804_v32, %v7808_v36  ;;  %v14957_v20 = vcombine.low %v7796_v42, %v7800_v50  ;;  %v7948_v48 = vld [vmem:[#allocation23 + $0x4d0] sm:$0xff] }
 0x792   :  { %12951 = vmatpush1.bf16.msra.mxu0 %v15005_v37  ;;  %v7964_v37 = vld [vmem:[#allocation23 + $0x550] sm:$0xff] }
 0x793   :  { %v12659_v27 = vpop.f32.mrf.mxu0  ;;  %12952 = vmatprep.subr.bf16.mxu0 %v14998_v44 }
 0x794   :  { %12934 = vmatpush2.bf16.msra.mxu1 %v15675_v45  ;;  %v15133_v45 = vcombine.low %v7972_v30, %v7976_v53  ;;  %v7956_v27 = vld [vmem:[#allocation23 + $0x510] sm:$0xff] }
 0x795   :  { %12935 = vmatprep.subr.bf16.mxu1 %v15668_v38  ;;  %v15126_v38 = vcombine.high %v7964_v37, %v7968_v25 }
 0x796   :  { %12953 = vmatpush1.bf16.msra.mxu0 %v14997_v56 }
 0x797   :  { %12954 = vmatprep.subr.bf16.mxu0 %v14990_v29  ;;  %v7960_v29 = vld [vmem:[#allocation23 + $0x530] sm:$0xff] }
 0x798   :  { %12936 = vmatpush2.bf16.msra.mxu1 %v15667_v15  ;;  %v14958_v15 = vcombine.high %v7796_v42, %v7800_v50  ;;  %v15117_v53 = vcombine.low %v7956_v27, %v7960_v29  ;;  %v7932_v50 = vld [vmem:[#allocation23 + $0x450] sm:$0xff] }
 0x799   :  { %12937 = vmatprep.subr.bf16.mxu1 %v15660_v16  ;;  %v15125_v16 = vcombine.low %v7964_v37, %v7968_v25 }
 0x79a   :  { %12955 = vmatpush1.bf16.msra.mxu0 %v14989_v11  ;;  %v7916_v11 = vld [vmem:[#allocation23 + $0x3d0] sm:$0xff] }
 0x79b   :  { %12956 = vmatprep.subr.bf16.mxu0 %v14982_v14  ;;  %v15118_v14 = vcombine.high %v7956_v27, %v7960_v29  ;;  %v15077_v36 = vcombine.low %v7916_v11, %v7920_v6  ;;  %v7896_v27 = vld [vmem:[#allocation23 + $0x330] sm:$0xff] }
 0x79c   :  { %12938 = vmatpush2.bf16.msra.mxu1 %v15659_v31 }
 0x79d   :  { %12989 = vmatprep.subr.bf16.mxu1 %v15142_v35  ;;  %v7952_v35 = vld [vmem:[#allocation23 + $0x4f0] sm:$0xff] }
 0x79e   :  { %12957 = vmatpush1.bf16.msra.mxu0 %v14981_v5  ;;  %v15078_v5 = vcombine.high %v7916_v11, %v7920_v6  ;;  %v15110_v32 = vcombine.high %v7948_v48, %v7952_v35  ;;  %v15109_v25 = vcombine.low %v7948_v48, %v7952_v35  ;;  %v7884_v11 = vld [vmem:[#allocation23 + $0x2d0] sm:$0xff] }
 0x79f   :  { %12940 = vmatmul.mubr.bf16.vlgmr.msra.gmra.mxu1 %v17603_v28  ;;  %v12695_v0 = vpop.f32.mrf.mxu1  ;;  %12958 = vmatprep.subr.bf16.mxu0 %v14974_v8  ;;  %v7908_v8 = vld [vmem:[#allocation23 + $0x390] sm:$0xff] }
 0x7a0   :  { %v17635_v44 = vadd.f32 %v12695_v0, %v12655_v60  ;;  %12990 = vmatpush1.bf16.msra.mxu1 %v15141_v24  ;;  %13021 = vmatprep.mubr.bf16.mxu1 %v17435_v63  ;;  %v7912_v24 = vld [vmem:[#allocation23 + $0x3b0] sm:$0xff] }
 0x7a1   :  { %v12697_v51 = vpop.f32.mrf.mxu1  ;;  %12991 = vmatprep.subr.bf16.mxu1 %v15134_v23  ;;  %v7940_v23 = vld [vmem:[#allocation23 + $0x490] sm:$0xff]  ;;  %v15070_v37 = vcombine.high %v7908_v8, %v7912_v24  ;;  %v15069_v42 = vcombine.low %v7908_v8, %v7912_v24 }
 0x7a2   :  { %v13464_v56 = vand.u32 2147483647, %v17635_v44  ;;  %v17640_v40 = vadd.f32 %v12697_v51, %v17632_v41  ;;  %12959 = vmatpush1.bf16.msra.mxu0 %v14973_v26  ;;  %v7944_v26 = vld [vmem:[#allocation23 + $0x4b0] sm:$0xff]  ;;  %vm13448_vm0 = vcmp.ne.f32.partialorder %v17635_v44, %v17635_v44 }
 0x7a3   :  { %v12699_v60 = vpop.f32.mrf.mxu1  ;;  %12960 = vmatprep.subr.bf16.mxu0 %v14966_v19  ;;  %v7900_v0 = vld [vmem:[#allocation23 + $0x350] sm:$0xff] }
 0x7a4   :  { %v13472_v59 = vsub.f32 0.0, %v13464_v56  ;;  %v13465_v34 = vand.u32 2147483647, %v17640_v40  ;;  %12992 = vmatpush1.bf16.msra.mxu1 %v15133_v45  ;;  %v7904_v19 = vld [vmem:[#allocation23 + $0x370] sm:$0xff]  ;;  %v15102_v45 = vcombine.high %v7940_v23, %v7944_v26  ;;  %v15101_v56 = vcombine.low %v7940_v23, %v7944_v26 }
 0x7a5   :  { %v12700_v2 = vpop.f32.mrf.mxu1  ;;  %12993 = vmatprep.subr.bf16.mxu1 %v15126_v38  ;;  %v7936_v51 = vld [vmem:[#allocation23 + $0x470] sm:$0xff]  ;;  %v15062_v38 = vcombine.high %v7900_v0, %v7904_v19  ;;  %v15061_v60 = vcombine.low %v7900_v0, %v7904_v19  ;;  %vm13449_vm1 = vcmp.ne.f32.partialorder %v17640_v40, %v17640_v40 }
 0x7a6   :  { %v13480_v31 = vmul.f32 1.442695, %v13472_v59  ;;  %v13473_v41 = vsub.f32 0.0, %v13465_v34  ;;  %12961 = vmatpush1.bf16.msra.mxu0 %v14965_v9  ;;  %v7892_v9 = vld [vmem:[#allocation23 + $0x310] sm:$0xff]  ;;  %v15094_v29 = vcombine.high %v7932_v50, %v7936_v51 }
 0x7a7   :  { %12962 = vmatprep.subr.bf16.mxu0 %v14958_v15  ;;  %v7924_v15 = vld [vmem:[#allocation23 + $0x410] sm:$0xff]  ;;  %v15054_v34 = vcombine.high %v7892_v9, %v7896_v27 }
 0x7a8   :  { %16488 = vpow2.f32 %v13480_v31  ;;  %v13482_v30 = vmul.f32 1.442695, %v13473_v41  ;;  %12994 = vmatpush1.bf16.msra.mxu1 %v15125_v16  ;;  %v7928_v59 = vld [vmem:[#allocation23 + $0x430] sm:$0xff]  ;;  %v15093_v16 = vcombine.low %v7932_v50, %v7936_v51  ;;  %v15053_v41 = vcombine.low %v7892_v9, %v7896_v27 }
 0x7a9   :  { %12995 = vmatprep.subr.bf16.mxu1 %v15118_v14  ;;  %v7888_v6 = vld [vmem:[#allocation23 + $0x2f0] sm:$0xff]  ;;  %v15086_v14 = vcombine.high %v7924_v15, %v7928_v59 }
 0x7aa   :  { %16490 = vpow2.f32 %v13482_v30  ;;  %12963 = vmatpush1.bf16.msra.mxu0 %v14957_v20  ;;  %v8044_v20 = vld [vmem:[#allocation23 + $0x7d0] sm:$0xff] }
 0x7ab   :  { %12964 = vmatprep.subr.bf16.mxu0 %v15078_v5  ;;  %v8048_v48 = vld [vmem:[#allocation23 + $0x7f0] sm:$0xff]  ;;  %v15046_v5 = vcombine.high %v7884_v11, %v7888_v6 }
 0x7ac   :  { %12996 = vmatpush1.bf16.msra.mxu1 %v15117_v53  ;;  %v15085_v53 = vcombine.low %v7924_v15, %v7928_v59  ;;  %v7876_v8 = vld [vmem:[#allocation23 + $0x290] sm:$0xff] }
 0x7ad   :  { %12997 = vmatprep.subr.bf16.mxu1 %v15110_v32  ;;  %v7880_v24 = vld [vmem:[#allocation23 + $0x2b0] sm:$0xff]  ;;  %v15206_v32 = vcombine.high %v8044_v20, %v8048_v48 }
 0x7ae   :  { %12965 = vmatpush2.bf16.msra.mxu0 %v15077_v36  ;;  %v15045_v36 = vcombine.low %v7884_v11, %v7888_v6  ;;  %v8036_v23 = vld [vmem:[#allocation23 + $0x790] sm:$0xff]  ;;  %v15037_v50 = vcombine.low %v7876_v8, %v7880_v24 }
 0x7af   :  { %12966 = vmatprep.subr.bf16.mxu0 %v15070_v37  ;;  %v8040_v26 = vld [vmem:[#allocation23 + $0x7b0] sm:$0xff]  ;;  %v15038_v37 = vcombine.high %v7876_v8, %v7880_v24 }
 0x7b0   :  { %12998 = vmatpush1.bf16.msra.mxu1 %v15109_v25  ;;  %v15205_v25 = vcombine.low %v8044_v20, %v8048_v48  ;;  %v7868_v0 = vld [vmem:[#allocation23 + $0x250] sm:$0xff]  ;;  %v15197_v27 = vcombine.low %v8036_v23, %v8040_v26 }
 0x7b1   :  { %12999 = vmatprep.subr.bf16.mxu1 %v15102_v45  ;;  %v7872_v19 = vld [vmem:[#allocation23 + $0x270] sm:$0xff]  ;;  %v15198_v45 = vcombine.high %v8036_v23, %v8040_v26 }
 0x7b2   :  { %12967 = vmatpush2.bf16.msra.mxu0 %v15069_v42  ;;  %v8028_v51 = vld [vmem:[#allocation23 + $0x750] sm:$0xff] }
 0x7b3   :  { %12968 = vmatprep.subr.bf16.mxu0 %v15062_v38  ;;  %v8032_v38 = vld [vmem:[#allocation23 + $0x770] sm:$0xff] }
 0x7b4   :  { %13000 = vmatpush1.bf16.msra.mxu1 %v15101_v56  ;;  %v15030_v56 = vcombine.high %v7868_v0, %v7872_v19  ;;  %v15190_v15 = vcombine.high %v8028_v51, %v8032_v38  ;;  %v8024_v11 = vld [vmem:[#allocation23 + $0x730] sm:$0xff] }
 0x7b5   :  { %v17643_v2 = vpop.eup %16488  ;;  %13001 = vmatprep.subr.bf16.mxu1 %v15094_v29  ;;  %v7860_v29 = vld [vmem:[#allocation23 + $0x210] sm:$0xff] }
 0x7b6   :  { %v13496_v31 = vadd.f32 1.0, %v17643_v2  ;;  %12969 = vmatpush2.bf16.msra.mxu0 %v15061_v60  ;;  %v13499_v42 = vmul.f32 -0.5, %v17643_v2  ;;  %v7864_v60 = vld [vmem:[#allocation23 + $0x230] sm:$0xff]  ;;  %v13502_v6 = vand.u32 2147483647, %v17643_v2 }
 0x7b7   :  { %v17646_v35 = vpop.eup %16490  ;;  %12970 = vmatprep.subr.bf16.mxu0 %v15054_v34  ;;  %v15029_v34 = vcombine.low %v7868_v0, %v7872_v19  ;;  %v8108_v20 = vld [vmem:[#allocation23 + $0x9d0] sm:$0xff] }
 0x7b8   :  { %16492 = vlog2.f32 %v13496_v31  ;;  %v13505_v30 = vadd.f32 1.0, %v17646_v35  ;;  %13002 = vmatpush1.bf16.msra.mxu1 %v15093_v16  ;;  %v13508_v9 = vmul.f32 -0.5, %v17646_v35  ;;  %v13500_v59 = vadd.f32 1.0, %v13499_v42  ;;  %v8020_v16 = vld [vmem:[#allocation23 + $0x710] sm:$0xff] }
 0x7b9   :  { %13003 = vmatprep.subr.bf16.mxu1 %v15086_v14  ;;  %v15022_v14 = vcombine.high %v7860_v29, %v7864_v60  ;;  %v8112_v48 = vld [vmem:[#allocation23 + $0x9f0] sm:$0xff]  ;;  %vm13503_vm14 = vcmp.lt.f32.partialorder %v13502_v6, 0.0004427343  ;;  %v15181_v42 = vcombine.low %v8020_v16, %v8024_v11 }
 0x7ba   :  { %16494 = vlog2.f32 %v13505_v30  ;;  %12971 = vmatpush2.bf16.msra.mxu0 %v15053_v41  ;;  %v13509_v31 = vadd.f32 1.0, %v13508_v9  ;;  %v15189_v41 = vcombine.low %v8028_v51, %v8032_v38  ;;  %v13511_v30 = vand.u32 2147483647, %v17646_v35  ;;  %v8016_v23 = vld [vmem:[#allocation23 + $0x6f0] sm:$0xff] }
 0x7bb   :  { %12972 = vmatprep.subr.bf16.mxu0 %v15046_v5  ;;  %v13501_v24 = vmul.f32 %v17643_v2, %v13500_v59  ;;  %v8104_v51 = vld [vmem:[#allocation23 + $0x9b0] sm:$0xff]  ;;  %v13441_v2 = vmax.f32 %v17640_v40, 0.0 }
 0x7bc   :  { %13004 = vmatpush1.bf16.msra.mxu1 %v15085_v53  ;;  %v15182_v53 = vcombine.high %v8020_v16, %v8024_v11  ;;  %vm13512_vm15 = vcmp.lt.f32.partialorder %v13511_v30, 0.0004427343  ;;  %v8092_v16 = vld [vmem:[#allocation23 + $0x950] sm:$0xff] }
 0x7bd   :  { %13005 = vmatprep.subr.bf16.mxu1 %v15206_v32  ;;  %v15021_v32 = vcombine.low %v7860_v29, %v7864_v60  ;;  %v8004_v29 = vld [vmem:[#allocation23 + $0x690] sm:$0xff] }
 0x7be   :  { %12973 = vmatpush2.bf16.msra.mxu0 %v15045_v36  ;;  %v8012_v36 = vld [vmem:[#allocation23 + $0x6d0] sm:$0xff] }
 0x7bf   :  { %12974 = vmatprep.subr.bf16.mxu0 %v15038_v37  ;;  %v13440_v37 = vmax.f32 %v17635_v44, 0.0  ;;  %v8008_v60 = vld [vmem:[#allocation23 + $0x6b0] sm:$0xff] }
 0x7c0   :  { %13006 = vmatpush2.bf16.msra.mxu1 %v15205_v25  ;;  %v15270_v25 = vcombine.high %v8108_v20, %v8112_v48  ;;  %v8096_v11 = vld [vmem:[#allocation23 + $0x970] sm:$0xff] }
 0x7c1   :  { %13007 = vmatprep.subr.bf16.mxu1 %v15198_v45  ;;  %v13510_v45 = vmul.f32 %v17646_v35, %v13509_v31  ;;  %v15166_v31 = vcombine.high %v8004_v29, %v8008_v60  ;;  %v15254_v30 = vcombine.high %v8092_v16, %v8096_v11 }
 0x7c2   :  { %12975 = vmatpush2.bf16.msra.mxu0 %v15037_v50  ;;  %v8100_v50 = vld [vmem:[#allocation23 + $0x990] sm:$0xff] }
 0x7c3   :  { %12976 = vmatprep.subr.bf16.mxu0 %v15030_v56  ;;  %v15174_v56 = vcombine.high %v8012_v36, %v8016_v23  ;;  %v15262_v59 = vcombine.high %v8100_v50, %v8104_v51 }
 0x7c4   :  { %13008 = vmatpush2.bf16.msra.mxu1 %v15197_v27  ;;  %v15269_v27 = vcombine.low %v8108_v20, %v8112_v48  ;;  %v7996_v20 = vld [vmem:[#allocation23 + $0x650] sm:$0xff] }
 0x7c5   :  { %v16493_v5 = vpop.eup %16492  ;;  %13009 = vmatprep.subr.bf16.mxu1 %v15190_v15  ;;  %v8000_v48 = vld [vmem:[#allocation23 + $0x670] sm:$0xff] }
 0x7c6   :  { %v13498_v8 = vmul.f32 0.6931472, %v16493_v5  ;;  %12977 = vmatpush2.bf16.msra.mxu0 %v15029_v34  ;;  %v15173_v34 = vcombine.low %v8012_v36, %v8016_v23  ;;  %v15158_v36 = vcombine.high %v7996_v20, %v8000_v48  ;;  %v15253_v23 = vcombine.low %v8092_v16, %v8096_v11  ;;  %v8228_v11 = vld [vmem:[#allocation23 + $0xd90] sm:$0xff] }
 0x7c7   :  { %v16495_v26 = vpop.eup %16494  ;;  %12978 = vmatprep.subr.bf16.mxu0 %v15022_v14 }
 0x7c8   :  { %v13504_v0 = vsel %vm13503_vm14, %v13501_v24, %v13498_v8  ;;  %v13507_v19 = vmul.f32 0.6931472, %v16495_v26  ;;  %13010 = vmatpush2.bf16.msra.mxu1 %v15189_v41  ;;  %v15261_v41 = vcombine.low %v8100_v50, %v8104_v51  ;;  %v8084_v8 = vld [vmem:[#allocation23 + $0x910] sm:$0xff] }
 0x7c9   :  { %v13568_v38 = vadd.f32 %v13504_v0, %v13440_v37  ;;  %13011 = vmatprep.subr.bf16.mxu1 %v15182_v53  ;;  %v15165_v53 = vcombine.low %v8004_v29, %v8008_v60  ;;  %v8088_v24 = vld [vmem:[#allocation23 + $0x930] sm:$0xff] }
 0x7ca   :  { %v13513_v9 = vsel %vm13512_vm15, %v13510_v45, %v13507_v19  ;;  %12979 = vmatpush2.bf16.msra.mxu0 %v15021_v32  ;;  %v7988_v26 = vld [vmem:[#allocation23 + $0x610] sm:$0xff]  ;;  %v15246_v0 = vcombine.high %v8084_v8, %v8088_v24  ;;  %v15157_v19 = vcombine.low %v7996_v20, %v8000_v48  ;;  %v15245_v51 = vcombine.low %v8084_v8, %v8088_v24 }
 0x7cb   :  { %v13576_v35 = vsel %vm13448_vm0, %v17635_v44, %v13568_v38  ;;  %v13569_v15 = vadd.f32 %v13513_v9, %v13441_v2  ;;  %13030 = vmatprep.subr.bf16.mxu0 %v15270_v25  ;;  %v7992_v37 = vld [vmem:[#allocation23 + $0x630] sm:$0xff] }
 0x7cc   :  { %16496 = vtanh.f32 %v13576_v35  ;;  %13012 = vmatpush2.bf16.msra.mxu1 %v15181_v42  ;;  %v8076_v45 = vld [vmem:[#allocation23 + $0x8d0] sm:$0xff]  ;;  %v15150_v50 = vcombine.high %v7988_v26, %v7992_v37  ;;  %v15149_v9 = vcombine.low %v7988_v26, %v7992_v37 }
 0x7cd   :  { %v13577_v6 = vsel %vm13449_vm1, %v17640_v40, %v13569_v15  ;;  %v17663_v14 = vpop.f32.mrf.mxu0  ;;  %12981 = vmatmul.mubr.bf16.vlgmr.msra.gmra.mxu0 %v17475_v54  ;;  %13013 = vmatprep.subr.bf16.mxu1 %v15174_v56  ;;  %v8080_v42 = vld [vmem:[#allocation23 + $0x8f0] sm:$0xff] }
 0x7ce   :  { %16498 = vtanh.f32 %v13577_v6  ;;  %13031 = vmatpush1.bf16.msra.mxu0 %v15269_v27  ;;  %13062 = vmatprep.mubr.bf16.mxu0 %v17486_v18  ;;  %v8236_v38 = vld [vmem:[#allocation23 + $0xdd0] sm:$0xff]  ;;  %v15238_v56 = vcombine.high %v8076_v45, %v8080_v42  ;;  %v15237_v16 = vcombine.low %v8076_v45, %v8080_v42 }
 0x7cf   :  { %v17667_v5 = vpop.f32.mrf.mxu0  ;;  %13032 = vmatprep.subr.bf16.mxu0 %v15262_v59  ;;  %v8240_v2 = vld [vmem:[#allocation23 + $0xdf0] sm:$0xff]  ;;  %v16538_v59 = vld [vmem:[#allocation25] sm:$0xff] }
 0x7d0   :  { %13014 = vmatpush2.bf16.msra.mxu1 %v15173_v34  ;;  %v8068_v27 = vld [vmem:[#allocation23 + $0x890] sm:$0xff]  ;;  %v15398_v35 = vcombine.high %v8236_v38, %v8240_v2  ;;  %v8587_v34 = vrot.slane %v16538_v59, %v17186_v10  ;;  %v8591_v20 = vrot.slane %v16538_v59, %v17192_v12  ;;  %v15397_v48 = vcombine.low %v8236_v38, %v8240_v2 }
 0x7d1   :  { %v12740_v32 = vpop.f32.mrf.mxu0  ;;  %13015 = vmatprep.subr.bf16.mxu1 %v15166_v31  ;;  %v8072_v29 = vld [vmem:[#allocation23 + $0x8b0] sm:$0xff] }
 0x7d2   :  { %13033 = vmatpush1.bf16.msra.mxu0 %v15261_v41  ;;  %v8232_v6 = vld [vmem:[#allocation23 + $0xdb0] sm:$0xff]  ;;  %v15230_v41 = vcombine.high %v8068_v27, %v8072_v29  ;;  %v12737_v24 = vadd.f32 %v17663_v14, %v8587_v34  ;;  %v15229_v32 = vcombine.low %v8068_v27, %v8072_v29 }
 0x7d3   :  { %v12741_v25 = vpop.f32.mrf.mxu0  ;;  %13034 = vmatprep.subr.bf16.mxu0 %v15254_v30  ;;  %v8060_v30 = vld [vmem:[#allocation23 + $0x850] sm:$0xff]  ;;  %v15390_v10 = vcombine.high %v8228_v11, %v8232_v6  ;;  %v15389_v14 = vcombine.low %v8228_v11, %v8232_v6 }
 0x7d4   :  { %13016 = vmatpush2.bf16.msra.mxu1 %v15165_v53  ;;  %v8064_v53 = vld [vmem:[#allocation23 + $0x870] sm:$0xff] }
 0x7d5   :  { %13017 = vmatprep.subr.bf16.mxu1 %v15158_v36  ;;  %v8220_v36 = vld [vmem:[#allocation23 + $0xd50] sm:$0xff]  ;;  %v15222_v37 = vcombine.high %v8060_v30, %v8064_v53  ;;  %v15221_v42 = vcombine.low %v8060_v30, %v8064_v53 }
 0x7d6   :  { %13035 = vmatpush1.bf16.msra.mxu0 %v15253_v23  ;;  %v8224_v23 = vld [vmem:[#allocation23 + $0xd70] sm:$0xff] }
 0x7d7   :  { %13036 = vmatprep.subr.bf16.mxu0 %v15246_v0  ;;  %v8052_v25 = vld [vmem:[#allocation23 + $0x810] sm:$0xff]  ;;  %v15382_v45 = vcombine.high %v8220_v36, %v8224_v23  ;;  %v15381_v2 = vcombine.low %v8220_v36, %v8224_v23 }
 0x7d8   :  { %13018 = vmatpush2.bf16.msra.mxu1 %v15157_v19  ;;  %v8056_v0 = vld [vmem:[#allocation23 + $0x830] sm:$0xff] }
 0x7d9   :  { %v16497_v60 = vpop.eup %16496  ;;  %13019 = vmatprep.subr.bf16.mxu1 %v15150_v50  ;;  %v8212_v50 = vld [vmem:[#allocation23 + $0xd10] sm:$0xff] }
 0x7da   :  { %v13592_v15 = vmul.f32 %v16497_v60, %v17635_v44  ;;  %13037 = vmatpush1.bf16.msra.mxu0 %v15245_v51  ;;  %v8216_v51 = vld [vmem:[#allocation23 + $0xd30] sm:$0xff]  ;;  %v15213_v60 = vcombine.low %v8052_v25, %v8056_v0 }
 0x7db   :  { %v16499_v31 = vpop.eup %16498  ;;  %13038 = vmatprep.subr.bf16.mxu0 %v15238_v56  ;;  %v8172_v56 = vld [vmem:[#allocation23 + $0xbd0] sm:$0xff]  ;;  %v15374_v29 = vcombine.high %v8212_v50, %v8216_v51  ;;  %v15373_v34 = vcombine.low %v8212_v50, %v8216_v51 }
 0x7dc   :  { %13020 = vmatpush2.bf16.msra.mxu1 %v15149_v9  ;;  %v13593_v8 = vmul.f32 %v16499_v31, %v17640_v40  ;;  %v17674_v44 = vmul.f32 %v13592_v15, %v17286_v62  ;;  %v12739_v40 = vadd.f32 %v17667_v5, %v8591_v20  ;;  %v15214_v5 = vcombine.high %v8052_v25, %v8056_v0  ;;  %v8176_v9 = vld [vmem:[#allocation23 + $0xbf0] sm:$0xff] }
 0x7dd   :  { %13071 = vmatprep.subr.bf16.mxu1 %v15398_v35  ;;  %v8204_v35 = vld [vmem:[#allocation23 + $0xcd0] sm:$0xff]  ;;  %v15334_v59 = vcombine.high %v8172_v56, %v8176_v9  ;;  %v15333_v31 = vcombine.low %v8172_v56, %v8176_v9 }
 0x7de   :  { %13039 = vmatpush1.bf16.msra.mxu0 %v15237_v16  ;;  %v17678_v26 = vmul.f32 %v13593_v8, %v17289_v61  ;;  %v8208_v15 = vld [vmem:[#allocation23 + $0xcf0] sm:$0xff] }
 0x7df   :  { %v12777_v12 = vpop.f32.mrf.mxu1  ;;  %13022 = vmatmul.mubr.bf16.vlgmr.msra.gmra.mxu1 %v17477_v3  ;;  %13040 = vmatprep.subr.bf16.mxu0 %v15230_v41  ;;  %v8164_v16 = vld [vmem:[#allocation23 + $0xb90] sm:$0xff]  ;;  %v15366_v6 = vcombine.high %v8204_v35, %v8208_v15  ;;  %v15365_v30 = vcombine.low %v8204_v35, %v8208_v15 }
 0x7e0   :  { %v17682_v62 = vadd.f32 %v12777_v12, %v12737_v24  ;;  %13072 = vmatpush1.bf16.msra.mxu1 %v15397_v48  ;;  %13103 = vmatprep.mubr.bf16.mxu1 %v17500_v49  ;;  %v8168_v11 = vld [vmem:[#allocation23 + $0xbb0] sm:$0xff] }
 0x7e1   :  { %v12779_v19 = vpop.f32.mrf.mxu1  ;;  %13073 = vmatprep.subr.bf16.mxu1 %v15390_v10  ;;  %v8196_v41 = vld [vmem:[#allocation23 + $0xc90] sm:$0xff]  ;;  %v15326_v48 = vcombine.high %v8164_v16, %v8168_v11  ;;  %v15325_v24 = vcombine.low %v8164_v16, %v8168_v11 }
 0x7e2   :  { %v17685_v61 = vadd.f32 %v12779_v19, %v12739_v40  ;;  %13041 = vmatpush1.bf16.msra.mxu0 %v15229_v32  ;;  %v8200_v20 = vld [vmem:[#allocation23 + $0xcb0] sm:$0xff] }
 0x7e3   :  { %v12781_v38 = vpop.f32.mrf.mxu1  ;;  %13042 = vmatprep.subr.bf16.mxu0 %v15222_v37  ;;  %v8156_v53 = vld [vmem:[#allocation23 + $0xb50] sm:$0xff]  ;;  %v15358_v10 = vcombine.high %v8196_v41, %v8200_v20  ;;  %v15357_v12 = vcombine.low %v8196_v41, %v8200_v20 }
 0x7e4   :  { %13074 = vmatpush1.bf16.msra.mxu1 %v15389_v14  ;;  %v8160_v8 = vld [vmem:[#allocation23 + $0xb70] sm:$0xff] }
 0x7e5   :  { %v12782_v27 = vpop.f32.mrf.mxu1  ;;  %13075 = vmatprep.subr.bf16.mxu1 %v15382_v45  ;;  %v8188_v32 = vld [vmem:[#allocation23 + $0xc50] sm:$0xff]  ;;  %v15318_v23 = vcombine.high %v8156_v53, %v8160_v8  ;;  %v15317_v25 = vcombine.low %v8156_v53, %v8160_v8 }
 0x7e6   :  { %13043 = vmatpush1.bf16.msra.mxu0 %v15221_v42  ;;  %v8192_v36 = vld [vmem:[#allocation23 + $0xc70] sm:$0xff] }
 0x7e7   :  { %13044 = vmatprep.subr.bf16.mxu0 %v15214_v5  ;;  %v8148_v37 = vld [vmem:[#allocation23 + $0xb10] sm:$0xff]  ;;  %v15350_v14 = vcombine.high %v8188_v32, %v8192_v36  ;;  %v15349_v42 = vcombine.low %v8188_v32, %v8192_v36 }
 0x7e8   :  { %13076 = vmatpush1.bf16.msra.mxu1 %v15381_v2  ;;  %v8152_v40 = vld [vmem:[#allocation23 + $0xb30] sm:$0xff] }
 0x7e9   :  { %13077 = vmatprep.subr.bf16.mxu1 %v15374_v29  ;;  %v8180_v0 = vld [vmem:[#allocation23 + $0xc10] sm:$0xff]  ;;  %v15310_v45 = vcombine.high %v8148_v37, %v8152_v40  ;;  %v15309_v5 = vcombine.low %v8148_v37, %v8152_v40 }
 0x7ea   :  { %13045 = vmatpush1.bf16.msra.mxu0 %v15213_v60  ;;  %v8184_v19 = vld [vmem:[#allocation23 + $0xc30] sm:$0xff] }
 0x7eb   :  { %13046 = vmatprep.subr.bf16.mxu0 %v15334_v59  ;;  %v8140_v50 = vld [vmem:[#allocation23 + $0xad0] sm:$0xff]  ;;  %v15342_v38 = vcombine.high %v8180_v0, %v8184_v19  ;;  %v15341_v27 = vcombine.low %v8180_v0, %v8184_v19 }
 0x7ec   :  { %13078 = vmatpush1.bf16.msra.mxu1 %v15373_v34  ;;  %v8144_v51 = vld [vmem:[#allocation23 + $0xaf0] sm:$0xff] }
 0x7ed   :  { %13079 = vmatprep.subr.bf16.mxu1 %v15366_v6  ;;  %v8300_v2 = vld [vmem:[#allocation23 + $0xfd0] sm:$0xff]  ;;  %v15302_v9 = vcombine.high %v8140_v50, %v8144_v51  ;;  %v15301_v15 = vcombine.low %v8140_v50, %v8144_v51 }
 0x7ee   :  { %13047 = vmatpush2.bf16.msra.mxu0 %v15333_v31  ;;  %v8304_v56 = vld [vmem:[#allocation23 + $0xff0] sm:$0xff] }
 0x7ef   :  { %13048 = vmatprep.subr.bf16.mxu0 %v15326_v48  ;;  %v8132_v29 = vld [vmem:[#allocation23 + $0xa90] sm:$0xff]  ;;  %v15462_v35 = vcombine.high %v8300_v2, %v8304_v56  ;;  %v15461_v11 = vcombine.low %v8300_v2, %v8304_v56 }
 0x7f0   :  { %13080 = vmatpush1.bf16.msra.mxu1 %v15365_v30  ;;  %v8136_v60 = vld [vmem:[#allocation23 + $0xab0] sm:$0xff] }
 0x7f1   :  { %13081 = vmatprep.subr.bf16.mxu1 %v15358_v10  ;;  %v8292_v59 = vld [vmem:[#allocation23 + $0xf90] sm:$0xff]  ;;  %v15294_v16 = vcombine.high %v8132_v29, %v8136_v60  ;;  %v15293_v20 = vcombine.low %v8132_v29, %v8136_v60 }
 0x7f2   :  { %13049 = vmatpush2.bf16.msra.mxu0 %v15325_v24  ;;  %v8296_v34 = vld [vmem:[#allocation23 + $0xfb0] sm:$0xff] }
 0x7f3   :  { %13050 = vmatprep.subr.bf16.mxu0 %v15318_v23  ;;  %v8124_v6 = vld [vmem:[#allocation23 + $0xa50] sm:$0xff]  ;;  %v15454_v41 = vcombine.high %v8292_v59, %v8296_v34  ;;  %v15453_v8 = vcombine.low %v8292_v59, %v8296_v34 }
 0x7f4   :  { %13082 = vmatpush1.bf16.msra.mxu1 %v15357_v12  ;;  %v8128_v31 = vld [vmem:[#allocation23 + $0xa70] sm:$0xff] }
 0x7f5   :  { %13083 = vmatprep.subr.bf16.mxu1 %v15350_v14  ;;  %v8284_v48 = vld [vmem:[#allocation23 + $0xf50] sm:$0xff]  ;;  %v15286_v53 = vcombine.high %v8124_v6, %v8128_v31  ;;  %v15285_v36 = vcombine.low %v8124_v6, %v8128_v31 }
 0x7f6   :  { %13051 = vmatpush2.bf16.msra.mxu0 %v15317_v25  ;;  %v8288_v30 = vld [vmem:[#allocation23 + $0xf70] sm:$0xff] }
 0x7f7   :  { %13052 = vmatprep.subr.bf16.mxu0 %v15310_v45  ;;  %v8116_v10 = vld [vmem:[#allocation23 + $0xa10] sm:$0xff]  ;;  %v15446_v32 = vcombine.high %v8284_v48, %v8288_v30  ;;  %v15445_v40 = vcombine.low %v8284_v48, %v8288_v30 }
 0x7f8   :  { %13084 = vmatpush1.bf16.msra.mxu1 %v15349_v42  ;;  %v8120_v24 = vld [vmem:[#allocation23 + $0xa30] sm:$0xff] }
 0x7f9   :  { %13085 = vmatprep.subr.bf16.mxu1 %v15342_v38  ;;  %v8276_v23 = vld [vmem:[#allocation23 + $0xf10] sm:$0xff]  ;;  %v15278_v37 = vcombine.high %v8116_v10, %v8120_v24  ;;  %v15277_v19 = vcombine.low %v8116_v10, %v8120_v24 }
 0x7fa   :  { %13053 = vmatpush2.bf16.msra.mxu0 %v15309_v5  ;;  %v8280_v12 = vld [vmem:[#allocation23 + $0xf30] sm:$0xff] }
 0x7fb   :  { %13054 = vmatprep.subr.bf16.mxu0 %v15302_v9  ;;  %v8364_v14 = vld [vmem:[#allocation23 + $0x11d0] sm:$0xff]  ;;  %v15438_v0 = vcombine.high %v8276_v23, %v8280_v12  ;;  %v15437_v51 = vcombine.low %v8276_v23, %v8280_v12 }
 0x7fc   :  { %13086 = vmatpush1.bf16.msra.mxu1 %v15341_v27  ;;  %v8368_v25 = vld [vmem:[#allocation23 + $0x11f0] sm:$0xff] }
 0x7fd   :  { %13087 = vmatprep.subr.bf16.mxu1 %v15462_v35  ;;  %v8268_v45 = vld [vmem:[#allocation23 + $0xed0] sm:$0xff]  ;;  %v15526_v50 = vcombine.high %v8364_v14, %v8368_v25  ;;  %v15525_v56 = vcombine.low %v8364_v14, %v8368_v25 }
 0x7fe   :  { %13055 = vmatpush2.bf16.msra.mxu0 %v15301_v15  ;;  %v8272_v42 = vld [vmem:[#allocation23 + $0xef0] sm:$0xff] }
 0x7ff   :  { %13056 = vmatprep.subr.bf16.mxu0 %v15294_v16  ;;  %v8356_v38 = vld [vmem:[#allocation23 + $0x1190] sm:$0xff]  ;;  %v15430_v2 = vcombine.high %v8268_v45, %v8272_v42  ;;  %v15429_v60 = vcombine.low %v8268_v45, %v8272_v42 }
 0x800   :  { %13088 = vmatpush2.bf16.msra.mxu1 %v15461_v11  ;;  %v8360_v5 = vld [vmem:[#allocation23 + $0x11b0] sm:$0xff] }
 0x801   :  { %13089 = vmatprep.subr.bf16.mxu1 %v15454_v41  ;;  %v8260_v9 = vld [vmem:[#allocation23 + $0xe90] sm:$0xff]  ;;  %v15518_v29 = vcombine.high %v8356_v38, %v8360_v5  ;;  %v15517_v11 = vcombine.low %v8356_v38, %v8360_v5 }
 0x802   :  { %13057 = vmatpush2.bf16.msra.mxu0 %v15293_v20  ;;  %v8264_v27 = vld [vmem:[#allocation23 + $0xeb0] sm:$0xff] }
 0x803   :  { %13058 = vmatprep.subr.bf16.mxu0 %v15286_v53  ;;  %v8348_v35 = vld [vmem:[#allocation23 + $0x1150] sm:$0xff]  ;;  %v15422_v34 = vcombine.high %v8260_v9, %v8264_v27  ;;  %v15421_v30 = vcombine.low %v8260_v9, %v8264_v27 }
 0x804   :  { %13090 = vmatpush2.bf16.msra.mxu1 %v15453_v8  ;;  %v8352_v15 = vld [vmem:[#allocation23 + $0x1170] sm:$0xff] }
 0x805   :  { %13091 = vmatprep.subr.bf16.mxu1 %v15446_v32  ;;  %v8252_v6 = vld [vmem:[#allocation23 + $0xe50] sm:$0xff]  ;;  %v15510_v20 = vcombine.high %v8348_v35, %v8352_v15 }
 0x806   :  { %13059 = vmatpush2.bf16.msra.mxu0 %v15285_v36  ;;  %v8256_v31 = vld [vmem:[#allocation23 + $0xe70] sm:$0xff] }
 0x807   :  { %13060 = vmatprep.subr.bf16.mxu0 %v15278_v37  ;;  %v8340_v53 = vld [vmem:[#allocation23 + $0x1110] sm:$0xff]  ;;  %v15414_v24 = vcombine.high %v8252_v6, %v8256_v31  ;;  %v15413_v37 = vcombine.low %v8252_v6, %v8256_v31 }
 0x808   :  { %13092 = vmatpush2.bf16.msra.mxu1 %v15445_v40  ;;  %v8344_v8 = vld [vmem:[#allocation23 + $0x1130] sm:$0xff] }
 0x809   :  { %13093 = vmatprep.subr.bf16.mxu1 %v15438_v0  ;;  %v8244_v32 = vld [vmem:[#allocation23 + $0xe10] sm:$0xff]  ;;  %v15502_v12 = vcombine.high %v8340_v53, %v8344_v8  ;;  %v15501_v25 = vcombine.low %v8340_v53, %v8344_v8 }
 0x80a   :  { %13061 = vmatpush2.bf16.msra.mxu0 %v15277_v19  ;;  %v8248_v36 = vld [vmem:[#allocation23 + $0xe30] sm:$0xff] }
 0x80b   :  { %13112 = vmatprep.subr.bf16.mxu0 %v15526_v50  ;;  %v8332_v40 = vld [vmem:[#allocation23 + $0x10d0] sm:$0xff]  ;;  %v15405_v42 = vcombine.low %v8244_v32, %v8248_v36 }
 0x80c   :  { %13094 = vmatpush2.bf16.msra.mxu1 %v15437_v51  ;;  %v8336_v14 = vld [vmem:[#allocation23 + $0x10f0] sm:$0xff] }
 0x80d   :  { %v12818_v59 = vpop.f32.mrf.mxu0  ;;  %13063 = vmatmul.mubr.bf16.vlgmr.msra.gmra.mxu0 %v17526_v52  ;;  %13095 = vmatprep.subr.bf16.mxu1 %v15430_v2  ;;  %v8492_v0 = vld [vmem:[#allocation23 + $0x15d0] sm:$0xff]  ;;  %v15494_v45 = vcombine.high %v8332_v40, %v8336_v14  ;;  %v15493_v5 = vcombine.low %v8332_v40, %v8336_v14 }
 0x80e   :  { %v12819_v16 = vadd.f32 %v12818_v59, %v17682_v62  ;;  %13113 = vmatpush1.bf16.msra.mxu0 %v15525_v56  ;;  %13144 = vmatprep.mubr.bf16.mxu0 %v17554_v17  ;;  %v15509_v62 = vcombine.low %v8348_v35, %v8352_v15  ;;  %v8496_v19 = vld [vmem:[#allocation23 + $0x15f0] sm:$0xff] }
 0x80f   :  { %v12820_v41 = vpop.f32.mrf.mxu0  ;;  %13114 = vmatprep.subr.bf16.mxu0 %v15518_v29  ;;  %v8324_v50 = vld [vmem:[#allocation23 + $0x1090] sm:$0xff]  ;;  %v15654_v38 = vcombine.high %v8492_v0, %v8496_v19  ;;  %v15653_v27 = vcombine.low %v8492_v0, %v8496_v19 }
 0x810   :  { %v12821_v48 = vadd.f32 %v12820_v41, %v17685_v61  ;;  %13096 = vmatpush2.bf16.msra.mxu1 %v15429_v60  ;;  %v15406_v61 = vcombine.high %v8244_v32, %v8248_v36  ;;  %v8328_v51 = vld [vmem:[#allocation23 + $0x10b0] sm:$0xff] }
 0x811   :  { %v12822_v10 = vpop.f32.mrf.mxu0  ;;  %13097 = vmatprep.subr.bf16.mxu1 %v15422_v34  ;;  %v8484_v2 = vld [vmem:[#allocation23 + $0x1590] sm:$0xff]  ;;  %v15486_v9 = vcombine.high %v8324_v50, %v8328_v51  ;;  %v15485_v15 = vcombine.low %v8324_v50, %v8328_v51 }
 0x812   :  { %13115 = vmatpush1.bf16.msra.mxu0 %v15517_v11  ;;  %v8488_v56 = vld [vmem:[#allocation23 + $0x15b0] sm:$0xff] }
 0x813   :  { %v12823_v23 = vpop.f32.mrf.mxu0  ;;  %13116 = vmatprep.subr.bf16.mxu0 %v15510_v20  ;;  %v8316_v29 = vld [vmem:[#allocation23 + $0x1050] sm:$0xff]  ;;  %v15646_v35 = vcombine.high %v8484_v2, %v8488_v56  ;;  %v15645_v41 = vcombine.low %v8484_v2, %v8488_v56 }
 0x814   :  { %13098 = vmatpush2.bf16.msra.mxu1 %v15421_v30  ;;  %v8320_v60 = vld [vmem:[#allocation23 + $0x1070] sm:$0xff] }
 0x815   :  { %13099 = vmatprep.subr.bf16.mxu1 %v15414_v24  ;;  %v8476_v59 = vld [vmem:[#allocation23 + $0x1550] sm:$0xff]  ;;  %v15478_v6 = vcombine.high %v8316_v29, %v8320_v60  ;;  %v15477_v24 = vcombine.low %v8316_v29, %v8320_v60 }
 0x816   :  { %13117 = vmatpush1.bf16.msra.mxu0 %v15509_v62  ;;  %v8480_v34 = vld [vmem:[#allocation23 + $0x1570] sm:$0xff] }
 0x817   :  { %13118 = vmatprep.subr.bf16.mxu0 %v15502_v12  ;;  %v8308_v20 = vld [vmem:[#allocation23 + $0x1010] sm:$0xff]  ;;  %v15638_v8 = vcombine.high %v8476_v59, %v8480_v34 }
 0x818   :  { %13100 = vmatpush2.bf16.msra.mxu1 %v15413_v37  ;;  %v8312_v30 = vld [vmem:[#allocation23 + $0x1030] sm:$0xff] }
 0x819   :  { %13101 = vmatprep.subr.bf16.mxu1 %v15406_v61  ;;  %v8468_v62 = vld [vmem:[#allocation23 + $0x1510] sm:$0xff]  ;;  %v15470_v23 = vcombine.high %v8308_v20, %v8312_v30  ;;  %v15469_v61 = vcombine.low %v8308_v20, %v8312_v30 }
 0x81a   :  { %13119 = vmatpush1.bf16.msra.mxu0 %v15501_v25  ;;  %v8472_v32 = vld [vmem:[#allocation23 + $0x1530] sm:$0xff] }
 0x81b   :  { %13120 = vmatprep.subr.bf16.mxu0 %v15494_v45  ;;  %v8428_v12 = vld [vmem:[#allocation23 + $0x13d0] sm:$0xff]  ;;  %v15630_v14 = vcombine.high %v8468_v62, %v8472_v32  ;;  %v15629_v19 = vcombine.low %v8468_v62, %v8472_v32 }
 0x81c   :  { %13102 = vmatpush2.bf16.msra.mxu1 %v15405_v42  ;;  %v8432_v37 = vld [vmem:[#allocation23 + $0x13f0] sm:$0xff] }
 0x81d   :  { %13153 = vmatprep.subr.bf16.mxu1 %v15654_v38  ;;  %v8460_v25 = vld [vmem:[#allocation23 + $0x14d0] sm:$0xff]  ;;  %v15589_v51 = vcombine.low %v8428_v12, %v8432_v37 }
 0x81e   :  { %13121 = vmatpush1.bf16.msra.mxu0 %v15493_v5  ;;  %v8464_v0 = vld [vmem:[#allocation23 + $0x14f0] sm:$0xff] }
 0x81f   :  { %v12859_v11 = vpop.f32.mrf.mxu1  ;;  %13104 = vmatmul.mubr.bf16.vlgmr.msra.gmra.mxu1 %v17528_v57  ;;  %13122 = vmatprep.subr.bf16.mxu0 %v15486_v9  ;;  %v8420_v45 = vld [vmem:[#allocation23 + $0x1390] sm:$0xff]  ;;  %v15622_v50 = vcombine.high %v8460_v25, %v8464_v0  ;;  %v15621_v56 = vcombine.low %v8460_v25, %v8464_v0 }
 0x820   :  { %v17692_v31 = vadd.f32 %v12859_v11, %v12819_v16  ;;  %13154 = vmatpush1.bf16.msra.mxu1 %v15653_v27  ;;  %13185 = vmatprep.mubr.bf16.mxu1 %v17599_v58  ;;  %v15637_v16 = vcombine.low %v8476_v59, %v8480_v34  ;;  %v8424_v42 = vld [vmem:[#allocation23 + $0x13b0] sm:$0xff] }
 0x821   :  { %v12861_v53 = vpop.f32.mrf.mxu1  ;;  %13155 = vmatprep.subr.bf16.mxu1 %v15646_v35  ;;  %v8452_v38 = vld [vmem:[#allocation23 + $0x1490] sm:$0xff]  ;;  %v15582_v2 = vcombine.high %v8420_v45, %v8424_v42  ;;  %v15581_v60 = vcombine.low %v8420_v45, %v8424_v42 }
 0x822   :  { %v17695_v10 = vadd.f32 %v12861_v53, %v12821_v48  ;;  %13123 = vmatpush1.bf16.msra.mxu0 %v15485_v15  ;;  %v15590_v48 = vcombine.high %v8428_v12, %v8432_v37  ;;  %v8456_v5 = vld [vmem:[#allocation23 + $0x14b0] sm:$0xff] }
 0x823   :  { %v12863_v36 = vpop.f32.mrf.mxu1  ;;  %13124 = vmatprep.subr.bf16.mxu0 %v15478_v6  ;;  %v8412_v9 = vld [vmem:[#allocation23 + $0x1350] sm:$0xff]  ;;  %v15614_v29 = vcombine.high %v8452_v38, %v8456_v5  ;;  %v15613_v34 = vcombine.low %v8452_v38, %v8456_v5 }
 0x824   :  { %13156 = vmatpush1.bf16.msra.mxu1 %v15645_v41  ;;  %v8416_v27 = vld [vmem:[#allocation23 + $0x1370] sm:$0xff] }
 0x825   :  { %v12864_v40 = vpop.f32.mrf.mxu1  ;;  %13157 = vmatprep.subr.bf16.mxu1 %v15638_v8  ;;  %v8444_v35 = vld [vmem:[#allocation23 + $0x1450] sm:$0xff]  ;;  %v15574_v59 = vcombine.high %v8412_v9, %v8416_v27  ;;  %v15573_v20 = vcombine.low %v8412_v9, %v8416_v27 }
 0x826   :  { %13125 = vmatpush1.bf16.msra.mxu0 %v15477_v24  ;;  %v8448_v15 = vld [vmem:[#allocation23 + $0x1470] sm:$0xff] }
 0x827   :  { %13126 = vmatprep.subr.bf16.mxu0 %v15470_v23  ;;  %v8404_v11 = vld [vmem:[#allocation23 + $0x1310] sm:$0xff]  ;;  %v15606_v41 = vcombine.high %v8444_v35, %v8448_v15  ;;  %v15605_v24 = vcombine.low %v8444_v35, %v8448_v15 }
 0x828   :  { %13158 = vmatpush1.bf16.msra.mxu1 %v15637_v16  ;;  %v8408_v6 = vld [vmem:[#allocation23 + $0x1330] sm:$0xff] }
 0x829   :  { %13159 = vmatprep.subr.bf16.mxu1 %v15630_v14  ;;  %v8436_v30 = vld [vmem:[#allocation23 + $0x1410] sm:$0xff]  ;;  %v15566_v8 = vcombine.high %v8404_v11, %v8408_v6  ;;  %v15565_v23 = vcombine.low %v8404_v11, %v8408_v6 }
 0x82a   :  { %13127 = vmatpush1.bf16.msra.mxu0 %v15469_v61  ;;  %v8440_v53 = vld [vmem:[#allocation23 + $0x1430] sm:$0xff] }
 0x82b   :  { %13128 = vmatprep.subr.bf16.mxu0 %v15590_v48  ;;  %v8396_v62 = vld [vmem:[#allocation23 + $0x12d0] sm:$0xff]  ;;  %v15598_v36 = vcombine.high %v8436_v30, %v8440_v53  ;;  %v15597_v40 = vcombine.low %v8436_v30, %v8440_v53 }
 0x82c   :  { %13160 = vmatpush1.bf16.msra.mxu1 %v15629_v19  ;;  %v8400_v32 = vld [vmem:[#allocation23 + $0x12f0] sm:$0xff] }
 0x82d   :  { %13161 = vmatprep.subr.bf16.mxu1 %v15622_v50  ;;  %v8556_v16 = vld [vmem:[#allocation23 + $0x17d0] sm:$0xff]  ;;  %v15558_v37 = vcombine.high %v8396_v62, %v8400_v32  ;;  %v15557_v0 = vcombine.low %v8396_v62, %v8400_v32 }
 0x82e   :  { %13129 = vmatpush2.bf16.msra.mxu0 %v15589_v51  ;;  %v8560_v12 = vld [vmem:[#allocation23 + $0x17f0] sm:$0xff] }
 0x82f   :  { %13130 = vmatprep.subr.bf16.mxu0 %v15582_v2  ;;  %v8388_v14 = vld [vmem:[#allocation23 + $0x1290] sm:$0xff]  ;;  %v15718_v25 = vcombine.high %v8556_v16, %v8560_v12  ;;  %v15717_v42 = vcombine.low %v8556_v16, %v8560_v12 }
 0x830   :  { %13162 = vmatpush1.bf16.msra.mxu1 %v15621_v56  ;;  %v8392_v61 = vld [vmem:[#allocation23 + $0x12b0] sm:$0xff] }
 0x831   :  { %13163 = vmatprep.subr.bf16.mxu1 %v15614_v29  ;;  %v8548_v48 = vld [vmem:[#allocation23 + $0x1790] sm:$0xff]  ;;  %v15550_v45 = vcombine.high %v8388_v14, %v8392_v61  ;;  %v15549_v5 = vcombine.low %v8388_v14, %v8392_v61 }
 0x832   :  { %13131 = vmatpush2.bf16.msra.mxu0 %v15581_v60  ;;  %v8552_v19 = vld [vmem:[#allocation23 + $0x17b0] sm:$0xff] }
 0x833   :  { %13132 = vmatprep.subr.bf16.mxu0 %v15574_v59  ;;  %v8380_v50 = vld [vmem:[#allocation23 + $0x1250] sm:$0xff]  ;;  %v15710_v38 = vcombine.high %v8548_v48, %v8552_v19  ;;  %v15709_v27 = vcombine.low %v8548_v48, %v8552_v19 }
 0x834   :  { %13164 = vmatpush1.bf16.msra.mxu1 %v15613_v34  ;;  %v8384_v51 = vld [vmem:[#allocation23 + $0x1270] sm:$0xff] }
 0x835   :  { %13165 = vmatprep.subr.bf16.mxu1 %v15606_v41  ;;  %v8540_v2 = vld [vmem:[#allocation23 + $0x1750] sm:$0xff]  ;;  %v15542_v9 = vcombine.high %v8380_v50, %v8384_v51  ;;  %v15541_v15 = vcombine.low %v8380_v50, %v8384_v51  ;;  %v7853_v41 = vld [vmem:[#allocation23 + $0x1d8] sm:$0xff] }
 0x836   :  { %13133 = vmatpush2.bf16.msra.mxu0 %v15573_v20  ;;  %v8544_v56 = vld [vmem:[#allocation23 + $0x1770] sm:$0xff]  ;;  %v7857_v20 = vld [vmem:[#allocation23 + $0x1f8] sm:$0xff] }
 0x837   :  { %13134 = vmatprep.subr.bf16.mxu0 %v15566_v8  ;;  %v8372_v29 = vld [vmem:[#allocation23 + $0x1210] sm:$0xff]  ;;  %v15702_v35 = vcombine.high %v8540_v2, %v8544_v56  ;;  %v15701_v6 = vcombine.low %v8540_v2, %v8544_v56  ;;  %v15016_v62 = vcombine.high %v7853_v41, %v7857_v20  ;;  %v15015_v12 = vcombine.low %v7853_v41, %v7857_v20  ;;  %v7981_v20 = vld [vmem:[#allocation23 + $0x5d8] sm:$0xff] }
 0x838   :  { %13166 = vmatpush1.bf16.msra.mxu1 %v15605_v24  ;;  %v8376_v60 = vld [vmem:[#allocation23 + $0x1230] sm:$0xff] }
 0x839   :  { %13167 = vmatprep.subr.bf16.mxu1 %v15598_v36  ;;  %v8532_v59 = vld [vmem:[#allocation23 + $0x1710] sm:$0xff]  ;;  %v15534_v11 = vcombine.high %v8372_v29, %v8376_v60  ;;  %v15533_v53 = vcombine.low %v8372_v29, %v8376_v60  ;;  %v7845_v36 = vld [vmem:[#allocation23 + $0x198] sm:$0xff] }
 0x83a   :  { %13135 = vmatpush2.bf16.msra.mxu0 %v15565_v23  ;;  %v8536_v34 = vld [vmem:[#allocation23 + $0x1730] sm:$0xff]  ;;  %v7849_v23 = vld [vmem:[#allocation23 + $0x1b8] sm:$0xff] }
 0x83b   :  { %13136 = vmatprep.subr.bf16.mxu0 %v15558_v37  ;;  %v15694_v30 = vcombine.high %v8532_v59, %v8536_v34  ;;  %v8524_v8 = vld [vmem:[#allocation23 + $0x16d0] sm:$0xff]  ;;  %v15693_v32 = vcombine.low %v8532_v59, %v8536_v34  ;;  %v15008_v14 = vcombine.high %v7845_v36, %v7849_v23 }
 0x83c   :  { %13168 = vmatpush1.bf16.msra.mxu1 %v15597_v40  ;;  %v8528_v24 = vld [vmem:[#allocation23 + $0x16f0] sm:$0xff] }
 0x83d   :  { %13169 = vmatprep.subr.bf16.mxu1 %v15718_v25  ;;  %v15686_v16 = vcombine.high %v8524_v8, %v8528_v24  ;;  %v8516_v37 = vld [vmem:[#allocation23 + $0x1690] sm:$0xff]  ;;  %v15685_v61 = vcombine.low %v8524_v8, %v8528_v24  ;;  %v7837_v25 = vld [vmem:[#allocation23 + $0x158] sm:$0xff] }
 0x83e   :  { %13137 = vmatpush2.bf16.msra.mxu0 %v15557_v0  ;;  %v8520_v40 = vld [vmem:[#allocation23 + $0x16b0] sm:$0xff]  ;;  %v7841_v0 = vld [vmem:[#allocation23 + $0x178] sm:$0xff] }
 0x83f   :  { %13138 = vmatprep.subr.bf16.mxu0 %v15550_v45  ;;  %v15678_v19 = vcombine.high %v8516_v37, %v8520_v40  ;;  %v8508_v50 = vld [vmem:[#allocation23 + $0x1650] sm:$0xff]  ;;  %v15677_v56 = vcombine.low %v8516_v37, %v8520_v40  ;;  %v7813_v24 = vld [vmem:[#allocation23 + $0x98] sm:$0xff] }
 0x840   :  { %13170 = vmatpush2.bf16.msra.mxu1 %v15717_v42  ;;  %v15007_v42 = vcombine.low %v7845_v36, %v7849_v23  ;;  %v8512_v51 = vld [vmem:[#allocation23 + $0x1670] sm:$0xff]  ;;  %v7973_v23 = vld [vmem:[#allocation23 + $0x598] sm:$0xff] }
 0x841   :  { %13171 = vmatprep.subr.bf16.mxu1 %v15710_v38  ;;  %v15670_v60 = vcombine.high %v8508_v50, %v8512_v51  ;;  %v15669_v34 = vcombine.low %v8508_v50, %v8512_v51  ;;  %v7805_v40 = vld [vmem:[#allocation23 + $0x58] sm:$0xff] }
 0x842   :  { %13139 = vmatpush2.bf16.msra.mxu0 %v15549_v5  ;;  %v15000_v5 = vcombine.high %v7837_v25, %v7841_v0 }
 0x843   :  { %13140 = vmatprep.subr.bf16.mxu0 %v15542_v9  ;;  %v7829_v9 = vld [vmem:[#allocation23 + $0x118] sm:$0xff] }
 0x844   :  { %13172 = vmatpush2.bf16.msra.mxu1 %v15709_v27  ;;  %v7833_v27 = vld [vmem:[#allocation23 + $0x138] sm:$0xff] }
 0x845   :  { %13173 = vmatprep.subr.bf16.mxu1 %v15702_v35  ;;  %v8500_v35 = vld [vmem:[#allocation23 + $0x1610] sm:$0xff]  ;;  %v14992_v59 = vcombine.high %v7829_v9, %v7833_v27  ;;  %v14991_v41 = vcombine.low %v7829_v9, %v7833_v27 }
 0x846   :  { %13141 = vmatpush2.bf16.msra.mxu0 %v15541_v15 }
 0x847   :  { %13142 = vmatprep.subr.bf16.mxu0 %v15534_v11  ;;  %v7821_v11 = vld [vmem:[#allocation23 + $0xd8] sm:$0xff] }
 0x848   :  { %13174 = vmatpush2.bf16.msra.mxu1 %v15701_v6  ;;  %v7825_v6 = vld [vmem:[#allocation23 + $0xf8] sm:$0xff] }
 0x849   :  { %13175 = vmatprep.subr.bf16.mxu1 %v15694_v30  ;;  %v7985_v30 = vld [vmem:[#allocation23 + $0x5f8] sm:$0xff]  ;;  %v14983_v36 = vcombine.low %v7821_v11, %v7825_v6 }
 0x84a   :  { %13143 = vmatpush2.bf16.msra.mxu0 %v15533_v53  ;;  %v14984_v53 = vcombine.high %v7821_v11, %v7825_v6  ;;  %v15143_v37 = vcombine.low %v7981_v20, %v7985_v30  ;;  %v7921_v11 = vld [vmem:[#allocation23 + $0x3f8] sm:$0xff] }
 0x84b   :  { %13194 = vmatprep.subr.bf16.mxu0 %v15016_v62  ;;  %v7817_v62 = vld [vmem:[#allocation23 + $0xb8] sm:$0xff] }
 0x84c   :  { %13176 = vmatpush2.bf16.msra.mxu1 %v15693_v32  ;;  %v15144_v32 = vcombine.high %v7981_v20, %v7985_v30  ;;  %v7949_v30 = vld [vmem:[#allocation23 + $0x4d8] sm:$0xff] }
 0x84d   :  { %v12900_v48 = vpop.f32.mrf.mxu0  ;;  %13145 = vmatmul.mubr.bf16.vlgmr.msra.gmra.mxu0 %v17577_v33  ;;  %13177 = vmatprep.subr.bf16.mxu1 %v15686_v16  ;;  %v7977_v16 = vld [vmem:[#allocation23 + $0x5b8] sm:$0xff] }
 0x84e   :  { %v12901_v45 = vadd.f32 %v12900_v48, %v17692_v31  ;;  %13195 = vmatpush1.bf16.msra.mxu0 %v15015_v12  ;;  %13226 = vmatprep.mubr.bf16.mxu0 %v17432_v7  ;;  %v14999_v31 = vcombine.low %v7837_v25, %v7841_v0  ;;  %v8504_v7 = vld [vmem:[#allocation23 + $0x1630] sm:$0xff]  ;;  %v14976_v12 = vcombine.high %v7813_v24, %v7817_v62  ;;  %v7965_v0 = vld [vmem:[#allocation23 + $0x558] sm:$0xff] }
 0x84f   :  { %v12902_v38 = vpop.f32.mrf.mxu0  ;;  %13196 = vmatprep.subr.bf16.mxu0 %v15008_v14  ;;  %v15661_v8 = vcombine.low %v8500_v35, %v8504_v7  ;;  %v7809_v14 = vld [vmem:[#allocation23 + $0x78] sm:$0xff]  ;;  %v14975_v25 = vcombine.low %v7813_v24, %v7817_v62  ;;  %v15135_v51 = vcombine.low %v7973_v23, %v7977_v16 }
 0x850   :  { %v17701_v2 = vadd.f32 %v12902_v38, %v17695_v10  ;;  %13178 = vmatpush2.bf16.msra.mxu1 %v15685_v61  ;;  %v15662_v10 = vcombine.high %v8500_v35, %v8504_v7  ;;  %v15136_v61 = vcombine.high %v7973_v23, %v7977_v16  ;;  %v7969_v48 = vld [vmem:[#allocation23 + $0x578] sm:$0xff] }
 0x851   :  { %v12904_v29 = vpop.f32.mrf.mxu0  ;;  %13179 = vmatprep.subr.bf16.mxu1 %v15678_v19  ;;  %v7797_v38 = vld [vmem:[#allocation23 + $0x18] sm:$0xff]  ;;  %v15128_v9 = vcombine.high %v7965_v0, %v7969_v48 }
 0x852   :  { %13197 = vmatpush1.bf16.msra.mxu0 %v15007_v42  ;;  %v14968_v42 = vcombine.high %v7805_v40, %v7809_v14  ;;  %v7961_v35 = vld [vmem:[#allocation23 + $0x538] sm:$0xff] }
 0x853   :  { %v12905_v15 = vpop.f32.mrf.mxu0  ;;  %13198 = vmatprep.subr.bf16.mxu0 %v15000_v5  ;;  %v7801_v5 = vld [vmem:[#allocation23 + $0x38] sm:$0xff] }
 0x854   :  { %13180 = vmatpush2.bf16.msra.mxu1 %v15677_v56  ;;  %v14960_v7 = vcombine.high %v7797_v38, %v7801_v5  ;;  %v14959_v20 = vcombine.low %v7797_v38, %v7801_v5  ;;  %v7893_v5 = vld [vmem:[#allocation23 + $0x318] sm:$0xff] }
 0x855   :  { %13181 = vmatprep.subr.bf16.mxu1 %v15670_v60  ;;  %v14967_v60 = vcombine.low %v7805_v40, %v7809_v14 }
 0x856   :  { %13199 = vmatpush1.bf16.msra.mxu0 %v14999_v31  ;;  %v7957_v31 = vld [vmem:[#allocation23 + $0x518] sm:$0xff] }
 0x857   :  { %13200 = vmatprep.subr.bf16.mxu0 %v14992_v59  ;;  %v15127_v59 = vcombine.low %v7965_v0, %v7969_v48  ;;  %v15119_v62 = vcombine.low %v7957_v31, %v7961_v35 }
 0x858   :  { %13182 = vmatpush2.bf16.msra.mxu1 %v15669_v34  ;;  %v7917_v34 = vld [vmem:[#allocation23 + $0x3d8] sm:$0xff] }
 0x859   :  { %13183 = vmatprep.subr.bf16.mxu1 %v15662_v10  ;;  %v15120_v10 = vcombine.high %v7957_v31, %v7961_v35  ;;  %v15079_v16 = vcombine.low %v7917_v34, %v7921_v11  ;;  %v7929_v31 = vld [vmem:[#allocation23 + $0x438] sm:$0xff] }
 0x85a   :  { %13201 = vmatpush1.bf16.msra.mxu0 %v14991_v41 }
 0x85b   :  { %13202 = vmatprep.subr.bf16.mxu0 %v14984_v53  ;;  %v7953_v53 = vld [vmem:[#allocation23 + $0x4f8] sm:$0xff] }
 0x85c   :  { %13184 = vmatpush2.bf16.msra.mxu1 %v15661_v8  ;;  %v15080_v8 = vcombine.high %v7917_v34, %v7921_v11  ;;  %v15112_v23 = vcombine.high %v7949_v30, %v7953_v53  ;;  %v15111_v14 = vcombine.low %v7949_v30, %v7953_v53  ;;  %v7877_v53 = vld [vmem:[#allocation23 + $0x298] sm:$0xff] }
 0x85d   :  { %13235 = vmatprep.subr.bf16.mxu1 %v15144_v32  ;;  %v7909_v32 = vld [vmem:[#allocation23 + $0x398] sm:$0xff] }
 0x85e   :  { %13203 = vmatpush1.bf16.msra.mxu0 %v14983_v36  ;;  %v7913_v36 = vld [vmem:[#allocation23 + $0x3b8] sm:$0xff] }
 0x85f   :  { %v12941_v19 = vpop.f32.mrf.mxu1  ;;  %13186 = vmatmul.mubr.bf16.vlgmr.msra.gmra.mxu1 %v17603_v28  ;;  %13204 = vmatprep.subr.bf16.mxu0 %v14976_v12  ;;  %v7941_v12 = vld [vmem:[#allocation23 + $0x498] sm:$0xff]  ;;  %v15072_v40 = vcombine.high %v7909_v32, %v7913_v36  ;;  %v15071_v48 = vcombine.low %v7909_v32, %v7913_v36 }
 0x860   :  { %v17704_v50 = vadd.f32 %v12941_v19, %v12901_v45  ;;  %13236 = vmatpush1.bf16.msra.mxu1 %v15143_v37  ;;  %13267 = vmatprep.mubr.bf16.mxu1 %v17435_v63  ;;  %v7945_v37 = vld [vmem:[#allocation23 + $0x4b8] sm:$0xff] }
 0x861   :  { %v12943_v56 = vpop.f32.mrf.mxu1  ;;  %13237 = vmatprep.subr.bf16.mxu1 %v15136_v61  ;;  %v7901_v61 = vld [vmem:[#allocation23 + $0x358] sm:$0xff]  ;;  %v15104_v0 = vcombine.high %v7941_v12, %v7945_v37  ;;  %v15103_v38 = vcombine.low %v7941_v12, %v7945_v37 }
 0x862   :  { %v13466_v27 = vand.u32 2147483647, %v17704_v50  ;;  %v17709_v29 = vadd.f32 %v12943_v56, %v17701_v2  ;;  %13205 = vmatpush1.bf16.msra.mxu0 %v14975_v25  ;;  %v7905_v25 = vld [vmem:[#allocation23 + $0x378] sm:$0xff]  ;;  %vm13450_vm4 = vcmp.ne.f32.partialorder %v17704_v50, %v17704_v50 }
 0x863   :  { %v12945_v45 = vpop.f32.mrf.mxu1  ;;  %13206 = vmatprep.subr.bf16.mxu0 %v14968_v42  ;;  %v7933_v19 = vld [vmem:[#allocation23 + $0x458] sm:$0xff] }
 0x864   :  { %v13474_v15 = vsub.f32 0.0, %v13466_v27  ;;  %v13467_v63 = vand.u32 2147483647, %v17709_v29  ;;  %13238 = vmatpush1.bf16.msra.mxu1 %v15135_v51  ;;  %v7937_v42 = vld [vmem:[#allocation23 + $0x478] sm:$0xff]  ;;  %v15064_v51 = vcombine.high %v7901_v61, %v7905_v25  ;;  %v15063_v27 = vcombine.low %v7901_v61, %v7905_v25 }
 0x865   :  { %v12946_v6 = vpop.f32.mrf.mxu1  ;;  %13239 = vmatprep.subr.bf16.mxu1 %v15128_v9  ;;  %v7897_v56 = vld [vmem:[#allocation23 + $0x338] sm:$0xff]  ;;  %v15096_v9 = vcombine.high %v7933_v19, %v7937_v42  ;;  %v15095_v45 = vcombine.low %v7933_v19, %v7937_v42  ;;  %vm13451_vm5 = vcmp.ne.f32.partialorder %v17709_v29, %v17709_v29 }
 0x866   :  { %v13484_v41 = vmul.f32 1.442695, %v13474_v15  ;;  %v13475_v2 = vsub.f32 0.0, %v13467_v63  ;;  %13207 = vmatpush1.bf16.msra.mxu0 %v14967_v60  ;;  %v7925_v60 = vld [vmem:[#allocation23 + $0x418] sm:$0xff]  ;;  %v15056_v35 = vcombine.high %v7893_v5, %v7897_v56  ;;  %v15055_v11 = vcombine.low %v7893_v5, %v7897_v56 }
 0x867   :  { %13208 = vmatprep.subr.bf16.mxu0 %v14960_v7  ;;  %v7885_v7 = vld [vmem:[#allocation23 + $0x2d8] sm:$0xff]  ;;  %v15087_v30 = vcombine.low %v7925_v60, %v7929_v31 }
 0x868   :  { %16500 = vpow2.f32 %v13484_v41  ;;  %v13486_v24 = vmul.f32 1.442695, %v13475_v2  ;;  %13240 = vmatpush1.bf16.msra.mxu1 %v15127_v59  ;;  %v7889_v15 = vld [vmem:[#allocation23 + $0x2f8] sm:$0xff]  ;;  %v15088_v59 = vcombine.high %v7925_v60, %v7929_v31 }
 0x869   :  { %13241 = vmatprep.subr.bf16.mxu1 %v15120_v10  ;;  %v8045_v6 = vld [vmem:[#allocation23 + $0x7d8] sm:$0xff]  ;;  %v15048_v2 = vcombine.high %v7885_v7, %v7889_v15 }
 0x86a   :  { %16502 = vpow2.f32 %v13486_v24  ;;  %13209 = vmatpush1.bf16.msra.mxu0 %v14959_v20  ;;  %v8049_v10 = vld [vmem:[#allocation23 + $0x7f8] sm:$0xff] }
 0x86b   :  { %13210 = vmatprep.subr.bf16.mxu0 %v15080_v8  ;;  %v7881_v8 = vld [vmem:[#allocation23 + $0x2b8] sm:$0xff]  ;;  %v15208_v24 = vcombine.high %v8045_v6, %v8049_v10 }
 0x86c   :  { %13242 = vmatpush1.bf16.msra.mxu1 %v15119_v62  ;;  %v15047_v62 = vcombine.low %v7885_v7, %v7889_v15  ;;  %v8037_v32 = vld [vmem:[#allocation23 + $0x798] sm:$0xff]  ;;  %v15039_v61 = vcombine.low %v7877_v53, %v7881_v8 }
 0x86d   :  { %13243 = vmatprep.subr.bf16.mxu1 %v15112_v23  ;;  %v8041_v36 = vld [vmem:[#allocation23 + $0x7b8] sm:$0xff]  ;;  %v15040_v23 = vcombine.high %v7877_v53, %v7881_v8 }
 0x86e   :  { %13211 = vmatpush2.bf16.msra.mxu0 %v15079_v16  ;;  %v15207_v16 = vcombine.low %v8045_v6, %v8049_v10  ;;  %v7869_v12 = vld [vmem:[#allocation23 + $0x258] sm:$0xff]  ;;  %v15199_v42 = vcombine.low %v8037_v32, %v8041_v36 }
 0x86f   :  { %13212 = vmatprep.subr.bf16.mxu0 %v15072_v40  ;;  %v7873_v37 = vld [vmem:[#allocation23 + $0x278] sm:$0xff]  ;;  %v15200_v40 = vcombine.high %v8037_v32, %v8041_v36 }
 0x870   :  { %13244 = vmatpush1.bf16.msra.mxu1 %v15111_v14  ;;  %v8029_v25 = vld [vmem:[#allocation23 + $0x758] sm:$0xff] }
 0x871   :  { %13245 = vmatprep.subr.bf16.mxu1 %v15104_v0  ;;  %v8033_v0 = vld [vmem:[#allocation23 + $0x778] sm:$0xff] }
 0x872   :  { %13213 = vmatpush2.bf16.msra.mxu0 %v15071_v48  ;;  %v15032_v48 = vcombine.high %v7869_v12, %v7873_v37  ;;  %v15192_v5 = vcombine.high %v8029_v25, %v8033_v0  ;;  %v8025_v60 = vld [vmem:[#allocation23 + $0x738] sm:$0xff]  ;;  %v15191_v7 = vcombine.low %v8029_v25, %v8033_v0 }
 0x873   :  { %13214 = vmatprep.subr.bf16.mxu0 %v15064_v51  ;;  %v7861_v51 = vld [vmem:[#allocation23 + $0x218] sm:$0xff] }
 0x874   :  { %13246 = vmatpush1.bf16.msra.mxu1 %v15103_v38  ;;  %v7865_v38 = vld [vmem:[#allocation23 + $0x238] sm:$0xff] }
 0x875   :  { %v17712_v63 = vpop.eup %16500  ;;  %13247 = vmatprep.subr.bf16.mxu1 %v15096_v9  ;;  %v15031_v9 = vcombine.low %v7869_v12, %v7873_v37  ;;  %v8109_v15 = vld [vmem:[#allocation23 + $0x9d8] sm:$0xff] }
 0x876   :  { %v13514_v34 = vadd.f32 1.0, %v17712_v63  ;;  %13215 = vmatpush2.bf16.msra.mxu0 %v15063_v27  ;;  %v13517_v14 = vmul.f32 -0.5, %v17712_v63  ;;  %v8021_v27 = vld [vmem:[#allocation23 + $0x718] sm:$0xff]  ;;  %v13520_v31 = vand.u32 2147483647, %v17712_v63 }
 0x877   :  { %v17715_v41 = vpop.eup %16502  ;;  %13216 = vmatprep.subr.bf16.mxu0 %v15056_v35  ;;  %v15024_v35 = vcombine.high %v7861_v51, %v7865_v38  ;;  %v15184_v6 = vcombine.high %v8021_v27, %v8025_v60  ;;  %v8017_v53 = vld [vmem:[#allocation23 + $0x6f8] sm:$0xff] }
 0x878   :  { %16504 = vlog2.f32 %v13514_v34  ;;  %v13523_v20 = vadd.f32 1.0, %v17715_v41  ;;  %13248 = vmatpush1.bf16.msra.mxu1 %v15095_v45  ;;  %v13526_v19 = vmul.f32 -0.5, %v17715_v41  ;;  %v13518_v56 = vadd.f32 1.0, %v13517_v14  ;;  %v8101_v12 = vld [vmem:[#allocation23 + $0x998] sm:$0xff] }
 0x879   :  { %13249 = vmatprep.subr.bf16.mxu1 %v15088_v59  ;;  %v8113_v59 = vld [vmem:[#allocation23 + $0x9f8] sm:$0xff]  ;;  %vm13521_vm2 = vcmp.lt.f32.partialorder %v13520_v31, 0.0004427343 }
 0x87a   :  { %16506 = vlog2.f32 %v13523_v20  ;;  %13217 = vmatpush2.bf16.msra.mxu0 %v15055_v11  ;;  %v13527_v45 = vadd.f32 1.0, %v13526_v19  ;;  %v13529_v11 = vand.u32 2147483647, %v17715_v41  ;;  %v15023_v20 = vcombine.low %v7861_v51, %v7865_v38  ;;  %v8105_v37 = vld [vmem:[#allocation23 + $0x9b8] sm:$0xff] }
 0x87b   :  { %13218 = vmatprep.subr.bf16.mxu0 %v15048_v2  ;;  %v13519_v2 = vmul.f32 %v17712_v63, %v13518_v56  ;;  %v13443_v63 = vmax.f32 %v17709_v29, 0.0  ;;  %v15271_v25 = vcombine.low %v8109_v15, %v8113_v59  ;;  %v8005_v0 = vld [vmem:[#allocation23 + $0x698] sm:$0xff] }
 0x87c   :  { %13250 = vmatpush1.bf16.msra.mxu1 %v15087_v30  ;;  %v8013_v30 = vld [vmem:[#allocation23 + $0x6d8] sm:$0xff]  ;;  %vm13530_vm3 = vcmp.lt.f32.partialorder %v13529_v11, 0.0004427343 }
 0x87d   :  { %13251 = vmatprep.subr.bf16.mxu1 %v15208_v24  ;;  %v13442_v24 = vmax.f32 %v17704_v50, 0.0  ;;  %v15176_v14 = vcombine.high %v8013_v30, %v8017_v53  ;;  %v15175_v51 = vcombine.low %v8013_v30, %v8017_v53  ;;  %v8093_v38 = vld [vmem:[#allocation23 + $0x958] sm:$0xff] }
 0x87e   :  { %13219 = vmatpush2.bf16.msra.mxu0 %v15047_v62  ;;  %v15272_v62 = vcombine.high %v8109_v15, %v8113_v59  ;;  %v7997_v31 = vld [vmem:[#allocation23 + $0x658] sm:$0xff] }
 0x87f   :  { %13220 = vmatprep.subr.bf16.mxu0 %v15040_v23  ;;  %v13528_v23 = vmul.f32 %v17715_v41, %v13527_v45  ;;  %v8085_v59 = vld [vmem:[#allocation23 + $0x918] sm:$0xff] }
 0x880   :  { %13252 = vmatpush2.bf16.msra.mxu1 %v15207_v16  ;;  %v15183_v16 = vcombine.low %v8021_v27, %v8025_v60  ;;  %v15263_v60 = vcombine.low %v8101_v12, %v8105_v37  ;;  %v8077_v53 = vld [vmem:[#allocation23 + $0x8d8] sm:$0xff] }
 0x881   :  { %13253 = vmatprep.subr.bf16.mxu1 %v15200_v40 }
 0x882   :  { %13221 = vmatpush2.bf16.msra.mxu0 %v15039_v61 }
 0x883   :  { %13222 = vmatprep.subr.bf16.mxu0 %v15032_v48  ;;  %v8009_v48 = vld [vmem:[#allocation23 + $0x6b8] sm:$0xff] }
 0x884   :  { %13254 = vmatpush2.bf16.msra.mxu1 %v15199_v42  ;;  %v15264_v42 = vcombine.high %v8101_v12, %v8105_v37  ;;  %v15168_v27 = vcombine.high %v8005_v0, %v8009_v48  ;;  %v15167_v15 = vcombine.low %v8005_v0, %v8009_v48  ;;  %v8069_v12 = vld [vmem:[#allocation23 + $0x898] sm:$0xff] }
 0x885   :  { %v16505_v34 = vpop.eup %16504  ;;  %13255 = vmatprep.subr.bf16.mxu1 %v15192_v5  ;;  %v8097_v5 = vld [vmem:[#allocation23 + $0x978] sm:$0xff] }
 0x886   :  { %v13516_v10 = vmul.f32 0.6931472, %v16505_v34  ;;  %13223 = vmatpush2.bf16.msra.mxu0 %v15031_v9  ;;  %v8089_v34 = vld [vmem:[#allocation23 + $0x938] sm:$0xff] }
 0x887   :  { %v16507_v8 = vpop.eup %16506  ;;  %13224 = vmatprep.subr.bf16.mxu0 %v15024_v35  ;;  %v8001_v35 = vld [vmem:[#allocation23 + $0x678] sm:$0xff] }
 0x888   :  { %v13522_v32 = vsel %vm13521_vm2, %v13519_v2, %v13516_v10  ;;  %v13525_v36 = vmul.f32 0.6931472, %v16507_v8  ;;  %13256 = vmatpush2.bf16.msra.mxu1 %v15191_v7  ;;  %v15256_v7 = vcombine.high %v8093_v38, %v8097_v5  ;;  %v7989_v10 = vld [vmem:[#allocation23 + $0x618] sm:$0xff]  ;;  %v15159_v30 = vcombine.low %v7997_v31, %v8001_v35 }
 0x889   :  { %v13570_v40 = vadd.f32 %v13522_v32, %v13442_v24  ;;  %13257 = vmatprep.subr.bf16.mxu1 %v15184_v6  ;;  %v15255_v6 = vcombine.low %v8093_v38, %v8097_v5  ;;  %v7993_v2 = vld [vmem:[#allocation23 + $0x638] sm:$0xff] }
 0x88a   :  { %v13531_v61 = vsel %vm13530_vm3, %v13528_v23, %v13525_v36  ;;  %13225 = vmatpush2.bf16.msra.mxu0 %v15023_v20  ;;  %v8081_v8 = vld [vmem:[#allocation23 + $0x8f8] sm:$0xff]  ;;  %v15152_v24 = vcombine.high %v7989_v10, %v7993_v2 }
 0x88b   :  { %v13578_v41 = vsel %vm13450_vm4, %v17704_v50, %v13570_v40  ;;  %v13571_v19 = vadd.f32 %v13531_v61, %v13443_v63  ;;  %13276 = vmatprep.subr.bf16.mxu0 %v15272_v62  ;;  %v15247_v62 = vcombine.low %v8085_v59, %v8089_v34  ;;  %v8237_v32 = vld [vmem:[#allocation23 + $0xdd8] sm:$0xff]  ;;  %v15240_v23 = vcombine.high %v8077_v53, %v8081_v8  ;;  %v16539_v61 = vld [vmem:[#allocation25] sm:$0xff] }
 0x88c   :  { %16508 = vtanh.f32 %v13578_v41  ;;  %13258 = vmatpush2.bf16.msra.mxu1 %v15183_v16  ;;  %v8241_v36 = vld [vmem:[#allocation23 + $0xdf8] sm:$0xff]  ;;  %v15151_v16 = vcombine.low %v7989_v10, %v7993_v2  ;;  %v15239_v0 = vcombine.low %v8077_v53, %v8081_v8 }
 0x88d   :  { %v13579_v56 = vsel %vm13451_vm5, %v17709_v29, %v13571_v19  ;;  %v17732_v9 = vpop.f32.mrf.mxu0  ;;  %13227 = vmatmul.mubr.bf16.vlgmr.msra.gmra.mxu0 %v17475_v54  ;;  %13259 = vmatprep.subr.bf16.mxu1 %v15176_v14  ;;  %v15160_v54 = vcombine.high %v7997_v31, %v8001_v35  ;;  %v8073_v37 = vld [vmem:[#allocation23 + $0x8b8] sm:$0xff]  ;;  %v15400_v63 = vcombine.high %v8237_v32, %v8241_v36 }
 0x88e   :  { %16510 = vtanh.f32 %v13579_v56  ;;  %13277 = vmatpush1.bf16.msra.mxu0 %v15271_v25  ;;  %13308 = vmatprep.mubr.bf16.mxu0 %v17486_v18  ;;  %v15248_v18 = vcombine.high %v8085_v59, %v8089_v34  ;;  %v8595_v25 = vrot.slane %v16539_v61, %v17243_v55  ;;  %v8229_v48 = vld [vmem:[#allocation23 + $0xd98] sm:$0xff]  ;;  %v15399_v38 = vcombine.low %v8237_v32, %v8241_v36 }
 0x88f   :  { %v17736_v45 = vpop.f32.mrf.mxu0  ;;  %13278 = vmatprep.subr.bf16.mxu0 %v15264_v42  ;;  %v8233_v41 = vld [vmem:[#allocation23 + $0xdb8] sm:$0xff]  ;;  %v15232_v42 = vcombine.high %v8069_v12, %v8073_v37  ;;  %v15231_v31 = vcombine.low %v8069_v12, %v8073_v37 }
 0x890   :  { %13260 = vmatpush2.bf16.msra.mxu1 %v15175_v51  ;;  %v8599_v51 = vrot.slane %v16539_v61, %v17205_v21  ;;  %v8061_v5 = vld [vmem:[#allocation23 + $0x858] sm:$0xff]  ;;  %v15392_v55 = vcombine.high %v8229_v48, %v8233_v41 }
 0x891   :  { %v12986_v11 = vpop.f32.mrf.mxu0  ;;  %13261 = vmatprep.subr.bf16.mxu1 %v15168_v27  ;;  %v8065_v56 = vld [vmem:[#allocation23 + $0x878] sm:$0xff] }
 0x892   :  { %13279 = vmatpush1.bf16.msra.mxu0 %v15263_v60  ;;  %v12983_v60 = vadd.f32 %v17732_v9, %v8595_v25  ;;  %v8221_v35 = vld [vmem:[#allocation23 + $0xd58] sm:$0xff]  ;;  %v15224_v59 = vcombine.high %v8061_v5, %v8065_v56  ;;  %v15391_v9 = vcombine.low %v8229_v48, %v8233_v41  ;;  %v15223_v10 = vcombine.low %v8061_v5, %v8065_v56 }
 0x893   :  { %v12987_v20 = vpop.f32.mrf.mxu0  ;;  %13280 = vmatprep.subr.bf16.mxu0 %v15256_v7  ;;  %v8225_v7 = vld [vmem:[#allocation23 + $0xd78] sm:$0xff] }
 0x894   :  { %13262 = vmatpush2.bf16.msra.mxu1 %v15167_v15  ;;  %v8053_v34 = vld [vmem:[#allocation23 + $0x818] sm:$0xff] }
 0x895   :  { %13263 = vmatprep.subr.bf16.mxu1 %v15160_v54  ;;  %v8057_v11 = vld [vmem:[#allocation23 + $0x838] sm:$0xff] }
 0x896   :  { %13281 = vmatpush1.bf16.msra.mxu0 %v15255_v6  ;;  %v15384_v6 = vcombine.high %v8221_v35, %v8225_v7  ;;  %v8217_v2 = vld [vmem:[#allocation23 + $0xd38] sm:$0xff] }
 0x897   :  { %13282 = vmatprep.subr.bf16.mxu0 %v15248_v18  ;;  %v15383_v18 = vcombine.low %v8221_v35, %v8225_v7  ;;  %v8177_v53 = vld [vmem:[#allocation23 + $0xbf8] sm:$0xff] }
 0x898   :  { %13264 = vmatpush2.bf16.msra.mxu1 %v15159_v30  ;;  %v8173_v30 = vld [vmem:[#allocation23 + $0xbd8] sm:$0xff] }
 0x899   :  { %v16509_v40 = vpop.eup %16508  ;;  %13265 = vmatprep.subr.bf16.mxu1 %v15152_v24  ;;  %v15215_v24 = vcombine.low %v8053_v34, %v8057_v11  ;;  %v8209_v32 = vld [vmem:[#allocation23 + $0xcf8] sm:$0xff]  ;;  %v15336_v36 = vcombine.high %v8173_v30, %v8177_v53 }
 0x89a   :  { %v13594_v14 = vmul.f32 %v16509_v40, %v17704_v50  ;;  %13283 = vmatpush1.bf16.msra.mxu0 %v15247_v62  ;;  %v8205_v62 = vld [vmem:[#allocation23 + $0xcd8] sm:$0xff]  ;;  %v15335_v40 = vcombine.low %v8173_v30, %v8177_v53 }
 0x89b   :  { %v16511_v19 = vpop.eup %16510  ;;  %13284 = vmatprep.subr.bf16.mxu0 %v15240_v23  ;;  %v8169_v12 = vld [vmem:[#allocation23 + $0xbb8] sm:$0xff]  ;;  %v15368_v37 = vcombine.high %v8205_v62, %v8209_v32  ;;  %v15367_v25 = vcombine.low %v8205_v62, %v8209_v32 }
 0x89c   :  { %13266 = vmatpush2.bf16.msra.mxu1 %v15151_v16  ;;  %v13595_v27 = vmul.f32 %v16511_v19, %v17709_v29  ;;  %v17743_v50 = vmul.f32 %v13594_v14, %v17311_v13  ;;  %v12985_v29 = vadd.f32 %v17736_v45, %v8599_v51  ;;  %v15216_v45 = vcombine.high %v8053_v34, %v8057_v11  ;;  %v8165_v16 = vld [vmem:[#allocation23 + $0xb98] sm:$0xff] }
 0x89d   :  { %13317 = vmatprep.subr.bf16.mxu1 %v15400_v63  ;;  %v8197_v63 = vld [vmem:[#allocation23 + $0xc98] sm:$0xff]  ;;  %v15328_v61 = vcombine.high %v8165_v16, %v8169_v12  ;;  %v15327_v19 = vcombine.low %v8165_v16, %v8169_v12 }
 0x89e   :  { %13285 = vmatpush1.bf16.msra.mxu0 %v15239_v0  ;;  %v17747_v15 = vmul.f32 %v13595_v27, %v17314_v1  ;;  %v8201_v14 = vld [vmem:[#allocation23 + $0xcb8] sm:$0xff] }
 0x89f   :  { %v13023_v21 = vpop.f32.mrf.mxu1  ;;  %13268 = vmatmul.mubr.bf16.vlgmr.msra.gmra.mxu1 %v17477_v3  ;;  %13286 = vmatprep.subr.bf16.mxu0 %v15232_v42  ;;  %v8213_v3 = vld [vmem:[#allocation23 + $0xd18] sm:$0xff]  ;;  %v15360_v41 = vcombine.high %v8197_v63, %v8201_v14  ;;  %v15359_v5 = vcombine.low %v8197_v63, %v8201_v14 }
 0x8a0   :  { %v17751_v13 = vadd.f32 %v13023_v21, %v12983_v60  ;;  %13318 = vmatpush1.bf16.msra.mxu1 %v15399_v38  ;;  %13349 = vmatprep.mubr.bf16.mxu1 %v17500_v49  ;;  %v15376_v8 = vcombine.high %v8213_v3, %v8217_v2  ;;  %v15375_v23 = vcombine.low %v8213_v3, %v8217_v2  ;;  %v8157_v0 = vld [vmem:[#allocation23 + $0xb58] sm:$0xff] }
 0x8a1   :  { %v13025_v54 = vpop.f32.mrf.mxu1  ;;  %13319 = vmatprep.subr.bf16.mxu1 %v15392_v55  ;;  %v8161_v48 = vld [vmem:[#allocation23 + $0xb78] sm:$0xff] }
 0x8a2   :  { %v17754_v1 = vadd.f32 %v13025_v54, %v12985_v29  ;;  %13287 = vmatpush1.bf16.msra.mxu0 %v15231_v31  ;;  %v8189_v42 = vld [vmem:[#allocation23 + $0xc58] sm:$0xff]  ;;  %v15320_v38 = vcombine.high %v8157_v0, %v8161_v48  ;;  %v15319_v60 = vcombine.low %v8157_v0, %v8161_v48 }
 0x8a3   :  { %v13027_v20 = vpop.f32.mrf.mxu1  ;;  %13288 = vmatprep.subr.bf16.mxu0 %v15224_v59  ;;  %v8193_v51 = vld [vmem:[#allocation23 + $0xc78] sm:$0xff] }
 0x8a4   :  { %13320 = vmatpush1.bf16.msra.mxu1 %v15391_v9  ;;  %v8149_v56 = vld [vmem:[#allocation23 + $0xb18] sm:$0xff]  ;;  %v15352_v55 = vcombine.high %v8189_v42, %v8193_v51  ;;  %v15351_v21 = vcombine.low %v8189_v42, %v8193_v51 }
 0x8a5   :  { %v13028_v49 = vpop.f32.mrf.mxu1  ;;  %13321 = vmatprep.subr.bf16.mxu1 %v15384_v6  ;;  %v8153_v27 = vld [vmem:[#allocation23 + $0xb38] sm:$0xff] }
 0x8a6   :  { %13289 = vmatpush1.bf16.msra.mxu0 %v15223_v10  ;;  %v8181_v31 = vld [vmem:[#allocation23 + $0xc18] sm:$0xff]  ;;  %v15312_v7 = vcombine.high %v8149_v56, %v8153_v27  ;;  %v15311_v34 = vcombine.low %v8149_v56, %v8153_v27 }
 0x8a7   :  { %13290 = vmatprep.subr.bf16.mxu0 %v15216_v45  ;;  %v8185_v35 = vld [vmem:[#allocation23 + $0xc38] sm:$0xff] }
 0x8a8   :  { %13322 = vmatpush1.bf16.msra.mxu1 %v15383_v18  ;;  %v8141_v59 = vld [vmem:[#allocation23 + $0xad8] sm:$0xff]  ;;  %v15344_v9 = vcombine.high %v8181_v31, %v8185_v35  ;;  %v15343_v10 = vcombine.low %v8181_v31, %v8185_v35 }
 0x8a9   :  { %13323 = vmatprep.subr.bf16.mxu1 %v15376_v8  ;;  %v8145_v29 = vld [vmem:[#allocation23 + $0xaf8] sm:$0xff] }
 0x8aa   :  { %13291 = vmatpush1.bf16.msra.mxu0 %v15215_v24  ;;  %v8301_v11 = vld [vmem:[#allocation23 + $0xfd8] sm:$0xff]  ;;  %v15304_v6 = vcombine.high %v8141_v59, %v8145_v29  ;;  %v15303_v45 = vcombine.low %v8141_v59, %v8145_v29 }
 0x8ab   :  { %13292 = vmatprep.subr.bf16.mxu0 %v15336_v36  ;;  %v8305_v54 = vld [vmem:[#allocation23 + $0xff8] sm:$0xff] }
 0x8ac   :  { %13324 = vmatpush1.bf16.msra.mxu1 %v15375_v23  ;;  %v8133_v3 = vld [vmem:[#allocation23 + $0xa98] sm:$0xff]  ;;  %v15464_v20 = vcombine.high %v8301_v11, %v8305_v54  ;;  %v15463_v49 = vcombine.low %v8301_v11, %v8305_v54 }
 0x8ad   :  { %13325 = vmatprep.subr.bf16.mxu1 %v15368_v37  ;;  %v8137_v2 = vld [vmem:[#allocation23 + $0xab8] sm:$0xff] }
 0x8ae   :  { %13293 = vmatpush2.bf16.msra.mxu0 %v15335_v40  ;;  %v8293_v18 = vld [vmem:[#allocation23 + $0xf98] sm:$0xff]  ;;  %v15296_v53 = vcombine.high %v8133_v3, %v8137_v2  ;;  %v15295_v32 = vcombine.low %v8133_v3, %v8137_v2 }
 0x8af   :  { %13294 = vmatprep.subr.bf16.mxu0 %v15328_v61  ;;  %v8297_v30 = vld [vmem:[#allocation23 + $0xfb8] sm:$0xff] }
 0x8b0   :  { %13326 = vmatpush1.bf16.msra.mxu1 %v15367_v25  ;;  %v8125_v8 = vld [vmem:[#allocation23 + $0xa58] sm:$0xff]  ;;  %v15456_v62 = vcombine.high %v8293_v18, %v8297_v30  ;;  %v15455_v12 = vcombine.low %v8293_v18, %v8297_v30 }
 0x8b1   :  { %13327 = vmatprep.subr.bf16.mxu1 %v15360_v41  ;;  %v8129_v24 = vld [vmem:[#allocation23 + $0xa78] sm:$0xff] }
 0x8b2   :  { %13295 = vmatpush2.bf16.msra.mxu0 %v15327_v19  ;;  %v8285_v36 = vld [vmem:[#allocation23 + $0xf58] sm:$0xff]  ;;  %v15288_v16 = vcombine.high %v8125_v8, %v8129_v24  ;;  %v15287_v14 = vcombine.low %v8125_v8, %v8129_v24 }
 0x8b3   :  { %13296 = vmatprep.subr.bf16.mxu0 %v15320_v38  ;;  %v8289_v23 = vld [vmem:[#allocation23 + $0xf78] sm:$0xff] }
 0x8b4   :  { %13328 = vmatpush1.bf16.msra.mxu1 %v15359_v5  ;;  %v8117_v37 = vld [vmem:[#allocation23 + $0xa18] sm:$0xff]  ;;  %v15448_v63 = vcombine.high %v8285_v36, %v8289_v23  ;;  %v15447_v48 = vcombine.low %v8285_v36, %v8289_v23 }
 0x8b5   :  { %13329 = vmatprep.subr.bf16.mxu1 %v15352_v55  ;;  %v8121_v40 = vld [vmem:[#allocation23 + $0xa38] sm:$0xff] }
 0x8b6   :  { %13297 = vmatpush2.bf16.msra.mxu0 %v15319_v60  ;;  %v8277_v61 = vld [vmem:[#allocation23 + $0xf18] sm:$0xff]  ;;  %v15280_v0 = vcombine.high %v8117_v37, %v8121_v40  ;;  %v15279_v51 = vcombine.low %v8117_v37, %v8121_v40 }
 0x8b7   :  { %13298 = vmatprep.subr.bf16.mxu0 %v15312_v7  ;;  %v8281_v25 = vld [vmem:[#allocation23 + $0xf38] sm:$0xff] }
 0x8b8   :  { %13330 = vmatpush1.bf16.msra.mxu1 %v15351_v21  ;;  %v8365_v41 = vld [vmem:[#allocation23 + $0x11d8] sm:$0xff]  ;;  %v15440_v42 = vcombine.high %v8277_v61, %v8281_v25  ;;  %v15439_v27 = vcombine.low %v8277_v61, %v8281_v25 }
 0x8b9   :  { %13331 = vmatprep.subr.bf16.mxu1 %v15344_v9  ;;  %v8369_v19 = vld [vmem:[#allocation23 + $0x11f8] sm:$0xff] }
 0x8ba   :  { %13299 = vmatpush2.bf16.msra.mxu0 %v15311_v34  ;;  %v8269_v38 = vld [vmem:[#allocation23 + $0xed8] sm:$0xff]  ;;  %v15528_v56 = vcombine.high %v8365_v41, %v8369_v19  ;;  %v15527_v35 = vcombine.low %v8365_v41, %v8369_v19 }
 0x8bb   :  { %13300 = vmatprep.subr.bf16.mxu0 %v15304_v6  ;;  %v8273_v5 = vld [vmem:[#allocation23 + $0xef8] sm:$0xff] }
 0x8bc   :  { %13332 = vmatpush1.bf16.msra.mxu1 %v15343_v10  ;;  %v8357_v55 = vld [vmem:[#allocation23 + $0x1198] sm:$0xff]  ;;  %v15432_v31 = vcombine.high %v8269_v38, %v8273_v5  ;;  %v15431_v29 = vcombine.low %v8269_v38, %v8273_v5 }
 0x8bd   :  { %13333 = vmatprep.subr.bf16.mxu1 %v15464_v20  ;;  %v8361_v60 = vld [vmem:[#allocation23 + $0x11b8] sm:$0xff] }
 0x8be   :  { %13301 = vmatpush2.bf16.msra.mxu0 %v15303_v45  ;;  %v8261_v7 = vld [vmem:[#allocation23 + $0xe98] sm:$0xff]  ;;  %v15520_v59 = vcombine.high %v8357_v55, %v8361_v60  ;;  %v15519_v10 = vcombine.low %v8357_v55, %v8361_v60 }
 0x8bf   :  { %13302 = vmatprep.subr.bf16.mxu0 %v15296_v53  ;;  %v8265_v21 = vld [vmem:[#allocation23 + $0xeb8] sm:$0xff] }
 0x8c0   :  { %13334 = vmatpush2.bf16.msra.mxu1 %v15463_v49  ;;  %v8349_v9 = vld [vmem:[#allocation23 + $0x1158] sm:$0xff]  ;;  %v15424_v54 = vcombine.high %v8261_v7, %v8265_v21  ;;  %v15423_v30 = vcombine.low %v8261_v7, %v8265_v21 }
 0x8c1   :  { %13335 = vmatprep.subr.bf16.mxu1 %v15456_v62  ;;  %v8353_v34 = vld [vmem:[#allocation23 + $0x1178] sm:$0xff] }
 0x8c2   :  { %13303 = vmatpush2.bf16.msra.mxu0 %v15295_v32  ;;  %v8253_v3 = vld [vmem:[#allocation23 + $0xe58] sm:$0xff]  ;;  %v15512_v45 = vcombine.high %v8349_v9, %v8353_v34  ;;  %v15511_v8 = vcombine.low %v8349_v9, %v8353_v34 }
 0x8c3   :  { %13304 = vmatprep.subr.bf16.mxu0 %v15288_v16  ;;  %v8257_v2 = vld [vmem:[#allocation23 + $0xe78] sm:$0xff] }
 0x8c4   :  { %13336 = vmatpush2.bf16.msra.mxu1 %v15455_v12  ;;  %v8345_v53 = vld [vmem:[#allocation23 + $0x1138] sm:$0xff]  ;;  %v15415_v36 = vcombine.low %v8253_v3, %v8257_v2 }
 0x8c5   :  { %13337 = vmatprep.subr.bf16.mxu1 %v15448_v63  ;;  %v8245_v24 = vld [vmem:[#allocation23 + $0xe18] sm:$0xff] }
 0x8c6   :  { %13305 = vmatpush2.bf16.msra.mxu0 %v15287_v14  ;;  %v8333_v23 = vld [vmem:[#allocation23 + $0x10d8] sm:$0xff] }
 0x8c7   :  { %13306 = vmatprep.subr.bf16.mxu0 %v15280_v0  ;;  %v8337_v16 = vld [vmem:[#allocation23 + $0x10f8] sm:$0xff] }
 0x8c8   :  { %13338 = vmatpush2.bf16.msra.mxu1 %v15447_v48  ;;  %v8493_v37 = vld [vmem:[#allocation23 + $0x15d8] sm:$0xff]  ;;  %v15496_v63 = vcombine.high %v8333_v23, %v8337_v16  ;;  %v15495_v48 = vcombine.low %v8333_v23, %v8337_v16 }
 0x8c9   :  { %13339 = vmatprep.subr.bf16.mxu1 %v15440_v42  ;;  %v8497_v40 = vld [vmem:[#allocation23 + $0x15f8] sm:$0xff] }
 0x8ca   :  { %13307 = vmatpush2.bf16.msra.mxu0 %v15279_v51  ;;  %v8325_v61 = vld [vmem:[#allocation23 + $0x1098] sm:$0xff]  ;;  %v15656_v0 = vcombine.high %v8493_v37, %v8497_v40  ;;  %v15655_v51 = vcombine.low %v8493_v37, %v8497_v40 }
 0x8cb   :  { %13358 = vmatprep.subr.bf16.mxu0 %v15528_v56  ;;  %v8329_v25 = vld [vmem:[#allocation23 + $0x10b8] sm:$0xff] }
 0x8cc   :  { %13340 = vmatpush2.bf16.msra.mxu1 %v15439_v27  ;;  %v8485_v41 = vld [vmem:[#allocation23 + $0x1598] sm:$0xff]  ;;  %v15488_v42 = vcombine.high %v8325_v61, %v8329_v25  ;;  %v15487_v27 = vcombine.low %v8325_v61, %v8329_v25 }
 0x8cd   :  { %v13064_v11 = vpop.f32.mrf.mxu0  ;;  %13309 = vmatmul.mubr.bf16.vlgmr.msra.gmra.mxu0 %v17526_v52  ;;  %13341 = vmatprep.subr.bf16.mxu1 %v15432_v31  ;;  %v8341_v52 = vld [vmem:[#allocation23 + $0x1118] sm:$0xff] }
 0x8ce   :  { %v17758_v6 = vadd.f32 %v13064_v11, %v17751_v13  ;;  %13359 = vmatpush1.bf16.msra.mxu0 %v15527_v35  ;;  %13390 = vmatprep.mubr.bf16.mxu0 %v17554_v17  ;;  %v15416_v13 = vcombine.high %v8253_v3, %v8257_v2  ;;  %v8249_v17 = vld [vmem:[#allocation23 + $0xe38] sm:$0xff]  ;;  %v15504_v32 = vcombine.high %v8341_v52, %v8345_v53 }
 0x8cf   :  { %v13066_v20 = vpop.f32.mrf.mxu0  ;;  %13360 = vmatprep.subr.bf16.mxu0 %v15520_v59  ;;  %v15503_v12 = vcombine.low %v8341_v52, %v8345_v53  ;;  %v15407_v14 = vcombine.low %v8245_v24, %v8249_v17  ;;  %v8489_v19 = vld [vmem:[#allocation23 + $0x15b8] sm:$0xff] }
 0x8d0   :  { %v17762_v18 = vadd.f32 %v13066_v20, %v17754_v1  ;;  %13342 = vmatpush2.bf16.msra.mxu1 %v15431_v29  ;;  %v15408_v1 = vcombine.high %v8245_v24, %v8249_v17  ;;  %v8317_v38 = vld [vmem:[#allocation23 + $0x1058] sm:$0xff]  ;;  %v15648_v56 = vcombine.high %v8485_v41, %v8489_v19  ;;  %v15647_v7 = vcombine.low %v8485_v41, %v8489_v19 }
 0x8d1   :  { %v13068_v49 = vpop.f32.mrf.mxu0  ;;  %13343 = vmatprep.subr.bf16.mxu1 %v15424_v54  ;;  %v8321_v5 = vld [vmem:[#allocation23 + $0x1078] sm:$0xff] }
 0x8d2   :  { %13361 = vmatpush1.bf16.msra.mxu0 %v15519_v10  ;;  %v8477_v55 = vld [vmem:[#allocation23 + $0x1558] sm:$0xff]  ;;  %v15480_v35 = vcombine.high %v8317_v38, %v8321_v5  ;;  %v15479_v34 = vcombine.low %v8317_v38, %v8321_v5 }
 0x8d3   :  { %v13069_v62 = vpop.f32.mrf.mxu0  ;;  %13362 = vmatprep.subr.bf16.mxu0 %v15512_v45  ;;  %v8481_v60 = vld [vmem:[#allocation23 + $0x1578] sm:$0xff] }
 0x8d4   :  { %13344 = vmatpush2.bf16.msra.mxu1 %v15423_v30  ;;  %v8309_v21 = vld [vmem:[#allocation23 + $0x1018] sm:$0xff]  ;;  %v15640_v9 = vcombine.high %v8477_v55, %v8481_v60 }
 0x8d5   :  { %13345 = vmatprep.subr.bf16.mxu1 %v15416_v13  ;;  %v8313_v59 = vld [vmem:[#allocation23 + $0x1038] sm:$0xff] }
 0x8d6   :  { %13363 = vmatpush1.bf16.msra.mxu0 %v15511_v8  ;;  %v8469_v11 = vld [vmem:[#allocation23 + $0x1518] sm:$0xff]  ;;  %v15472_v3 = vcombine.high %v8309_v21, %v8313_v59  ;;  %v15471_v30 = vcombine.low %v8309_v21, %v8313_v59 }
 0x8d7   :  { %13364 = vmatprep.subr.bf16.mxu0 %v15504_v32  ;;  %v8473_v54 = vld [vmem:[#allocation23 + $0x1538] sm:$0xff] }
 0x8d8   :  { %13346 = vmatpush2.bf16.msra.mxu1 %v15415_v36  ;;  %v8429_v2 = vld [vmem:[#allocation23 + $0x13d8] sm:$0xff]  ;;  %v15631_v13 = vcombine.low %v8469_v11, %v8473_v54 }
 0x8d9   :  { %13347 = vmatprep.subr.bf16.mxu1 %v15408_v1  ;;  %v8433_v20 = vld [vmem:[#allocation23 + $0x13f8] sm:$0xff] }
 0x8da   :  { %13365 = vmatpush1.bf16.msra.mxu0 %v15503_v12  ;;  %v8461_v52 = vld [vmem:[#allocation23 + $0x14d8] sm:$0xff]  ;;  %v15592_v49 = vcombine.high %v8429_v2, %v8433_v20  ;;  %v15591_v62 = vcombine.low %v8429_v2, %v8433_v20 }
 0x8db   :  { %13366 = vmatprep.subr.bf16.mxu0 %v15496_v63  ;;  %v8465_v53 = vld [vmem:[#allocation23 + $0x14f8] sm:$0xff] }
 0x8dc   :  { %13348 = vmatpush2.bf16.msra.mxu1 %v15407_v14  ;;  %v8421_v8 = vld [vmem:[#allocation23 + $0x1398] sm:$0xff]  ;;  %v15624_v17 = vcombine.high %v8461_v52, %v8465_v53  ;;  %v15623_v16 = vcombine.low %v8461_v52, %v8465_v53 }
 0x8dd   :  { %13399 = vmatprep.subr.bf16.mxu1 %v15656_v0  ;;  %v8425_v24 = vld [vmem:[#allocation23 + $0x13b8] sm:$0xff] }
 0x8de   :  { %13367 = vmatpush1.bf16.msra.mxu0 %v15495_v48  ;;  %v8453_v32 = vld [vmem:[#allocation23 + $0x1498] sm:$0xff]  ;;  %v15584_v23 = vcombine.high %v8421_v8, %v8425_v24  ;;  %v15583_v40 = vcombine.low %v8421_v8, %v8425_v24 }
 0x8df   :  { %v17764_v31 = vpop.f32.mrf.mxu1  ;;  %13350 = vmatmul.mubr.bf16.vlgmr.msra.gmra.mxu1 %v17528_v57  ;;  %13368 = vmatprep.subr.bf16.mxu0 %v15488_v42  ;;  %v15639_v57 = vcombine.low %v8477_v55, %v8481_v60  ;;  %v8457_v36 = vld [vmem:[#allocation23 + $0x14b8] sm:$0xff] }
 0x8e0   :  { %13400 = vmatpush1.bf16.msra.mxu1 %v15655_v51  ;;  %13431 = vmatprep.mubr.bf16.mxu1 %v17599_v58  ;;  %v15632_v58 = vcombine.high %v8469_v11, %v8473_v54  ;;  %v8413_v1 = vld [vmem:[#allocation23 + $0x1358] sm:$0xff]  ;;  %v15616_v37 = vcombine.high %v8453_v32, %v8457_v36  ;;  %v15615_v25 = vcombine.low %v8453_v32, %v8457_v36 }
 0x8e1   :  { %v17768_v29 = vpop.f32.mrf.mxu1  ;;  %13401 = vmatprep.subr.bf16.mxu1 %v15648_v56  ;;  %v8417_v12 = vld [vmem:[#allocation23 + $0x1378] sm:$0xff] }
 0x8e2   :  { %13369 = vmatpush1.bf16.msra.mxu0 %v15487_v27  ;;  %v8445_v63 = vld [vmem:[#allocation23 + $0x1458] sm:$0xff]  ;;  %v15576_v61 = vcombine.high %v8413_v1, %v8417_v12  ;;  %v15575_v19 = vcombine.low %v8413_v1, %v8417_v12 }
 0x8e3   :  { %v13109_v10 = vpop.f32.mrf.mxu1  ;;  %13370 = vmatprep.subr.bf16.mxu0 %v15480_v35  ;;  %v8449_v14 = vld [vmem:[#allocation23 + $0x1478] sm:$0xff] }
 0x8e4   :  { %13402 = vmatpush1.bf16.msra.mxu1 %v15647_v7  ;;  %v8405_v0 = vld [vmem:[#allocation23 + $0x1318] sm:$0xff]  ;;  %v15608_v41 = vcombine.high %v8445_v63, %v8449_v14  ;;  %v15607_v5 = vcombine.low %v8445_v63, %v8449_v14  ;;  %v13639_v14 = vld [vmem:[#allocation26 + $0xf8] sm:$0xff] }
 0x8e5   :  { %v13110_v45 = vpop.f32.mrf.mxu1  ;;  %13403 = vmatprep.subr.bf16.mxu1 %v15640_v9  ;;  %v8409_v48 = vld [vmem:[#allocation23 + $0x1338] sm:$0xff] }
 0x8e6   :  { %13371 = vmatpush1.bf16.msra.mxu0 %v15479_v34  ;;  %v8437_v42 = vld [vmem:[#allocation23 + $0x1418] sm:$0xff]  ;;  %v15568_v38 = vcombine.high %v8405_v0, %v8409_v48  ;;  %v15567_v60 = vcombine.low %v8405_v0, %v8409_v48  ;;  %v13623_v48 = vld [vmem:[#allocation26 + $0x78] sm:$0xff] }
 0x8e7   :  { %13372 = vmatprep.subr.bf16.mxu0 %v15472_v3  ;;  %v8441_v51 = vld [vmem:[#allocation23 + $0x1438] sm:$0xff] }
 0x8e8   :  { %13404 = vmatpush1.bf16.msra.mxu1 %v15639_v57  ;;  %v8397_v56 = vld [vmem:[#allocation23 + $0x12d8] sm:$0xff]  ;;  %v15600_v55 = vcombine.high %v8437_v42, %v8441_v51  ;;  %v15599_v59 = vcombine.low %v8437_v42, %v8441_v51 }
 0x8e9   :  { %13405 = vmatprep.subr.bf16.mxu1 %v15632_v58  ;;  %v8401_v27 = vld [vmem:[#allocation23 + $0x12f8] sm:$0xff] }
 0x8ea   :  { %13373 = vmatpush1.bf16.msra.mxu0 %v15471_v30  ;;  %v8557_v35 = vld [vmem:[#allocation23 + $0x17d8] sm:$0xff]  ;;  %v15560_v21 = vcombine.high %v8397_v56, %v8401_v27  ;;  %v15559_v54 = vcombine.low %v8397_v56, %v8401_v27 }
 0x8eb   :  { %13374 = vmatprep.subr.bf16.mxu0 %v15592_v49  ;;  %v8561_v7 = vld [vmem:[#allocation23 + $0x17f8] sm:$0xff] }
 0x8ec   :  { %13406 = vmatpush1.bf16.msra.mxu1 %v15631_v13  ;;  %v8389_v9 = vld [vmem:[#allocation23 + $0x1298] sm:$0xff]  ;;  %v15720_v11 = vcombine.high %v8557_v35, %v8561_v7  ;;  %v15719_v2 = vcombine.low %v8557_v35, %v8561_v7  ;;  %v13636_v7 = vld [vmem:[#allocation26 + $0xe0] sm:$0xff] }
 0x8ed   :  { %13407 = vmatprep.subr.bf16.mxu1 %v15624_v17  ;;  %v8393_v34 = vld [vmem:[#allocation23 + $0x12b8] sm:$0xff] }
 0x8ee   :  { %13375 = vmatpush2.bf16.msra.mxu0 %v15591_v62  ;;  %v8549_v10 = vld [vmem:[#allocation23 + $0x1798] sm:$0xff]  ;;  %v15552_v57 = vcombine.high %v8389_v9, %v8393_v34  ;;  %v15551_v30 = vcombine.low %v8389_v9, %v8393_v34  ;;  %v13635_v9 = vld [vmem:[#allocation26 + $0xd8] sm:$0xff] }
 0x8ef   :  { %13376 = vmatprep.subr.bf16.mxu0 %v15584_v23  ;;  %v8553_v3 = vld [vmem:[#allocation23 + $0x17b8] sm:$0xff] }
 0x8f0   :  { %13408 = vmatpush1.bf16.msra.mxu1 %v15623_v16  ;;  %v8381_v20 = vld [vmem:[#allocation23 + $0x1258] sm:$0xff]  ;;  %v15712_v58 = vcombine.high %v8549_v10, %v8553_v3  ;;  %v15711_v13 = vcombine.low %v8549_v10, %v8553_v3 }
 0x8f1   :  { %13409 = vmatprep.subr.bf16.mxu1 %v15616_v37  ;;  %v8385_v45 = vld [vmem:[#allocation23 + $0x1278] sm:$0xff] }
 0x8f2   :  { %13377 = vmatpush2.bf16.msra.mxu0 %v15583_v40  ;;  %v8541_v52 = vld [vmem:[#allocation23 + $0x1758] sm:$0xff]  ;;  %v15544_v49 = vcombine.high %v8381_v20, %v8385_v45  ;;  %v15543_v62 = vcombine.low %v8381_v20, %v8385_v45  ;;  %v13633_v20 = vld [vmem:[#allocation26 + $0xc8] sm:$0xff] }
 0x8f3   :  { %13378 = vmatprep.subr.bf16.mxu0 %v15576_v61  ;;  %v8545_v53 = vld [vmem:[#allocation23 + $0x1778] sm:$0xff]  ;;  %v13617_v45 = vld [vmem:[#allocation26 + $0x48] sm:$0xff] }
 0x8f4   :  { %13410 = vmatpush1.bf16.msra.mxu1 %v15615_v25  ;;  %v8373_v8 = vld [vmem:[#allocation23 + $0x1218] sm:$0xff]  ;;  %v15704_v17 = vcombine.high %v8541_v52, %v8545_v53  ;;  %v15703_v16 = vcombine.low %v8541_v52, %v8545_v53  ;;  %v13616_v52 = vld [vmem:[#allocation26 + $0x40] sm:$0xff]  ;;  %v13631_v53 = vld [vmem:[#allocation26 + $0xb8] sm:$0xff] }
 0x8f5   :  { %13411 = vmatprep.subr.bf16.mxu1 %v15608_v41  ;;  %v8377_v24 = vld [vmem:[#allocation23 + $0x1238] sm:$0xff] }
 0x8f6   :  { %13379 = vmatpush2.bf16.msra.mxu0 %v15575_v19  ;;  %v8533_v32 = vld [vmem:[#allocation23 + $0x1718] sm:$0xff]  ;;  %v15536_v23 = vcombine.high %v8373_v8, %v8377_v24  ;;  %v15535_v12 = vcombine.low %v8373_v8, %v8377_v24  ;;  %v13106_v8 = vadd.f32 %v17764_v31, %v17758_v6 }
 0x8f7   :  { %13380 = vmatprep.subr.bf16.mxu0 %v15568_v38  ;;  %v8537_v36 = vld [vmem:[#allocation23 + $0x1738] sm:$0xff] }
 0x8f8   :  { %13412 = vmatpush1.bf16.msra.mxu1 %v15607_v5  ;;  %v15696_v1 = vcombine.high %v8533_v32, %v8537_v36  ;;  %v8525_v37 = vld [vmem:[#allocation23 + $0x16d8] sm:$0xff]  ;;  %v15695_v63 = vcombine.low %v8533_v32, %v8537_v36  ;;  %v13637_v5 = vld [vmem:[#allocation26 + $0xe8] sm:$0xff] }
 0x8f9   :  { %13413 = vmatprep.subr.bf16.mxu1 %v15600_v55  ;;  %v8529_v40 = vld [vmem:[#allocation23 + $0x16f8] sm:$0xff] }
 0x8fa   :  { %13381 = vmatpush2.bf16.msra.mxu0 %v15567_v60  ;;  %v15688_v61 = vcombine.high %v8525_v37, %v8529_v40  ;;  %v8517_v25 = vld [vmem:[#allocation23 + $0x1698] sm:$0xff]  ;;  %v15687_v41 = vcombine.low %v8525_v37, %v8529_v40  ;;  %v13621_v60 = vld [vmem:[#allocation26 + $0x68] sm:$0xff] }
 0x8fb   :  { %13382 = vmatprep.subr.bf16.mxu0 %v15560_v21  ;;  %v8521_v0 = vld [vmem:[#allocation23 + $0x16b8] sm:$0xff]  ;;  %v13613_v37 = vld [vmem:[#allocation26 + $0x28] sm:$0xff] }
 0x8fc   :  { %13414 = vmatpush1.bf16.msra.mxu1 %v15599_v59  ;;  %v13638_v19 = vld [vmem:[#allocation26 + $0xf0] sm:$0xff]  ;;  %v15680_v38 = vcombine.high %v8517_v25, %v8521_v0  ;;  %v15679_v35 = vcombine.low %v8517_v25, %v8521_v0  ;;  %v13669_v40 = vld [vmem:[#allocation26 + $0x1e8] sm:$0xff]  ;;  %v13668_v25 = vld [vmem:[#allocation26 + $0x1e0] sm:$0xff] }
 0x8fd   :  { %13415 = vmatprep.subr.bf16.mxu1 %v15720_v11  ;;  %v13622_v51 = vld [vmem:[#allocation26 + $0x70] sm:$0xff] }
 0x8fe   :  { %13383 = vmatpush2.bf16.msra.mxu0 %v15559_v54  ;;  %v8509_v56 = vld [vmem:[#allocation23 + $0x1658] sm:$0xff]  ;;  %v13619_v54 = vld [vmem:[#allocation26 + $0x58] sm:$0xff] }
 0x8ff   :  { %13384 = vmatprep.subr.bf16.mxu0 %v15552_v57  ;;  %v8513_v27 = vld [vmem:[#allocation23 + $0x1678] sm:$0xff] }
 0x900   :  { %13416 = vmatpush2.bf16.msra.mxu1 %v15719_v2  ;;  %v15672_v59 = vcombine.high %v8509_v56, %v8513_v27  ;;  %v8501_v34 = vld [vmem:[#allocation23 + $0x1618] sm:$0xff]  ;;  %v15671_v10 = vcombine.low %v8509_v56, %v8513_v27  ;;  %v13651_v56 = vld [vmem:[#allocation26 + $0x158] sm:$0xff] }
 0x901   :  { %13417 = vmatprep.subr.bf16.mxu1 %v15712_v58  ;;  %v8505_v11 = vld [vmem:[#allocation23 + $0x1638] sm:$0xff] }
 0x902   :  { %13385 = vmatpush2.bf16.msra.mxu0 %v15551_v30  ;;  %v13634_v3 = vld [vmem:[#allocation26 + $0xd0] sm:$0xff]  ;;  %v15664_v2 = vcombine.high %v8501_v34, %v8505_v11  ;;  %v15663_v58 = vcombine.low %v8501_v34, %v8505_v11  ;;  %v13632_v30 = vld [vmem:[#allocation26 + $0xc0] sm:$0xff]  ;;  %v13649_v11 = vld [vmem:[#allocation26 + $0x148] sm:$0xff] }
 0x903   :  { %13386 = vmatprep.subr.bf16.mxu0 %v15544_v49  ;;  %v13618_v57 = vld [vmem:[#allocation26 + $0x50] sm:$0xff]  ;;  %v13671_v49 = vld [vmem:[#allocation26 + $0x1f8] sm:$0xff]  ;;  %v13624_v34 = vld [vmem:[#allocation26 + $0x80] sm:$0xff] }
 0x904   :  { %13418 = vmatpush2.bf16.msra.mxu1 %v15711_v13  ;;  %v13615_v13 = vld [vmem:[#allocation26 + $0x38] sm:$0xff]  ;;  %v13630_v24 = vld [vmem:[#allocation26 + $0xb0] sm:$0xff] }
 0x905   :  { %13419 = vmatprep.subr.bf16.mxu1 %v15704_v17  ;;  %v13655_v17 = vld [vmem:[#allocation26 + $0x178] sm:$0xff]  ;;  %v13614_v36 = vld [vmem:[#allocation26 + $0x30] sm:$0xff] }
 0x906   :  { %13387 = vmatpush2.bf16.msra.mxu0 %v15543_v62  ;;  %v13108_v62 = vadd.f32 %v17768_v29, %v17762_v18  ;;  %v13628_v18 = vld [vmem:[#allocation26 + $0xa0] sm:$0xff]  ;;  %v13653_v29 = vld [vmem:[#allocation26 + $0x168] sm:$0xff] }
 0x907   :  { %13388 = vmatprep.subr.bf16.mxu0 %v15536_v23  ;;  %v13670_v23 = vld [vmem:[#allocation26 + $0x1f0] sm:$0xff] }
 0x908   :  { %13420 = vmatpush2.bf16.msra.mxu1 %v15703_v16 }
 0x909   :  { %13421 = vmatprep.subr.bf16.mxu1 %v15696_v1  ;;  %v13629_v1 = vld [vmem:[#allocation26 + $0xa8] sm:$0xff] }
 0x90a   :  { %13389 = vmatpush2.bf16.msra.mxu0 %v15535_v12  ;;  %v13654_v12 = vld [vmem:[#allocation26 + $0x170] sm:$0xff] }
 0x90b   :  { %15722 = vmatprep.subr.mxu0 %v13639_v14 }
 0x90c   :  { %13422 = vmatpush2.bf16.msra.mxu1 %v15695_v63 }
 0x90d   :  { %v13146_v42 = vpop.f32.mrf.mxu0  ;;  %13391 = vmatmul.mubr.bf16.vlgmr.msra.gmra.mxu0 %v17577_v33  ;;  %13423 = vmatprep.subr.bf16.mxu1 %v15688_v61  ;;  %v13620_v33 = vld [vmem:[#allocation26 + $0x60] sm:$0xff] }
 0x90e   :  { %15723 = vmatpush3.msra.mxu0 %v13623_v48  ;;  %13807 = vmatprep.mubr.f32.mxu0 %v17678_v26  ;;  %v13147_v32 = vadd.f32 %v13146_v42, %v13106_v8  ;;  %v13627_v48 = vld [vmem:[#allocation26 + $0x98] sm:$0xff]  ;;  %v13685_v8 = vld [vmem:[#allocation26 + $0x268] sm:$0xff] }
 0x90f   :  { %v13148_v55 = vpop.f32.mrf.mxu0  ;;  %15724 = vmatprep.subr.mxu0 %v13638_v19  ;;  %v13611_v42 = vld [vmem:[#allocation26 + $0x18] sm:$0xff] }
 0x910   :  { %13424 = vmatpush2.bf16.msra.mxu1 %v15687_v41  ;;  %15725 = vmatpush3.msra.mxu0 %v13622_v51  ;;  %v13149_v6 = vadd.f32 %v13148_v55, %v13108_v62  ;;  %v13667_v51 = vld [vmem:[#allocation26 + $0x1d8] sm:$0xff]  ;;  %v13684_v62 = vld [vmem:[#allocation26 + $0x260] sm:$0xff] }
 0x911   :  { %v13150_v21 = vpop.f32.mrf.mxu0  ;;  %15726 = vmatprep.subr.mxu0 %v13637_v5  ;;  %13425 = vmatprep.subr.bf16.mxu1 %v15680_v38  ;;  %v13626_v5 = vld [vmem:[#allocation26 + $0x90] sm:$0xff] }
 0x912   :  { %15727 = vmatpush3.msra.mxu0 %v13621_v60  ;;  %v13610_v60 = vld [vmem:[#allocation26 + $0x10] sm:$0xff] }
 0x913   :  { %v13151_v26 = vpop.f32.mrf.mxu0  ;;  %15728 = vmatprep.subr.mxu0 %v13636_v7  ;;  %v13625_v7 = vld [vmem:[#allocation26 + $0x88] sm:$0xff]  ;;  %v13650_v21 = vld [vmem:[#allocation26 + $0x150] sm:$0xff] }
 0x914   :  { %13426 = vmatpush2.bf16.msra.mxu1 %v15679_v35  ;;  %15729 = vmatpush3.msra.mxu0 %v13620_v33  ;;  %v13666_v35 = vld [vmem:[#allocation26 + $0x1d0] sm:$0xff]  ;;  %v13608_v26 = vld [vmem:[#allocation26] sm:$0xff] }
 0x915   :  { %15730 = vmatprep.subr.mxu0 %v13635_v9  ;;  %13427 = vmatprep.subr.bf16.mxu1 %v15672_v59  ;;  %v13609_v59 = vld [vmem:[#allocation26 + $0x8] sm:$0xff] }
 0x916   :  { %15731 = vmatpush3.msra.mxu0 %v13619_v54  ;;  %v13665_v9 = vld [vmem:[#allocation26 + $0x1c8] sm:$0xff]  ;;  %v13664_v54 = vld [vmem:[#allocation26 + $0x1c0] sm:$0xff] }
 0x917   :  { %15732 = vmatprep.subr.mxu0 %v13634_v3  ;;  %v13663_v3 = vld [vmem:[#allocation26 + $0x1b8] sm:$0xff] }
 0x918   :  { %13428 = vmatpush2.bf16.msra.mxu1 %v15671_v10  ;;  %15733 = vmatpush3.msra.mxu0 %v13618_v57  ;;  %v13648_v10 = vld [vmem:[#allocation26 + $0x140] sm:$0xff]  ;;  %v13703_v57 = vld [vmem:[#allocation26 + $0x2f8] sm:$0xff] }
 0x919   :  { %15734 = vmatprep.subr.mxu0 %v13633_v20  ;;  %13429 = vmatprep.subr.bf16.mxu1 %v15664_v2  ;;  %v13647_v2 = vld [vmem:[#allocation26 + $0x138] sm:$0xff] }
 0x91a   :  { %15735 = vmatpush3.msra.mxu0 %v13617_v45  ;;  %v13687_v20 = vld [vmem:[#allocation26 + $0x278] sm:$0xff]  ;;  %v13662_v45 = vld [vmem:[#allocation26 + $0x1b0] sm:$0xff] }
 0x91b   :  { %15736 = vmatprep.subr.mxu0 %v13632_v30  ;;  %v13646_v30 = vld [vmem:[#allocation26 + $0x130] sm:$0xff] }
 0x91c   :  { %13430 = vmatpush2.bf16.msra.mxu1 %v15663_v58  ;;  %15737 = vmatpush3.msra.mxu0 %v13616_v52  ;;  %v13702_v58 = vld [vmem:[#allocation26 + $0x2f0] sm:$0xff] }
 0x91d   :  { %15738 = vmatprep.subr.mxu0 %v13631_v53  ;;  %15757 = vmatprep.subr.mxu1 %v13671_v49  ;;  %v13686_v52 = vld [vmem:[#allocation26 + $0x270] sm:$0xff]  ;;  %v13661_v53 = vld [vmem:[#allocation26 + $0x1a8] sm:$0xff] }
 0x91e   :  { %15739 = vmatpush3.msra.mxu0 %v13615_v13  ;;  %v13701_v49 = vld [vmem:[#allocation26 + $0x2e8] sm:$0xff] }
 0x91f   :  { %v13187_v16 = vpop.f32.mrf.mxu1  ;;  %13432 = vmatmul.mubr.bf16.vlgmr.msra.gmra.mxu1 %v17603_v28  ;;  %15740 = vmatprep.subr.mxu0 %v13630_v24  ;;  %v13612_v28 = vld [vmem:[#allocation26 + $0x20] sm:$0xff]  ;;  %v13645_v13 = vld [vmem:[#allocation26 + $0x128] sm:$0xff] }
 0x920   :  { %v17777_v31 = vadd.f32 %v13187_v16, %v13147_v32  ;;  %15758 = vmatpush3.msra.mxu1 %v13655_v17  ;;  %13877 = vmatprep.mubr.f32.mxu1 %v17747_v15  ;;  %v13652_v15 = vld [vmem:[#allocation26 + $0x160] sm:$0xff]  ;;  %v13659_v32 = vld [vmem:[#allocation26 + $0x198] sm:$0xff] }
 0x921   :  { %v13189_v63 = vpop.f32.mrf.mxu1  ;;  %15741 = vmatpush3.msra.mxu0 %v13614_v36  ;;  %15759 = vmatprep.subr.mxu1 %v13670_v23  ;;  %v13660_v24 = vld [vmem:[#allocation26 + $0x1a0] sm:$0xff]  ;;  %v13699_v36 = vld [vmem:[#allocation26 + $0x2d8] sm:$0xff] }
 0x922   :  { %v13468_v14 = vand.u32 2147483647, %v17777_v31  ;;  %v17781_v61 = vadd.f32 %v13189_v63, %v13149_v6  ;;  %15742 = vmatprep.subr.mxu0 %v13629_v1  ;;  %15760 = vmatpush3.msra.mxu1 %v13654_v12  ;;  %v13700_v17 = vld [vmem:[#allocation26 + $0x2e0] sm:$0xff]  ;;  %v13643_v16 = vld [vmem:[#allocation26 + $0x118] sm:$0xff]  ;;  %v13658_v6 = vld [vmem:[#allocation26 + $0x190] sm:$0xff]  ;;  %vm13452_vm8 = vcmp.ne.f32.partialorder %v17777_v31, %v17777_v31 }
 0x923   :  { %v13191_v0 = vpop.f32.mrf.mxu1  ;;  %15743 = vmatpush3.msra.mxu0 %v13613_v37  ;;  %15761 = vmatprep.subr.mxu1 %v13669_v40  ;;  %v13683_v1 = vld [vmem:[#allocation26 + $0x258] sm:$0xff]  ;;  %v13698_v37 = vld [vmem:[#allocation26 + $0x2d0] sm:$0xff] }
 0x924   :  { %v13476_v41 = vsub.f32 0.0, %v13468_v14  ;;  %v13469_v19 = vand.u32 2147483647, %v17781_v61  ;;  %15744 = vmatprep.subr.mxu0 %v13628_v18  ;;  %15762 = vmatpush3.msra.mxu1 %v13653_v29  ;;  %v13642_v63 = vld [vmem:[#allocation26 + $0x110] sm:$0xff]  ;;  %v13657_v14 = vld [vmem:[#allocation26 + $0x188] sm:$0xff]  ;;  %vm13453_vm9 = vcmp.ne.f32.partialorder %v17781_v61, %v17781_v61 }
 0x925   :  { %v13192_v38 = vpop.f32.mrf.mxu1  ;;  %15745 = vmatpush3.msra.mxu0 %v13612_v28  ;;  %15763 = vmatprep.subr.mxu1 %v13668_v25  ;;  %v13682_v18 = vld [vmem:[#allocation26 + $0x250] sm:$0xff]  ;;  %v13697_v28 = vld [vmem:[#allocation26 + $0x2c8] sm:$0xff] }
 0x926   :  { %v13488_v27 = vmul.f32 1.442695, %v13476_v41  ;;  %v13477_v55 = vsub.f32 0.0, %v13469_v19  ;;  %15746 = vmatprep.subr.mxu0 %v13627_v48  ;;  %15764 = vmatpush3.msra.mxu1 %v13652_v15  ;;  %v13641_v25 = vld [vmem:[#allocation26 + $0x108] sm:$0xff]  ;;  %v13656_v48 = vld [vmem:[#allocation26 + $0x180] sm:$0xff] }
 0x927   :  { %15747 = vmatpush3.msra.mxu0 %v13611_v42  ;;  %15765 = vmatprep.subr.mxu1 %v13667_v51  ;;  %v13681_v0 = vld [vmem:[#allocation26 + $0x248] sm:$0xff]  ;;  %v13696_v15 = vld [vmem:[#allocation26 + $0x2c0] sm:$0xff]  ;;  %v13695_v42 = vld [vmem:[#allocation26 + $0x2b8] sm:$0xff] }
 0x928   :  { %16512 = vpow2.f32 %v13488_v27  ;;  %v13490_v33 = vmul.f32 1.442695, %v13477_v55  ;;  %15748 = vmatprep.subr.mxu0 %v13626_v5  ;;  %15766 = vmatpush3.msra.mxu1 %v13651_v56  ;;  %v13640_v41 = vld [vmem:[#allocation26 + $0x100] sm:$0xff]  ;;  %v13679_v51 = vld [vmem:[#allocation26 + $0x238] sm:$0xff]  ;;  %v13694_v5 = vld [vmem:[#allocation26 + $0x2b0] sm:$0xff] }
 0x929   :  { %15749 = vmatpush3.msra.mxu0 %v13610_v60  ;;  %15767 = vmatprep.subr.mxu1 %v13666_v35  ;;  %v13680_v19 = vld [vmem:[#allocation26 + $0x240] sm:$0xff]  ;;  %v13678_v56 = vld [vmem:[#allocation26 + $0x230] sm:$0xff]  ;;  %v13693_v55 = vld [vmem:[#allocation26 + $0x2a8] sm:$0xff] }
 0x92a   :  { %16514 = vpow2.f32 %v13490_v33  ;;  %15750 = vmatprep.subr.mxu0 %v13625_v7  ;;  %15768 = vmatpush3.msra.mxu1 %v13650_v21  ;;  %v13677_v60 = vld [vmem:[#allocation26 + $0x228] sm:$0xff]  ;;  %v13692_v7 = vld [vmem:[#allocation26 + $0x2a0] sm:$0xff] }
 0x92b   :  { %15751 = vmatpush3.msra.mxu0 %v13609_v59  ;;  %15769 = vmatprep.subr.mxu1 %v13665_v9  ;;  %v13676_v33 = vld [vmem:[#allocation26 + $0x220] sm:$0xff]  ;;  %v13691_v9 = vld [vmem:[#allocation26 + $0x298] sm:$0xff] }
 0x92c   :  { %15752 = vmatprep.subr.mxu0 %v13624_v34  ;;  %15770 = vmatpush3.msra.mxu1 %v13649_v11  ;;  %v13675_v11 = vld [vmem:[#allocation26 + $0x218] sm:$0xff] }
 0x92d   :  { %15753 = vmatpush3.msra.mxu0 %v13608_v26  ;;  %15771 = vmatprep.subr.mxu1 %v13664_v54 }
 0x92e   :  { %13808 = vmatmul.mubr.f32.vlgmr.msra.gmra.mxu0 %v17674_v44  ;;  %15772 = vmatpush3.msra.mxu1 %v13648_v10  ;;  %v13644_v44 = vld [vmem:[#allocation26 + $0x120] sm:$0xff]  ;;  %v13690_v10 = vld [vmem:[#allocation26 + $0x290] sm:$0xff] }
 0x92f   :  { %15773 = vmatprep.subr.mxu1 %v13663_v3  ;;  %15792 = vmatprep.subr.mxu0 %v13703_v57  ;;  %v13444_v57 = vmax.f32 %v17777_v31, 0.0 }
 0x930   :  { %15774 = vmatpush3.msra.mxu1 %v13647_v2  ;;  %15793 = vmatpush3.msra.mxu0 %v13687_v20  ;;  %v13674_v2 = vld [vmem:[#allocation26 + $0x210] sm:$0xff] }
 0x931   :  { %15775 = vmatprep.subr.mxu1 %v13662_v45  ;;  %15794 = vmatprep.subr.mxu0 %v13702_v58 }
 0x932   :  { %15776 = vmatpush3.msra.mxu1 %v13646_v30  ;;  %15795 = vmatpush3.msra.mxu0 %v13686_v52  ;;  %v13689_v30 = vld [vmem:[#allocation26 + $0x288] sm:$0xff] }
 0x933   :  { %15777 = vmatprep.subr.mxu1 %v13661_v53  ;;  %15796 = vmatprep.subr.mxu0 %v13701_v49  ;;  %v13445_v53 = vmax.f32 %v17781_v61, 0.0  ;;  %v13673_v49 = vld [vmem:[#allocation26 + $0x208] sm:$0xff] }
 0x934   :  { %15778 = vmatpush3.msra.mxu1 %v13645_v13  ;;  %15797 = vmatpush3.msra.mxu0 %v13685_v8  ;;  %v13688_v8 = vld [vmem:[#allocation26 + $0x280] sm:$0xff] }
 0x935   :  { %v17785_v23 = vpop.eup %16512  ;;  %15779 = vmatprep.subr.mxu1 %v13660_v24  ;;  %15798 = vmatprep.subr.mxu0 %v13700_v17 }
 0x936   :  { %v13532_v12 = vadd.f32 1.0, %v17785_v23  ;;  %15780 = vmatpush3.msra.mxu1 %v13644_v44  ;;  %15799 = vmatpush3.msra.mxu0 %v13684_v62  ;;  %v13535_v38 = vmul.f32 -0.5, %v17785_v23  ;;  %v13538_v21 = vand.u32 2147483647, %v17785_v23  ;;  %v13672_v44 = vld [vmem:[#allocation26 + $0x200] sm:$0xff] }
 0x937   :  { %v17788_v40 = vpop.eup %16514  ;;  %15781 = vmatprep.subr.mxu1 %v13659_v32  ;;  %15800 = vmatprep.subr.mxu0 %v13699_v36 }
 0x938   :  { %16516 = vlog2.f32 %v13532_v12  ;;  %v13541_v29 = vadd.f32 1.0, %v17788_v40  ;;  %15782 = vmatpush3.msra.mxu1 %v13643_v16  ;;  %15801 = vmatpush3.msra.mxu0 %v13683_v1  ;;  %v13544_v27 = vmul.f32 -0.5, %v17788_v40  ;;  %v13536_v35 = vadd.f32 1.0, %v13535_v38  ;;  %v13716_v38 = vld [vmem:[#allocation26 + $0x360] sm:$0xff] }
 0x939   :  { %15783 = vmatprep.subr.mxu1 %v13658_v6  ;;  %15802 = vmatprep.subr.mxu0 %v13698_v37  ;;  %vm13539_vm6 = vcmp.lt.f32.partialorder %v13538_v21, 0.0004427343  ;;  %v16540_v6 = vld [vmem:[#allocation25] sm:$0xff]  ;;  %v13713_v21 = vld [vmem:[#allocation26 + $0x348] sm:$0xff] }
 0x93a   :  { %16518 = vlog2.f32 %v13541_v29  ;;  %15784 = vmatpush3.msra.mxu1 %v13642_v63  ;;  %15803 = vmatpush3.msra.mxu0 %v13682_v18  ;;  %v13545_v59 = vadd.f32 1.0, %v13544_v27  ;;  %v13537_v54 = vmul.f32 %v17785_v23, %v13536_v35  ;;  %v8603_v37 = vrot.slane %v16540_v6, %v17240_v47  ;;  %v13735_v47 = vld [vmem:[#allocation26 + $0x3f8] sm:$0xff]  ;;  %v13730_v27 = vld [vmem:[#allocation26 + $0x3d0] sm:$0xff]  ;;  %v13729_v35 = vld [vmem:[#allocation26 + $0x3c8] sm:$0xff] }
 0x93b   :  { %15785 = vmatprep.subr.mxu1 %v13657_v14  ;;  %15804 = vmatprep.subr.mxu0 %v13697_v28  ;;  %v8607_v63 = vrot.slane %v16540_v6, %v17208_v22  ;;  %v13734_v22 = vld [vmem:[#allocation26 + $0x3f0] sm:$0xff] }
 0x93c   :  { %15786 = vmatpush3.msra.mxu1 %v13641_v25  ;;  %15805 = vmatpush3.msra.mxu0 %v13681_v0  ;;  %v13546_v58 = vmul.f32 %v17788_v40, %v13545_v59  ;;  %v13728_v59 = vld [vmem:[#allocation26 + $0x3c0] sm:$0xff] }
 0x93d   :  { %15787 = vmatprep.subr.mxu1 %v13656_v48  ;;  %15806 = vmatprep.subr.mxu0 %v13696_v15 }
 0x93e   :  { %15788 = vmatpush3.msra.mxu1 %v13640_v41  ;;  %15807 = vmatpush3.msra.mxu0 %v13680_v19 }
 0x93f   :  { %13878 = vmatmul.mubr.f32.vlgmr.msra.gmra.mxu1 %v17743_v50  ;;  %15808 = vmatprep.subr.mxu0 %v13695_v42  ;;  %v13547_v50 = vand.u32 2147483647, %v17788_v40  ;;  %v13719_v42 = vld [vmem:[#allocation26 + $0x378] sm:$0xff] }
 0x940   :  { %15809 = vmatpush3.msra.mxu0 %v13679_v51  ;;  %15827 = vmatprep.subr.mxu1 %v13735_v47  ;;  %v13732_v51 = vld [vmem:[#allocation26 + $0x3e0] sm:$0xff] }
 0x941   :  { %15810 = vmatprep.subr.mxu0 %v13694_v5  ;;  %vm13548_vm7 = vcmp.lt.f32.partialorder %v13547_v50, 0.0004427343  ;;  %15828 = vmatpush3.msra.mxu1 %v13719_v42  ;;  %v13731_v5 = vld [vmem:[#allocation26 + $0x3d8] sm:$0xff] }
 0x942   :  { %15811 = vmatpush3.msra.mxu0 %v13678_v56  ;;  %15829 = vmatprep.subr.mxu1 %v13734_v22  ;;  %v13715_v56 = vld [vmem:[#allocation26 + $0x358] sm:$0xff] }
 0x943   :  { %15812 = vmatprep.subr.mxu0 %v13693_v55  ;;  %v13714_v55 = vld [vmem:[#allocation26 + $0x350] sm:$0xff] }
 0x944   :  { %15813 = vmatpush3.msra.mxu0 %v13677_v60 }
 0x945   :  { %v16517_v34 = vpop.eup %16516  ;;  %15814 = vmatprep.subr.mxu0 %v13692_v7 }
 0x946   :  { %v13534_v26 = vmul.f32 0.6931472, %v16517_v34  ;;  %15815 = vmatpush3.msra.mxu0 %v13676_v33  ;;  %v13712_v34 = vld [vmem:[#allocation26 + $0x340] sm:$0xff] }
 0x947   :  { %v16519_v3 = vpop.eup %16518  ;;  %15816 = vmatprep.subr.mxu0 %v13691_v9 }
 0x948   :  { %v13540_v20 = vsel %vm13539_vm6, %v13537_v54, %v13534_v26  ;;  %v13543_v45 = vmul.f32 0.6931472, %v16519_v3  ;;  %15817 = vmatpush3.msra.mxu0 %v13675_v11  ;;  %v13727_v11 = vld [vmem:[#allocation26 + $0x3b8] sm:$0xff]  ;;  %v13710_v3 = vld [vmem:[#allocation26 + $0x330] sm:$0xff] }
 0x949   :  { %v13572_v52 = vadd.f32 %v13540_v20, %v13444_v57  ;;  %15818 = vmatprep.subr.mxu0 %v13690_v10  ;;  %v13711_v26 = vld [vmem:[#allocation26 + $0x338] sm:$0xff]  ;;  %v13726_v10 = vld [vmem:[#allocation26 + $0x3b0] sm:$0xff]  ;;  %v13725_v57 = vld [vmem:[#allocation26 + $0x3a8] sm:$0xff] }
 0x94a   :  { %v13549_v13 = vsel %vm13548_vm7, %v13546_v58, %v13543_v45  ;;  %15819 = vmatpush3.msra.mxu0 %v13674_v2  ;;  %v13709_v2 = vld [vmem:[#allocation26 + $0x328] sm:$0xff]  ;;  %v13724_v20 = vld [vmem:[#allocation26 + $0x3a0] sm:$0xff]  ;;  %v13723_v58 = vld [vmem:[#allocation26 + $0x398] sm:$0xff] }
 0x94b   :  { %v13580_v24 = vsel %vm13452_vm8, %v17777_v31, %v13572_v52  ;;  %v13573_v17 = vadd.f32 %v13549_v13, %v13445_v53  ;;  %15820 = vmatprep.subr.mxu0 %v13689_v30  ;;  %v13708_v45 = vld [vmem:[#allocation26 + $0x320] sm:$0xff]  ;;  %v13707_v30 = vld [vmem:[#allocation26 + $0x318] sm:$0xff]  ;;  %v13722_v52 = vld [vmem:[#allocation26 + $0x390] sm:$0xff] }
 0x94c   :  { %16520 = vtanh.f32 %v13580_v24  ;;  %15821 = vmatpush3.msra.mxu0 %v13673_v49  ;;  %v13706_v53 = vld [vmem:[#allocation26 + $0x310] sm:$0xff]  ;;  %v13721_v49 = vld [vmem:[#allocation26 + $0x388] sm:$0xff]  ;;  %v13704_v24 = vld [vmem:[#allocation26 + $0x300] sm:$0xff] }
 0x94d   :  { %v13581_v62 = vsel %vm13453_vm9, %v17781_v61, %v13573_v17  ;;  %v13228_v32 = vpop.f32.mrf.mxu0  ;;  %15822 = vmatprep.subr.mxu0 %v13688_v8  ;;  %v13705_v13 = vld [vmem:[#allocation26 + $0x308] sm:$0xff]  ;;  %v13720_v8 = vld [vmem:[#allocation26 + $0x380] sm:$0xff] }
 0x94e   :  { %16522 = vtanh.f32 %v13581_v62  ;;  %15823 = vmatpush3.msra.mxu0 %v13672_v44  ;;  %v13229_v14 = vadd.f32 %v13228_v32, %v8603_v37 }
 0x94f   :  { %v13230_v36 = vpop.f32.mrf.mxu0 }
 0x950   :  { %v13231_v0 = vadd.f32 %v13230_v36, %v8607_v63 }
 0x951   :  { %v13232_v23 = vpop.f32.mrf.mxu0 }
 0x953   :  { %v13233_v16 = vpop.f32.mrf.mxu0 }
 0x959   :  { %v16521_v1 = vpop.eup %16520 }
 0x95a   :  { %v13596_v12 = vmul.f32 %v16521_v1, %v17777_v31 }
 0x95b   :  { %v16523_v40 = vpop.eup %16522 }
 0x95c   :  { %v13597_v18 = vmul.f32 %v16523_v40, %v17781_v61  ;;  %v13604_v29 = vmul.f32 %v13596_v12, %v17335_v4  ;;  %v13718_v61 = vld [vmem:[#allocation26 + $0x370] sm:$0xff]  ;;  %v13733_v4 = vld [vmem:[#allocation26 + $0x3e8] sm:$0xff] }
 0x95d   :  { %15830 = vmatpush3.msra.mxu1 %v13718_v61 }
 0x95e   :  { %v13605_v28 = vmul.f32 %v13597_v18, %v17338_v43  ;;  %15831 = vmatprep.subr.mxu1 %v13733_v4  ;;  %v13717_v43 = vld [vmem:[#allocation26 + $0x368] sm:$0xff] }
 0x95f   :  { %v13269_v25 = vpop.f32.mrf.mxu1  ;;  %15832 = vmatpush3.msra.mxu1 %v13717_v43 }
 0x960   :  { %v13270_v48 = vadd.f32 %v13269_v25, %v13229_v14  ;;  %13947 = vmatprep.mubr.f32.mxu0 %v13605_v28  ;;  %15833 = vmatprep.subr.mxu1 %v13732_v51 }
 0x961   :  { %v13271_v15 = vpop.f32.mrf.mxu1  ;;  %13948 = vmatmul.mubr.f32.vlgmr.msra.gmra.mxu0 %v13604_v29  ;;  %15834 = vmatpush3.msra.mxu1 %v13716_v38 }
 0x962   :  { %v13272_v31 = vadd.f32 %v13271_v15, %v13231_v0  ;;  %15835 = vmatprep.subr.mxu1 %v13731_v5 }
 0x963   :  { %v13273_v41 = vpop.f32.mrf.mxu1  ;;  %15836 = vmatpush3.msra.mxu1 %v13715_v56 }
 0x964   :  { %15837 = vmatprep.subr.mxu1 %v13730_v27 }
 0x965   :  { %v13274_v19 = vpop.f32.mrf.mxu1  ;;  %15838 = vmatpush3.msra.mxu1 %v13714_v55 }
 0x966   :  { %15839 = vmatprep.subr.mxu1 %v13729_v35 }
 0x967   :  { %15840 = vmatpush3.msra.mxu1 %v13713_v21 }
 0x968   :  { %15841 = vmatprep.subr.mxu1 %v13728_v59 }
 0x969   :  { %15842 = vmatpush3.msra.mxu1 %v13712_v34 }
 0x96a   :  { %15843 = vmatprep.subr.mxu1 %v13727_v11 }
 0x96b   :  { %15844 = vmatpush3.msra.mxu1 %v13711_v26 }
 0x96c   :  { %15845 = vmatprep.subr.mxu1 %v13726_v10 }
 0x96d   :  { %15846 = vmatpush3.msra.mxu1 %v13710_v3 }
 0x96e   :  { %15847 = vmatprep.subr.mxu1 %v13725_v57 }
 0x96f   :  { %15848 = vmatpush3.msra.mxu1 %v13709_v2 }
 0x970   :  { %15849 = vmatprep.subr.mxu1 %v13724_v20 }
 0x971   :  { %15850 = vmatpush3.msra.mxu1 %v13708_v45 }
 0x972   :  { %15851 = vmatprep.subr.mxu1 %v13723_v58 }
 0x973   :  { %15852 = vmatpush3.msra.mxu1 %v13707_v30 }
 0x974   :  { %15853 = vmatprep.subr.mxu1 %v13722_v52 }
 0x975   :  { %15854 = vmatpush3.msra.mxu1 %v13706_v53 }
 0x976   :  { %15855 = vmatprep.subr.mxu1 %v13721_v49 }
 0x977   :  { %15856 = vmatpush3.msra.mxu1 %v13705_v13 }
 0x978   :  { %15857 = vmatprep.subr.mxu1 %v13720_v8  ;;  %v15721_v8 = vld [vmem:[#allocation28] ss:$0 sm:$0xff] }
 0x979   :  { %15858 = vmatpush3.msra.mxu1 %v13704_v24 }
 0x98d   :  { %v13310_v60 = vpop.f32.mrf.mxu0 }
 0x98e   :  { %v13311_v7 = vadd.f32 %v13310_v60, %v13270_v48 }
 0x98f   :  { %v13312_v33 = vpop.f32.mrf.mxu0 }
 0x990   :  { %v13313_v9 = vadd.f32 %v13312_v33, %v13272_v31 }
 0x991   :  { %v13314_v50 = vpop.f32.mrf.mxu0 }
 0x993   :  { %v13315_v54 = vpop.f32.mrf.mxu0 }
 0x99f   :  { %v13351_v17 = vpop.f32.mrf.mxu1 }
 0x9a0   :  { %v13352_v12 = vadd.f32 %v13351_v17, %v13311_v7 }
 0x9a1   :  { %v13353_v44 = vpop.f32.mrf.mxu1 }
 0x9a2   :  { %v13354_v6 = vadd.f32 %v13353_v44, %v13313_v9 }
 0x9a3   :  { %v13355_v62 = vpop.f32.mrf.mxu1 }
 0x9a5   :  { %v13356_v32 = vpop.f32.mrf.mxu1 }
 0x9cd   :  { %v13392_v36 = vpop.f32.mrf.mxu0 }
 0x9ce   :  { %v13393_v37 = vadd.f32 %v13392_v36, %v13352_v12 }
 0x9cf   :  { %v13394_v23 = vpop.f32.mrf.mxu0 }
 0x9d0   :  { %v13395_v63 = vadd.f32 %v13394_v23, %v13354_v6 }
 0x9d1   :  { %v13396_v16 = vpop.f32.mrf.mxu0 }
 0x9d3   :  { %v13397_v1 = vpop.f32.mrf.mxu0 }
 0x9df   :  { %v13433_v40 = vpop.f32.mrf.mxu1 }
 0x9e0   :  { %v13434_v18 = vadd.f32 %v13433_v40, %v13393_v37 }
 0x9e1   :  { %v13435_v29 = vpop.f32.mrf.mxu1 }
 0x9e2   :  { %v13470_v14 = vand.u32 2147483647, %v13434_v18  ;;  %v13436_v28 = vadd.f32 %v13435_v29, %v13395_v63  ;;  %v13446_v7 = vmax.f32 %v13434_v18, 0.0  ;;  %vm13454_vm12 = vcmp.ne.f32.partialorder %v13434_v18, %v13434_v18 }
 0x9e3   :  { %v13437_v25 = vpop.f32.mrf.mxu1 }
 0x9e4   :  { %v13478_v0 = vsub.f32 0.0, %v13470_v14  ;;  %v13471_v48 = vand.u32 2147483647, %v13436_v28  ;;  %v13447_v34 = vmax.f32 %v13436_v28, 0.0  ;;  %vm13455_vm13 = vcmp.ne.f32.partialorder %v13436_v28, %v13436_v28 }
 0x9e5   :  { %v13438_v15 = vpop.f32.mrf.mxu1 }
 0x9e6   :  { %v13492_v31 = vmul.f32 1.442695, %v13478_v0  ;;  %v13479_v41 = vsub.f32 0.0, %v13471_v48 }
 0x9e8   :  { %16524 = vpow2.f32 %v13492_v31  ;;  %v13494_v19 = vmul.f32 1.442695, %v13479_v41 }
 0x9ea   :  { %16526 = vpow2.f32 %v13494_v19 }
 0x9ee   :  { %v15754_v58 = vpop.f32.mrf.mxu0 }
 0x9f0   :  { %v15755_v30 = vpop.f32.mrf.mxu0 }
 0x9f1   :  { %v15756_v13 = vadd.f32 %v15755_v30, %v15754_v58 }
 0x9f3   :  { %v13810_v44 = vadd.f32 %v15756_v13, %v15721_v8 }
 0x9f5   :  { %v16525_v47 = vpop.eup %16524 }
 0x9f6   :  { %v13550_v42 = vadd.f32 1.0, %v16525_v47  ;;  %v13553_v4 = vmul.f32 -0.5, %v16525_v47  ;;  %v13556_v38 = vand.u32 2147483647, %v16525_v47 }
 0x9f7   :  { %v16527_v22 = vpop.eup %16526 }
 0x9f8   :  { %16528 = vlog2.f32 %v13550_v42  ;;  %v13559_v61 = vadd.f32 1.0, %v16527_v22  ;;  %v13562_v43 = vmul.f32 -0.5, %v16527_v22  ;;  %v13554_v51 = vadd.f32 1.0, %v13553_v4 }
 0x9f9   :  { %v13565_v27 = vand.u32 2147483647, %v16527_v22  ;;  %vm13557_vm10 = vcmp.lt.f32.partialorder %v13556_v38, 0.0004427343 }
 0x9fa   :  { %16530 = vlog2.f32 %v13559_v61  ;;  %v13563_v5 = vadd.f32 1.0, %v13562_v43  ;;  %v13555_v60 = vmul.f32 %v16525_v47, %v13554_v51 }
 0x9fb   :  { %vm13566_vm11 = vcmp.lt.f32.partialorder %v13565_v27, 0.0004427343 }
 0x9fc   :  { %v13564_v59 = vmul.f32 %v16527_v22, %v13563_v5 }
 0x9ff   :  { %v15789_v52 = vpop.f32.mrf.mxu1 }
 0xa01   :  { %v15790_v49 = vpop.f32.mrf.mxu1 }
 0xa02   :  { %v15791_v17 = vadd.f32 %v15790_v49, %v15789_v52 }
 0xa04   :  { %v13880_v36 = vadd.f32 %v15791_v17, %v13810_v44 }
 0xa05   :  { %v16529_v56 = vpop.eup %16528 }
 0xa06   :  { %v13552_v55 = vmul.f32 0.6931472, %v16529_v56 }
 0xa07   :  { %v16531_v35 = vpop.eup %16530 }
 0xa08   :  { %v13558_v21 = vsel %vm13557_vm10, %v13555_v60, %v13552_v55  ;;  %v13561_v33 = vmul.f32 0.6931472, %v16531_v35 }
 0xa09   :  { %v13574_v9 = vadd.f32 %v13558_v21, %v13446_v7 }
 0xa0a   :  { %v13567_v50 = vsel %vm13566_vm11, %v13564_v59, %v13561_v33 }
 0xa0b   :  { %v13582_v11 = vsel %vm13454_vm12, %v13434_v18, %v13574_v9  ;;  %v13575_v26 = vadd.f32 %v13567_v50, %v13447_v34 }
 0xa0c   :  { %16532 = vtanh.f32 %v13582_v11 }
 0xa0d   :  { %v13583_v54 = vsel %vm13455_vm13, %v13436_v28, %v13575_v26 }
 0xa0e   :  { %16534 = vtanh.f32 %v13583_v54 }
 0xa19   :  { %v16533_v10 = vpop.eup %16532 }
 0xa1a   :  { %v13598_v3 = vmul.f32 %v16533_v10, %v13434_v18 }
 0xa1b   :  { %v16535_v57 = vpop.eup %16534 }
 0xa1c   :  { %v13599_v2 = vmul.f32 %v16535_v57, %v13436_v28  ;;  %v13606_v20 = vmul.f32 %v13598_v3, %v17344_v39 }
 0xa1e   :  { %v13607_v45 = vmul.f32 %v13599_v2, %v17346_v46 }
 0xa20   :  { %14017 = vmatprep.mubr.f32.mxu1 %v13607_v45 }
 0xa21   :  { %14018 = vmatmul.mubr.f32.vlgmr.msra.gmra.mxu1 %v13606_v20  ;;  %v15824_v53 = vpop.f32.mrf.mxu0 }
 0xa23   :  { %v15825_v24 = vpop.f32.mrf.mxu0 }
 0xa24   :  { %v15826_v62 = vadd.f32 %v15825_v24, %v15824_v53 }
 0xa26   :  { %v13950_v39 = vadd.f32 %v15826_v62, %v13880_v36 }
 0xae1   :  { %v15859_v32 = vpop.f32.mrf.mxu1 }
 0xae3   :  { %v15860_v23 = vpop.f32.mrf.mxu1 }
 0xae4   :  { %v15861_v46 = vadd.f32 %v15860_v23, %v15859_v32 }
 0xae6   :  { %v14020_v16 = vadd.f32 %v15861_v46, %v13950_v39 }
 0xae8   :  { %14023 = vst [vmem:[#allocation29] sm:$0xff] %v14020_v16 }
 0xae9   :  { %16892 = shalt.err (!%p16889_p5)
}
 0xaea   :  { %14033 = dma.vmem_to_hbm [thread:$0]  %s14031_s19, 128, %s17835_s18, [#allocation4]  }
 0xaeb   :  { %16919 = dma.done.wait [#allocation4], 128  }
 0xaec   :  { %16920 = vsyncadd [#allocation4], 4294967168 }
 0xaed   :  { %14037 = vsyncpa [#allocation3], 1 }
 0xaee   :  { %14038 = vsyncpa [#allocation6], 1 }
 0xaef   :  { %14039 = vsyncpa [#allocation9], 1 }
 0xaf0   :  { %14040 = vsyncpa [#allocation12], 1 }
 0xaf1   :  { %14041 = vsyncpa [#allocation15], 1 }
 0xaf2   :  { %14042 = vsyncpa [#allocation18], 1 }
 0xaf3   :  { %14043 = vsyncpa [#allocation21], 1 }
 0xaf4   :  { %14044 = vsyncpa [#allocation24], 1 }
 0xaf5   :  { %14045 = vsyncpa [#allocation27], 1 }
 0xaf6   :  { %14046 = vsyncpa [#allocation4], 1 }

</bundles_post_ra>
